<compile_context>
chip_gen: v7x
topology: tpu7x:2x2x1
jax: 0.10.0
libtpu: 0.0.40
codegen_flags: <defaults>
</compile_context>

<pallas_src>
import functools

import jax
import jax.numpy as jnp
from jax.experimental import pallas as pl
from jax.experimental.pallas import tpu as pltpu


# --------------------------------------------------------------------------
# Fused InceptionA kernel (one batch element per grid step, NHWC)
# --------------------------------------------------------------------------
def _inception_a_kernel(x_ref,
                        w_stem_ref, b1_ref, b5a_ref, b3s_ref,
                        w5_ref, b5_ref,
                        w3a_ref, b3a_ref,
                        w3b_ref, b3b_ref,
                        wp_ref, bp_ref,
                        o_ref,
                        xp_pad, p5_pad, p3a_pad, p3b_pad,
                        *, H, W):
    HW = H * W
    f32 = jnp.float32
    bf16 = jnp.bfloat16
    Cin = x_ref.shape[-1]

    # ---- border-only zeroing of padded scratch (interiors overwritten) -----
    def zero_border(buf, pad):
        Hp, Wp, C = buf.shape
        zrow = jnp.zeros((pad, Wp, C), buf.dtype)
        zcol = jnp.zeros((Hp, pad, C), buf.dtype)
        buf[0:pad] = zrow
        buf[Hp - pad:Hp] = zrow
        buf[:, 0:pad, :] = zcol
        buf[:, Wp - pad:Wp, :] = zcol

    zero_border(xp_pad, 1)
    zero_border(p5_pad, 2)
    zero_border(p3a_pad, 1)
    zero_border(p3b_pad, 1)

    xv = x_ref[...]                                  # (H, W, Cin) f32
    xp_pad[1:1 + H, 1:1 + W, :] = xv                 # pad=1 for the avg-pool

    # ---- fused lane-aligned 1x1 stem ----------------------------------------
    # w_stem columns: [0:64]=branch1x1, [128:176]=branch5x5_1,
    # [256:320]=branch3x3dbl_1; every slice starts on a 128-lane boundary.
    xs = xv.reshape(HW, Cin).astype(bf16)
    stem = jnp.dot(xs, w_stem_ref[...], preferred_element_type=f32)

    y1    = jnp.maximum(stem[:, 0:64]    + b1_ref[0],  0.0)   # (HW, 64)
    p5_in = jnp.maximum(stem[:, 128:176] + b5a_ref[0], 0.0)   # (HW, 48)
    p3_in = jnp.maximum(stem[:, 256:320] + b3s_ref[0], 0.0)   # (HW, 64)

    p5_pad[2:2 + H, 2:2 + W, :]  = p5_in.reshape(H, W, 48)
    p3a_pad[1:1 + H, 1:1 + W, :] = p3_in.reshape(H, W, 64)

    # ---- KxK convs as per-tap matmul accumulation (no lane concatenation) ---
    def conv_kk(src_pad, w_ref, b_ref, K):
        Cout = w_ref.shape[-1]
        acc = jnp.zeros((HW, Cout), f32)
        for kh in range(K):
            for kw in range(K):
                tap = src_pad[kh:kh + H, kw:kw + W, :]
                tap = tap.reshape(HW, tap.shape[-1]).astype(bf16)
                acc = acc + jnp.dot(tap, w_ref[kh * K + kw],
                                    preferred_element_type=f32)
        return jnp.maximum(acc + b_ref[0], 0.0)

    # branch5x5: 5x5 conv (pad=2) on branch5x5_1 output
    y5 = conv_kk(p5_pad, w5_ref, b5_ref, 5)                    # (HW, 64)

    # branch3x3dbl: two chained 3x3 convs (pad=1)
    t3 = conv_kk(p3a_pad, w3a_ref, b3a_ref, 3)                 # (HW, 96)
    p3b_pad[1:1 + H, 1:1 + W, :] = t3.reshape(H, W, 96)
    y3 = conv_kk(p3b_pad, w3b_ref, b3b_ref, 3)                 # (HW, 96)

    # ---- branch_pool: 3x3 avg pool (stride 1, count_include_pad) + 1x1 ------
    pooled = jnp.zeros((HW, Cin), f32)
    for kh in range(3):
        for kw in range(3):
            pooled = pooled + xp_pad[kh:kh + H, kw:kw + W, :].reshape(HW, Cin)
    pooled = pooled * (1.0 / 9.0)                              # PyTorch default
    yp = jnp.dot(pooled.astype(bf16), wp_ref[...], preferred_element_type=f32)
    yp = jnp.maximum(yp + bp_ref[0], 0.0)                      # (HW, P_pad)

    # ---- direct channel-slice writes into the lane-dense 256-ch output ------
    dt = o_ref.dtype
    o_ref[:, :, 0:64]    = y1.reshape(H, W, 64).astype(dt)
    o_ref[:, :, 64:128]  = y5.reshape(H, W, 64).astype(dt)
    o_ref[:, :, 128:224] = y3.reshape(H, W, 96).astype(dt)
    o_ref[:, :, 224:]    = yp.reshape(H, W, yp.shape[-1]).astype(dt)


# --------------------------------------------------------------------------
# pallas_call wrapper (NHWC, padded output channels)
# --------------------------------------------------------------------------
def _bcast_spec(arr):
    zeros = (0,) * arr.ndim
    return pl.BlockSpec(arr.shape, lambda n, _z=zeros: _z)


def inception_a_fused(x_nhwc, prep):
    N, H, W, Cin = x_nhwc.shape
    Cpad = 224 + prep["wp"].shape[-1]     # multiple of 128 (lane-dense output)

    kernel = functools.partial(_inception_a_kernel, H=H, W=W)

    weight_args = (prep["w_stem"], prep["b1"], prep["b5a"], prep["b3s"],
                   prep["w5"], prep["b5"],
                   prep["w3a"], prep["b3a"],
                   prep["w3b"], prep["b3b"],
                   prep["wp"], prep["bp"])

    return pl.pallas_call(
        kernel,
        out_shape=jax.ShapeDtypeStruct((N, H, W, Cpad), x_nhwc.dtype),
        grid=(N,),
        in_specs=[pl.BlockSpec((None, H, W, Cin), lambda n: (n, 0, 0, 0))]
                 + [_bcast_spec(a) for a in weight_args],
        out_specs=pl.BlockSpec((None, H, W, Cpad), lambda n: (n, 0, 0, 0)),
        scratch_shapes=[
            pltpu.VMEM((H + 2, W + 2, Cin), jnp.float32),  # padded x (pool)
            pltpu.VMEM((H + 4, W + 4, 48), jnp.float32),   # padded branch5x5_1
            pltpu.VMEM((H + 2, W + 2, 64), jnp.float32),   # padded branch3x3dbl_1
            pltpu.VMEM((H + 2, W + 2, 96), jnp.float32),   # padded branch3x3dbl_2
        ],
        compiler_params=pltpu.CompilerParams(
            dimension_semantics=("parallel",),
            vmem_limit_bytes=32 * 1024 * 1024,
        ),
    )(x_nhwc, *weight_args)


# --------------------------------------------------------------------------
# Parameter construction (deterministic, synthetic) + BN folding / packing
# --------------------------------------------------------------------------
def make_basic_conv2d(key, cin, cout, k, eps=1e-3):
    kw_, kg, kb, km, kv = jax.random.split(key, 5)
    w = jax.random.normal(kw_, (k, k, cin, cout), jnp.float32) * 0.1
    gamma = jax.random.uniform(kg, (cout,), jnp.float32, 0.5, 1.5)
    beta = jax.random.normal(kb, (cout,), jnp.float32) * 0.1
    rmean = jax.random.normal(km, (cout,), jnp.float32) * 0.1
    rvar = jax.random.uniform(kv, (cout,), jnp.float32, 0.5, 1.5)
    scale = gamma / jnp.sqrt(rvar + eps)     # inference-mode BN fold
    bias = beta - rmean * scale
    return dict(w=w, scale=scale, bias=bias, k=k)


def make_inception_a_params(key, in_channels, pool_features):
    keys = jax.random.split(key, 7)
    return {
        "branch1x1":      make_basic_conv2d(keys[0], in_channels, 64, 1),
        "branch5x5_1":    make_basic_conv2d(keys[1], in_channels, 48, 1),
        "branch5x5_2":    make_basic_conv2d(keys[2], 48, 64, 5),
        "branch3x3dbl_1": make_basic_conv2d(keys[3], in_channels, 64, 1),
        "branch3x3dbl_2": make_basic_conv2d(keys[4], 64, 96, 3),
        "branch3x3dbl_3": make_basic_conv2d(keys[5], 96, 96, 3),
        "branch_pool":    make_basic_conv2d(keys[6], in_channels,
                                            pool_features, 1),
    }


def prepare_inception_a(params, dot_dtype=jnp.bfloat16):
    """Fold BN scale into conv weights; pack into lane-aligned kernel layout."""
    def fold(p):
        return p["w"] * p["scale"], p["bias"]        # (K,K,Cin,Cout), (Cout,)

    row = lambda b: jnp.asarray(b, jnp.float32).reshape(1, -1)

    # Fused 1x1 stem: each branch output starts at a 128-lane boundary.
    w1, b1 = fold(params["branch1x1"])
    w5a, b5a = fold(params["branch5x5_1"])
    w3s, b3s = fold(params["branch3x3dbl_1"])
    cin = w1.shape[2]
    w_stem = jnp.zeros((cin, 384), jnp.float32)
    w_stem = w_stem.at[:, 0:64].set(w1.reshape(cin, 64))
    w_stem = w_stem.at[:, 128:176].set(w5a.reshape(cin, 48))
    w_stem = w_stem.at[:, 256:320].set(w3s.reshape(cin, 64))

    # KxK convs packed per tap: (K,K,Cin,Cout) -> (K*K, Cin, Cout)
    def taps(name):
        w, b = fold(params[name])
        k, _, ci, co = w.shape
        return w.reshape(k * k, ci, co).astype(dot_dtype), row(b)

    w5, b5 = taps("branch5x5_2")
    w3a, b3a = taps("branch3x3dbl_2")
    w3b, b3b = taps("branch3x3dbl_3")

    # Pool branch zero-padded so total output channels are a multiple of 128
    # (lane-dense output stores); pad channels are dropped in the wrapper.
    wp, bp = fold(params["branch_pool"])
    pf = wp.shape[-1]
    ctot = 224 + pf
    cpad = ((ctot + 127) // 128) * 128
    p_pad = cpad - 224
    wp_p = jnp.zeros((cin, p_pad), jnp.float32).at[:, :pf].set(
        wp.reshape(cin, pf))
    bp_p = jnp.zeros((p_pad,), jnp.float32).at[:pf].set(bp)

    return dict(
        w_stem=w_stem.astype(dot_dtype),
        b1=row(b1), b5a=row(b5a), b3s=row(b3s),
        w5=w5, b5=b5, w3a=w3a, b3a=b3a, w3b=w3b, b3b=b3b,
        wp=wp_p.astype(dot_dtype), bp=row(bp_p),
        out_channels=ctot,
    )


# --------------------------------------------------------------------------
# InceptionA forward (NCHW in / NCHW out, like the PyTorch module)
# --------------------------------------------------------------------------
def inception_a(x_nchw, prep):
    x = jnp.transpose(x_nchw, (0, 2, 3, 1))                    # NCHW -> NHWC
    out = inception_a_fused(x, prep)[..., :prep["out_channels"]]
    return jnp.transpose(out, (0, 3, 1, 2))                    # NHWC -> NCHW


# --------------------------------------------------------------------------
# Pure-JAX/XLA f32 reference (for a loose numerical check)
# --------------------------------------------------------------------------
def _ref_basic_conv(x, p, pad):
    y = jax.lax.conv_general_dilated(
        x, p["w"], window_strides=(1, 1),
        padding=[(pad, pad), (pad, pad)],
        dimension_numbers=("NHWC", "HWIO", "NHWC"))
    return jnp.maximum(y * p["scale"] + p["bias"], 0.0)


def inception_a_reference(x_nchw, params):
    x = jnp.transpose(x_nchw, (0, 2, 3, 1))
    b1 = _ref_basic_conv(x, params["branch1x1"], 0)
    b5 = _ref_basic_conv(x, params["branch5x5_1"], 0)
    b5 = _ref_basic_conv(b5, params["branch5x5_2"], 2)
    b3 = _ref_basic_conv(x, params["branch3x3dbl_1"], 0)
    b3 = _ref_basic_conv(b3, params["branch3x3dbl_2"], 1)
    b3 = _ref_basic_conv(b3, params["branch3x3dbl_3"], 1)
    pooled = jax.lax.reduce_window(
        x, 0.0, jax.lax.add, (1, 3, 3, 1), (1, 1, 1, 1),
        [(0, 0), (1, 1), (1, 1), (0, 0)]) / 9.0
    bp = _ref_basic_conv(pooled, params["branch_pool"], 0)
    out = jnp.concatenate([b1, b5, b3, bp], axis=-1)
    return jnp.transpose(out, (0, 3, 1, 2))


# --------------------------------------------------------------------------
if __name__ == "__main__":
    N, C, H, W = 2, 4, 16, 16
    pool_features = 8

    key = jax.random.PRNGKey(0)
    kx, kp = jax.random.split(key)
    x = jax.random.normal(kx, (N, C, H, W), jnp.float32)
    params = make_inception_a_params(kp, in_channels=C,
                                     pool_features=pool_features)
    prep = prepare_inception_a(params)

    out = jax.block_until_ready(inception_a(x, prep))

    expected_channels = 64 + 64 + 96 + pool_features       # 232
    assert out.shape == (N, expected_channels, H, W), out.shape
    assert bool(jnp.all(jnp.isfinite(out)))

    # Loose check vs. f32 XLA reference (kernel matmuls use bf16 operands
    # with f32 accumulation, so allow a small absolute tolerance).
    ref = inception_a_reference(x, params)
    max_err = float(jnp.max(jnp.abs(out - ref)))
    assert max_err < 0.1, f"max abs error vs reference: {max_err}"

    print("KERNEL_OK")
</pallas_src>

<mosaic_0001>
module attributes {stable_mosaic.version = 11 : i64} {
  func.func @_inception_a_kernel(%arg0: i32, %arg1: memref<1x16x16x4xf32, #tpu.memory_space<vmem>>, %arg2: memref<4x384xbf16, #tpu.memory_space<vmem>>, %arg3: memref<1x64xf32, #tpu.memory_space<vmem>>, %arg4: memref<1x48xf32, #tpu.memory_space<vmem>>, %arg5: memref<1x64xf32, #tpu.memory_space<vmem>>, %arg6: memref<25x48x64xbf16, #tpu.memory_space<vmem>>, %arg7: memref<1x64xf32, #tpu.memory_space<vmem>>, %arg8: memref<9x64x96xbf16, #tpu.memory_space<vmem>>, %arg9: memref<1x96xf32, #tpu.memory_space<vmem>>, %arg10: memref<9x96x96xbf16, #tpu.memory_space<vmem>>, %arg11: memref<1x96xf32, #tpu.memory_space<vmem>>, %arg12: memref<4x32xbf16, #tpu.memory_space<vmem>>, %arg13: memref<1x32xf32, #tpu.memory_space<vmem>>, %arg14: memref<1x16x16x256xf32, #tpu.memory_space<vmem>>, %arg15: memref<18x18x4xf32, #tpu.memory_space<vmem>>, %arg16: memref<20x20x48xf32, #tpu.memory_space<vmem>>, %arg17: memref<18x18x64xf32, #tpu.memory_space<vmem>>, %arg18: memref<18x18x96xf32, #tpu.memory_space<vmem>>) attributes {dimension_semantics = [#tpu.dimension_semantics<parallel>], iteration_bounds = array<i64: 2>, scalar_prefetch = 0 : i64, scratch_operands = 4 : i64, tpu.core_type = #tpu.core_type<tc>, window_params = [{transform_indices = @transform_0, window_bounds = array<i64: 1, 16, 16, 4>}, {pipeline_mode = #tpu.pipeline_mode<synchronous>, transform_indices = @transform_1, window_bounds = array<i64: 4, 384>}, {pipeline_mode = #tpu.pipeline_mode<synchronous>, transform_indices = @transform_2, window_bounds = array<i64: 1, 64>}, {pipeline_mode = #tpu.pipeline_mode<synchronous>, transform_indices = @transform_3, window_bounds = array<i64: 1, 48>}, {pipeline_mode = #tpu.pipeline_mode<synchronous>, transform_indices = @transform_4, window_bounds = array<i64: 1, 64>}, {pipeline_mode = #tpu.pipeline_mode<synchronous>, transform_indices = @transform_5, window_bounds = array<i64: 25, 48, 64>}, {pipeline_mode = #tpu.pipeline_mode<synchronous>, transform_indices = @transform_6, window_bounds = array<i64: 1, 64>}, {pipeline_mode = #tpu.pipeline_mode<synchronous>, transform_indices = @transform_7, window_bounds = array<i64: 9, 64, 96>}, {pipeline_mode = #tpu.pipeline_mode<synchronous>, transform_indices = @transform_8, window_bounds = array<i64: 1, 96>}, {pipeline_mode = #tpu.pipeline_mode<synchronous>, transform_indices = @transform_9, window_bounds = array<i64: 9, 96, 96>}, {pipeline_mode = #tpu.pipeline_mode<synchronous>, transform_indices = @transform_10, window_bounds = array<i64: 1, 96>}, {pipeline_mode = #tpu.pipeline_mode<synchronous>, transform_indices = @transform_11, window_bounds = array<i64: 4, 32>}, {pipeline_mode = #tpu.pipeline_mode<synchronous>, transform_indices = @transform_12, window_bounds = array<i64: 1, 32>}, {transform_indices = @transform_13, window_bounds = array<i64: 1, 16, 16, 256>}]} {
    %cst = arith.constant 0.000000e+00 : f32
    %0 = vector.broadcast %cst : f32 to vector<1x18x4xf32>
    %cst_0 = arith.constant 0.000000e+00 : f32
    %1 = vector.broadcast %cst_0 : f32 to vector<18x1x4xf32>
    %c0 = arith.constant 0 : index
    %c0_1 = arith.constant 0 : index
    %c0_2 = arith.constant 0 : index
    %2 = vector.load %arg15[%c0, %c0_1, %c0_2] : memref<18x18x4xf32, #tpu.memory_space<vmem>>, vector<1x18x4xf32>
    tpu.vector_store %arg15[%c0, %c0_1, %c0_2], %0 {strides = array<i32>} : memref<18x18x4xf32, #tpu.memory_space<vmem>>, vector<1x18x4xf32>,
    %c17 = arith.constant 17 : index
    %c0_3 = arith.constant 0 : index
    %c0_4 = arith.constant 0 : index
    %3 = vector.load %arg15[%c17, %c0_3, %c0_4] : memref<18x18x4xf32, #tpu.memory_space<vmem>>, vector<1x18x4xf32>
    tpu.vector_store %arg15[%c17, %c0_3, %c0_4], %0 {strides = array<i32>} : memref<18x18x4xf32, #tpu.memory_space<vmem>>, vector<1x18x4xf32>,
    %c0_5 = arith.constant 0 : index
    %c0_6 = arith.constant 0 : index
    %c0_7 = arith.constant 0 : index
    %4 = vector.load %arg15[%c0_5, %c0_6, %c0_7] : memref<18x18x4xf32, #tpu.memory_space<vmem>>, vector<18x1x4xf32>
    tpu.vector_store %arg15[%c0_5, %c0_6, %c0_7], %1 {strides = array<i32>} : memref<18x18x4xf32, #tpu.memory_space<vmem>>, vector<18x1x4xf32>,
    %c0_8 = arith.constant 0 : index
    %c17_9 = arith.constant 17 : index
    %c0_10 = arith.constant 0 : index
    %5 = vector.load %arg15[%c0_8, %c17_9, %c0_10] : memref<18x18x4xf32, #tpu.memory_space<vmem>>, vector<18x1x4xf32>
    tpu.vector_store %arg15[%c0_8, %c17_9, %c0_10], %1 {strides = array<i32>} : memref<18x18x4xf32, #tpu.memory_space<vmem>>, vector<18x1x4xf32>,
    %cst_11 = arith.constant 0.000000e+00 : f32
    %6 = vector.broadcast %cst_11 : f32 to vector<2x20x48xf32>
    %cst_12 = arith.constant 0.000000e+00 : f32
    %7 = vector.broadcast %cst_12 : f32 to vector<20x2x48xf32>
    %c0_13 = arith.constant 0 : index
    %c0_14 = arith.constant 0 : index
    %c0_15 = arith.constant 0 : index
    %8 = vector.load %arg16[%c0_13, %c0_14, %c0_15] : memref<20x20x48xf32, #tpu.memory_space<vmem>>, vector<2x20x48xf32>
    tpu.vector_store %arg16[%c0_13, %c0_14, %c0_15], %6 {strides = array<i32>} : memref<20x20x48xf32, #tpu.memory_space<vmem>>, vector<2x20x48xf32>,
    %c18 = arith.constant 18 : index
    %c0_16 = arith.constant 0 : index
    %c0_17 = arith.constant 0 : index
    %9 = vector.load %arg16[%c18, %c0_16, %c0_17] : memref<20x20x48xf32, #tpu.memory_space<vmem>>, vector<2x20x48xf32>
    tpu.vector_store %arg16[%c18, %c0_16, %c0_17], %6 {strides = array<i32>} : memref<20x20x48xf32, #tpu.memory_space<vmem>>, vector<2x20x48xf32>,
    %c0_18 = arith.constant 0 : index
    %c0_19 = arith.constant 0 : index
    %c0_20 = arith.constant 0 : index
    %10 = vector.load %arg16[%c0_18, %c0_19, %c0_20] : memref<20x20x48xf32, #tpu.memory_space<vmem>>, vector<20x2x48xf32>
    tpu.vector_store %arg16[%c0_18, %c0_19, %c0_20], %7 {strides = array<i32>} : memref<20x20x48xf32, #tpu.memory_space<vmem>>, vector<20x2x48xf32>,
    %c0_21 = arith.constant 0 : index
    %c18_22 = arith.constant 18 : index
    %c0_23 = arith.constant 0 : index
    %11 = vector.load %arg16[%c0_21, %c18_22, %c0_23] : memref<20x20x48xf32, #tpu.memory_space<vmem>>, vector<20x2x48xf32>
    tpu.vector_store %arg16[%c0_21, %c18_22, %c0_23], %7 {strides = array<i32>} : memref<20x20x48xf32, #tpu.memory_space<vmem>>, vector<20x2x48xf32>,
    %cst_24 = arith.constant 0.000000e+00 : f32
    %12 = vector.broadcast %cst_24 : f32 to vector<1x18x64xf32>
    %cst_25 = arith.constant 0.000000e+00 : f32
    %13 = vector.broadcast %cst_25 : f32 to vector<18x1x64xf32>
    %c0_26 = arith.constant 0 : index
    %c0_27 = arith.constant 0 : index
    %c0_28 = arith.constant 0 : index
    %14 = vector.load %arg17[%c0_26, %c0_27, %c0_28] : memref<18x18x64xf32, #tpu.memory_space<vmem>>, vector<1x18x64xf32>
    tpu.vector_store %arg17[%c0_26, %c0_27, %c0_28], %12 {strides = array<i32>} : memref<18x18x64xf32, #tpu.memory_space<vmem>>, vector<1x18x64xf32>,
    %c17_29 = arith.constant 17 : index
    %c0_30 = arith.constant 0 : index
    %c0_31 = arith.constant 0 : index
    %15 = vector.load %arg17[%c17_29, %c0_30, %c0_31] : memref<18x18x64xf32, #tpu.memory_space<vmem>>, vector<1x18x64xf32>
    tpu.vector_store %arg17[%c17_29, %c0_30, %c0_31], %12 {strides = array<i32>} : memref<18x18x64xf32, #tpu.memory_space<vmem>>, vector<1x18x64xf32>,
    %c0_32 = arith.constant 0 : index
    %c0_33 = arith.constant 0 : index
    %c0_34 = arith.constant 0 : index
    %16 = vector.load %arg17[%c0_32, %c0_33, %c0_34] : memref<18x18x64xf32, #tpu.memory_space<vmem>>, vector<18x1x64xf32>
    tpu.vector_store %arg17[%c0_32, %c0_33, %c0_34], %13 {strides = array<i32>} : memref<18x18x64xf32, #tpu.memory_space<vmem>>, vector<18x1x64xf32>,
    %c0_35 = arith.constant 0 : index
    %c17_36 = arith.constant 17 : index
    %c0_37 = arith.constant 0 : index
    %17 = vector.load %arg17[%c0_35, %c17_36, %c0_37] : memref<18x18x64xf32, #tpu.memory_space<vmem>>, vector<18x1x64xf32>
    tpu.vector_store %arg17[%c0_35, %c17_36, %c0_37], %13 {strides = array<i32>} : memref<18x18x64xf32, #tpu.memory_space<vmem>>, vector<18x1x64xf32>,
    %cst_38 = arith.constant 0.000000e+00 : f32
    %18 = vector.broadcast %cst_38 : f32 to vector<1x18x96xf32>
    %cst_39 = arith.constant 0.000000e+00 : f32
    %19 = vector.broadcast %cst_39 : f32 to vector<18x1x96xf32>
    %c0_40 = arith.constant 0 : index
    %c0_41 = arith.constant 0 : index
    %c0_42 = arith.constant 0 : index
    %20 = vector.load %arg18[%c0_40, %c0_41, %c0_42] : memref<18x18x96xf32, #tpu.memory_space<vmem>>, vector<1x18x96xf32>
    tpu.vector_store %arg18[%c0_40, %c0_41, %c0_42], %18 {strides = array<i32>} : memref<18x18x96xf32, #tpu.memory_space<vmem>>, vector<1x18x96xf32>,
    %c17_43 = arith.constant 17 : index
    %c0_44 = arith.constant 0 : index
    %c0_45 = arith.constant 0 : index
    %21 = vector.load %arg18[%c17_43, %c0_44, %c0_45] : memref<18x18x96xf32, #tpu.memory_space<vmem>>, vector<1x18x96xf32>
    tpu.vector_store %arg18[%c17_43, %c0_44, %c0_45], %18 {strides = array<i32>} : memref<18x18x96xf32, #tpu.memory_space<vmem>>, vector<1x18x96xf32>,
    %c0_46 = arith.constant 0 : index
    %c0_47 = arith.constant 0 : index
    %c0_48 = arith.constant 0 : index
    %22 = vector.load %arg18[%c0_46, %c0_47, %c0_48] : memref<18x18x96xf32, #tpu.memory_space<vmem>>, vector<18x1x96xf32>
    tpu.vector_store %arg18[%c0_46, %c0_47, %c0_48], %19 {strides = array<i32>} : memref<18x18x96xf32, #tpu.memory_space<vmem>>, vector<18x1x96xf32>,
    %c0_49 = arith.constant 0 : index
    %c17_50 = arith.constant 17 : index
    %c0_51 = arith.constant 0 : index
    %23 = vector.load %arg18[%c0_49, %c17_50, %c0_51] : memref<18x18x96xf32, #tpu.memory_space<vmem>>, vector<18x1x96xf32>
    tpu.vector_store %arg18[%c0_49, %c17_50, %c0_51], %19 {strides = array<i32>} : memref<18x18x96xf32, #tpu.memory_space<vmem>>, vector<18x1x96xf32>,
    %c0_52 = arith.constant 0 : index
    %c0_53 = arith.constant 0 : index
    %c0_54 = arith.constant 0 : index
    %c0_55 = arith.constant 0 : index
    %24 = vector.load %arg1[%c0_52, %c0_53, %c0_54, %c0_55] : memref<1x16x16x4xf32, #tpu.memory_space<vmem>>, vector<1x16x16x4xf32>
    %25 = vector.shape_cast %24 : vector<1x16x16x4xf32> to vector<16x16x4xf32>
    %c1 = arith.constant 1 : index
    %c1_56 = arith.constant 1 : index
    %c0_57 = arith.constant 0 : index
    %26 = vector.load %arg15[%c1, %c1_56, %c0_57] : memref<18x18x4xf32, #tpu.memory_space<vmem>>, vector<16x16x4xf32>
    tpu.vector_store %arg15[%c1, %c1_56, %c0_57], %25 {strides = array<i32>} : memref<18x18x4xf32, #tpu.memory_space<vmem>>, vector<16x16x4xf32>,
    %27 = vector.shape_cast %25 : vector<16x16x4xf32> to vector<256x4xf32>
    %28 = arith.truncf %27 : vector<256x4xf32> to vector<256x4xbf16>
    %c0_58 = arith.constant 0 : index
    %c0_59 = arith.constant 0 : index
    %29 = vector.load %arg2[%c0_58, %c0_59] : memref<4x384xbf16, #tpu.memory_space<vmem>>, vector<4x384xbf16>
    %cst_60 = arith.constant dense<0.000000e+00> : vector<256x384xf32>
    %30 = tpu.matmul %28, %29, %cst_60 {dimension_numbers = #tpu.dot_dimension_numbers<[1], [0], [0], [1], [0, 0, 1, 1], [], []>} : vector<256x4xbf16>, vector<4x384xbf16>, vector<256x384xf32> -> vector<256x384xf32>
    %31 = vector.extract_strided_slice %30 {offsets = [0, 0], sizes = [256, 64], strides = [1, 1]} : vector<256x384xf32> to vector<256x64xf32>
    %c0_61 = arith.constant 0 : index
    %c0_62 = arith.constant 0 : index
    %32 = vector.load %arg3[%c0_61, %c0_62] : memref<1x64xf32, #tpu.memory_space<vmem>>, vector<1x64xf32>
    %33 = vector.shape_cast %32 : vector<1x64xf32> to vector<64xf32>
    %34 = vector.shape_cast %33 : vector<64xf32> to vector<1x64xf32>
    %35 = vector.broadcast %34 : vector<1x64xf32> to vector<256x64xf32>
    %36 = arith.addf %31, %35 : vector<256x64xf32>
    %cst_63 = arith.constant 0.000000e+00 : f32
    %37 = vector.broadcast %cst_63 : f32 to vector<256x64xf32>
    %38 = arith.maximumf %36, %37 : vector<256x64xf32>
    %39 = vector.extract_strided_slice %30 {offsets = [0, 128], sizes = [256, 48], strides = [1, 1]} : vector<256x384xf32> to vector<256x48xf32>
    %c0_64 = arith.constant 0 : index
    %c0_65 = arith.constant 0 : index
    %40 = vector.load %arg4[%c0_64, %c0_65] : memref<1x48xf32, #tpu.memory_space<vmem>>, vector<1x48xf32>
    %41 = vector.shape_cast %40 : vector<1x48xf32> to vector<48xf32>
    %42 = vector.shape_cast %41 : vector<48xf32> to vector<1x48xf32>
    %43 = vector.broadcast %42 : vector<1x48xf32> to vector<256x48xf32>
    %44 = arith.addf %39, %43 : vector<256x48xf32>
    %cst_66 = arith.constant 0.000000e+00 : f32
    %45 = vector.broadcast %cst_66 : f32 to vector<256x48xf32>
    %46 = arith.maximumf %44, %45 : vector<256x48xf32>
    %47 = vector.extract_strided_slice %30 {offsets = [0, 256], sizes = [256, 64], strides = [1, 1]} : vector<256x384xf32> to vector<256x64xf32>
    %c0_67 = arith.constant 0 : index
    %c0_68 = arith.constant 0 : index
    %48 = vector.load %arg5[%c0_67, %c0_68] : memref<1x64xf32, #tpu.memory_space<vmem>>, vector<1x64xf32>
    %49 = vector.shape_cast %48 : vector<1x64xf32> to vector<64xf32>
    %50 = vector.shape_cast %49 : vector<64xf32> to vector<1x64xf32>
    %51 = vector.broadcast %50 : vector<1x64xf32> to vector<256x64xf32>
    %52 = arith.addf %47, %51 : vector<256x64xf32>
    %cst_69 = arith.constant 0.000000e+00 : f32
    %53 = vector.broadcast %cst_69 : f32 to vector<256x64xf32>
    %54 = arith.maximumf %52, %53 : vector<256x64xf32>
    %55 = vector.shape_cast %46 : vector<256x48xf32> to vector<16x16x48xf32>
    %c2 = arith.constant 2 : index
    %c2_70 = arith.constant 2 : index
    %c0_71 = arith.constant 0 : index
    %56 = vector.load %arg16[%c2, %c2_70, %c0_71] : memref<20x20x48xf32, #tpu.memory_space<vmem>>, vector<16x16x48xf32>
    tpu.vector_store %arg16[%c2, %c2_70, %c0_71], %55 {strides = array<i32>} : memref<20x20x48xf32, #tpu.memory_space<vmem>>, vector<16x16x48xf32>,
    %57 = vector.shape_cast %54 : vector<256x64xf32> to vector<16x16x64xf32>
    %c1_72 = arith.constant 1 : index
    %c1_73 = arith.constant 1 : index
    %c0_74 = arith.constant 0 : index
    %58 = vector.load %arg17[%c1_72, %c1_73, %c0_74] : memref<18x18x64xf32, #tpu.memory_space<vmem>>, vector<16x16x64xf32>
    tpu.vector_store %arg17[%c1_72, %c1_73, %c0_74], %57 {strides = array<i32>} : memref<18x18x64xf32, #tpu.memory_space<vmem>>, vector<16x16x64xf32>,
    %cst_75 = arith.constant 0.000000e+00 : f32
    %59 = vector.broadcast %cst_75 : f32 to vector<256x64xf32>
    %c0_76 = arith.constant 0 : index
    %c0_77 = arith.constant 0 : index
    %c0_78 = arith.constant 0 : index
    %60 = vector.load %arg16[%c0_76, %c0_77, %c0_78] : memref<20x20x48xf32, #tpu.memory_space<vmem>>, vector<16x16x48xf32>
    %61 = vector.shape_cast %60 : vector<16x16x48xf32> to vector<256x48xf32>
    %62 = arith.truncf %61 : vector<256x48xf32> to vector<256x48xbf16>
    %c0_79 = arith.constant 0 : index
    %c0_80 = arith.constant 0 : index
    %c0_81 = arith.constant 0 : index
    %63 = vector.load %arg6[%c0_79, %c0_80, %c0_81] : memref<25x48x64xbf16, #tpu.memory_space<vmem>>, vector<1x48x64xbf16>
    %64 = vector.shape_cast %63 : vector<1x48x64xbf16> to vector<48x64xbf16>
    %cst_82 = arith.constant dense<0.000000e+00> : vector<256x64xf32>
    %65 = tpu.matmul %62, %64, %cst_82 {dimension_numbers = #tpu.dot_dimension_numbers<[1], [0], [0], [1], [0, 0, 1, 1], [], []>} : vector<256x48xbf16>, vector<48x64xbf16>, vector<256x64xf32> -> vector<256x64xf32>
    %66 = arith.addf %59, %65 : vector<256x64xf32>
    %c0_83 = arith.constant 0 : index
    %c1_84 = arith.constant 1 : index
    %c0_85 = arith.constant 0 : index
    %67 = vector.load %arg16[%c0_83, %c1_84, %c0_85] : memref<20x20x48xf32, #tpu.memory_space<vmem>>, vector<16x16x48xf32>
    %68 = vector.shape_cast %67 : vector<16x16x48xf32> to vector<256x48xf32>
    %69 = arith.truncf %68 : vector<256x48xf32> to vector<256x48xbf16>
    %c1_86 = arith.constant 1 : index
    %c0_87 = arith.constant 0 : index
    %c0_88 = arith.constant 0 : index
    %70 = vector.load %arg6[%c1_86, %c0_87, %c0_88] : memref<25x48x64xbf16, #tpu.memory_space<vmem>>, vector<1x48x64xbf16>
    %71 = vector.shape_cast %70 : vector<1x48x64xbf16> to vector<48x64xbf16>
    %cst_89 = arith.constant dense<0.000000e+00> : vector<256x64xf32>
    %72 = tpu.matmul %69, %71, %cst_89 {dimension_numbers = #tpu.dot_dimension_numbers<[1], [0], [0], [1], [0, 0, 1, 1], [], []>} : vector<256x48xbf16>, vector<48x64xbf16>, vector<256x64xf32> -> vector<256x64xf32>
    %73 = arith.addf %66, %72 : vector<256x64xf32>
    %c0_90 = arith.constant 0 : index
    %c2_91 = arith.constant 2 : index
    %c0_92 = arith.constant 0 : index
    %74 = vector.load %arg16[%c0_90, %c2_91, %c0_92] : memref<20x20x48xf32, #tpu.memory_space<vmem>>, vector<16x16x48xf32>
    %75 = vector.shape_cast %74 : vector<16x16x48xf32> to vector<256x48xf32>
    %76 = arith.truncf %75 : vector<256x48xf32> to vector<256x48xbf16>
    %c2_93 = arith.constant 2 : index
    %c0_94 = arith.constant 0 : index
    %c0_95 = arith.constant 0 : index
    %77 = vector.load %arg6[%c2_93, %c0_94, %c0_95] : memref<25x48x64xbf16, #tpu.memory_space<vmem>>, vector<1x48x64xbf16>
    %78 = vector.shape_cast %77 : vector<1x48x64xbf16> to vector<48x64xbf16>
    %cst_96 = arith.constant dense<0.000000e+00> : vector<256x64xf32>
    %79 = tpu.matmul %76, %78, %cst_96 {dimension_numbers = #tpu.dot_dimension_numbers<[1], [0], [0], [1], [0, 0, 1, 1], [], []>} : vector<256x48xbf16>, vector<48x64xbf16>, vector<256x64xf32> -> vector<256x64xf32>
    %80 = arith.addf %73, %79 : vector<256x64xf32>
    %c0_97 = arith.constant 0 : index
    %c3 = arith.constant 3 : index
    %c0_98 = arith.constant 0 : index
    %81 = vector.load %arg16[%c0_97, %c3, %c0_98] : memref<20x20x48xf32, #tpu.memory_space<vmem>>, vector<16x16x48xf32>
    %82 = vector.shape_cast %81 : vector<16x16x48xf32> to vector<256x48xf32>
    %83 = arith.truncf %82 : vector<256x48xf32> to vector<256x48xbf16>
    %c3_99 = arith.constant 3 : index
    %c0_100 = arith.constant 0 : index
    %c0_101 = arith.constant 0 : index
    %84 = vector.load %arg6[%c3_99, %c0_100, %c0_101] : memref<25x48x64xbf16, #tpu.memory_space<vmem>>, vector<1x48x64xbf16>
    %85 = vector.shape_cast %84 : vector<1x48x64xbf16> to vector<48x64xbf16>
    %cst_102 = arith.constant dense<0.000000e+00> : vector<256x64xf32>
    %86 = tpu.matmul %83, %85, %cst_102 {dimension_numbers = #tpu.dot_dimension_numbers<[1], [0], [0], [1], [0, 0, 1, 1], [], []>} : vector<256x48xbf16>, vector<48x64xbf16>, vector<256x64xf32> -> vector<256x64xf32>
    %87 = arith.addf %80, %86 : vector<256x64xf32>
    %c0_103 = arith.constant 0 : index
    %c4 = arith.constant 4 : index
    %c0_104 = arith.constant 0 : index
    %88 = vector.load %arg16[%c0_103, %c4, %c0_104] : memref<20x20x48xf32, #tpu.memory_space<vmem>>, vector<16x16x48xf32>
    %89 = vector.shape_cast %88 : vector<16x16x48xf32> to vector<256x48xf32>
    %90 = arith.truncf %89 : vector<256x48xf32> to vector<256x48xbf16>
    %c4_105 = arith.constant 4 : index
    %c0_106 = arith.constant 0 : index
    %c0_107 = arith.constant 0 : index
    %91 = vector.load %arg6[%c4_105, %c0_106, %c0_107] : memref<25x48x64xbf16, #tpu.memory_space<vmem>>, vector<1x48x64xbf16>
    %92 = vector.shape_cast %91 : vector<1x48x64xbf16> to vector<48x64xbf16>
    %cst_108 = arith.constant dense<0.000000e+00> : vector<256x64xf32>
    %93 = tpu.matmul %90, %92, %cst_108 {dimension_numbers = #tpu.dot_dimension_numbers<[1], [0], [0], [1], [0, 0, 1, 1], [], []>} : vector<256x48xbf16>, vector<48x64xbf16>, vector<256x64xf32> -> vector<256x64xf32>
    %94 = arith.addf %87, %93 : vector<256x64xf32>
    %c1_109 = arith.constant 1 : index
    %c0_110 = arith.constant 0 : index
    %c0_111 = arith.constant 0 : index
    %95 = vector.load %arg16[%c1_109, %c0_110, %c0_111] : memref<20x20x48xf32, #tpu.memory_space<vmem>>, vector<16x16x48xf32>
    %96 = vector.shape_cast %95 : vector<16x16x48xf32> to vector<256x48xf32>
    %97 = arith.truncf %96 : vector<256x48xf32> to vector<256x48xbf16>
    %c5 = arith.constant 5 : index
    %c0_112 = arith.constant 0 : index
    %c0_113 = arith.constant 0 : index
    %98 = vector.load %arg6[%c5, %c0_112, %c0_113] : memref<25x48x64xbf16, #tpu.memory_space<vmem>>, vector<1x48x64xbf16>
    %99 = vector.shape_cast %98 : vector<1x48x64xbf16> to vector<48x64xbf16>
    %cst_114 = arith.constant dense<0.000000e+00> : vector<256x64xf32>
    %100 = tpu.matmul %97, %99, %cst_114 {dimension_numbers = #tpu.dot_dimension_numbers<[1], [0], [0], [1], [0, 0, 1, 1], [], []>} : vector<256x48xbf16>, vector<48x64xbf16>, vector<256x64xf32> -> vector<256x64xf32>
    %101 = arith.addf %94, %100 : vector<256x64xf32>
    %c1_115 = arith.constant 1 : index
    %c1_116 = arith.constant 1 : index
    %c0_117 = arith.constant 0 : index
    %102 = vector.load %arg16[%c1_115, %c1_116, %c0_117] : memref<20x20x48xf32, #tpu.memory_space<vmem>>, vector<16x16x48xf32>
    %103 = vector.shape_cast %102 : vector<16x16x48xf32> to vector<256x48xf32>
    %104 = arith.truncf %103 : vector<256x48xf32> to vector<256x48xbf16>
    %c6 = arith.constant 6 : index
    %c0_118 = arith.constant 0 : index
    %c0_119 = arith.constant 0 : index
    %105 = vector.load %arg6[%c6, %c0_118, %c0_119] : memref<25x48x64xbf16, #tpu.memory_space<vmem>>, vector<1x48x64xbf16>
    %106 = vector.shape_cast %105 : vector<1x48x64xbf16> to vector<48x64xbf16>
    %cst_120 = arith.constant dense<0.000000e+00> : vector<256x64xf32>
    %107 = tpu.matmul %104, %106, %cst_120 {dimension_numbers = #tpu.dot_dimension_numbers<[1], [0], [0], [1], [0, 0, 1, 1], [], []>} : vector<256x48xbf16>, vector<48x64xbf16>, vector<256x64xf32> -> vector<256x64xf32>
    %108 = arith.addf %101, %107 : vector<256x64xf32>
    %c1_121 = arith.constant 1 : index
    %c2_122 = arith.constant 2 : index
    %c0_123 = arith.constant 0 : index
    %109 = vector.load %arg16[%c1_121, %c2_122, %c0_123] : memref<20x20x48xf32, #tpu.memory_space<vmem>>, vector<16x16x48xf32>
    %110 = vector.shape_cast %109 : vector<16x16x48xf32> to vector<256x48xf32>
    %111 = arith.truncf %110 : vector<256x48xf32> to vector<256x48xbf16>
    %c7 = arith.constant 7 : index
    %c0_124 = arith.constant 0 : index
    %c0_125 = arith.constant 0 : index
    %112 = vector.load %arg6[%c7, %c0_124, %c0_125] : memref<25x48x64xbf16, #tpu.memory_space<vmem>>, vector<1x48x64xbf16>
    %113 = vector.shape_cast %112 : vector<1x48x64xbf16> to vector<48x64xbf16>
    %cst_126 = arith.constant dense<0.000000e+00> : vector<256x64xf32>
    %114 = tpu.matmul %111, %113, %cst_126 {dimension_numbers = #tpu.dot_dimension_numbers<[1], [0], [0], [1], [0, 0, 1, 1], [], []>} : vector<256x48xbf16>, vector<48x64xbf16>, vector<256x64xf32> -> vector<256x64xf32>
    %115 = arith.addf %108, %114 : vector<256x64xf32>
    %c1_127 = arith.constant 1 : index
    %c3_128 = arith.constant 3 : index
    %c0_129 = arith.constant 0 : index
    %116 = vector.load %arg16[%c1_127, %c3_128, %c0_129] : memref<20x20x48xf32, #tpu.memory_space<vmem>>, vector<16x16x48xf32>
    %117 = vector.shape_cast %116 : vector<16x16x48xf32> to vector<256x48xf32>
    %118 = arith.truncf %117 : vector<256x48xf32> to vector<256x48xbf16>
    %c8 = arith.constant 8 : index
    %c0_130 = arith.constant 0 : index
    %c0_131 = arith.constant 0 : index
    %119 = vector.load %arg6[%c8, %c0_130, %c0_131] : memref<25x48x64xbf16, #tpu.memory_space<vmem>>, vector<1x48x64xbf16>
    %120 = vector.shape_cast %119 : vector<1x48x64xbf16> to vector<48x64xbf16>
    %cst_132 = arith.constant dense<0.000000e+00> : vector<256x64xf32>
    %121 = tpu.matmul %118, %120, %cst_132 {dimension_numbers = #tpu.dot_dimension_numbers<[1], [0], [0], [1], [0, 0, 1, 1], [], []>} : vector<256x48xbf16>, vector<48x64xbf16>, vector<256x64xf32> -> vector<256x64xf32>
    %122 = arith.addf %115, %121 : vector<256x64xf32>
    %c1_133 = arith.constant 1 : index
    %c4_134 = arith.constant 4 : index
    %c0_135 = arith.constant 0 : index
    %123 = vector.load %arg16[%c1_133, %c4_134, %c0_135] : memref<20x20x48xf32, #tpu.memory_space<vmem>>, vector<16x16x48xf32>
    %124 = vector.shape_cast %123 : vector<16x16x48xf32> to vector<256x48xf32>
    %125 = arith.truncf %124 : vector<256x48xf32> to vector<256x48xbf16>
    %c9 = arith.constant 9 : index
    %c0_136 = arith.constant 0 : index
    %c0_137 = arith.constant 0 : index
    %126 = vector.load %arg6[%c9, %c0_136, %c0_137] : memref<25x48x64xbf16, #tpu.memory_space<vmem>>, vector<1x48x64xbf16>
    %127 = vector.shape_cast %126 : vector<1x48x64xbf16> to vector<48x64xbf16>
    %cst_138 = arith.constant dense<0.000000e+00> : vector<256x64xf32>
    %128 = tpu.matmul %125, %127, %cst_138 {dimension_numbers = #tpu.dot_dimension_numbers<[1], [0], [0], [1], [0, 0, 1, 1], [], []>} : vector<256x48xbf16>, vector<48x64xbf16>, vector<256x64xf32> -> vector<256x64xf32>
    %129 = arith.addf %122, %128 : vector<256x64xf32>
    %c2_139 = arith.constant 2 : index
    %c0_140 = arith.constant 0 : index
    %c0_141 = arith.constant 0 : index
    %130 = vector.load %arg16[%c2_139, %c0_140, %c0_141] : memref<20x20x48xf32, #tpu.memory_space<vmem>>, vector<16x16x48xf32>
    %131 = vector.shape_cast %130 : vector<16x16x48xf32> to vector<256x48xf32>
    %132 = arith.truncf %131 : vector<256x48xf32> to vector<256x48xbf16>
    %c10 = arith.constant 10 : index
    %c0_142 = arith.constant 0 : index
    %c0_143 = arith.constant 0 : index
    %133 = vector.load %arg6[%c10, %c0_142, %c0_143] : memref<25x48x64xbf16, #tpu.memory_space<vmem>>, vector<1x48x64xbf16>
    %134 = vector.shape_cast %133 : vector<1x48x64xbf16> to vector<48x64xbf16>
    %cst_144 = arith.constant dense<0.000000e+00> : vector<256x64xf32>
    %135 = tpu.matmul %132, %134, %cst_144 {dimension_numbers = #tpu.dot_dimension_numbers<[1], [0], [0], [1], [0, 0, 1, 1], [], []>} : vector<256x48xbf16>, vector<48x64xbf16>, vector<256x64xf32> -> vector<256x64xf32>
    %136 = arith.addf %129, %135 : vector<256x64xf32>
    %c2_145 = arith.constant 2 : index
    %c1_146 = arith.constant 1 : index
    %c0_147 = arith.constant 0 : index
    %137 = vector.load %arg16[%c2_145, %c1_146, %c0_147] : memref<20x20x48xf32, #tpu.memory_space<vmem>>, vector<16x16x48xf32>
    %138 = vector.shape_cast %137 : vector<16x16x48xf32> to vector<256x48xf32>
    %139 = arith.truncf %138 : vector<256x48xf32> to vector<256x48xbf16>
    %c11 = arith.constant 11 : index
    %c0_148 = arith.constant 0 : index
    %c0_149 = arith.constant 0 : index
    %140 = vector.load %arg6[%c11, %c0_148, %c0_149] : memref<25x48x64xbf16, #tpu.memory_space<vmem>>, vector<1x48x64xbf16>
    %141 = vector.shape_cast %140 : vector<1x48x64xbf16> to vector<48x64xbf16>
    %cst_150 = arith.constant dense<0.000000e+00> : vector<256x64xf32>
    %142 = tpu.matmul %139, %141, %cst_150 {dimension_numbers = #tpu.dot_dimension_numbers<[1], [0], [0], [1], [0, 0, 1, 1], [], []>} : vector<256x48xbf16>, vector<48x64xbf16>, vector<256x64xf32> -> vector<256x64xf32>
    %143 = arith.addf %136, %142 : vector<256x64xf32>
    %c2_151 = arith.constant 2 : index
    %c2_152 = arith.constant 2 : index
    %c0_153 = arith.constant 0 : index
    %144 = vector.load %arg16[%c2_151, %c2_152, %c0_153] : memref<20x20x48xf32, #tpu.memory_space<vmem>>, vector<16x16x48xf32>
    %145 = vector.shape_cast %144 : vector<16x16x48xf32> to vector<256x48xf32>
    %146 = arith.truncf %145 : vector<256x48xf32> to vector<256x48xbf16>
    %c12 = arith.constant 12 : index
    %c0_154 = arith.constant 0 : index
    %c0_155 = arith.constant 0 : index
    %147 = vector.load %arg6[%c12, %c0_154, %c0_155] : memref<25x48x64xbf16, #tpu.memory_space<vmem>>, vector<1x48x64xbf16>
    %148 = vector.shape_cast %147 : vector<1x48x64xbf16> to vector<48x64xbf16>
    %cst_156 = arith.constant dense<0.000000e+00> : vector<256x64xf32>
    %149 = tpu.matmul %146, %148, %cst_156 {dimension_numbers = #tpu.dot_dimension_numbers<[1], [0], [0], [1], [0, 0, 1, 1], [], []>} : vector<256x48xbf16>, vector<48x64xbf16>, vector<256x64xf32> -> vector<256x64xf32>
    %150 = arith.addf %143, %149 : vector<256x64xf32>
    %c2_157 = arith.constant 2 : index
    %c3_158 = arith.constant 3 : index
    %c0_159 = arith.constant 0 : index
    %151 = vector.load %arg16[%c2_157, %c3_158, %c0_159] : memref<20x20x48xf32, #tpu.memory_space<vmem>>, vector<16x16x48xf32>
    %152 = vector.shape_cast %151 : vector<16x16x48xf32> to vector<256x48xf32>
    %153 = arith.truncf %152 : vector<256x48xf32> to vector<256x48xbf16>
    %c13 = arith.constant 13 : index
    %c0_160 = arith.constant 0 : index
    %c0_161 = arith.constant 0 : index
    %154 = vector.load %arg6[%c13, %c0_160, %c0_161] : memref<25x48x64xbf16, #tpu.memory_space<vmem>>, vector<1x48x64xbf16>
    %155 = vector.shape_cast %154 : vector<1x48x64xbf16> to vector<48x64xbf16>
    %cst_162 = arith.constant dense<0.000000e+00> : vector<256x64xf32>
    %156 = tpu.matmul %153, %155, %cst_162 {dimension_numbers = #tpu.dot_dimension_numbers<[1], [0], [0], [1], [0, 0, 1, 1], [], []>} : vector<256x48xbf16>, vector<48x64xbf16>, vector<256x64xf32> -> vector<256x64xf32>
    %157 = arith.addf %150, %156 : vector<256x64xf32>
    %c2_163 = arith.constant 2 : index
    %c4_164 = arith.constant 4 : index
    %c0_165 = arith.constant 0 : index
    %158 = vector.load %arg16[%c2_163, %c4_164, %c0_165] : memref<20x20x48xf32, #tpu.memory_space<vmem>>, vector<16x16x48xf32>
    %159 = vector.shape_cast %158 : vector<16x16x48xf32> to vector<256x48xf32>
    %160 = arith.truncf %159 : vector<256x48xf32> to vector<256x48xbf16>
    %c14 = arith.constant 14 : index
    %c0_166 = arith.constant 0 : index
    %c0_167 = arith.constant 0 : index
    %161 = vector.load %arg6[%c14, %c0_166, %c0_167] : memref<25x48x64xbf16, #tpu.memory_space<vmem>>, vector<1x48x64xbf16>
    %162 = vector.shape_cast %161 : vector<1x48x64xbf16> to vector<48x64xbf16>
    %cst_168 = arith.constant dense<0.000000e+00> : vector<256x64xf32>
    %163 = tpu.matmul %160, %162, %cst_168 {dimension_numbers = #tpu.dot_dimension_numbers<[1], [0], [0], [1], [0, 0, 1, 1], [], []>} : vector<256x48xbf16>, vector<48x64xbf16>, vector<256x64xf32> -> vector<256x64xf32>
    %164 = arith.addf %157, %163 : vector<256x64xf32>
    %c3_169 = arith.constant 3 : index
    %c0_170 = arith.constant 0 : index
    %c0_171 = arith.constant 0 : index
    %165 = vector.load %arg16[%c3_169, %c0_170, %c0_171] : memref<20x20x48xf32, #tpu.memory_space<vmem>>, vector<16x16x48xf32>
    %166 = vector.shape_cast %165 : vector<16x16x48xf32> to vector<256x48xf32>
    %167 = arith.truncf %166 : vector<256x48xf32> to vector<256x48xbf16>
    %c15 = arith.constant 15 : index
    %c0_172 = arith.constant 0 : index
    %c0_173 = arith.constant 0 : index
    %168 = vector.load %arg6[%c15, %c0_172, %c0_173] : memref<25x48x64xbf16, #tpu.memory_space<vmem>>, vector<1x48x64xbf16>
    %169 = vector.shape_cast %168 : vector<1x48x64xbf16> to vector<48x64xbf16>
    %cst_174 = arith.constant dense<0.000000e+00> : vector<256x64xf32>
    %170 = tpu.matmul %167, %169, %cst_174 {dimension_numbers = #tpu.dot_dimension_numbers<[1], [0], [0], [1], [0, 0, 1, 1], [], []>} : vector<256x48xbf16>, vector<48x64xbf16>, vector<256x64xf32> -> vector<256x64xf32>
    %171 = arith.addf %164, %170 : vector<256x64xf32>
    %c3_175 = arith.constant 3 : index
    %c1_176 = arith.constant 1 : index
    %c0_177 = arith.constant 0 : index
    %172 = vector.load %arg16[%c3_175, %c1_176, %c0_177] : memref<20x20x48xf32, #tpu.memory_space<vmem>>, vector<16x16x48xf32>
    %173 = vector.shape_cast %172 : vector<16x16x48xf32> to vector<256x48xf32>
    %174 = arith.truncf %173 : vector<256x48xf32> to vector<256x48xbf16>
    %c16 = arith.constant 16 : index
    %c0_178 = arith.constant 0 : index
    %c0_179 = arith.constant 0 : index
    %175 = vector.load %arg6[%c16, %c0_178, %c0_179] : memref<25x48x64xbf16, #tpu.memory_space<vmem>>, vector<1x48x64xbf16>
    %176 = vector.shape_cast %175 : vector<1x48x64xbf16> to vector<48x64xbf16>
    %cst_180 = arith.constant dense<0.000000e+00> : vector<256x64xf32>
    %177 = tpu.matmul %174, %176, %cst_180 {dimension_numbers = #tpu.dot_dimension_numbers<[1], [0], [0], [1], [0, 0, 1, 1], [], []>} : vector<256x48xbf16>, vector<48x64xbf16>, vector<256x64xf32> -> vector<256x64xf32>
    %178 = arith.addf %171, %177 : vector<256x64xf32>
    %c3_181 = arith.constant 3 : index
    %c2_182 = arith.constant 2 : index
    %c0_183 = arith.constant 0 : index
    %179 = vector.load %arg16[%c3_181, %c2_182, %c0_183] : memref<20x20x48xf32, #tpu.memory_space<vmem>>, vector<16x16x48xf32>
    %180 = vector.shape_cast %179 : vector<16x16x48xf32> to vector<256x48xf32>
    %181 = arith.truncf %180 : vector<256x48xf32> to vector<256x48xbf16>
    %c17_184 = arith.constant 17 : index
    %c0_185 = arith.constant 0 : index
    %c0_186 = arith.constant 0 : index
    %182 = vector.load %arg6[%c17_184, %c0_185, %c0_186] : memref<25x48x64xbf16, #tpu.memory_space<vmem>>, vector<1x48x64xbf16>
    %183 = vector.shape_cast %182 : vector<1x48x64xbf16> to vector<48x64xbf16>
    %cst_187 = arith.constant dense<0.000000e+00> : vector<256x64xf32>
    %184 = tpu.matmul %181, %183, %cst_187 {dimension_numbers = #tpu.dot_dimension_numbers<[1], [0], [0], [1], [0, 0, 1, 1], [], []>} : vector<256x48xbf16>, vector<48x64xbf16>, vector<256x64xf32> -> vector<256x64xf32>
    %185 = arith.addf %178, %184 : vector<256x64xf32>
    %c3_188 = arith.constant 3 : index
    %c3_189 = arith.constant 3 : index
    %c0_190 = arith.constant 0 : index
    %186 = vector.load %arg16[%c3_188, %c3_189, %c0_190] : memref<20x20x48xf32, #tpu.memory_space<vmem>>, vector<16x16x48xf32>
    %187 = vector.shape_cast %186 : vector<16x16x48xf32> to vector<256x48xf32>
    %188 = arith.truncf %187 : vector<256x48xf32> to vector<256x48xbf16>
    %c18_191 = arith.constant 18 : index
    %c0_192 = arith.constant 0 : index
    %c0_193 = arith.constant 0 : index
    %189 = vector.load %arg6[%c18_191, %c0_192, %c0_193] : memref<25x48x64xbf16, #tpu.memory_space<vmem>>, vector<1x48x64xbf16>
    %190 = vector.shape_cast %189 : vector<1x48x64xbf16> to vector<48x64xbf16>
    %cst_194 = arith.constant dense<0.000000e+00> : vector<256x64xf32>
    %191 = tpu.matmul %188, %190, %cst_194 {dimension_numbers = #tpu.dot_dimension_numbers<[1], [0], [0], [1], [0, 0, 1, 1], [], []>} : vector<256x48xbf16>, vector<48x64xbf16>, vector<256x64xf32> -> vector<256x64xf32>
    %192 = arith.addf %185, %191 : vector<256x64xf32>
    %c3_195 = arith.constant 3 : index
    %c4_196 = arith.constant 4 : index
    %c0_197 = arith.constant 0 : index
    %193 = vector.load %arg16[%c3_195, %c4_196, %c0_197] : memref<20x20x48xf32, #tpu.memory_space<vmem>>, vector<16x16x48xf32>
    %194 = vector.shape_cast %193 : vector<16x16x48xf32> to vector<256x48xf32>
    %195 = arith.truncf %194 : vector<256x48xf32> to vector<256x48xbf16>
    %c19 = arith.constant 19 : index
    %c0_198 = arith.constant 0 : index
    %c0_199 = arith.constant 0 : index
    %196 = vector.load %arg6[%c19, %c0_198, %c0_199] : memref<25x48x64xbf16, #tpu.memory_space<vmem>>, vector<1x48x64xbf16>
    %197 = vector.shape_cast %196 : vector<1x48x64xbf16> to vector<48x64xbf16>
    %cst_200 = arith.constant dense<0.000000e+00> : vector<256x64xf32>
    %198 = tpu.matmul %195, %197, %cst_200 {dimension_numbers = #tpu.dot_dimension_numbers<[1], [0], [0], [1], [0, 0, 1, 1], [], []>} : vector<256x48xbf16>, vector<48x64xbf16>, vector<256x64xf32> -> vector<256x64xf32>
    %199 = arith.addf %192, %198 : vector<256x64xf32>
    %c4_201 = arith.constant 4 : index
    %c0_202 = arith.constant 0 : index
    %c0_203 = arith.constant 0 : index
    %200 = vector.load %arg16[%c4_201, %c0_202, %c0_203] : memref<20x20x48xf32, #tpu.memory_space<vmem>>, vector<16x16x48xf32>
    %201 = vector.shape_cast %200 : vector<16x16x48xf32> to vector<256x48xf32>
    %202 = arith.truncf %201 : vector<256x48xf32> to vector<256x48xbf16>
    %c20 = arith.constant 20 : index
    %c0_204 = arith.constant 0 : index
    %c0_205 = arith.constant 0 : index
    %203 = vector.load %arg6[%c20, %c0_204, %c0_205] : memref<25x48x64xbf16, #tpu.memory_space<vmem>>, vector<1x48x64xbf16>
    %204 = vector.shape_cast %203 : vector<1x48x64xbf16> to vector<48x64xbf16>
    %cst_206 = arith.constant dense<0.000000e+00> : vector<256x64xf32>
    %205 = tpu.matmul %202, %204, %cst_206 {dimension_numbers = #tpu.dot_dimension_numbers<[1], [0], [0], [1], [0, 0, 1, 1], [], []>} : vector<256x48xbf16>, vector<48x64xbf16>, vector<256x64xf32> -> vector<256x64xf32>
    %206 = arith.addf %199, %205 : vector<256x64xf32>
    %c4_207 = arith.constant 4 : index
    %c1_208 = arith.constant 1 : index
    %c0_209 = arith.constant 0 : index
    %207 = vector.load %arg16[%c4_207, %c1_208, %c0_209] : memref<20x20x48xf32, #tpu.memory_space<vmem>>, vector<16x16x48xf32>
    %208 = vector.shape_cast %207 : vector<16x16x48xf32> to vector<256x48xf32>
    %209 = arith.truncf %208 : vector<256x48xf32> to vector<256x48xbf16>
    %c21 = arith.constant 21 : index
    %c0_210 = arith.constant 0 : index
    %c0_211 = arith.constant 0 : index
    %210 = vector.load %arg6[%c21, %c0_210, %c0_211] : memref<25x48x64xbf16, #tpu.memory_space<vmem>>, vector<1x48x64xbf16>
    %211 = vector.shape_cast %210 : vector<1x48x64xbf16> to vector<48x64xbf16>
    %cst_212 = arith.constant dense<0.000000e+00> : vector<256x64xf32>
    %212 = tpu.matmul %209, %211, %cst_212 {dimension_numbers = #tpu.dot_dimension_numbers<[1], [0], [0], [1], [0, 0, 1, 1], [], []>} : vector<256x48xbf16>, vector<48x64xbf16>, vector<256x64xf32> -> vector<256x64xf32>
    %213 = arith.addf %206, %212 : vector<256x64xf32>
    %c4_213 = arith.constant 4 : index
    %c2_214 = arith.constant 2 : index
    %c0_215 = arith.constant 0 : index
    %214 = vector.load %arg16[%c4_213, %c2_214, %c0_215] : memref<20x20x48xf32, #tpu.memory_space<vmem>>, vector<16x16x48xf32>
    %215 = vector.shape_cast %214 : vector<16x16x48xf32> to vector<256x48xf32>
    %216 = arith.truncf %215 : vector<256x48xf32> to vector<256x48xbf16>
    %c22 = arith.constant 22 : index
    %c0_216 = arith.constant 0 : index
    %c0_217 = arith.constant 0 : index
    %217 = vector.load %arg6[%c22, %c0_216, %c0_217] : memref<25x48x64xbf16, #tpu.memory_space<vmem>>, vector<1x48x64xbf16>
    %218 = vector.shape_cast %217 : vector<1x48x64xbf16> to vector<48x64xbf16>
    %cst_218 = arith.constant dense<0.000000e+00> : vector<256x64xf32>
    %219 = tpu.matmul %216, %218, %cst_218 {dimension_numbers = #tpu.dot_dimension_numbers<[1], [0], [0], [1], [0, 0, 1, 1], [], []>} : vector<256x48xbf16>, vector<48x64xbf16>, vector<256x64xf32> -> vector<256x64xf32>
    %220 = arith.addf %213, %219 : vector<256x64xf32>
    %c4_219 = arith.constant 4 : index
    %c3_220 = arith.constant 3 : index
    %c0_221 = arith.constant 0 : index
    %221 = vector.load %arg16[%c4_219, %c3_220, %c0_221] : memref<20x20x48xf32, #tpu.memory_space<vmem>>, vector<16x16x48xf32>
    %222 = vector.shape_cast %221 : vector<16x16x48xf32> to vector<256x48xf32>
    %223 = arith.truncf %222 : vector<256x48xf32> to vector<256x48xbf16>
    %c23 = arith.constant 23 : index
    %c0_222 = arith.constant 0 : index
    %c0_223 = arith.constant 0 : index
    %224 = vector.load %arg6[%c23, %c0_222, %c0_223] : memref<25x48x64xbf16, #tpu.memory_space<vmem>>, vector<1x48x64xbf16>
    %225 = vector.shape_cast %224 : vector<1x48x64xbf16> to vector<48x64xbf16>
    %cst_224 = arith.constant dense<0.000000e+00> : vector<256x64xf32>
    %226 = tpu.matmul %223, %225, %cst_224 {dimension_numbers = #tpu.dot_dimension_numbers<[1], [0], [0], [1], [0, 0, 1, 1], [], []>} : vector<256x48xbf16>, vector<48x64xbf16>, vector<256x64xf32> -> vector<256x64xf32>
    %227 = arith.addf %220, %226 : vector<256x64xf32>
    %c4_225 = arith.constant 4 : index
    %c4_226 = arith.constant 4 : index
    %c0_227 = arith.constant 0 : index
    %228 = vector.load %arg16[%c4_225, %c4_226, %c0_227] : memref<20x20x48xf32, #tpu.memory_space<vmem>>, vector<16x16x48xf32>
    %229 = vector.shape_cast %228 : vector<16x16x48xf32> to vector<256x48xf32>
    %230 = arith.truncf %229 : vector<256x48xf32> to vector<256x48xbf16>
    %c24 = arith.constant 24 : index
    %c0_228 = arith.constant 0 : index
    %c0_229 = arith.constant 0 : index
    %231 = vector.load %arg6[%c24, %c0_228, %c0_229] : memref<25x48x64xbf16, #tpu.memory_space<vmem>>, vector<1x48x64xbf16>
    %232 = vector.shape_cast %231 : vector<1x48x64xbf16> to vector<48x64xbf16>
    %cst_230 = arith.constant dense<0.000000e+00> : vector<256x64xf32>
    %233 = tpu.matmul %230, %232, %cst_230 {dimension_numbers = #tpu.dot_dimension_numbers<[1], [0], [0], [1], [0, 0, 1, 1], [], []>} : vector<256x48xbf16>, vector<48x64xbf16>, vector<256x64xf32> -> vector<256x64xf32>
    %234 = arith.addf %227, %233 : vector<256x64xf32>
    %c0_231 = arith.constant 0 : index
    %c0_232 = arith.constant 0 : index
    %235 = vector.load %arg7[%c0_231, %c0_232] : memref<1x64xf32, #tpu.memory_space<vmem>>, vector<1x64xf32>
    %236 = vector.shape_cast %235 : vector<1x64xf32> to vector<64xf32>
    %237 = vector.shape_cast %236 : vector<64xf32> to vector<1x64xf32>
    %238 = vector.broadcast %237 : vector<1x64xf32> to vector<256x64xf32>
    %239 = arith.addf %234, %238 : vector<256x64xf32>
    %cst_233 = arith.constant 0.000000e+00 : f32
    %240 = vector.broadcast %cst_233 : f32 to vector<256x64xf32>
    %241 = arith.maximumf %239, %240 : vector<256x64xf32>
    %cst_234 = arith.constant 0.000000e+00 : f32
    %242 = vector.broadcast %cst_234 : f32 to vector<256x96xf32>
    %c0_235 = arith.constant 0 : index
    %c0_236 = arith.constant 0 : index
    %c0_237 = arith.constant 0 : index
    %243 = vector.load %arg17[%c0_235, %c0_236, %c0_237] : memref<18x18x64xf32, #tpu.memory_space<vmem>>, vector<16x16x64xf32>
    %244 = vector.shape_cast %243 : vector<16x16x64xf32> to vector<256x64xf32>
    %245 = arith.truncf %244 : vector<256x64xf32> to vector<256x64xbf16>
    %c0_238 = arith.constant 0 : index
    %c0_239 = arith.constant 0 : index
    %c0_240 = arith.constant 0 : index
    %246 = vector.load %arg8[%c0_238, %c0_239, %c0_240] : memref<9x64x96xbf16, #tpu.memory_space<vmem>>, vector<1x64x96xbf16>
    %247 = vector.shape_cast %246 : vector<1x64x96xbf16> to vector<64x96xbf16>
    %cst_241 = arith.constant dense<0.000000e+00> : vector<256x96xf32>
    %248 = tpu.matmul %245, %247, %cst_241 {dimension_numbers = #tpu.dot_dimension_numbers<[1], [0], [0], [1], [0, 0, 1, 1], [], []>} : vector<256x64xbf16>, vector<64x96xbf16>, vector<256x96xf32> -> vector<256x96xf32>
    %249 = arith.addf %242, %248 : vector<256x96xf32>
    %c0_242 = arith.constant 0 : index
    %c1_243 = arith.constant 1 : index
    %c0_244 = arith.constant 0 : index
    %250 = vector.load %arg17[%c0_242, %c1_243, %c0_244] : memref<18x18x64xf32, #tpu.memory_space<vmem>>, vector<16x16x64xf32>
    %251 = vector.shape_cast %250 : vector<16x16x64xf32> to vector<256x64xf32>
    %252 = arith.truncf %251 : vector<256x64xf32> to vector<256x64xbf16>
    %c1_245 = arith.constant 1 : index
    %c0_246 = arith.constant 0 : index
    %c0_247 = arith.constant 0 : index
    %253 = vector.load %arg8[%c1_245, %c0_246, %c0_247] : memref<9x64x96xbf16, #tpu.memory_space<vmem>>, vector<1x64x96xbf16>
    %254 = vector.shape_cast %253 : vector<1x64x96xbf16> to vector<64x96xbf16>
    %cst_248 = arith.constant dense<0.000000e+00> : vector<256x96xf32>
    %255 = tpu.matmul %252, %254, %cst_248 {dimension_numbers = #tpu.dot_dimension_numbers<[1], [0], [0], [1], [0, 0, 1, 1], [], []>} : vector<256x64xbf16>, vector<64x96xbf16>, vector<256x96xf32> -> vector<256x96xf32>
    %256 = arith.addf %249, %255 : vector<256x96xf32>
    %c0_249 = arith.constant 0 : index
    %c2_250 = arith.constant 2 : index
    %c0_251 = arith.constant 0 : index
    %257 = vector.load %arg17[%c0_249, %c2_250, %c0_251] : memref<18x18x64xf32, #tpu.memory_space<vmem>>, vector<16x16x64xf32>
    %258 = vector.shape_cast %257 : vector<16x16x64xf32> to vector<256x64xf32>
    %259 = arith.truncf %258 : vector<256x64xf32> to vector<256x64xbf16>
    %c2_252 = arith.constant 2 : index
    %c0_253 = arith.constant 0 : index
    %c0_254 = arith.constant 0 : index
    %260 = vector.load %arg8[%c2_252, %c0_253, %c0_254] : memref<9x64x96xbf16, #tpu.memory_space<vmem>>, vector<1x64x96xbf16>
    %261 = vector.shape_cast %260 : vector<1x64x96xbf16> to vector<64x96xbf16>
    %cst_255 = arith.constant dense<0.000000e+00> : vector<256x96xf32>
    %262 = tpu.matmul %259, %261, %cst_255 {dimension_numbers = #tpu.dot_dimension_numbers<[1], [0], [0], [1], [0, 0, 1, 1], [], []>} : vector<256x64xbf16>, vector<64x96xbf16>, vector<256x96xf32> -> vector<256x96xf32>
    %263 = arith.addf %256, %262 : vector<256x96xf32>
    %c1_256 = arith.constant 1 : index
    %c0_257 = arith.constant 0 : index
    %c0_258 = arith.constant 0 : index
    %264 = vector.load %arg17[%c1_256, %c0_257, %c0_258] : memref<18x18x64xf32, #tpu.memory_space<vmem>>, vector<16x16x64xf32>
    %265 = vector.shape_cast %264 : vector<16x16x64xf32> to vector<256x64xf32>
    %266 = arith.truncf %265 : vector<256x64xf32> to vector<256x64xbf16>
    %c3_259 = arith.constant 3 : index
    %c0_260 = arith.constant 0 : index
    %c0_261 = arith.constant 0 : index
    %267 = vector.load %arg8[%c3_259, %c0_260, %c0_261] : memref<9x64x96xbf16, #tpu.memory_space<vmem>>, vector<1x64x96xbf16>
    %268 = vector.shape_cast %267 : vector<1x64x96xbf16> to vector<64x96xbf16>
    %cst_262 = arith.constant dense<0.000000e+00> : vector<256x96xf32>
    %269 = tpu.matmul %266, %268, %cst_262 {dimension_numbers = #tpu.dot_dimension_numbers<[1], [0], [0], [1], [0, 0, 1, 1], [], []>} : vector<256x64xbf16>, vector<64x96xbf16>, vector<256x96xf32> -> vector<256x96xf32>
    %270 = arith.addf %263, %269 : vector<256x96xf32>
    %c1_263 = arith.constant 1 : index
    %c1_264 = arith.constant 1 : index
    %c0_265 = arith.constant 0 : index
    %271 = vector.load %arg17[%c1_263, %c1_264, %c0_265] : memref<18x18x64xf32, #tpu.memory_space<vmem>>, vector<16x16x64xf32>
    %272 = vector.shape_cast %271 : vector<16x16x64xf32> to vector<256x64xf32>
    %273 = arith.truncf %272 : vector<256x64xf32> to vector<256x64xbf16>
    %c4_266 = arith.constant 4 : index
    %c0_267 = arith.constant 0 : index
    %c0_268 = arith.constant 0 : index
    %274 = vector.load %arg8[%c4_266, %c0_267, %c0_268] : memref<9x64x96xbf16, #tpu.memory_space<vmem>>, vector<1x64x96xbf16>
    %275 = vector.shape_cast %274 : vector<1x64x96xbf16> to vector<64x96xbf16>
    %cst_269 = arith.constant dense<0.000000e+00> : vector<256x96xf32>
    %276 = tpu.matmul %273, %275, %cst_269 {dimension_numbers = #tpu.dot_dimension_numbers<[1], [0], [0], [1], [0, 0, 1, 1], [], []>} : vector<256x64xbf16>, vector<64x96xbf16>, vector<256x96xf32> -> vector<256x96xf32>
    %277 = arith.addf %270, %276 : vector<256x96xf32>
    %c1_270 = arith.constant 1 : index
    %c2_271 = arith.constant 2 : index
    %c0_272 = arith.constant 0 : index
    %278 = vector.load %arg17[%c1_270, %c2_271, %c0_272] : memref<18x18x64xf32, #tpu.memory_space<vmem>>, vector<16x16x64xf32>
    %279 = vector.shape_cast %278 : vector<16x16x64xf32> to vector<256x64xf32>
    %280 = arith.truncf %279 : vector<256x64xf32> to vector<256x64xbf16>
    %c5_273 = arith.constant 5 : index
    %c0_274 = arith.constant 0 : index
    %c0_275 = arith.constant 0 : index
    %281 = vector.load %arg8[%c5_273, %c0_274, %c0_275] : memref<9x64x96xbf16, #tpu.memory_space<vmem>>, vector<1x64x96xbf16>
    %282 = vector.shape_cast %281 : vector<1x64x96xbf16> to vector<64x96xbf16>
    %cst_276 = arith.constant dense<0.000000e+00> : vector<256x96xf32>
    %283 = tpu.matmul %280, %282, %cst_276 {dimension_numbers = #tpu.dot_dimension_numbers<[1], [0], [0], [1], [0, 0, 1, 1], [], []>} : vector<256x64xbf16>, vector<64x96xbf16>, vector<256x96xf32> -> vector<256x96xf32>
    %284 = arith.addf %277, %283 : vector<256x96xf32>
    %c2_277 = arith.constant 2 : index
    %c0_278 = arith.constant 0 : index
    %c0_279 = arith.constant 0 : index
    %285 = vector.load %arg17[%c2_277, %c0_278, %c0_279] : memref<18x18x64xf32, #tpu.memory_space<vmem>>, vector<16x16x64xf32>
    %286 = vector.shape_cast %285 : vector<16x16x64xf32> to vector<256x64xf32>
    %287 = arith.truncf %286 : vector<256x64xf32> to vector<256x64xbf16>
    %c6_280 = arith.constant 6 : index
    %c0_281 = arith.constant 0 : index
    %c0_282 = arith.constant 0 : index
    %288 = vector.load %arg8[%c6_280, %c0_281, %c0_282] : memref<9x64x96xbf16, #tpu.memory_space<vmem>>, vector<1x64x96xbf16>
    %289 = vector.shape_cast %288 : vector<1x64x96xbf16> to vector<64x96xbf16>
    %cst_283 = arith.constant dense<0.000000e+00> : vector<256x96xf32>
    %290 = tpu.matmul %287, %289, %cst_283 {dimension_numbers = #tpu.dot_dimension_numbers<[1], [0], [0], [1], [0, 0, 1, 1], [], []>} : vector<256x64xbf16>, vector<64x96xbf16>, vector<256x96xf32> -> vector<256x96xf32>
    %291 = arith.addf %284, %290 : vector<256x96xf32>
    %c2_284 = arith.constant 2 : index
    %c1_285 = arith.constant 1 : index
    %c0_286 = arith.constant 0 : index
    %292 = vector.load %arg17[%c2_284, %c1_285, %c0_286] : memref<18x18x64xf32, #tpu.memory_space<vmem>>, vector<16x16x64xf32>
    %293 = vector.shape_cast %292 : vector<16x16x64xf32> to vector<256x64xf32>
    %294 = arith.truncf %293 : vector<256x64xf32> to vector<256x64xbf16>
    %c7_287 = arith.constant 7 : index
    %c0_288 = arith.constant 0 : index
    %c0_289 = arith.constant 0 : index
    %295 = vector.load %arg8[%c7_287, %c0_288, %c0_289] : memref<9x64x96xbf16, #tpu.memory_space<vmem>>, vector<1x64x96xbf16>
    %296 = vector.shape_cast %295 : vector<1x64x96xbf16> to vector<64x96xbf16>
    %cst_290 = arith.constant dense<0.000000e+00> : vector<256x96xf32>
    %297 = tpu.matmul %294, %296, %cst_290 {dimension_numbers = #tpu.dot_dimension_numbers<[1], [0], [0], [1], [0, 0, 1, 1], [], []>} : vector<256x64xbf16>, vector<64x96xbf16>, vector<256x96xf32> -> vector<256x96xf32>
    %298 = arith.addf %291, %297 : vector<256x96xf32>
    %c2_291 = arith.constant 2 : index
    %c2_292 = arith.constant 2 : index
    %c0_293 = arith.constant 0 : index
    %299 = vector.load %arg17[%c2_291, %c2_292, %c0_293] : memref<18x18x64xf32, #tpu.memory_space<vmem>>, vector<16x16x64xf32>
    %300 = vector.shape_cast %299 : vector<16x16x64xf32> to vector<256x64xf32>
    %301 = arith.truncf %300 : vector<256x64xf32> to vector<256x64xbf16>
    %c8_294 = arith.constant 8 : index
    %c0_295 = arith.constant 0 : index
    %c0_296 = arith.constant 0 : index
    %302 = vector.load %arg8[%c8_294, %c0_295, %c0_296] : memref<9x64x96xbf16, #tpu.memory_space<vmem>>, vector<1x64x96xbf16>
    %303 = vector.shape_cast %302 : vector<1x64x96xbf16> to vector<64x96xbf16>
    %cst_297 = arith.constant dense<0.000000e+00> : vector<256x96xf32>
    %304 = tpu.matmul %301, %303, %cst_297 {dimension_numbers = #tpu.dot_dimension_numbers<[1], [0], [0], [1], [0, 0, 1, 1], [], []>} : vector<256x64xbf16>, vector<64x96xbf16>, vector<256x96xf32> -> vector<256x96xf32>
    %305 = arith.addf %298, %304 : vector<256x96xf32>
    %c0_298 = arith.constant 0 : index
    %c0_299 = arith.constant 0 : index
    %306 = vector.load %arg9[%c0_298, %c0_299] : memref<1x96xf32, #tpu.memory_space<vmem>>, vector<1x96xf32>
    %307 = vector.shape_cast %306 : vector<1x96xf32> to vector<96xf32>
    %308 = vector.shape_cast %307 : vector<96xf32> to vector<1x96xf32>
    %309 = vector.broadcast %308 : vector<1x96xf32> to vector<256x96xf32>
    %310 = arith.addf %305, %309 : vector<256x96xf32>
    %cst_300 = arith.constant 0.000000e+00 : f32
    %311 = vector.broadcast %cst_300 : f32 to vector<256x96xf32>
    %312 = arith.maximumf %310, %311 : vector<256x96xf32>
    %313 = vector.shape_cast %312 : vector<256x96xf32> to vector<16x16x96xf32>
    %c1_301 = arith.constant 1 : index
    %c1_302 = arith.constant 1 : index
    %c0_303 = arith.constant 0 : index
    %314 = vector.load %arg18[%c1_301, %c1_302, %c0_303] : memref<18x18x96xf32, #tpu.memory_space<vmem>>, vector<16x16x96xf32>
    tpu.vector_store %arg18[%c1_301, %c1_302, %c0_303], %313 {strides = array<i32>} : memref<18x18x96xf32, #tpu.memory_space<vmem>>, vector<16x16x96xf32>,
    %cst_304 = arith.constant 0.000000e+00 : f32
    %315 = vector.broadcast %cst_304 : f32 to vector<256x96xf32>
    %c0_305 = arith.constant 0 : index
    %c0_306 = arith.constant 0 : index
    %c0_307 = arith.constant 0 : index
    %316 = vector.load %arg18[%c0_305, %c0_306, %c0_307] : memref<18x18x96xf32, #tpu.memory_space<vmem>>, vector<16x16x96xf32>
    %317 = vector.shape_cast %316 : vector<16x16x96xf32> to vector<256x96xf32>
    %318 = arith.truncf %317 : vector<256x96xf32> to vector<256x96xbf16>
    %c0_308 = arith.constant 0 : index
    %c0_309 = arith.constant 0 : index
    %c0_310 = arith.constant 0 : index
    %319 = vector.load %arg10[%c0_308, %c0_309, %c0_310] : memref<9x96x96xbf16, #tpu.memory_space<vmem>>, vector<1x96x96xbf16>
    %320 = vector.shape_cast %319 : vector<1x96x96xbf16> to vector<96x96xbf16>
    %cst_311 = arith.constant dense<0.000000e+00> : vector<256x96xf32>
    %321 = tpu.matmul %318, %320, %cst_311 {dimension_numbers = #tpu.dot_dimension_numbers<[1], [0], [0], [1], [0, 0, 1, 1], [], []>} : vector<256x96xbf16>, vector<96x96xbf16>, vector<256x96xf32> -> vector<256x96xf32>
    %322 = arith.addf %315, %321 : vector<256x96xf32>
    %c0_312 = arith.constant 0 : index
    %c1_313 = arith.constant 1 : index
    %c0_314 = arith.constant 0 : index
    %323 = vector.load %arg18[%c0_312, %c1_313, %c0_314] : memref<18x18x96xf32, #tpu.memory_space<vmem>>, vector<16x16x96xf32>
    %324 = vector.shape_cast %323 : vector<16x16x96xf32> to vector<256x96xf32>
    %325 = arith.truncf %324 : vector<256x96xf32> to vector<256x96xbf16>
    %c1_315 = arith.constant 1 : index
    %c0_316 = arith.constant 0 : index
    %c0_317 = arith.constant 0 : index
    %326 = vector.load %arg10[%c1_315, %c0_316, %c0_317] : memref<9x96x96xbf16, #tpu.memory_space<vmem>>, vector<1x96x96xbf16>
    %327 = vector.shape_cast %326 : vector<1x96x96xbf16> to vector<96x96xbf16>
    %cst_318 = arith.constant dense<0.000000e+00> : vector<256x96xf32>
    %328 = tpu.matmul %325, %327, %cst_318 {dimension_numbers = #tpu.dot_dimension_numbers<[1], [0], [0], [1], [0, 0, 1, 1], [], []>} : vector<256x96xbf16>, vector<96x96xbf16>, vector<256x96xf32> -> vector<256x96xf32>
    %329 = arith.addf %322, %328 : vector<256x96xf32>
    %c0_319 = arith.constant 0 : index
    %c2_320 = arith.constant 2 : index
    %c0_321 = arith.constant 0 : index
    %330 = vector.load %arg18[%c0_319, %c2_320, %c0_321] : memref<18x18x96xf32, #tpu.memory_space<vmem>>, vector<16x16x96xf32>
    %331 = vector.shape_cast %330 : vector<16x16x96xf32> to vector<256x96xf32>
    %332 = arith.truncf %331 : vector<256x96xf32> to vector<256x96xbf16>
    %c2_322 = arith.constant 2 : index
    %c0_323 = arith.constant 0 : index
    %c0_324 = arith.constant 0 : index
    %333 = vector.load %arg10[%c2_322, %c0_323, %c0_324] : memref<9x96x96xbf16, #tpu.memory_space<vmem>>, vector<1x96x96xbf16>
    %334 = vector.shape_cast %333 : vector<1x96x96xbf16> to vector<96x96xbf16>
    %cst_325 = arith.constant dense<0.000000e+00> : vector<256x96xf32>
    %335 = tpu.matmul %332, %334, %cst_325 {dimension_numbers = #tpu.dot_dimension_numbers<[1], [0], [0], [1], [0, 0, 1, 1], [], []>} : vector<256x96xbf16>, vector<96x96xbf16>, vector<256x96xf32> -> vector<256x96xf32>
    %336 = arith.addf %329, %335 : vector<256x96xf32>
    %c1_326 = arith.constant 1 : index
    %c0_327 = arith.constant 0 : index
    %c0_328 = arith.constant 0 : index
    %337 = vector.load %arg18[%c1_326, %c0_327, %c0_328] : memref<18x18x96xf32, #tpu.memory_space<vmem>>, vector<16x16x96xf32>
    %338 = vector.shape_cast %337 : vector<16x16x96xf32> to vector<256x96xf32>
    %339 = arith.truncf %338 : vector<256x96xf32> to vector<256x96xbf16>
    %c3_329 = arith.constant 3 : index
    %c0_330 = arith.constant 0 : index
    %c0_331 = arith.constant 0 : index
    %340 = vector.load %arg10[%c3_329, %c0_330, %c0_331] : memref<9x96x96xbf16, #tpu.memory_space<vmem>>, vector<1x96x96xbf16>
    %341 = vector.shape_cast %340 : vector<1x96x96xbf16> to vector<96x96xbf16>
    %cst_332 = arith.constant dense<0.000000e+00> : vector<256x96xf32>
    %342 = tpu.matmul %339, %341, %cst_332 {dimension_numbers = #tpu.dot_dimension_numbers<[1], [0], [0], [1], [0, 0, 1, 1], [], []>} : vector<256x96xbf16>, vector<96x96xbf16>, vector<256x96xf32> -> vector<256x96xf32>
    %343 = arith.addf %336, %342 : vector<256x96xf32>
    %c1_333 = arith.constant 1 : index
    %c1_334 = arith.constant 1 : index
    %c0_335 = arith.constant 0 : index
    %344 = vector.load %arg18[%c1_333, %c1_334, %c0_335] : memref<18x18x96xf32, #tpu.memory_space<vmem>>, vector<16x16x96xf32>
    %345 = vector.shape_cast %344 : vector<16x16x96xf32> to vector<256x96xf32>
    %346 = arith.truncf %345 : vector<256x96xf32> to vector<256x96xbf16>
    %c4_336 = arith.constant 4 : index
    %c0_337 = arith.constant 0 : index
    %c0_338 = arith.constant 0 : index
    %347 = vector.load %arg10[%c4_336, %c0_337, %c0_338] : memref<9x96x96xbf16, #tpu.memory_space<vmem>>, vector<1x96x96xbf16>
    %348 = vector.shape_cast %347 : vector<1x96x96xbf16> to vector<96x96xbf16>
    %cst_339 = arith.constant dense<0.000000e+00> : vector<256x96xf32>
    %349 = tpu.matmul %346, %348, %cst_339 {dimension_numbers = #tpu.dot_dimension_numbers<[1], [0], [0], [1], [0, 0, 1, 1], [], []>} : vector<256x96xbf16>, vector<96x96xbf16>, vector<256x96xf32> -> vector<256x96xf32>
    %350 = arith.addf %343, %349 : vector<256x96xf32>
    %c1_340 = arith.constant 1 : index
    %c2_341 = arith.constant 2 : index
    %c0_342 = arith.constant 0 : index
    %351 = vector.load %arg18[%c1_340, %c2_341, %c0_342] : memref<18x18x96xf32, #tpu.memory_space<vmem>>, vector<16x16x96xf32>
    %352 = vector.shape_cast %351 : vector<16x16x96xf32> to vector<256x96xf32>
    %353 = arith.truncf %352 : vector<256x96xf32> to vector<256x96xbf16>
    %c5_343 = arith.constant 5 : index
    %c0_344 = arith.constant 0 : index
    %c0_345 = arith.constant 0 : index
    %354 = vector.load %arg10[%c5_343, %c0_344, %c0_345] : memref<9x96x96xbf16, #tpu.memory_space<vmem>>, vector<1x96x96xbf16>
    %355 = vector.shape_cast %354 : vector<1x96x96xbf16> to vector<96x96xbf16>
    %cst_346 = arith.constant dense<0.000000e+00> : vector<256x96xf32>
    %356 = tpu.matmul %353, %355, %cst_346 {dimension_numbers = #tpu.dot_dimension_numbers<[1], [0], [0], [1], [0, 0, 1, 1], [], []>} : vector<256x96xbf16>, vector<96x96xbf16>, vector<256x96xf32> -> vector<256x96xf32>
    %357 = arith.addf %350, %356 : vector<256x96xf32>
    %c2_347 = arith.constant 2 : index
    %c0_348 = arith.constant 0 : index
    %c0_349 = arith.constant 0 : index
    %358 = vector.load %arg18[%c2_347, %c0_348, %c0_349] : memref<18x18x96xf32, #tpu.memory_space<vmem>>, vector<16x16x96xf32>
    %359 = vector.shape_cast %358 : vector<16x16x96xf32> to vector<256x96xf32>
    %360 = arith.truncf %359 : vector<256x96xf32> to vector<256x96xbf16>
    %c6_350 = arith.constant 6 : index
    %c0_351 = arith.constant 0 : index
    %c0_352 = arith.constant 0 : index
    %361 = vector.load %arg10[%c6_350, %c0_351, %c0_352] : memref<9x96x96xbf16, #tpu.memory_space<vmem>>, vector<1x96x96xbf16>
    %362 = vector.shape_cast %361 : vector<1x96x96xbf16> to vector<96x96xbf16>
    %cst_353 = arith.constant dense<0.000000e+00> : vector<256x96xf32>
    %363 = tpu.matmul %360, %362, %cst_353 {dimension_numbers = #tpu.dot_dimension_numbers<[1], [0], [0], [1], [0, 0, 1, 1], [], []>} : vector<256x96xbf16>, vector<96x96xbf16>, vector<256x96xf32> -> vector<256x96xf32>
    %364 = arith.addf %357, %363 : vector<256x96xf32>
    %c2_354 = arith.constant 2 : index
    %c1_355 = arith.constant 1 : index
    %c0_356 = arith.constant 0 : index
    %365 = vector.load %arg18[%c2_354, %c1_355, %c0_356] : memref<18x18x96xf32, #tpu.memory_space<vmem>>, vector<16x16x96xf32>
    %366 = vector.shape_cast %365 : vector<16x16x96xf32> to vector<256x96xf32>
    %367 = arith.truncf %366 : vector<256x96xf32> to vector<256x96xbf16>
    %c7_357 = arith.constant 7 : index
    %c0_358 = arith.constant 0 : index
    %c0_359 = arith.constant 0 : index
    %368 = vector.load %arg10[%c7_357, %c0_358, %c0_359] : memref<9x96x96xbf16, #tpu.memory_space<vmem>>, vector<1x96x96xbf16>
    %369 = vector.shape_cast %368 : vector<1x96x96xbf16> to vector<96x96xbf16>
    %cst_360 = arith.constant dense<0.000000e+00> : vector<256x96xf32>
    %370 = tpu.matmul %367, %369, %cst_360 {dimension_numbers = #tpu.dot_dimension_numbers<[1], [0], [0], [1], [0, 0, 1, 1], [], []>} : vector<256x96xbf16>, vector<96x96xbf16>, vector<256x96xf32> -> vector<256x96xf32>
    %371 = arith.addf %364, %370 : vector<256x96xf32>
    %c2_361 = arith.constant 2 : index
    %c2_362 = arith.constant 2 : index
    %c0_363 = arith.constant 0 : index
    %372 = vector.load %arg18[%c2_361, %c2_362, %c0_363] : memref<18x18x96xf32, #tpu.memory_space<vmem>>, vector<16x16x96xf32>
    %373 = vector.shape_cast %372 : vector<16x16x96xf32> to vector<256x96xf32>
    %374 = arith.truncf %373 : vector<256x96xf32> to vector<256x96xbf16>
    %c8_364 = arith.constant 8 : index
    %c0_365 = arith.constant 0 : index
    %c0_366 = arith.constant 0 : index
    %375 = vector.load %arg10[%c8_364, %c0_365, %c0_366] : memref<9x96x96xbf16, #tpu.memory_space<vmem>>, vector<1x96x96xbf16>
    %376 = vector.shape_cast %375 : vector<1x96x96xbf16> to vector<96x96xbf16>
    %cst_367 = arith.constant dense<0.000000e+00> : vector<256x96xf32>
    %377 = tpu.matmul %374, %376, %cst_367 {dimension_numbers = #tpu.dot_dimension_numbers<[1], [0], [0], [1], [0, 0, 1, 1], [], []>} : vector<256x96xbf16>, vector<96x96xbf16>, vector<256x96xf32> -> vector<256x96xf32>
    %378 = arith.addf %371, %377 : vector<256x96xf32>
    %c0_368 = arith.constant 0 : index
    %c0_369 = arith.constant 0 : index
    %379 = vector.load %arg11[%c0_368, %c0_369] : memref<1x96xf32, #tpu.memory_space<vmem>>, vector<1x96xf32>
    %380 = vector.shape_cast %379 : vector<1x96xf32> to vector<96xf32>
    %381 = vector.shape_cast %380 : vector<96xf32> to vector<1x96xf32>
    %382 = vector.broadcast %381 : vector<1x96xf32> to vector<256x96xf32>
    %383 = arith.addf %378, %382 : vector<256x96xf32>
    %cst_370 = arith.constant 0.000000e+00 : f32
    %384 = vector.broadcast %cst_370 : f32 to vector<256x96xf32>
    %385 = arith.maximumf %383, %384 : vector<256x96xf32>
    %cst_371 = arith.constant 0.000000e+00 : f32
    %386 = vector.broadcast %cst_371 : f32 to vector<256x4xf32>
    %c0_372 = arith.constant 0 : index
    %c0_373 = arith.constant 0 : index
    %c0_374 = arith.constant 0 : index
    %387 = vector.load %arg15[%c0_372, %c0_373, %c0_374] : memref<18x18x4xf32, #tpu.memory_space<vmem>>, vector<16x16x4xf32>
    %388 = vector.shape_cast %387 : vector<16x16x4xf32> to vector<256x4xf32>
    %389 = arith.addf %386, %388 : vector<256x4xf32>
    %c0_375 = arith.constant 0 : index
    %c1_376 = arith.constant 1 : index
    %c0_377 = arith.constant 0 : index
    %390 = vector.load %arg15[%c0_375, %c1_376, %c0_377] : memref<18x18x4xf32, #tpu.memory_space<vmem>>, vector<16x16x4xf32>
    %391 = vector.shape_cast %390 : vector<16x16x4xf32> to vector<256x4xf32>
    %392 = arith.addf %389, %391 : vector<256x4xf32>
    %c0_378 = arith.constant 0 : index
    %c2_379 = arith.constant 2 : index
    %c0_380 = arith.constant 0 : index
    %393 = vector.load %arg15[%c0_378, %c2_379, %c0_380] : memref<18x18x4xf32, #tpu.memory_space<vmem>>, vector<16x16x4xf32>
    %394 = vector.shape_cast %393 : vector<16x16x4xf32> to vector<256x4xf32>
    %395 = arith.addf %392, %394 : vector<256x4xf32>
    %c1_381 = arith.constant 1 : index
    %c0_382 = arith.constant 0 : index
    %c0_383 = arith.constant 0 : index
    %396 = vector.load %arg15[%c1_381, %c0_382, %c0_383] : memref<18x18x4xf32, #tpu.memory_space<vmem>>, vector<16x16x4xf32>
    %397 = vector.shape_cast %396 : vector<16x16x4xf32> to vector<256x4xf32>
    %398 = arith.addf %395, %397 : vector<256x4xf32>
    %c1_384 = arith.constant 1 : index
    %c1_385 = arith.constant 1 : index
    %c0_386 = arith.constant 0 : index
    %399 = vector.load %arg15[%c1_384, %c1_385, %c0_386] : memref<18x18x4xf32, #tpu.memory_space<vmem>>, vector<16x16x4xf32>
    %400 = vector.shape_cast %399 : vector<16x16x4xf32> to vector<256x4xf32>
    %401 = arith.addf %398, %400 : vector<256x4xf32>
    %c1_387 = arith.constant 1 : index
    %c2_388 = arith.constant 2 : index
    %c0_389 = arith.constant 0 : index
    %402 = vector.load %arg15[%c1_387, %c2_388, %c0_389] : memref<18x18x4xf32, #tpu.memory_space<vmem>>, vector<16x16x4xf32>
    %403 = vector.shape_cast %402 : vector<16x16x4xf32> to vector<256x4xf32>
    %404 = arith.addf %401, %403 : vector<256x4xf32>
    %c2_390 = arith.constant 2 : index
    %c0_391 = arith.constant 0 : index
    %c0_392 = arith.constant 0 : index
    %405 = vector.load %arg15[%c2_390, %c0_391, %c0_392] : memref<18x18x4xf32, #tpu.memory_space<vmem>>, vector<16x16x4xf32>
    %406 = vector.shape_cast %405 : vector<16x16x4xf32> to vector<256x4xf32>
    %407 = arith.addf %404, %406 : vector<256x4xf32>
    %c2_393 = arith.constant 2 : index
    %c1_394 = arith.constant 1 : index
    %c0_395 = arith.constant 0 : index
    %408 = vector.load %arg15[%c2_393, %c1_394, %c0_395] : memref<18x18x4xf32, #tpu.memory_space<vmem>>, vector<16x16x4xf32>
    %409 = vector.shape_cast %408 : vector<16x16x4xf32> to vector<256x4xf32>
    %410 = arith.addf %407, %409 : vector<256x4xf32>
    %c2_396 = arith.constant 2 : index
    %c2_397 = arith.constant 2 : index
    %c0_398 = arith.constant 0 : index
    %411 = vector.load %arg15[%c2_396, %c2_397, %c0_398] : memref<18x18x4xf32, #tpu.memory_space<vmem>>, vector<16x16x4xf32>
    %412 = vector.shape_cast %411 : vector<16x16x4xf32> to vector<256x4xf32>
    %413 = arith.addf %410, %412 : vector<256x4xf32>
    %cst_399 = arith.constant 0.111111112 : f32
    %414 = vector.broadcast %cst_399 : f32 to vector<256x4xf32>
    %415 = arith.mulf %413, %414 : vector<256x4xf32>
    %416 = arith.truncf %415 : vector<256x4xf32> to vector<256x4xbf16>
    %c0_400 = arith.constant 0 : index
    %c0_401 = arith.constant 0 : index
    %417 = vector.load %arg12[%c0_400, %c0_401] : memref<4x32xbf16, #tpu.memory_space<vmem>>, vector<4x32xbf16>
    %cst_402 = arith.constant dense<0.000000e+00> : vector<256x32xf32>
    %418 = tpu.matmul %416, %417, %cst_402 {dimension_numbers = #tpu.dot_dimension_numbers<[1], [0], [0], [1], [0, 0, 1, 1], [], []>} : vector<256x4xbf16>, vector<4x32xbf16>, vector<256x32xf32> -> vector<256x32xf32>
    %c0_403 = arith.constant 0 : index
    %c0_404 = arith.constant 0 : index
    %419 = vector.load %arg13[%c0_403, %c0_404] : memref<1x32xf32, #tpu.memory_space<vmem>>, vector<1x32xf32>
    %420 = vector.shape_cast %419 : vector<1x32xf32> to vector<32xf32>
    %421 = vector.shape_cast %420 : vector<32xf32> to vector<1x32xf32>
    %422 = vector.broadcast %421 : vector<1x32xf32> to vector<256x32xf32>
    %423 = arith.addf %418, %422 : vector<256x32xf32>
    %cst_405 = arith.constant 0.000000e+00 : f32
    %424 = vector.broadcast %cst_405 : f32 to vector<256x32xf32>
    %425 = arith.maximumf %423, %424 : vector<256x32xf32>
    %426 = vector.shape_cast %38 : vector<256x64xf32> to vector<16x16x64xf32>
    %c0_406 = arith.constant 0 : index
    %c0_407 = arith.constant 0 : index
    %c0_408 = arith.constant 0 : index
    %c0_409 = arith.constant 0 : index
    %427 = vector.load %arg14[%c0_406, %c0_407, %c0_408, %c0_409] : memref<1x16x16x256xf32, #tpu.memory_space<vmem>>, vector<1x16x16x64xf32>
    %428 = vector.shape_cast %427 : vector<1x16x16x64xf32> to vector<16x16x64xf32>
    %429 = vector.shape_cast %426 : vector<16x16x64xf32> to vector<1x16x16x64xf32>
    tpu.vector_store %arg14[%c0_406, %c0_407, %c0_408, %c0_409], %429 {strides = array<i32>} : memref<1x16x16x256xf32, #tpu.memory_space<vmem>>, vector<1x16x16x64xf32>,
    %430 = vector.shape_cast %241 : vector<256x64xf32> to vector<16x16x64xf32>
    %c0_410 = arith.constant 0 : index
    %c0_411 = arith.constant 0 : index
    %c0_412 = arith.constant 0 : index
    %c64 = arith.constant 64 : index
    %431 = vector.load %arg14[%c0_410, %c0_411, %c0_412, %c64] : memref<1x16x16x256xf32, #tpu.memory_space<vmem>>, vector<1x16x16x64xf32>
    %432 = vector.shape_cast %431 : vector<1x16x16x64xf32> to vector<16x16x64xf32>
    %433 = vector.shape_cast %430 : vector<16x16x64xf32> to vector<1x16x16x64xf32>
    tpu.vector_store %arg14[%c0_410, %c0_411, %c0_412, %c64], %433 {strides = array<i32>} : memref<1x16x16x256xf32, #tpu.memory_space<vmem>>, vector<1x16x16x64xf32>,
    %434 = vector.shape_cast %385 : vector<256x96xf32> to vector<16x16x96xf32>
    %c0_413 = arith.constant 0 : index
    %c0_414 = arith.constant 0 : index
    %c0_415 = arith.constant 0 : index
    %c128 = arith.constant 128 : index
    %435 = vector.load %arg14[%c0_413, %c0_414, %c0_415, %c128] : memref<1x16x16x256xf32, #tpu.memory_space<vmem>>, vector<1x16x16x96xf32>
    %436 = vector.shape_cast %435 : vector<1x16x16x96xf32> to vector<16x16x96xf32>
    %437 = vector.shape_cast %434 : vector<16x16x96xf32> to vector<1x16x16x96xf32>
    tpu.vector_store %arg14[%c0_413, %c0_414, %c0_415, %c128], %437 {strides = array<i32>} : memref<1x16x16x256xf32, #tpu.memory_space<vmem>>, vector<1x16x16x96xf32>,
    %438 = vector.shape_cast %425 : vector<256x32xf32> to vector<16x16x32xf32>
    %c0_416 = arith.constant 0 : index
    %c0_417 = arith.constant 0 : index
    %c0_418 = arith.constant 0 : index
    %c224 = arith.constant 224 : index
    %439 = vector.load %arg14[%c0_416, %c0_417, %c0_418, %c224] : memref<1x16x16x256xf32, #tpu.memory_space<vmem>>, vector<1x16x16x32xf32>
    %440 = vector.shape_cast %439 : vector<1x16x16x32xf32> to vector<16x16x32xf32>
    %441 = vector.shape_cast %438 : vector<16x16x32xf32> to vector<1x16x16x32xf32>
    tpu.vector_store %arg14[%c0_416, %c0_417, %c0_418, %c224], %441 {strides = array<i32>} : memref<1x16x16x256xf32, #tpu.memory_space<vmem>>, vector<1x16x16x32xf32>,
    return
  }
  func.func @transform_0(%arg0: i32) -> (i32, i32, i32, i32) {
    %c0_i32 = arith.constant 0 : i32
    %c0_i32_0 = arith.constant 0 : i32
    %c0_i32_1 = arith.constant 0 : i32
    %c0_i32_2 = arith.constant 0 : i32
    return %arg0, %c0_i32, %c0_i32_0, %c0_i32_1 : i32, i32, i32, i32
  }
  func.func @transform_1(%arg0: i32) -> (i32, i32) {
    %c0_i32 = arith.constant 0 : i32
    %c0_i32_0 = arith.constant 0 : i32
    %c0_i32_1 = arith.constant 0 : i32
    return %c0_i32, %c0_i32_0 : i32, i32
  }
  func.func @transform_2(%arg0: i32) -> (i32, i32) {
    %c0_i32 = arith.constant 0 : i32
    %c0_i32_0 = arith.constant 0 : i32
    %c0_i32_1 = arith.constant 0 : i32
    return %c0_i32, %c0_i32_0 : i32, i32
  }
  func.func @transform_3(%arg0: i32) -> (i32, i32) {
    %c0_i32 = arith.constant 0 : i32
    %c0_i32_0 = arith.constant 0 : i32
    %c0_i32_1 = arith.constant 0 : i32
    return %c0_i32, %c0_i32_0 : i32, i32
  }
  func.func @transform_4(%arg0: i32) -> (i32, i32) {
    %c0_i32 = arith.constant 0 : i32
    %c0_i32_0 = arith.constant 0 : i32
    %c0_i32_1 = arith.constant 0 : i32
    return %c0_i32, %c0_i32_0 : i32, i32
  }
  func.func @transform_5(%arg0: i32) -> (i32, i32, i32) {
    %c0_i32 = arith.constant 0 : i32
    %c0_i32_0 = arith.constant 0 : i32
    %c0_i32_1 = arith.constant 0 : i32
    %c0_i32_2 = arith.constant 0 : i32
    return %c0_i32, %c0_i32_0, %c0_i32_1 : i32, i32, i32
  }
  func.func @transform_6(%arg0: i32) -> (i32, i32) {
    %c0_i32 = arith.constant 0 : i32
    %c0_i32_0 = arith.constant 0 : i32
    %c0_i32_1 = arith.constant 0 : i32
    return %c0_i32, %c0_i32_0 : i32, i32
  }
  func.func @transform_7(%arg0: i32) -> (i32, i32, i32) {
    %c0_i32 = arith.constant 0 : i32
    %c0_i32_0 = arith.constant 0 : i32
    %c0_i32_1 = arith.constant 0 : i32
    %c0_i32_2 = arith.constant 0 : i32
    return %c0_i32, %c0_i32_0, %c0_i32_1 : i32, i32, i32
  }
  func.func @transform_8(%arg0: i32) -> (i32, i32) {
    %c0_i32 = arith.constant 0 : i32
    %c0_i32_0 = arith.constant 0 : i32
    %c0_i32_1 = arith.constant 0 : i32
    return %c0_i32, %c0_i32_0 : i32, i32
  }
  func.func @transform_9(%arg0: i32) -> (i32, i32, i32) {
    %c0_i32 = arith.constant 0 : i32
    %c0_i32_0 = arith.constant 0 : i32
    %c0_i32_1 = arith.constant 0 : i32
    %c0_i32_2 = arith.constant 0 : i32
    return %c0_i32, %c0_i32_0, %c0_i32_1 : i32, i32, i32
  }
  func.func @transform_10(%arg0: i32) -> (i32, i32) {
    %c0_i32 = arith.constant 0 : i32
    %c0_i32_0 = arith.constant 0 : i32
    %c0_i32_1 = arith.constant 0 : i32
    return %c0_i32, %c0_i32_0 : i32, i32
  }
  func.func @transform_11(%arg0: i32) -> (i32, i32) {
    %c0_i32 = arith.constant 0 : i32
    %c0_i32_0 = arith.constant 0 : i32
    %c0_i32_1 = arith.constant 0 : i32
    return %c0_i32, %c0_i32_0 : i32, i32
  }
  func.func @transform_12(%arg0: i32) -> (i32, i32) {
    %c0_i32 = arith.constant 0 : i32
    %c0_i32_0 = arith.constant 0 : i32
    %c0_i32_1 = arith.constant 0 : i32
    return %c0_i32, %c0_i32_0 : i32, i32
  }
  func.func @transform_13(%arg0: i32) -> (i32, i32, i32, i32) {
    %c0_i32 = arith.constant 0 : i32
    %c0_i32_0 = arith.constant 0 : i32
    %c0_i32_1 = arith.constant 0 : i32
    %c0_i32_2 = arith.constant 0 : i32
    return %arg0, %c0_i32, %c0_i32_0, %c0_i32_1 : i32, i32, i32, i32
  }
}

</mosaic_0001>

<bundles_post_ra>
// kernel: tpu_custom_call.1
= control target key start
LH: loop header
LB: loop body
LE: loop exit
PB: predicated region body
PF: predicated region fallthrough
CT: control target
= control target key end

     0   :  { %s25760_s0 = inlined_call_operand.vmem [shape: f32[2,16,16,4], index: 0, kind: input, shape index: {}]   ;;  %s25761_s1 = inlined_call_operand.vmem [shape: bf16[4,384], index: 1, kind: input, shape index: {}]   ;;  %s25762_s2 = inlined_call_operand.vmem [shape: f32[1,64], index: 2, kind: input, shape index: {}]   ;;  %s25763_s3 = inlined_call_operand.vmem [shape: f32[1,48], index: 3, kind: input, shape index: {}]   ;;  %s25764_s4 = inlined_call_operand.vmem [shape: f32[1,64], index: 4, kind: input, shape index: {}]   ;;  %s25765_s5 = inlined_call_operand.vmem [shape: bf16[25,48,64], index: 5, kind: input, shape index: {}]   ;;  %s25766_s6 = inlined_call_operand.vmem [shape: f32[1,64], index: 6, kind: input, shape index: {}]   ;;  %s25767_s7 = inlined_call_operand.hbm [shape: bf16[9,64,96], index: 7, kind: input, shape index: {}]   ;;  %s25768_s8 = inlined_call_operand.vmem [shape: f32[1,96], index: 8, kind: input, shape index: {}]   ;;  %s25769_s9 = inlined_call_operand.hbm [shape: bf16[9,96,96], index: 9, kind: input, shape index: {}]   ;;  %s25770_s10 = inlined_call_operand.vmem [shape: f32[1,96], index: 10, kind: input, shape index: {}]   ;;  %s25771_s11 = inlined_call_operand.vmem [shape: bf16[4,32], index: 11, kind: input, shape index: {}]   ;;  %s25772_s12 = inlined_call_operand.vmem [shape: f32[1,32], index: 12, kind: input, shape index: {}]   ;;  %s25773_s13 = inlined_call_operand.hbm [shape: f32[2,16,16,256], index: 13, kind: output, shape index: {}]  }
   0x1   :  { %25793 = sst [smem:[#allocation60_spill]] %s25773_s13 }
   0x2   :  { %18 = vsyncpa [#allocation7], 0 }
   0x3   :  { %19 = vsyncpa [#allocation10], 0 }
   0x4   :  { %20 = vsyncpa [#allocation8], 0 }
   0x5   :  { %22 = vsyncpa [#allocation8 + $0x1], 0  ;;  %s22123_s25 = smov 0   ;;  %s22125_s26 = smov 0  }
   0x6   :  { %s22127_s27 = smov 0   ;;  %s22129_s28 = smov 0  }
   0x7 LB: > { %25794 = sst [smem:[#allocation15_spill]] %s22027_s25  ;;  %s22144_s29 = sadd.s32 4294967295, %s22039_s28   ;;  %s22039_s28 = sphi %s22129_s28, %s25909_s28   ;;  %s22035_s27 = sphi %s22127_s27, %s25911_s27   ;;  %s22031_s26 = sphi %s22125_s26, %s25913_s26   ;;  %s22027_s25 = sphi %s22123_s25, %s25912_s25  }
   0x8   : > { %25795 = sst [smem:[#allocation16_spill]] %s22035_s27  ;;  %s16661_s30 = sadd.s32 4294967294, %s22039_s28  }
   0x9   : > { %25796 = sst [smem:[#allocation17_spill]] %s22039_s28  ;;  %s22148_s14 = sadd.s32 1, %s22039_s28  }
   0xa   : > { %25797 = sst [smem:[#allocation18_spill]] %s22148_s14  ;;  %s313_s15 = sadd.s32 1, %s22035_s27 }
   0xb   : > { %s310_s16 = ssub.s32 %s22039_s28, %s22148_s14  ;;  %p323_p0 = scmp.ne.s32.totalorder %s22035_s27, %s22031_s26 }
   0xc   : > { %p311_p1 = scmp.eq.s32.totalorder %s310_s16, 0  ;;  %p324_p2 = scmp.eq.s32.totalorder %s22144_s29, 1 }
   0xd   : > { %p329_p3 = scmp.ne.s32.totalorder %s22031_s26, %s22027_s25  ;;  %p330_p4 = scmp.eq.s32.totalorder %s16661_s30, 1 }
   0xe   : > { %s22159_s17 = scalar_select %p311_p1, %s22035_s27, %s313_s15  }
   0xf   : > { %p22161_p5 = por %p324_p2, %p323_p0  ;;  %p22165_p6 = por %p330_p4, %p329_p3 }
  0x10   : > { %25798 = sst [smem:[#allocation19_spill]] %s22159_s17  ;;  %p16662_p7 = scmp.ge.s32.totalorder %s22039_s28, 1 }
  0x11   : > { %s25799_s18 = scalar_select %p22161_p5, 1, 0 }
  0x12   : > { %s25800_s19 = scalar_select %p22165_p6, 1, 0 }
  0x13   : > { %p337_p8 = scmp.lt.s32.totalorder %s22039_s28, 3  ;;  %p25778_p9 = scmp.eq.s32.totalorder %s22144_s29, 0 }
  0x14   : > { %25801 = sst [smem:[#allocation20_spill]] %s25800_s19  ;;  %s22041_s21 = smov [#allocation6]  }
  0x15   : > { %p22172_p10 = pnand %p16662_p7, %p337_p8  ;;  %s367_s22 = sshll.u32 %s22041_s21, 4  ;;  %s368_s22 = int_to_ptr.vmem [resolvable:$true] %s367_s22 }
  0x16   : > { %s22042_s24 = smov [#allocation9]   ;;  %s21913_s17 = scalar_lea.hbm %s25767_s7, 4608 }
  0x17   : > { %s25802_s20 = scalar_select %p22172_p10, 1, 0 }
  0x18   : > { %p21688_p11 = pneg %p22172_p10  ;;  %s383_s30 = sshll.u32 %s22042_s24, 4  ;;  %s22184_s30 = int_to_ptr.vmem [resolvable:$true] %s383_s30 }
  0x19   : > { %p21914_p13 = scmp.ne.s32.totalorder %s25767_s7, %s21913_s17  ;;  %p21920_p3 = scmp.lt.u32.totalorder %s21913_s17, %s25767_s7 }
  0x1a   : > { %p22180_p12 = pnand %p25778_p9, %p21688_p11 }
  0x1c   : > { %p21915_p0 = pneg %p22180_p12 }
  0x1e   : > { %p21916_p1 = pnand %p21915_p0, %p21914_p13 }
  0x20   : > { %p21917_p2 = pneg %p21916_p1 }
  0x22   : > { %p21922_p4 = pnand %p21920_p3, %p21917_p2 }
  0x24   : > { %21925 = shalt.err (!%p21922_p4)
}
  0x25   : > { %s21926_s24 = scalar_lea.vmem %s368_s22, 4608  ;;  %p21934_p9 = scmp.lt.s32.totalorder %s368_s22, %s368_s22 }
  0x26   : > { %p21927_p7 = scmp.ne.s32.totalorder %s368_s22, %s21926_s24  ;;  %p21935_p6 = scmp.lt.s32.totalorder %s21926_s24, %s21926_s24 }
  0x28   : > { %p21929_p8 = pnand %p21927_p7, %p21915_p0  ;;  %p21936_p5 = por %p21935_p6, %p21934_p9 }
  0x2a   : > { %p21930_p11 = pneg %p21929_p8 }
  0x2c   : > { %p21937_p10 = pnand %p21936_p5, %p21930_p11 }
  0x2e   : > { %21940 = shalt.err (!%p21937_p10)
}
  0x2f   : > { %s22043_s27 = smov 64   ;;  %s22044_s15 = smov 4  }
  0x30   : > { %21691 = dma.hbm_to_vmem [thread:$0]  (!%p22180_p12), %s25767_s7, 4608, %s368_s22, [#allocation7], %s22043_s27, %s22043_s27, %s22044_s15  }
  0x31   : > { %s21941_s21 = scalar_lea.hbm %s25769_s9, 6912 }
  0x32   : > { %p21942_p13 = scmp.ne.s32.totalorder %s25769_s9, %s21941_s21  ;;  %p21948_p9 = scmp.lt.u32.totalorder %s21941_s21, %s25769_s9 }
  0x34   : > { %p21944_p5 = pnand %p21942_p13, %p21915_p0 }
  0x36   : > { %p21945_p6 = pneg %p21944_p5 }
  0x38   : > { %p21950_p10 = pnand %p21948_p9, %p21945_p6 }
  0x3a   : > { %21953 = shalt.err (!%p21950_p10)
}
  0x3b   : > { %s21954_s22 = scalar_lea.vmem %s22184_s30, 6912  ;;  %p21962_p4 = scmp.lt.s32.totalorder %s22184_s30, %s22184_s30 }
  0x3c   : > { %p21955_p1 = scmp.ne.s32.totalorder %s22184_s30, %s21954_s22  ;;  %p21963_p7 = scmp.lt.s32.totalorder %s21954_s22, %s21954_s22 }
  0x3e   : > { %p21957_p2 = pnand %p21955_p1, %p21915_p0  ;;  %p21964_p8 = por %p21963_p7, %p21962_p4 }
  0x40   : > { %p21958_p3 = pneg %p21957_p2 }
  0x42   : > { %p21965_p11 = pnand %p21964_p8, %p21958_p3 }
  0x44   : > { %21968 = shalt.err (!%p21965_p11)
}
  0x45   : > { %21694 = dma.hbm_to_vmem [thread:$0]  (!%p22180_p12), %s25769_s9, 6912, %s22184_s30, [#allocation10], %s22043_s27, %s22043_s27, %s22044_s15  }
  0x46   : > { %p25804_p13 = scmp.ne.s32.totalorder %s25802_s20, 0 }
  0x48   : > { %416 = sbr.rel (%p25804_p13) target bundleno = 2261 (0x8d5), region = 72 }
  0x4f   : > { %p25805_p5 = scmp.eq.s32.totalorder %s22144_s29, 0 }
  0x51   : > { %22014 = dma.done.wait (%p25805_p5), [#allocation7], 4608   ;;  %p25806_p0 = pmov %p25805_p5 }
  0x53   : > { %22016 = vsyncadd (%p25806_p0), [#allocation7], 4294962688  ;;  %p25807_p6 = pmov %p25806_p0 }
  0x54   : > { %p25808_p9 = pmov %p25806_p0 }
  0x55   : > { %22018 = dma.done.wait (%p25807_p6), [#allocation10], 6912  }
  0x56   : > { %22020 = vsyncadd (%p25808_p9), [#allocation10], 4294960384  ;;  %v751_v0 = vlaneseq  ;;  %v22045_v1 = vmov 1983009808   ;;  %v22046_v3 = vmov 0   ;;  %p464_p12 = scmp.lt.s32.totalorder %s22144_s29, 1 }
  0x57   : > { %v749_v2 = vunpack.c.l.s4 %v22045_v1  ;;  %853 = vmatprep.mubr.bf16.mxu0 %v22046_v3  ;;  %v745_v7 = vld [vmem:[%s25761_s1] sm:$0x3f]  ;;  %vm811_vm0 = vcmask 1041408   ;;  %vm470_vm1 = vcmask 31744   ;;  %vm572_vm2 = vcmask 523264   ;;  %v22452_v62 = vld [vmem:[%s25765_s5 + $0x18] sm:$0xff]  }
  0x58   : > { %v752_v4 = vshrl.u32 %v751_v0, 7  ;;  %s465_s28 = scalar_select %p464_p12, %s22144_s29, 1  ;;  %v747_v10 = vcombine.high %v745_v7, %v745_v7  ;;  %v22457_v63 = vld [vmem:[%s25765_s5 + $0x30] sm:$0xff]   ;;  %vm516_vm3 = vcmask 392192   ;;  %v25784_v0 = vmov 0.0   ;;  %v21751_v1 = vld [vmem:[%s25765_s5 + $0x38] sm:$0xff]  }
  0x59   : > { %v750_v5 = vunpack.c.0.s8 %v749_v2  ;;  %517 = vst.msk [vmem:[#allocation3] sm:$0xff] %vm516_vm3, %v25784_v0  ;;  %518 = vst.msk [vmem:[#allocation3 + $0x8] sm:$0xff] %vm516_vm3, %v25784_v0  ;;  %vm519_vm4 = vcmask 388096   ;;  %vm531_vm5 = vcmask 386048   ;;  %v21753_v2 = vld [vmem:[%s25765_s5 + $0x40] sm:$0xff]   ;;  %s461_s30 = sand.u32 1, %s22031_s26  }
  0x5a   : > { %s17730_s20 = sshll.u32 %s465_s28, 8  ;;  %471 = vst.msk [vmem:[#allocation2] sm:$0xff] %vm470_vm1, %v25784_v0  ;;  %472 = vst.msk [vmem:[#allocation2 + $0x8] sm:$0xff] %vm470_vm1, %v25784_v0  ;;  %s16669_s14 = sshll.u32 %s461_s30, 9  ;;  %vm575_vm6 = vcmask 517120   ;;  %vm581_vm7 = vcmask 516096  }
  0x5b   : > { %v753_v6 = vsub.s32 %v750_v5, %v752_v4  ;;  %s22249_s27 = scalar_lea.vmem %s25760_s0, %s17730_s20  ;;  %476 = vst.msk [vmem:[#allocation2 + $0x198] sm:$0xff] %vm470_vm1, %v25784_v0  ;;  %477 = vst.msk [vmem:[#allocation2 + $0x1a0] sm:$0xff] %vm470_vm1, %v25784_v0  ;;  %s22671_s16 = scalar_lea.vmem [#allocation11], %s16669_s14  ;;  %vm618_vm8 = vcmask 785408   ;;  %vm621_vm9 = vcmask 779264   ;;  %vm627_vm10 = vcmask 778240  }
  0x5c   : > { %v664_v8 = vld [vmem:[%s22249_s27] sm:$0xff]  ;;  %v665_v9 = vld [vmem:[%s22249_s27 + $0x8] sm:$0xff]  ;;  %v22259_v12 = vld [vmem:[%s22249_s27 + $0x10] sm:$0xff]  ;;  %521 = vst.msk [vmem:[#allocation3 + $0x18] sm:$0xff] %vm516_vm3, %v25784_v0  ;;  %vm473_vm11 = vcmask 25600   ;;  %vm479_vm12 = vcmask 24576  }
  0x5d   : > { %v754_v11 = vrot.slane %v745_v7, %v753_v6  ;;  %697 = vst.msk [vmem:[#allocation2 + $0x19] sm:$0xff] %vm470_vm1, %v664_v8  ;;  %698 = vst.msk [vmem:[#allocation2 + $0x21] sm:$0xff] %vm470_vm1, %v665_v9  ;;  %v22262_v13 = vld [vmem:[%s22249_s27 + $0x18] sm:$0xff]  ;;  %v22265_v14 = vld [vmem:[%s22249_s27 + $0x20] sm:$0xff]  ;;  %v761_v26 = vrot.slane %v747_v10, %v753_v6  ;;  %v22314_v27 = vpack.c.bf16 %v665_v9, %v664_v8  ;;  %s22048_s25 = smov 64   ;;  %s22049_s23 = smov 96  }
  0x5e   : > { %699 = vst.msk [vmem:[#allocation2 + $0x31] sm:$0xff] %vm470_vm1, %v22259_v12  ;;  %700 = vst.msk [vmem:[#allocation2 + $0x39] sm:$0xff] %vm470_vm1, %v22262_v13  ;;  %v22272_v15 = vld [vmem:[%s22249_s27 + $0x28] sm:$0xff]  ;;  %v22277_v16 = vld [vmem:[%s22249_s27 + $0x30] sm:$0xff]  ;;  %v22378_v50 = vpack.c.bf16 %v22262_v13, %v22259_v12  ;;  %vm16337_vm13 = vcmask 1048064   ;;  %vm16530_vm14 = vcmask 1048320  }
  0x5f   : > { %701 = vst.msk [vmem:[#allocation2 + $0x49] sm:$0xff] %vm470_vm1, %v22265_v14  ;;  %v22280_v17 = vld [vmem:[%s22249_s27 + $0x38] sm:$0xff]  ;;  %v762_v18 = vcombine.high %v754_v11, %v754_v11  ;;  %v813_v19 = vsel %vm811_vm0, %v754_v11, 0  ;;  %702 = vst.msk [vmem:[#allocation2 + $0x51] sm:$0xff] %vm470_vm1, %v22272_v15  ;;  %v22290_v20 = vld [vmem:[%s22249_s27 + $0x40] sm:$0xff]  ;;  %v819_v31 = vsel %vm811_vm0, %v761_v26, 0  ;;  %21676 = vmatprep.subr.msk.bf16.mxu1 %vm811_vm0, %v761_v26  ;;  %v22390_v53 = vpack.c.bf16 %v22272_v15, %v22265_v14 }
  0x60   : > { %703 = vst.msk [vmem:[#allocation2 + $0x61] sm:$0xff] %vm470_vm1, %v22277_v16  ;;  %704 = vst.msk [vmem:[#allocation2 + $0x69] sm:$0xff] %vm470_vm1, %v22280_v17  ;;  %v22293_v21 = vld [vmem:[%s22249_s27 + $0x48] sm:$0xff]  ;;  %v22296_v22 = vld [vmem:[%s22249_s27 + $0x50] sm:$0xff]  ;;  %20394 = vmatpush3.bf16.msra.mxu1 %v819_v31  ;;  %v22405_v56 = vpack.c.bf16 %v22280_v17, %v22277_v16  ;;  %s16577_s15 = sshll.u32 %s22671_s16, 4  ;;  %s25903_s19 = sld [smem:[#allocation60_spill]]  ;;  %s25711_s15 = int_to_ptr.vmem [resolvable:$true] %s16577_s15 }
  0x61   : > { %705 = vst.msk [vmem:[#allocation2 + $0x79] sm:$0xff] %vm470_vm1, %v22290_v20  ;;  %706 = vst.msk [vmem:[#allocation2 + $0x81] sm:$0xff] %vm470_vm1, %v22293_v21  ;;  %v22303_v23 = vld [vmem:[%s22249_s27 + $0x58] sm:$0xff]  ;;  %v22308_v24 = vld [vmem:[%s22249_s27 + $0x60] sm:$0xff]  ;;  %16672 = vmatprep.subr.msk.bf16.mxu0 %vm811_vm0, %v762_v18  ;;  %v22416_v58 = vpack.c.bf16 %v22293_v21, %v22290_v20  ;;  %18729 = vmatprep.subr.bf16.mxu1 %v22457_v63  ;;  %s21969_s24 = scalar_lea.vmem %s25711_s15, 8192  ;;  %p25904_p1 = scmp.ne.s32.totalorder %s25799_s18, 0 }
  0x62   : > { %707 = vst.msk [vmem:[#allocation2 + $0x91] sm:$0xff] %vm470_vm1, %v22296_v22  ;;  %v22311_v25 = vld [vmem:[%s22249_s27 + $0x68] sm:$0xff]  ;;  %708 = vst.msk [vmem:[#allocation2 + $0x99] sm:$0xff] %vm470_vm1, %v22303_v23  ;;  %v22323_v28 = vld [vmem:[%s22249_s27 + $0x70] sm:$0xff]  ;;  %822 = vmatpush1.bf16.msra.mxu0 %v813_v19  ;;  %v22423_v59 = vpack.c.bf16 %v22303_v23, %v22296_v22  ;;  %p21970_p10 = scmp.ne.s32.totalorder %s25711_s15, %s21969_s24  ;;  %s22050_s22 = smov [#allocation11]  }
  0x63   : > { %709 = vst.msk [vmem:[#allocation2 + $0xa9] sm:$0xff] %vm470_vm1, %v22308_v24  ;;  %710 = vst.msk [vmem:[#allocation2 + $0xb1] sm:$0xff] %vm470_vm1, %v22311_v25  ;;  %v22326_v29 = vld [vmem:[%s22249_s27 + $0x78] sm:$0xff]  ;;  %v680_v30 = vld [vmem:[%s22249_s27 + $0x80] sm:$0xff]  ;;  %21675 = vmatprep.subr.msk.bf16.mxu0 %vm811_vm0, %v761_v26  ;;  %v22430_v60 = vpack.c.bf16 %v22311_v25, %v22308_v24  ;;  %s21973_s13 = sshll.u32 %s22050_s22, 4  ;;  %s21974_s13 = int_to_ptr.vmem [resolvable:$false] %s21973_s13 }
  0x64   : > { %711 = vst.msk [vmem:[#allocation2 + $0xc1] sm:$0xff] %vm470_vm1, %v22323_v28  ;;  %712 = vst.msk [vmem:[#allocation2 + $0xc9] sm:$0xff] %vm470_vm1, %v22326_v29  ;;  %v681_v32 = vld [vmem:[%s22249_s27 + $0x88] sm:$0xff]  ;;  %v682_v33 = vld [vmem:[%s22249_s27 + $0x90] sm:$0xff]  ;;  %v22437_v61 = vpack.c.bf16 %v22326_v29, %v22323_v28  ;;  %p21971_p2 = pnand %p21970_p10, %p25904_p1  ;;  %p21976_p4 = scmp.lt.s32.totalorder %s25711_s15, %s21974_s13 }
  0x65   : > { %713 = vst.msk [vmem:[#allocation2 + $0xd9] sm:$0xff] %vm470_vm1, %v680_v30  ;;  %v683_v34 = vld [vmem:[%s22249_s27 + $0x98] sm:$0xff]  ;;  %714 = vst.msk [vmem:[#allocation2 + $0xe1] sm:$0xff] %vm470_vm1, %v681_v32  ;;  %v22341_v35 = vpack.c.bf16 %v681_v32, %v680_v30  ;;  %v684_v36 = vld [vmem:[%s22249_s27 + $0xa0] sm:$0xff]  ;;  %16673 = vmatmul.mubr.msk.bf16.vlgmr.msra.gmra.mrb[0].mxu0 %vm470_vm1, %v22314_v27 }
  0x66   : > { %715 = vst.msk [vmem:[#allocation2 + $0xf1] sm:$0xff] %vm470_vm1, %v682_v33  ;;  %716 = vst.msk [vmem:[#allocation2 + $0xf9] sm:$0xff] %vm470_vm1, %v683_v34  ;;  %v685_v37 = vld [vmem:[%s22249_s27 + $0xa8] sm:$0xff]  ;;  %v686_v38 = vld [vmem:[%s22249_s27 + $0xb0] sm:$0xff]  ;;  %v738_v42 = vpack.c.bf16 %v683_v34, %v682_v33  ;;  %863 = vmatprep.mubr.bf16.mxu0 %v22046_v3  ;;  %18620 = vmatpush3.bf16.msra.mxu0 %v819_v31  ;;  %p21972_p3 = pneg %p21971_p2 }
  0x67   : > { %717 = vst.msk [vmem:[#allocation2 + $0x109] sm:$0xff] %vm470_vm1, %v684_v36  ;;  %718 = vst.msk [vmem:[#allocation2 + $0x111] sm:$0xff] %vm470_vm1, %v685_v37  ;;  %v687_v39 = vld [vmem:[%s22249_s27 + $0xb8] sm:$0xff]  ;;  %v688_v40 = vld [vmem:[%s22249_s27 + $0xc0] sm:$0xff]  ;;  %18637 = vmatprep.mubr.msk.bf16.mxu1 %vm470_vm1, %v22341_v35  ;;  %v739_v46 = vpack.c.bf16 %v685_v37, %v684_v36  ;;  %18653 = vmatprep.subr.bf16.mxu0 %v22452_v62 }
  0x68   : > { %719 = vst.msk [vmem:[#allocation2 + $0x121] sm:$0xff] %vm470_vm1, %v686_v38  ;;  %v689_v41 = vld [vmem:[%s22249_s27 + $0xc8] sm:$0xff]  ;;  %720 = vst.msk [vmem:[#allocation2 + $0x129] sm:$0xff] %vm470_vm1, %v687_v39  ;;  %v690_v43 = vld [vmem:[%s22249_s27 + $0xd0] sm:$0xff]  ;;  %18638 = vmatmul.mubr.msk.bf16.vlgmr.msra.gmra.mrb[0].mxu1 %vm470_vm1, %v738_v42  ;;  %v740_v51 = vpack.c.bf16 %v687_v39, %v686_v38 }
  0x69   : > { %721 = vst.msk [vmem:[#allocation2 + $0x139] sm:$0xff] %vm470_vm1, %v688_v40  ;;  %722 = vst.msk [vmem:[#allocation2 + $0x141] sm:$0xff] %vm470_vm1, %v689_v41  ;;  %v691_v44 = vld [vmem:[%s22249_s27 + $0xd8] sm:$0xff]  ;;  %v692_v45 = vld [vmem:[%s22249_s27 + $0xe0] sm:$0xff]  ;;  %18641 = vmatprep.mubr.msk.bf16.mxu1 %vm470_vm1, %v739_v46  ;;  %v22383_v52 = vpack.c.bf16 %v689_v41, %v688_v40  ;;  %18730 = vmatpush3.bf16.msra.mxu1 %v22457_v63 }
  0x6a   : > { %723 = vst.msk [vmem:[#allocation2 + $0x151] sm:$0xff] %vm470_vm1, %v690_v43  ;;  %724 = vst.msk [vmem:[#allocation2 + $0x159] sm:$0xff] %vm470_vm1, %v691_v44  ;;  %v693_v47 = vld [vmem:[%s22249_s27 + $0xe8] sm:$0xff]  ;;  %v694_v48 = vld [vmem:[%s22249_s27 + $0xf0] sm:$0xff]  ;;  %v22394_v54 = vpack.c.bf16 %v691_v44, %v690_v43  ;;  %18731 = vmatprep.subr.bf16.mxu1 %v21751_v1 }
  0x6b   : > { %725 = vst.msk [vmem:[#allocation2 + $0x169] sm:$0xff] %vm470_vm1, %v692_v45  ;;  %v695_v49 = vld [vmem:[%s22249_s27 + $0xf8] sm:$0xff]  ;;  %726 = vst.msk [vmem:[#allocation2 + $0x171] sm:$0xff] %vm470_vm1, %v693_v47  ;;  %v22397_v55 = vpack.c.bf16 %v693_v47, %v692_v45  ;;  %v2017_v4 = vld [vmem:[#allocation3 + $0x2] sm:$0xff]  ;;  %s17731_s27 = sshll.u32 %s22144_s29, 13  ;;  %s25719_s29 = scalar_lea.sflag [#allocation8], %s461_s30 }
  0x6c   : > { %727 = vst.msk [vmem:[#allocation2 + $0x181] sm:$0xff] %vm470_vm1, %v694_v48  ;;  %728 = vst.msk [vmem:[#allocation2 + $0x189] sm:$0xff] %vm470_vm1, %v695_v49  ;;  %v22409_v57 = vpack.c.bf16 %v695_v49, %v694_v48  ;;  %v21750_v10 = vld [vmem:[%s25765_s5 + $0x20] sm:$0xff]   ;;  %v21754_v16 = vld [vmem:[%s25765_s5 + $0x48] sm:$0xff]   ;;  %s25709_s21 = scalar_lea.hbm %s25903_s19, %s17731_s27 }
  0x6d   : > { %16674 = vmatmul.mubr.msk.bf16.gmra.mrb[4].mxu0 %vm470_vm1, %v22378_v50  ;;  %522 = vst.msk [vmem:[#allocation3 + $0x20] sm:$0xff] %vm516_vm3, %v25784_v0  ;;  %525 = vst.msk [vmem:[#allocation3 + $0x1b0] sm:$0xff] %vm516_vm3, %v25784_v0  ;;  %18732 = vmatpush3.bf16.msra.mxu1 %v21751_v1  ;;  %v21755_v17 = vld [vmem:[%s25765_s5] sm:$0xff]   ;;  %v21756_v19 = vld [vmem:[%s25765_s5 + $0x50] sm:$0xff]  }
  0x6e   : > { %873 = vmatprep.mubr.bf16.mxu0 %v22046_v3  ;;  %526 = vst.msk [vmem:[#allocation3 + $0x1b8] sm:$0xff] %vm516_vm3, %v25784_v0  ;;  %528 = vst.msk [vmem:[#allocation3 + $0x1c8] sm:$0xff] %vm516_vm3, %v25784_v0  ;;  %18733 = vmatprep.subr.bf16.mxu1 %v21753_v2  ;;  %v21757_v20 = vld [vmem:[%s25765_s5 + $0x8] sm:$0xff]   ;;  %v21758_v21 = vld [vmem:[%s25765_s5 + $0x58] sm:$0xff]  }
  0x6f   : > { %529 = vst.msk [vmem:[#allocation3 + $0x1d0] sm:$0xff] %vm516_vm3, %v25784_v0  ;;  %v21759_v22 = vld [vmem:[%s25765_s5 + $0x10] sm:$0xff]   ;;  %v22649_v23 = vld [vmem:[%s25765_s5 + $0x60] sm:$0xff]   ;;  %v22669_v36 = vld [vmem:[#allocation6 + $0x20] sm:$0xff]  }
  0x70   : > { %18642 = vmatmul.mubr.msk.bf16.gmra.mrb[4].mxu1 %vm470_vm1, %v740_v51  ;;  %573 = vst.msk [vmem:[#allocation4] sm:$0xff] %vm572_vm2, %v25784_v0  ;;  %574 = vst.msk [vmem:[#allocation4 + $0x8] sm:$0xff] %vm572_vm2, %v25784_v0  ;;  %v22656_v24 = vld [vmem:[%s25762_s2] ss:$0 sm:$0xff] }
  0x71   : > { %18645 = vmatprep.mubr.msk.bf16.mxu1 %vm470_vm1, %v22383_v52  ;;  %578 = vst.msk [vmem:[#allocation4 + $0x198] sm:$0xff] %vm572_vm2, %v25784_v0  ;;  %579 = vst.msk [vmem:[#allocation4 + $0x1a0] sm:$0xff] %vm572_vm2, %v25784_v0  ;;  %18734 = vmatpush3.bf16.msra.mxu1 %v21753_v2  ;;  %v22663_v25 = vld [vmem:[%s25763_s3] ss:$0 sm:$0xff] }
  0x72   : > { %520 = vst.msk [vmem:[#allocation3 + $0x10] sm:$0xf] %vm519_vm4, %v25784_v0  ;;  %523 = vst.msk [vmem:[#allocation3 + $0x28] sm:$0xf] %vm519_vm4, %v25784_v0  ;;  %18767 = vmatprep.subr.bf16.mxu1 %v21754_v16 }
  0x73   : > { %532 = vst.msk [vmem:[#allocation3] sm:$0x3] %vm531_vm5, %v25784_v0  ;;  %534 = vst.msk [vmem:[#allocation3 + $0x30] sm:$0x3] %vm531_vm5, %v25784_v0 }
  0x74   : > { %527 = vst.msk [vmem:[#allocation3 + $0x1c0] sm:$0xf] %vm519_vm4, %v25784_v0  ;;  %530 = vst.msk [vmem:[#allocation3 + $0x1d8] sm:$0xf] %vm519_vm4, %v25784_v0  ;;  %v2019_v7 = vld [vmem:[#allocation3 + $0x1a] sm:$0xff] }
  0x75   : > { %16675 = vmatmul.mubr.msk.bf16.gmra.mrb[8].mxu0 %vm470_vm1, %v22390_v53  ;;  %535 = vst.msk [vmem:[#allocation3 + $0x48] sm:$0x3] %vm531_vm5, %v25784_v0  ;;  %536 = vst.msk [vmem:[#allocation3 + $0x60] sm:$0x3] %vm531_vm5, %v25784_v0 }
  0x76   : > { %883 = vmatprep.mubr.bf16.mxu0 %v22046_v3  ;;  %537 = vst.msk [vmem:[#allocation3 + $0x78] sm:$0x3] %vm531_vm5, %v25784_v0  ;;  %538 = vst.msk [vmem:[#allocation3 + $0x90] sm:$0x3] %vm531_vm5, %v25784_v0 }
  0x77   : > { %539 = vst.msk [vmem:[#allocation3 + $0xa8] sm:$0x3] %vm531_vm5, %v25784_v0  ;;  %540 = vst.msk [vmem:[#allocation3 + $0xc0] sm:$0x3] %vm531_vm5, %v25784_v0 }
  0x78   : > { %18646 = vmatmul.mubr.msk.bf16.gmra.mrb[8].mxu1 %vm470_vm1, %v22394_v54  ;;  %541 = vst.msk [vmem:[#allocation3 + $0xd8] sm:$0x3] %vm531_vm5, %v25784_v0  ;;  %542 = vst.msk [vmem:[#allocation3 + $0xf0] sm:$0x3] %vm531_vm5, %v25784_v0 }
  0x79   : > { %18649 = vmatprep.mubr.msk.bf16.mxu1 %vm470_vm1, %v22397_v55  ;;  %543 = vst.msk [vmem:[#allocation3 + $0x108] sm:$0x3] %vm531_vm5, %v25784_v0  ;;  %544 = vst.msk [vmem:[#allocation3 + $0x120] sm:$0x3] %vm531_vm5, %v25784_v0  ;;  %v2018_v5 = vld [vmem:[#allocation3 + $0xa] sm:$0xff]  ;;  %v2020_v8 = vld [vmem:[#allocation3 + $0x22] sm:$0xff] }
  0x7a   : > { %545 = vst.msk [vmem:[#allocation3 + $0x138] sm:$0x3] %vm531_vm5, %v25784_v0  ;;  %546 = vst.msk [vmem:[#allocation3 + $0x150] sm:$0x3] %vm531_vm5, %v25784_v0  ;;  %v2049_v6 = vpack.c.bf16 %v2018_v5, %v2017_v4  ;;  %v2050_v9 = vpack.c.bf16 %v2020_v8, %v2019_v7  ;;  %v1508_v11 = vld [vmem:[#allocation3 + $0x1] sm:$0xff]  ;;  %v1509_v12 = vld [vmem:[#allocation3 + $0x9] sm:$0xff] }
  0x7b   : > { %547 = vst.msk [vmem:[#allocation3 + $0x168] sm:$0x3] %vm531_vm5, %v25784_v0  ;;  %548 = vst.msk [vmem:[#allocation3 + $0x180] sm:$0x3] %vm531_vm5, %v25784_v0  ;;  %v1540_v13 = vpack.c.bf16 %v1509_v12, %v1508_v11  ;;  %v1511_v15 = vld [vmem:[#allocation3 + $0x21] sm:$0xff] }
  0x7c   : > { %549 = vst.msk [vmem:[#allocation3 + $0x198] sm:$0x3] %vm531_vm5, %v25784_v0  ;;  %554 = vst.msk [vmem:[#allocation3 + $0x42] sm:$0x3] %vm531_vm5, %v25784_v0 }
  0x7d   : > { %16676 = vmatmul.mubr.msk.bf16.gmra.mrb[12].mxu0 %vm470_vm1, %v22405_v56  ;;  %555 = vst.msk [vmem:[#allocation3 + $0x5a] sm:$0x3] %vm531_vm5, %v25784_v0  ;;  %556 = vst.msk [vmem:[#allocation3 + $0x72] sm:$0x3] %vm531_vm5, %v25784_v0 }
  0x7e   : > { %893 = vmatprep.mubr.bf16.mxu0 %v22046_v3  ;;  %557 = vst.msk [vmem:[#allocation3 + $0x8a] sm:$0x3] %vm531_vm5, %v25784_v0  ;;  %558 = vst.msk [vmem:[#allocation3 + $0xa2] sm:$0x3] %vm531_vm5, %v25784_v0 }
  0x7f   : > { %559 = vst.msk [vmem:[#allocation3 + $0xba] sm:$0x3] %vm531_vm5, %v25784_v0  ;;  %560 = vst.msk [vmem:[#allocation3 + $0xd2] sm:$0x3] %vm531_vm5, %v25784_v0 }
  0x80   : > { %18650 = vmatmul.mubr.msk.bf16.gmra.mrb[12].mxu1 %vm470_vm1, %v22409_v57  ;;  %561 = vst.msk [vmem:[#allocation3 + $0xea] sm:$0x3] %vm531_vm5, %v25784_v0  ;;  %562 = vst.msk [vmem:[#allocation3 + $0x102] sm:$0x3] %vm531_vm5, %v25784_v0 }
  0x81   : > { %563 = vst.msk [vmem:[#allocation3 + $0x11a] sm:$0x3] %vm531_vm5, %v25784_v0  ;;  %564 = vst.msk [vmem:[#allocation3 + $0x132] sm:$0x3] %vm531_vm5, %v25784_v0  ;;  %18735 = vmatprep.mubr.msk.bf16.mxu1 %vm516_vm3, %v2049_v6 }
  0x82   : > { %565 = vst.msk [vmem:[#allocation3 + $0x14a] sm:$0x3] %vm531_vm5, %v25784_v0  ;;  %566 = vst.msk [vmem:[#allocation3 + $0x162] sm:$0x3] %vm531_vm5, %v25784_v0 }
  0x83   : > { %567 = vst.msk [vmem:[#allocation3 + $0x17a] sm:$0x3] %vm531_vm5, %v25784_v0  ;;  %568 = vst.msk [vmem:[#allocation3 + $0x192] sm:$0x3] %vm531_vm5, %v25784_v0 }
  0x84   : > { %569 = vst.msk [vmem:[#allocation3 + $0x1aa] sm:$0x3] %vm531_vm5, %v25784_v0  ;;  %533 = vst.msk [vmem:[#allocation3 + $0x18] sm:$0x3] %vm531_vm5, %v25784_v0 }
  0x85   : > { %16677 = vmatmul.mubr.msk.bf16.gmra.mrb[16].mxu0 %vm470_vm1, %v22416_v58  ;;  %550 = vst.msk [vmem:[#allocation3 + $0x1b0] sm:$0x3] %vm531_vm5, %v25784_v0  ;;  %551 = vst.msk [vmem:[#allocation3 + $0x1c8] sm:$0x3] %vm531_vm5, %v25784_v0 }
  0x86   : > { %903 = vmatprep.mubr.bf16.mxu0 %v22046_v3  ;;  %552 = vst.msk [vmem:[#allocation3 + $0x12] sm:$0x3] %vm531_vm5, %v25784_v0  ;;  %553 = vst.msk [vmem:[#allocation3 + $0x2a] sm:$0x3] %vm531_vm5, %v25784_v0 }
  0x87   : > { %570 = vst.msk [vmem:[#allocation3 + $0x1c2] sm:$0x3] %vm531_vm5, %v25784_v0  ;;  %571 = vst.msk [vmem:[#allocation3 + $0x1da] sm:$0x3] %vm531_vm5, %v25784_v0 }
  0x88   : > { %18736 = vmatmul.mubr.msk.bf16.vlgmr.msra.gmra.mrb[16].mxu1 %vm516_vm3, %v2050_v9  ;;  %576 = vst.msk [vmem:[#allocation4 + $0x10] sm:$0x3] %vm575_vm6, %v25784_v0  ;;  %580 = vst.msk [vmem:[#allocation4 + $0x1a8] sm:$0x3] %vm575_vm6, %v25784_v0 }
  0x89   : > { %18768 = vmatpush3.bf16.msra.mxu1 %v21754_v16  ;;  %582 = vst.msk [vmem:[#allocation4] sm:$0x1] %vm581_vm7, %v25784_v0  ;;  %583 = vst.msk [vmem:[#allocation4 + $0x18] sm:$0x1] %vm581_vm7, %v25784_v0 }
  0x8a   : > { %18769 = vmatprep.subr.bf16.mxu1 %v21756_v19  ;;  %584 = vst.msk [vmem:[#allocation4 + $0x30] sm:$0x1] %vm581_vm7, %v25784_v0  ;;  %585 = vst.msk [vmem:[#allocation4 + $0x48] sm:$0x1] %vm581_vm7, %v25784_v0 }
  0x8b   : > { %v1510_v14 = vld [vmem:[#allocation3 + $0x19] sm:$0xff]  ;;  %586 = vst.msk [vmem:[#allocation4 + $0x60] sm:$0x1] %vm581_vm7, %v25784_v0  ;;  %587 = vst.msk [vmem:[#allocation4 + $0x78] sm:$0x1] %vm581_vm7, %v25784_v0 }
  0x8c   : > { %v1541_v18 = vpack.c.bf16 %v1511_v15, %v1510_v14  ;;  %588 = vst.msk [vmem:[#allocation4 + $0x90] sm:$0x1] %vm581_vm7, %v25784_v0  ;;  %589 = vst.msk [vmem:[#allocation4 + $0xa8] sm:$0x1] %vm581_vm7, %v25784_v0 }
  0x8d   : > { %16678 = vmatmul.mubr.msk.bf16.gmra.mrb[20].mxu0 %vm470_vm1, %v22423_v59  ;;  %18770 = vmatpush3.bf16.msra.mxu1 %v21756_v19  ;;  %590 = vst.msk [vmem:[#allocation4 + $0xc0] sm:$0x1] %vm581_vm7, %v25784_v0  ;;  %591 = vst.msk [vmem:[#allocation4 + $0xd8] sm:$0x1] %vm581_vm7, %v25784_v0 }
  0x8e   : > { %913 = vmatprep.mubr.bf16.mxu0 %v22046_v3  ;;  %18771 = vmatprep.subr.bf16.mxu1 %v21758_v21  ;;  %592 = vst.msk [vmem:[#allocation4 + $0xf0] sm:$0x1] %vm581_vm7, %v25784_v0  ;;  %593 = vst.msk [vmem:[#allocation4 + $0x108] sm:$0x1] %vm581_vm7, %v25784_v0 }
  0x8f   : > { %594 = vst.msk [vmem:[#allocation4 + $0x120] sm:$0x1] %vm581_vm7, %v25784_v0  ;;  %595 = vst.msk [vmem:[#allocation4 + $0x138] sm:$0x1] %vm581_vm7, %v25784_v0 }
  0x90   : > { %596 = vst.msk [vmem:[#allocation4 + $0x150] sm:$0x1] %vm581_vm7, %v25784_v0  ;;  %597 = vst.msk [vmem:[#allocation4 + $0x168] sm:$0x1] %vm581_vm7, %v25784_v0 }
  0x91   : > { %18772 = vmatpush3.bf16.msra.mxu1 %v21758_v21  ;;  %598 = vst.msk [vmem:[#allocation4 + $0x180] sm:$0x1] %vm581_vm7, %v25784_v0  ;;  %599 = vst.msk [vmem:[#allocation4 + $0x198] sm:$0x1] %vm581_vm7, %v25784_v0 }
  0x92   : > { %18805 = vmatprep.subr.bf16.mxu1 %v22649_v23  ;;  %600 = vst.msk [vmem:[#allocation4 + $0x11] sm:$0x1] %vm581_vm7, %v25784_v0  ;;  %601 = vst.msk [vmem:[#allocation4 + $0x29] sm:$0x1] %vm581_vm7, %v25784_v0 }
  0x93   : > { %602 = vst.msk [vmem:[#allocation4 + $0x41] sm:$0x1] %vm581_vm7, %v25784_v0  ;;  %603 = vst.msk [vmem:[#allocation4 + $0x59] sm:$0x1] %vm581_vm7, %v25784_v0 }
  0x94   : > { %604 = vst.msk [vmem:[#allocation4 + $0x71] sm:$0x1] %vm581_vm7, %v25784_v0  ;;  %605 = vst.msk [vmem:[#allocation4 + $0x89] sm:$0x1] %vm581_vm7, %v25784_v0 }
  0x95   : > { %16679 = vmatmul.mubr.msk.bf16.gmra.mrb[24].mxu0 %vm470_vm1, %v22430_v60  ;;  %606 = vst.msk [vmem:[#allocation4 + $0xa1] sm:$0x1] %vm581_vm7, %v25784_v0  ;;  %607 = vst.msk [vmem:[#allocation4 + $0xb9] sm:$0x1] %vm581_vm7, %v25784_v0 }
  0x96   : > { %923 = vmatprep.mubr.bf16.mxu0 %v22046_v3  ;;  %608 = vst.msk [vmem:[#allocation4 + $0xd1] sm:$0x1] %vm581_vm7, %v25784_v0  ;;  %609 = vst.msk [vmem:[#allocation4 + $0xe9] sm:$0x1] %vm581_vm7, %v25784_v0 }
  0x97   : > { %610 = vst.msk [vmem:[#allocation4 + $0x101] sm:$0x1] %vm581_vm7, %v25784_v0  ;;  %611 = vst.msk [vmem:[#allocation4 + $0x119] sm:$0x1] %vm581_vm7, %v25784_v0 }
  0x98   : > { %612 = vst.msk [vmem:[#allocation4 + $0x131] sm:$0x1] %vm581_vm7, %v25784_v0  ;;  %613 = vst.msk [vmem:[#allocation4 + $0x149] sm:$0x1] %vm581_vm7, %v25784_v0 }
  0x99   : > { %614 = vst.msk [vmem:[#allocation4 + $0x161] sm:$0x1] %vm581_vm7, %v25784_v0  ;;  %615 = vst.msk [vmem:[#allocation4 + $0x179] sm:$0x1] %vm581_vm7, %v25784_v0 }
  0x9a   : > { %616 = vst.msk [vmem:[#allocation4 + $0x191] sm:$0x1] %vm581_vm7, %v25784_v0  ;;  %617 = vst.msk [vmem:[#allocation4 + $0x1a9] sm:$0x1] %vm581_vm7, %v25784_v0 }
  0x9d   : > { %16680 = vmatmul.mubr.msk.bf16.gmra.mrb[28].mxu0 %vm470_vm1, %v22437_v61 }
  0x9e   : > { %933 = vmatprep.mubr.bf16.mxu0 %v22046_v3 }
  0xa5   : > { %16681 = vmatmul.mubr.msk.bf16.gmra.mrb[32].mxu0 %vm470_vm1, %v22341_v35 }
  0xa6   : > { %943 = vmatprep.mubr.bf16.mxu0 %v22046_v3 }
  0xad   : > { %16682 = vmatmul.mubr.msk.bf16.gmra.mrb[36].mxu0 %vm470_vm1, %v738_v42 }
  0xae   : > { %953 = vmatprep.mubr.bf16.mxu0 %v22046_v3 }
  0xb5   : > { %16683 = vmatmul.mubr.msk.bf16.gmra.mrb[40].mxu0 %vm470_vm1, %v739_v46 }
  0xb6   : > { %963 = vmatprep.mubr.bf16.mxu0 %v22046_v3 }
  0xbd   : > { %16684 = vmatmul.mubr.msk.bf16.gmra.mrb[44].mxu0 %vm470_vm1, %v740_v51 }
  0xbe   : > { %973 = vmatprep.mubr.bf16.mxu0 %v22046_v3 }
  0xc5   : > { %16685 = vmatmul.mubr.msk.bf16.gmra.mrb[48].mxu0 %vm470_vm1, %v22383_v52 }
  0xc6   : > { %983 = vmatprep.mubr.bf16.mxu0 %v22046_v3 }
  0xcd   : > { %16686 = vmatmul.mubr.msk.bf16.gmra.mrb[52].mxu0 %vm470_vm1, %v22394_v54 }
  0xce   : > { %993 = vmatprep.mubr.bf16.mxu0 %v22046_v3 }
  0xd5   : > { %16687 = vmatmul.mubr.msk.bf16.gmra.mrb[56].mxu0 %vm470_vm1, %v22397_v55 }
  0xd6   : > { %1003 = vmatprep.mubr.bf16.mxu0 %v22046_v3  ;;  %v21752_v3 = vld [vmem:[%s25765_s5 + $0x28] sm:$0xff]  }
  0xdd   : > { %16688 = vmatmul.mubr.msk.bf16.gmra.mrb[60].mxu0 %vm470_vm1, %v22409_v57 }
  0xde   : > { %18621 = vmatprep.mubr.msk.bf16.mxu0 %vm470_vm1, %v22314_v27 }
  0xe5   : > { %18622 = vmatmul.mubr.msk.bf16.vlgmr.msra.gmra.mrb[64].mxu0 %vm470_vm1, %v22378_v50 }
  0xe6   : > { %18625 = vmatprep.mubr.msk.bf16.mxu0 %vm470_vm1, %v22390_v53  ;;  %18654 = vmatpush3.bf16.msra.mxu0 %v22452_v62 }
  0xe7   : > { %18655 = vmatprep.subr.bf16.mxu0 %v21750_v10 }
  0xea   : > { %18656 = vmatpush3.bf16.msra.mxu0 %v21750_v10 }
  0xeb   : > { %18657 = vmatprep.subr.bf16.mxu0 %v21752_v3 }
  0xed   : > { %18626 = vmatmul.mubr.msk.bf16.gmra.mrb[68].mxu0 %vm470_vm1, %v22405_v56 }
  0xee   : > { %18629 = vmatprep.mubr.msk.bf16.mxu0 %vm470_vm1, %v22416_v58  ;;  %18658 = vmatpush3.bf16.msra.mxu0 %v21752_v3 }
  0xef   : > { %18691 = vmatprep.subr.bf16.mxu0 %v21755_v17 }
  0xf5   : > { %18630 = vmatmul.mubr.msk.bf16.gmra.mrb[72].mxu0 %vm470_vm1, %v22423_v59 }
  0xf6   : > { %18633 = vmatprep.mubr.msk.bf16.mxu0 %vm470_vm1, %v22430_v60 }
  0xfd   : > { %18634 = vmatmul.mubr.msk.bf16.gmra.mrb[76].mxu0 %vm470_vm1, %v22437_v61 }
  0xfe   : > { %18659 = vmatprep.mubr.msk.bf16.mxu0 %vm516_vm3, %v1540_v13 }
 0x105   : > { %18660 = vmatmul.mubr.msk.bf16.vlgmr.msra.gmra.mrb[80].mxu0 %vm516_vm3, %v1541_v18 }
 0x106   : > { %18692 = vmatpush3.bf16.msra.mxu0 %v21755_v17 }
 0x107   : > { %18693 = vmatprep.subr.bf16.mxu0 %v21757_v20 }
 0x10a   : > { %18694 = vmatpush3.bf16.msra.mxu0 %v21757_v20 }
 0x10b   : > { %18695 = vmatprep.subr.bf16.mxu0 %v21759_v22 }
 0x10e   : > { %18696 = vmatpush3.bf16.msra.mxu0 %v21759_v22 }
 0x10f   : > { %19603 = vmatprep.subr.bf16.mxu0 %v22669_v36 }
 0x138   : > { %v855_v26 = vpop.f32.mrb[0].mxu0 }
 0x139   : > { %v1182_v27 = vadd.f32 %v22656_v24, %v855_v26  ;;  %v857_v28 = vpop.f32.mrb[1].mxu0 }
 0x13a   : > { %v1253_v29 = vadd.f32 %v22663_v25, %v857_v28  ;;  %v859_v30 = vpop.f32.mrb[2].mxu0 }
 0x13b   : > { %v1214_v31 = vmax.f32 %v1182_v27, 0.0  ;;  %v1183_v32 = vadd.f32 %v22656_v24, %v859_v30  ;;  %v861_v33 = vpop.f32.mrb[3].mxu0 }
 0x13c   : > { %v1285_v34 = vmax.f32 %v1253_v29, 0.0  ;;  %v1254_v35 = vadd.f32 %v22663_v25, %v861_v33 }
 0x13d   : > { %16177 = vst.msk [vmem:[%s22671_s16] sm:$0xff] %vm572_vm2, %v1214_v31  ;;  %v1215_v37 = vmax.f32 %v1183_v32, 0.0 }
 0x13e   : > { %1389 = vst.msk [vmem:[#allocation3 + $0x32] sm:$0xff] %vm516_vm3, %v1285_v34  ;;  %v1286_v38 = vmax.f32 %v1254_v35, 0.0 }
 0x13f   : > { %16178 = vst.msk [vmem:[%s22671_s16 + $0x10] sm:$0xff] %vm572_vm2, %v1215_v37 }
 0x140   : > { %1390 = vst.msk [vmem:[#allocation3 + $0x3a] sm:$0xff] %vm516_vm3, %v1286_v38  ;;  %v865_v39 = vpop.f32.mrb[4].mxu0 }
 0x141   : > { %v1184_v40 = vadd.f32 %v22656_v24, %v865_v39  ;;  %v867_v41 = vpop.f32.mrb[5].mxu0 }
 0x142   : > { %v1255_v42 = vadd.f32 %v22663_v25, %v867_v41  ;;  %v869_v43 = vpop.f32.mrb[6].mxu0 }
 0x143   : > { %v1216_v44 = vmax.f32 %v1184_v40, 0.0  ;;  %v1185_v45 = vadd.f32 %v22656_v24, %v869_v43  ;;  %v871_v46 = vpop.f32.mrb[7].mxu0 }
 0x144   : > { %v1287_v47 = vmax.f32 %v1255_v42, 0.0  ;;  %v1256_v48 = vadd.f32 %v22663_v25, %v871_v46 }
 0x145   : > { %16179 = vst.msk [vmem:[%s22671_s16 + $0x20] sm:$0xff] %vm572_vm2, %v1216_v44  ;;  %v1217_v49 = vmax.f32 %v1185_v45, 0.0  ;;  %v1512_v51 = vld [vmem:[#allocation3 + $0x31] sm:$0xff] }
 0x146   : > { %1391 = vst.msk [vmem:[#allocation3 + $0x4a] sm:$0xff] %vm516_vm3, %v1287_v47  ;;  %v1288_v50 = vmax.f32 %v1256_v48, 0.0  ;;  %v2021_v53 = vld [vmem:[#allocation3 + $0x32] sm:$0xff] }
 0x147   : > { %16180 = vst.msk [vmem:[%s22671_s16 + $0x30] sm:$0xff] %vm572_vm2, %v1217_v49  ;;  %v1513_v52 = vld [vmem:[#allocation3 + $0x39] sm:$0xff] }
 0x148   : > { %v2022_v54 = vld [vmem:[#allocation3 + $0x3a] sm:$0xff]  ;;  %1392 = vst.msk [vmem:[#allocation3 + $0x52] sm:$0xff] %vm516_vm3, %v1288_v50  ;;  %v875_v55 = vpop.f32.mrb[8].mxu0  ;;  %v1542_v56 = vpack.c.bf16 %v1513_v52, %v1512_v51 }
 0x149   : > { %v2051_v57 = vpack.c.bf16 %v2022_v54, %v2021_v53  ;;  %v1186_v58 = vadd.f32 %v22656_v24, %v875_v55  ;;  %v877_v59 = vpop.f32.mrb[9].mxu0 }
 0x14a   : > { %v1257_v60 = vadd.f32 %v22663_v25, %v877_v59  ;;  %v879_v61 = vpop.f32.mrb[10].mxu0  ;;  %18663 = vmatprep.mubr.msk.bf16.mxu0 %vm516_vm3, %v1542_v56 }
 0x14b   : > { %18739 = vmatprep.mubr.msk.bf16.mxu1 %vm516_vm3, %v2051_v57  ;;  %v1218_v62 = vmax.f32 %v1186_v58, 0.0  ;;  %v1187_v63 = vadd.f32 %v22656_v24, %v879_v61  ;;  %v881_v1 = vpop.f32.mrb[11].mxu0 }
 0x14c   : > { %v1289_v2 = vmax.f32 %v1257_v60, 0.0  ;;  %v1258_v4 = vadd.f32 %v22663_v25, %v881_v1 }
 0x14d   : > { %16181 = vst.msk [vmem:[%s22671_s16 + $0x40] sm:$0xff] %vm572_vm2, %v1218_v62  ;;  %v1219_v5 = vmax.f32 %v1187_v63, 0.0  ;;  %v1514_v7 = vld [vmem:[#allocation3 + $0x49] sm:$0xff] }
 0x14e   : > { %1393 = vst.msk [vmem:[#allocation3 + $0x62] sm:$0xff] %vm516_vm3, %v1289_v2  ;;  %v1290_v6 = vmax.f32 %v1258_v4, 0.0  ;;  %v2023_v9 = vld [vmem:[#allocation3 + $0x4a] sm:$0xff] }
 0x14f   : > { %16182 = vst.msk [vmem:[%s22671_s16 + $0x50] sm:$0xff] %vm572_vm2, %v1219_v5  ;;  %v1515_v8 = vld [vmem:[#allocation3 + $0x51] sm:$0xff] }
 0x150   : > { %v2024_v10 = vld [vmem:[#allocation3 + $0x52] sm:$0xff]  ;;  %1394 = vst.msk [vmem:[#allocation3 + $0x6a] sm:$0xff] %vm516_vm3, %v1290_v6  ;;  %v885_v3 = vpop.f32.mrb[12].mxu0  ;;  %v1543_v11 = vpack.c.bf16 %v1515_v8, %v1514_v7 }
 0x151   : > { %v2052_v12 = vpack.c.bf16 %v2024_v10, %v2023_v9  ;;  %v1188_v13 = vadd.f32 %v22656_v24, %v885_v3  ;;  %v887_v14 = vpop.f32.mrb[13].mxu0 }
 0x152   : > { %v1259_v15 = vadd.f32 %v22663_v25, %v887_v14  ;;  %v889_v16 = vpop.f32.mrb[14].mxu0  ;;  %18664 = vmatmul.mubr.msk.bf16.gmra.mrb[84].mxu0 %vm516_vm3, %v1543_v11 }
 0x153   : > { %18740 = vmatmul.mubr.msk.bf16.gmra.mrb[20].mxu1 %vm516_vm3, %v2052_v12  ;;  %v1220_v17 = vmax.f32 %v1188_v13, 0.0  ;;  %v1189_v18 = vadd.f32 %v22656_v24, %v889_v16  ;;  %v891_v19 = vpop.f32.mrb[15].mxu0 }
 0x154   : > { %v1291_v20 = vmax.f32 %v1259_v15, 0.0  ;;  %v1260_v21 = vadd.f32 %v22663_v25, %v891_v19 }
 0x155   : > { %16183 = vst.msk [vmem:[%s22671_s16 + $0x60] sm:$0xff] %vm572_vm2, %v1220_v17  ;;  %v1221_v22 = vmax.f32 %v1189_v18, 0.0  ;;  %v1516_v27 = vld [vmem:[#allocation3 + $0x61] sm:$0xff] }
 0x156   : > { %1395 = vst.msk [vmem:[#allocation3 + $0x7a] sm:$0xff] %vm516_vm3, %v1291_v20  ;;  %v1292_v26 = vmax.f32 %v1260_v21, 0.0  ;;  %v2025_v29 = vld [vmem:[#allocation3 + $0x62] sm:$0xff] }
 0x157   : > { %16184 = vst.msk [vmem:[%s22671_s16 + $0x70] sm:$0xff] %vm572_vm2, %v1221_v22  ;;  %v1517_v28 = vld [vmem:[#allocation3 + $0x69] sm:$0xff] }
 0x158   : > { %v2026_v30 = vld [vmem:[#allocation3 + $0x6a] sm:$0xff]  ;;  %1396 = vst.msk [vmem:[#allocation3 + $0x82] sm:$0xff] %vm516_vm3, %v1292_v26  ;;  %v895_v31 = vpop.f32.mrb[16].mxu0  ;;  %v1544_v32 = vpack.c.bf16 %v1517_v28, %v1516_v27 }
 0x159   : > { %v2053_v33 = vpack.c.bf16 %v2026_v30, %v2025_v29  ;;  %v1190_v34 = vadd.f32 %v22656_v24, %v895_v31  ;;  %v897_v35 = vpop.f32.mrb[17].mxu0 }
 0x15a   : > { %v1261_v37 = vadd.f32 %v22663_v25, %v897_v35  ;;  %v899_v38 = vpop.f32.mrb[18].mxu0  ;;  %18667 = vmatprep.mubr.msk.bf16.mxu0 %vm516_vm3, %v1544_v32 }
 0x15b   : > { %18743 = vmatprep.mubr.msk.bf16.mxu1 %vm516_vm3, %v2053_v33  ;;  %v1222_v39 = vmax.f32 %v1190_v34, 0.0  ;;  %v1191_v40 = vadd.f32 %v22656_v24, %v899_v38  ;;  %v901_v41 = vpop.f32.mrb[19].mxu0 }
 0x15c   : > { %v1293_v42 = vmax.f32 %v1261_v37, 0.0  ;;  %v1262_v43 = vadd.f32 %v22663_v25, %v901_v41 }
 0x15d   : > { %16185 = vst.msk [vmem:[%s22671_s16 + $0x80] sm:$0xff] %vm572_vm2, %v1222_v39  ;;  %v1223_v44 = vmax.f32 %v1191_v40, 0.0  ;;  %v1518_v46 = vld [vmem:[#allocation3 + $0x79] sm:$0xff] }
 0x15e   : > { %1397 = vst.msk [vmem:[#allocation3 + $0x92] sm:$0xff] %vm516_vm3, %v1293_v42  ;;  %v1294_v45 = vmax.f32 %v1262_v43, 0.0  ;;  %v2027_v48 = vld [vmem:[#allocation3 + $0x7a] sm:$0xff] }
 0x15f   : > { %16186 = vst.msk [vmem:[%s22671_s16 + $0x90] sm:$0xff] %vm572_vm2, %v1223_v44  ;;  %v1519_v47 = vld [vmem:[#allocation3 + $0x81] sm:$0xff] }
 0x160   : > { %v2028_v49 = vld [vmem:[#allocation3 + $0x82] sm:$0xff]  ;;  %1398 = vst.msk [vmem:[#allocation3 + $0x9a] sm:$0xff] %vm516_vm3, %v1294_v45  ;;  %v905_v50 = vpop.f32.mrb[20].mxu0  ;;  %v1545_v51 = vpack.c.bf16 %v1519_v47, %v1518_v46 }
 0x161   : > { %v2054_v52 = vpack.c.bf16 %v2028_v49, %v2027_v48  ;;  %v1192_v53 = vadd.f32 %v22656_v24, %v905_v50  ;;  %v907_v54 = vpop.f32.mrb[21].mxu0 }
 0x162   : > { %v1263_v55 = vadd.f32 %v22663_v25, %v907_v54  ;;  %v909_v56 = vpop.f32.mrb[22].mxu0  ;;  %18668 = vmatmul.mubr.msk.bf16.gmra.mrb[88].mxu0 %vm516_vm3, %v1545_v51 }
 0x163   : > { %18744 = vmatmul.mubr.msk.bf16.gmra.mrb[24].mxu1 %vm516_vm3, %v2054_v52  ;;  %v1224_v57 = vmax.f32 %v1192_v53, 0.0  ;;  %v1193_v58 = vadd.f32 %v22656_v24, %v909_v56  ;;  %v911_v59 = vpop.f32.mrb[23].mxu0 }
 0x164   : > { %v1295_v60 = vmax.f32 %v1263_v55, 0.0  ;;  %v1264_v61 = vadd.f32 %v22663_v25, %v911_v59 }
 0x165   : > { %16187 = vst.msk [vmem:[%s22671_s16 + $0xa0] sm:$0xff] %vm572_vm2, %v1224_v57  ;;  %v1225_v62 = vmax.f32 %v1193_v58, 0.0  ;;  %v1520_v1 = vld [vmem:[#allocation3 + $0x91] sm:$0xff] }
 0x166   : > { %1399 = vst.msk [vmem:[#allocation3 + $0xaa] sm:$0xff] %vm516_vm3, %v1295_v60  ;;  %v1296_v63 = vmax.f32 %v1264_v61, 0.0  ;;  %v2029_v4 = vld [vmem:[#allocation3 + $0x92] sm:$0xff] }
 0x167   : > { %16188 = vst.msk [vmem:[%s22671_s16 + $0xb0] sm:$0xff] %vm572_vm2, %v1225_v62  ;;  %v1521_v2 = vld [vmem:[#allocation3 + $0x99] sm:$0xff] }
 0x168   : > { %v2030_v5 = vld [vmem:[#allocation3 + $0x9a] sm:$0xff]  ;;  %1400 = vst.msk [vmem:[#allocation3 + $0xb2] sm:$0xff] %vm516_vm3, %v1296_v63  ;;  %v915_v6 = vpop.f32.mrb[24].mxu0  ;;  %v1546_v7 = vpack.c.bf16 %v1521_v2, %v1520_v1 }
 0x169   : > { %v2055_v8 = vpack.c.bf16 %v2030_v5, %v2029_v4  ;;  %v1194_v9 = vadd.f32 %v22656_v24, %v915_v6  ;;  %v917_v10 = vpop.f32.mrb[25].mxu0 }
 0x16a   : > { %v1265_v3 = vadd.f32 %v22663_v25, %v917_v10  ;;  %v919_v11 = vpop.f32.mrb[26].mxu0  ;;  %18671 = vmatprep.mubr.msk.bf16.mxu0 %vm516_vm3, %v1546_v7 }
 0x16b   : > { %18747 = vmatprep.mubr.msk.bf16.mxu1 %vm516_vm3, %v2055_v8  ;;  %v1226_v12 = vmax.f32 %v1194_v9, 0.0  ;;  %v1195_v13 = vadd.f32 %v22656_v24, %v919_v11  ;;  %v921_v14 = vpop.f32.mrb[27].mxu0  ;;  %v18639_v11 = vpop.f32.mrb[0].mxu1 }
 0x16c   : > { %v1297_v15 = vmax.f32 %v1265_v3, 0.0  ;;  %v1266_v16 = vadd.f32 %v22663_v25, %v921_v14  ;;  %v22856_v3 = vld [vmem:[%s25764_s4] ss:$0 sm:$0xff] }
 0x16d   : > { %16189 = vst.msk [vmem:[%s22671_s16 + $0xc0] sm:$0xff] %vm572_vm2, %v1226_v12  ;;  %v1227_v17 = vmax.f32 %v1195_v13, 0.0  ;;  %v1522_v19 = vld [vmem:[#allocation3 + $0xa9] sm:$0xff]  ;;  %v1342_v14 = vadd.f32 %v18639_v11, %v22856_v3 }
 0x16e   : > { %1401 = vst.msk [vmem:[#allocation3 + $0xc2] sm:$0xff] %vm516_vm3, %v1297_v15  ;;  %v1298_v18 = vmax.f32 %v1266_v16, 0.0  ;;  %v2031_v21 = vld [vmem:[#allocation3 + $0xaa] sm:$0xff]  ;;  %v1112_v15 = vpop.f32.mrb[1].mxu1 }
 0x16f   : > { %16190 = vst.msk [vmem:[%s22671_s16 + $0xd0] sm:$0xff] %vm572_vm2, %v1227_v17  ;;  %v1523_v20 = vld [vmem:[#allocation3 + $0xb1] sm:$0xff]  ;;  %v1340_v17 = vadd.f32 %v22856_v3, %v1112_v15 }
 0x170   : > { %v2032_v22 = vld [vmem:[#allocation3 + $0xb2] sm:$0xff]  ;;  %1402 = vst.msk [vmem:[#allocation3 + $0xca] sm:$0xff] %vm516_vm3, %v1298_v18  ;;  %v925_v26 = vpop.f32.mrb[28].mxu0  ;;  %v1547_v27 = vpack.c.bf16 %v1523_v20, %v1522_v19  ;;  %v18640_v18 = vpop.f32.mrb[2].mxu1 }
 0x171   : > { %v2056_v28 = vpack.c.bf16 %v2032_v22, %v2031_v21  ;;  %v1196_v29 = vadd.f32 %v22656_v24, %v925_v26  ;;  %v927_v30 = vpop.f32.mrb[29].mxu0  ;;  %v1374_v21 = vmax.f32 %v1342_v14, 0.0  ;;  %v1343_v22 = vadd.f32 %v18640_v18, %v22856_v3 }
 0x172   : > { %v1267_v31 = vadd.f32 %v22663_v25, %v927_v30  ;;  %v929_v32 = vpop.f32.mrb[30].mxu0  ;;  %18672 = vmatmul.mubr.msk.bf16.gmra.mrb[92].mxu0 %vm516_vm3, %v1547_v27 }
 0x173   : > { %18748 = vmatmul.mubr.msk.bf16.gmra.mrb[28].mxu1 %vm516_vm3, %v2056_v28  ;;  %v1228_v33 = vmax.f32 %v1196_v29, 0.0  ;;  %v1197_v34 = vadd.f32 %v22656_v24, %v929_v32  ;;  %v931_v35 = vpop.f32.mrb[31].mxu0  ;;  %v1372_v29 = vmax.f32 %v1340_v17, 0.0  ;;  %1440 = vst.msk [vmem:[#allocation4 + $0xf1] sm:$0xff] %vm572_vm2, %v1374_v21 }
 0x174   : > { %v1299_v37 = vmax.f32 %v1267_v31, 0.0  ;;  %v1268_v38 = vadd.f32 %v22663_v25, %v931_v35 }
 0x175   : > { %16191 = vst.msk [vmem:[%s22671_s16 + $0xe0] sm:$0xff] %vm572_vm2, %v1228_v33  ;;  %v1229_v39 = vmax.f32 %v1197_v34, 0.0  ;;  %v1524_v41 = vld [vmem:[#allocation3 + $0xc1] sm:$0xff]  ;;  %v1375_v33 = vmax.f32 %v1343_v22, 0.0  ;;  %1438 = vst.msk [vmem:[#allocation4 + $0xd9] sm:$0xff] %vm572_vm2, %v1372_v29 }
 0x176   : > { %1403 = vst.msk [vmem:[#allocation3 + $0xda] sm:$0xff] %vm516_vm3, %v1299_v37  ;;  %v1300_v40 = vmax.f32 %v1268_v38, 0.0  ;;  %v2033_v43 = vld [vmem:[#allocation3 + $0xc2] sm:$0xff] }
 0x177   : > { %16192 = vst.msk [vmem:[%s22671_s16 + $0xf0] sm:$0xff] %vm572_vm2, %v1229_v39  ;;  %v1525_v42 = vld [vmem:[#allocation3 + $0xc9] sm:$0xff]  ;;  %1441 = vst.msk [vmem:[#allocation4 + $0xf9] sm:$0xff] %vm572_vm2, %v1375_v33  ;;  %v1115_v39 = vpop.f32.mrb[3].mxu1 }
 0x178   : > { %v2034_v44 = vld [vmem:[#allocation3 + $0xca] sm:$0xff]  ;;  %1404 = vst.msk [vmem:[#allocation3 + $0xe2] sm:$0xff] %vm516_vm3, %v1300_v40  ;;  %v935_v45 = vpop.f32.mrb[32].mxu0  ;;  %v1548_v46 = vpack.c.bf16 %v1525_v42, %v1524_v41 }
 0x179   : > { %v2057_v47 = vpack.c.bf16 %v2034_v44, %v2033_v43  ;;  %v1198_v48 = vadd.f32 %v22656_v24, %v935_v45  ;;  %v937_v49 = vpop.f32.mrb[33].mxu0  ;;  %v1341_v43 = vadd.f32 %v22856_v3, %v1115_v39  ;;  %v18643_v44 = vpop.f32.mrb[4].mxu1 }
 0x17a   : > { %v1269_v50 = vadd.f32 %v22663_v25, %v937_v49  ;;  %v939_v51 = vpop.f32.mrb[34].mxu0  ;;  %18675 = vmatprep.mubr.msk.bf16.mxu0 %vm516_vm3, %v1548_v46 }
 0x17b   : > { %18751 = vmatprep.mubr.msk.bf16.mxu1 %vm516_vm3, %v2057_v47  ;;  %v1230_v52 = vmax.f32 %v1198_v48, 0.0  ;;  %v1199_v53 = vadd.f32 %v22656_v24, %v939_v51  ;;  %v941_v54 = vpop.f32.mrb[35].mxu0  ;;  %v1346_v47 = vadd.f32 %v18643_v44, %v22856_v3  ;;  %v1128_v48 = vpop.f32.mrb[5].mxu1 }
 0x17c   : > { %v1301_v55 = vmax.f32 %v1269_v50, 0.0  ;;  %v1270_v56 = vadd.f32 %v22663_v25, %v941_v54  ;;  %v1373_v50 = vmax.f32 %v1341_v43, 0.0  ;;  %v1344_v51 = vadd.f32 %v22856_v3, %v1128_v48 }
 0x17d   : > { %16193 = vst.msk [vmem:[%s22671_s16 + $0x100] sm:$0xff] %vm572_vm2, %v1230_v52  ;;  %v1231_v57 = vmax.f32 %v1199_v53, 0.0  ;;  %v1526_v59 = vld [vmem:[#allocation3 + $0xd9] sm:$0xff]  ;;  %v18644_v52 = vpop.f32.mrb[6].mxu1 }
 0x17e   : > { %1405 = vst.msk [vmem:[#allocation3 + $0xf2] sm:$0xff] %vm516_vm3, %v1301_v55  ;;  %v1302_v58 = vmax.f32 %v1270_v56, 0.0  ;;  %v2035_v61 = vld [vmem:[#allocation3 + $0xda] sm:$0xff]  ;;  %v1378_v55 = vmax.f32 %v1346_v47, 0.0  ;;  %v1347_v56 = vadd.f32 %v18644_v52, %v22856_v3 }
 0x17f   : > { %16194 = vst.msk [vmem:[%s22671_s16 + $0x110] sm:$0xff] %vm572_vm2, %v1231_v57  ;;  %v1527_v60 = vld [vmem:[#allocation3 + $0xe1] sm:$0xff]  ;;  %1439 = vst.msk [vmem:[#allocation4 + $0xe1] sm:$0xff] %vm572_vm2, %v1373_v50 }
 0x180   : > { %v2036_v62 = vld [vmem:[#allocation3 + $0xe2] sm:$0xff]  ;;  %1406 = vst.msk [vmem:[#allocation3 + $0xfa] sm:$0xff] %vm516_vm3, %v1302_v58  ;;  %v945_v63 = vpop.f32.mrb[36].mxu0  ;;  %v1549_v1 = vpack.c.bf16 %v1527_v60, %v1526_v59  ;;  %v1376_v60 = vmax.f32 %v1344_v51, 0.0 }
 0x181   : > { %v2058_v2 = vpack.c.bf16 %v2036_v62, %v2035_v61  ;;  %v1200_v4 = vadd.f32 %v22656_v24, %v945_v63  ;;  %v947_v5 = vpop.f32.mrb[37].mxu0  ;;  %1444 = vst.msk [vmem:[#allocation4 + $0x121] sm:$0xff] %vm572_vm2, %v1378_v55  ;;  %v3605_v0 = vld [vmem:[#allocation3 + $0xe2] sm:$0xff] }
 0x182   : > { %v1271_v6 = vadd.f32 %v22663_v25, %v947_v5  ;;  %v949_v7 = vpop.f32.mrb[38].mxu0  ;;  %18676 = vmatmul.mubr.msk.bf16.gmra.mrb[96].mxu0 %vm516_vm3, %v1549_v1  ;;  %v1379_v1 = vmax.f32 %v1347_v56, 0.0  ;;  %1442 = vst.msk [vmem:[#allocation4 + $0x109] sm:$0xff] %vm572_vm2, %v1376_v60 }
 0x183   : > { %18752 = vmatmul.mubr.msk.bf16.gmra.mrb[32].mxu1 %vm516_vm3, %v2058_v2  ;;  %v1232_v8 = vmax.f32 %v1200_v4, 0.0  ;;  %v1201_v9 = vadd.f32 %v22656_v24, %v949_v7  ;;  %v951_v10 = vpop.f32.mrb[39].mxu0  ;;  %v1131_v7 = vpop.f32.mrb[7].mxu1 }
 0x184   : > { %v1303_v12 = vmax.f32 %v1271_v6, 0.0  ;;  %v1272_v13 = vadd.f32 %v22663_v25, %v951_v10  ;;  %1445 = vst.msk [vmem:[#allocation4 + $0x129] sm:$0xff] %vm572_vm2, %v1379_v1  ;;  %v1345_v11 = vadd.f32 %v22856_v3, %v1131_v7 }
 0x185   : > { %16195 = vst.msk [vmem:[%s22671_s16 + $0x120] sm:$0xff] %vm572_vm2, %v1232_v8  ;;  %v1233_v16 = vmax.f32 %v1201_v9, 0.0  ;;  %v1528_v20 = vld [vmem:[#allocation3 + $0xf1] sm:$0xff] }
 0x186   : > { %1407 = vst.msk [vmem:[#allocation3 + $0x10a] sm:$0xff] %vm516_vm3, %v1303_v12  ;;  %v1304_v19 = vmax.f32 %v1272_v13, 0.0  ;;  %v2037_v27 = vld [vmem:[#allocation3 + $0xf2] sm:$0xff]  ;;  %v18647_v12 = vpop.f32.mrb[8].mxu1  ;;  %v1377_v18 = vmax.f32 %v1345_v11, 0.0 }
 0x187   : > { %16196 = vst.msk [vmem:[%s22671_s16 + $0x130] sm:$0xff] %vm572_vm2, %v1233_v16  ;;  %v1529_v26 = vld [vmem:[#allocation3 + $0xf9] sm:$0xff]  ;;  %v1350_v15 = vadd.f32 %v18647_v12, %v22856_v3  ;;  %v1144_v16 = vpop.f32.mrb[9].mxu1 }
 0x188   : > { %v2038_v28 = vld [vmem:[#allocation3 + $0xfa] sm:$0xff]  ;;  %1408 = vst.msk [vmem:[#allocation3 + $0x112] sm:$0xff] %vm516_vm3, %v1304_v19  ;;  %v955_v30 = vpop.f32.mrb[40].mxu0  ;;  %v1550_v31 = vpack.c.bf16 %v1529_v26, %v1528_v20  ;;  %v1348_v19 = vadd.f32 %v22856_v3, %v1144_v16  ;;  %v18648_v20 = vpop.f32.mrb[10].mxu1 }
 0x189   : > { %v2059_v32 = vpack.c.bf16 %v2038_v28, %v2037_v27  ;;  %v1202_v34 = vadd.f32 %v22656_v24, %v955_v30  ;;  %v957_v35 = vpop.f32.mrb[41].mxu0  ;;  %v1382_v26 = vmax.f32 %v1350_v15, 0.0  ;;  %v1351_v27 = vadd.f32 %v18648_v20, %v22856_v3  ;;  %1443 = vst.msk [vmem:[#allocation4 + $0x111] sm:$0xff] %vm572_vm2, %v1377_v18 }
 0x18a   : > { %v1273_v37 = vadd.f32 %v22663_v25, %v957_v35  ;;  %v959_v38 = vpop.f32.mrb[42].mxu0  ;;  %18679 = vmatprep.mubr.msk.bf16.mxu0 %vm516_vm3, %v1550_v31  ;;  %v1380_v31 = vmax.f32 %v1348_v19, 0.0 }
 0x18b   : > { %18755 = vmatprep.mubr.msk.bf16.mxu1 %vm516_vm3, %v2059_v32  ;;  %v1234_v40 = vmax.f32 %v1202_v34, 0.0  ;;  %v1203_v41 = vadd.f32 %v22656_v24, %v959_v38  ;;  %v961_v42 = vpop.f32.mrb[43].mxu0  ;;  %1448 = vst.msk [vmem:[#allocation4 + $0x151] sm:$0xff] %vm572_vm2, %v1382_v26  ;;  %v1383_v35 = vmax.f32 %v1351_v27, 0.0 }
 0x18c   : > { %v1305_v45 = vmax.f32 %v1273_v37, 0.0  ;;  %v1274_v46 = vadd.f32 %v22663_v25, %v961_v42  ;;  %1446 = vst.msk [vmem:[#allocation4 + $0x139] sm:$0xff] %vm572_vm2, %v1380_v31 }
 0x18d   : > { %16197 = vst.msk [vmem:[%s22671_s16 + $0x140] sm:$0xff] %vm572_vm2, %v1234_v40  ;;  %v1235_v49 = vmax.f32 %v1203_v41, 0.0  ;;  %v1530_v54 = vld [vmem:[#allocation3 + $0x109] sm:$0xff]  ;;  %1449 = vst.msk [vmem:[#allocation4 + $0x159] sm:$0xff] %vm572_vm2, %v1383_v35  ;;  %v1147_v41 = vpop.f32.mrb[11].mxu1 }
 0x18e   : > { %1409 = vst.msk [vmem:[#allocation3 + $0x122] sm:$0xff] %vm516_vm3, %v1305_v45  ;;  %v1306_v53 = vmax.f32 %v1274_v46, 0.0  ;;  %v2039_v58 = vld [vmem:[#allocation3 + $0x10a] sm:$0xff]  ;;  %v1349_v45 = vadd.f32 %v22856_v3, %v1147_v41  ;;  %v18651_v46 = vpop.f32.mrb[12].mxu1 }
 0x18f   : > { %16198 = vst.msk [vmem:[%s22671_s16 + $0x150] sm:$0xff] %vm572_vm2, %v1235_v49  ;;  %v1531_v57 = vld [vmem:[#allocation3 + $0x111] sm:$0xff]  ;;  %v1354_v49 = vadd.f32 %v18651_v46, %v22856_v3  ;;  %v1160_v50 = vpop.f32.mrb[13].mxu1 }
 0x190   : > { %v2040_v59 = vld [vmem:[#allocation3 + $0x112] sm:$0xff]  ;;  %1410 = vst.msk [vmem:[#allocation3 + $0x12a] sm:$0xff] %vm516_vm3, %v1306_v53  ;;  %v965_v61 = vpop.f32.mrb[44].mxu0  ;;  %v1551_v62 = vpack.c.bf16 %v1531_v57, %v1530_v54  ;;  %v1381_v52 = vmax.f32 %v1349_v45, 0.0  ;;  %v1352_v53 = vadd.f32 %v22856_v3, %v1160_v50  ;;  %v18652_v54 = vpop.f32.mrb[14].mxu1 }
 0x191   : > { %v2060_v63 = vpack.c.bf16 %v2040_v59, %v2039_v58  ;;  %v1204_v2 = vadd.f32 %v22656_v24, %v965_v61  ;;  %v967_v4 = vpop.f32.mrb[45].mxu0  ;;  %v1386_v57 = vmax.f32 %v1354_v49, 0.0  ;;  %v1355_v58 = vadd.f32 %v18652_v54, %v22856_v3 }
 0x192   : > { %v1275_v5 = vadd.f32 %v22663_v25, %v967_v4  ;;  %v969_v6 = vpop.f32.mrb[46].mxu0  ;;  %18680 = vmatmul.mubr.msk.bf16.gmra.mrb[100].mxu0 %vm516_vm3, %v1551_v62  ;;  %1447 = vst.msk [vmem:[#allocation4 + $0x141] sm:$0xff] %vm572_vm2, %v1381_v52  ;;  %v1384_v62 = vmax.f32 %v1352_v53, 0.0 }
 0x193   : > { %18756 = vmatmul.mubr.msk.bf16.gmra.mrb[36].mxu1 %vm516_vm3, %v2060_v63  ;;  %v1236_v8 = vmax.f32 %v1204_v2, 0.0  ;;  %v1205_v9 = vadd.f32 %v22656_v24, %v969_v6  ;;  %v971_v10 = vpop.f32.mrb[47].mxu0  ;;  %1452 = vst.msk [vmem:[#allocation4 + $0x181] sm:$0xff] %vm572_vm2, %v1386_v57  ;;  %v1387_v4 = vmax.f32 %v1355_v58, 0.0 }
 0x194   : > { %v1307_v13 = vmax.f32 %v1275_v5, 0.0  ;;  %v1276_v14 = vadd.f32 %v22663_v25, %v971_v10  ;;  %1450 = vst.msk [vmem:[#allocation4 + $0x169] sm:$0xff] %vm572_vm2, %v1384_v62 }
 0x195   : > { %16199 = vst.msk [vmem:[%s22671_s16 + $0x160] sm:$0xff] %vm572_vm2, %v1236_v8  ;;  %v1237_v17 = vmax.f32 %v1205_v9, 0.0  ;;  %v1532_v22 = vld [vmem:[#allocation3 + $0x121] sm:$0xff]  ;;  %1453 = vst.msk [vmem:[#allocation4 + $0x189] sm:$0xff] %vm572_vm2, %v1387_v4  ;;  %v1163_v9 = vpop.f32.mrb[15].mxu1 }
 0x196   : > { %1411 = vst.msk [vmem:[#allocation3 + $0x13a] sm:$0xff] %vm516_vm3, %v1307_v13  ;;  %v1308_v21 = vmax.f32 %v1276_v14, 0.0  ;;  %v2041_v29 = vld [vmem:[#allocation3 + $0x122] sm:$0xff]  ;;  %v1353_v13 = vadd.f32 %v22856_v3, %v1163_v9 }
 0x197   : > { %16200 = vst.msk [vmem:[%s22671_s16 + $0x170] sm:$0xff] %vm572_vm2, %v1237_v17  ;;  %v1533_v28 = vld [vmem:[#allocation3 + $0x129] sm:$0xff] }
 0x198   : > { %v2042_v30 = vld [vmem:[#allocation3 + $0x12a] sm:$0xff]  ;;  %1412 = vst.msk [vmem:[#allocation3 + $0x142] sm:$0xff] %vm516_vm3, %v1308_v21  ;;  %v975_v32 = vpop.f32.mrb[48].mxu0  ;;  %v1552_v33 = vpack.c.bf16 %v1533_v28, %v1532_v22  ;;  %v1385_v17 = vmax.f32 %v1353_v13, 0.0 }
 0x199   : > { %v2061_v34 = vpack.c.bf16 %v2042_v30, %v2041_v29  ;;  %v1206_v37 = vadd.f32 %v22656_v24, %v975_v32  ;;  %v977_v38 = vpop.f32.mrb[49].mxu0 }
 0x19a   : > { %v1277_v39 = vadd.f32 %v22663_v25, %v977_v38  ;;  %v979_v40 = vpop.f32.mrb[50].mxu0  ;;  %18683 = vmatprep.mubr.msk.bf16.mxu0 %vm516_vm3, %v1552_v33  ;;  %1451 = vst.msk [vmem:[#allocation4 + $0x171] sm:$0xff] %vm572_vm2, %v1385_v17  ;;  %v1454_v33 = vld [vmem:[#allocation3] sm:$0xff]  ;;  %v1455_v38 = vld [vmem:[#allocation3 + $0x8] sm:$0xff] }
 0x19b   : > { %18759 = vmatprep.mubr.msk.bf16.mxu1 %vm516_vm3, %v2061_v34  ;;  %v1238_v42 = vmax.f32 %v1206_v37, 0.0  ;;  %v1207_v43 = vadd.f32 %v22656_v24, %v979_v40  ;;  %v981_v44 = vpop.f32.mrb[51].mxu0  ;;  %v2332_v40 = vld [vmem:[#allocation3 + $0xb] sm:$0xff]  ;;  %v1486_v49 = vpack.c.bf16 %v1455_v38, %v1454_v33 }
 0x19c   : > { %v1309_v47 = vmax.f32 %v1277_v39, 0.0  ;;  %v1278_v48 = vadd.f32 %v22663_v25, %v981_v44  ;;  %v2331_v39 = vld [vmem:[#allocation3 + $0x3] sm:$0xff] }
 0x19d   : > { %16201 = vst.msk [vmem:[%s22671_s16 + $0x180] sm:$0xff] %vm572_vm2, %v1238_v42  ;;  %v1239_v51 = vmax.f32 %v1207_v43, 0.0  ;;  %v1534_v56 = vld [vmem:[#allocation3 + $0x139] sm:$0xff]  ;;  %v2363_v50 = vpack.c.bf16 %v2332_v40, %v2331_v39  ;;  %v1463_v33 = vld [vmem:[#allocation3 + $0x68] sm:$0xff] }
 0x19e   : > { %1413 = vst.msk [vmem:[#allocation3 + $0x152] sm:$0xff] %vm516_vm3, %v1309_v47  ;;  %v1310_v55 = vmax.f32 %v1278_v48, 0.0  ;;  %v2043_v60 = vld [vmem:[#allocation3 + $0x13a] sm:$0xff] }
 0x19f   : > { %16202 = vst.msk [vmem:[%s22671_s16 + $0x190] sm:$0xff] %vm572_vm2, %v1239_v51  ;;  %v1535_v59 = vld [vmem:[#allocation3 + $0x141] sm:$0xff] }
 0x1a0   : > { %v2044_v61 = vld [vmem:[#allocation3 + $0x142] sm:$0xff]  ;;  %1414 = vst.msk [vmem:[#allocation3 + $0x15a] sm:$0xff] %vm516_vm3, %v1310_v55  ;;  %v985_v63 = vpop.f32.mrb[52].mxu0  ;;  %v1553_v1 = vpack.c.bf16 %v1535_v59, %v1534_v56  ;;  %v1456_v56 = vld [vmem:[#allocation3 + $0x18] sm:$0xff] }
 0x1a1   : > { %v2062_v2 = vpack.c.bf16 %v2044_v61, %v2043_v60  ;;  %v1208_v5 = vadd.f32 %v22656_v24, %v985_v63  ;;  %v987_v6 = vpop.f32.mrb[53].mxu0  ;;  %v1457_v59 = vld [vmem:[#allocation3 + $0x20] sm:$0xff] }
 0x1a2   : > { %v1279_v7 = vadd.f32 %v22663_v25, %v987_v6  ;;  %v989_v8 = vpop.f32.mrb[54].mxu0  ;;  %18684 = vmatmul.mubr.msk.bf16.gmra.mrb[104].mxu0 %vm516_vm3, %v1553_v1  ;;  %v2333_v60 = vld [vmem:[#allocation3 + $0x1b] sm:$0xff]  ;;  %v2334_v61 = vld [vmem:[#allocation3 + $0x23] sm:$0xff]  ;;  %v22967_v6 = vpack.c.bf16 %v1457_v59, %v1456_v56 }
 0x1a3   : > { %18760 = vmatmul.mubr.msk.bf16.gmra.mrb[40].mxu1 %vm516_vm3, %v2062_v2  ;;  %v1240_v10 = vmax.f32 %v1208_v5, 0.0  ;;  %v1209_v11 = vadd.f32 %v22656_v24, %v989_v8  ;;  %v991_v12 = vpop.f32.mrb[55].mxu0  ;;  %v1459_v8 = vld [vmem:[#allocation3 + $0x38] sm:$0xff]  ;;  %v1462_v40 = vld [vmem:[#allocation3 + $0x60] sm:$0xff] }
 0x1a4   : > { %v1311_v14 = vmax.f32 %v1279_v7, 0.0  ;;  %v1280_v15 = vadd.f32 %v22663_v25, %v991_v12  ;;  %v2364_v7 = vpack.c.bf16 %v2334_v61, %v2333_v60  ;;  %v1458_v12 = vld [vmem:[#allocation3 + $0x30] sm:$0xff]  ;;  %v2341_v56 = vld [vmem:[#allocation3 + $0x7b] sm:$0xff] }
 0x1a5   : > { %16203 = vst.msk [vmem:[%s22671_s16 + $0x1a0] sm:$0xff] %vm572_vm2, %v1240_v10  ;;  %v1241_v16 = vmax.f32 %v1209_v11, 0.0  ;;  %v1536_v19 = vld [vmem:[#allocation3 + $0x151] sm:$0xff]  ;;  %v2336_v11 = vld [vmem:[#allocation3 + $0x3b] sm:$0xff]  ;;  %v1488_v13 = vpack.c.bf16 %v1459_v8, %v1458_v12 }
 0x1a6   : > { %1415 = vst.msk [vmem:[#allocation3 + $0x16a] sm:$0xff] %vm516_vm3, %v1311_v14  ;;  %v1312_v18 = vmax.f32 %v1280_v15, 0.0  ;;  %v2045_v21 = vld [vmem:[#allocation3 + $0x152] sm:$0xff]  ;;  %v21763_v14 = vld [vmem:[%s25765_s5 + $0x68] sm:$0xff]  }
 0x1a7   : > { %16204 = vst.msk [vmem:[%s22671_s16 + $0x1b0] sm:$0xff] %vm572_vm2, %v1241_v16  ;;  %v1537_v20 = vld [vmem:[#allocation3 + $0x159] sm:$0xff] }
 0x1a8   : > { %v2046_v22 = vld [vmem:[#allocation3 + $0x15a] sm:$0xff]  ;;  %1416 = vst.msk [vmem:[#allocation3 + $0x172] sm:$0xff] %vm516_vm3, %v1312_v18  ;;  %v1554_v26 = vpack.c.bf16 %v1537_v20, %v1536_v19  ;;  %v995_v28 = vpop.f32.mrb[56].mxu0 }
 0x1a9   : > { %v2063_v27 = vpack.c.bf16 %v2046_v22, %v2045_v21  ;;  %v1210_v29 = vadd.f32 %v22656_v24, %v995_v28  ;;  %v997_v30 = vpop.f32.mrb[57].mxu0  ;;  %v2335_v10 = vld [vmem:[#allocation3 + $0x33] sm:$0xff]  ;;  %v23009_v59 = vld [vmem:[#allocation6] sm:$0xff]  }
 0x1aa   : > { %18687 = vmatprep.mubr.msk.bf16.mxu0 %vm516_vm3, %v1554_v26  ;;  %v1281_v31 = vadd.f32 %v22663_v25, %v997_v30  ;;  %v999_v32 = vpop.f32.mrb[58].mxu0  ;;  %v2365_v17 = vpack.c.bf16 %v2336_v11, %v2335_v10  ;;  %v1461_v26 = vld [vmem:[#allocation3 + $0x50] sm:$0xff]  ;;  %v1467_v60 = vld [vmem:[#allocation3 + $0x98] sm:$0xff] }
 0x1ab   : > { %18763 = vmatprep.mubr.msk.bf16.mxu1 %vm516_vm3, %v2063_v27  ;;  %v1242_v34 = vmax.f32 %v1210_v29, 0.0  ;;  %v1211_v35 = vadd.f32 %v22656_v24, %v999_v32  ;;  %v1001_v37 = vpop.f32.mrb[59].mxu0  ;;  %v21765_v27 = vld [vmem:[%s25765_s5 + $0x70] sm:$0xff]   ;;  %v2343_v61 = vld [vmem:[#allocation3 + $0x93] sm:$0xff] }
 0x1ac   : > { %v1313_v41 = vmax.f32 %v1281_v31, 0.0  ;;  %v1282_v42 = vadd.f32 %v22663_v25, %v1001_v37  ;;  %v2337_v30 = vld [vmem:[#allocation3 + $0x4b] sm:$0xff] }
 0x1ad   : > { %16205 = vst.msk [vmem:[%s22671_s16 + $0x1c0] sm:$0xff] %vm572_vm2, %v1242_v34  ;;  %v1243_v43 = vmax.f32 %v1211_v35, 0.0  ;;  %v1538_v44 = vld [vmem:[#allocation3 + $0x169] sm:$0xff] }
 0x1ae   : > { %1417 = vst.msk [vmem:[#allocation3 + $0x182] sm:$0xff] %vm516_vm3, %v1313_v41  ;;  %v1314_v45 = vmax.f32 %v1282_v42, 0.0  ;;  %v2047_v47 = vld [vmem:[#allocation3 + $0x16a] sm:$0xff]  ;;  %v1490_v42 = vpack.c.bf16 %v1463_v33, %v1462_v40 }
 0x1af   : > { %v1539_v46 = vld [vmem:[#allocation3 + $0x171] sm:$0xff]  ;;  %16206 = vst.msk [vmem:[%s22671_s16 + $0x1d0] sm:$0xff] %vm572_vm2, %v1243_v43  ;;  %v2339_v34 = vld [vmem:[#allocation3 + $0x63] sm:$0xff] }
 0x1b0   : > { %v2048_v48 = vld [vmem:[#allocation3 + $0x172] sm:$0xff]  ;;  %v1555_v51 = vpack.c.bf16 %v1539_v46, %v1538_v44  ;;  %1418 = vst.msk [vmem:[#allocation3 + $0x18a] sm:$0xff] %vm516_vm3, %v1314_v45  ;;  %v1005_v53 = vpop.f32.mrb[60].mxu0  ;;  %v1460_v37 = vld [vmem:[#allocation3 + $0x48] sm:$0xff] }
 0x1b1   : > { %v2064_v52 = vpack.c.bf16 %v2048_v48, %v2047_v47  ;;  %v1212_v54 = vadd.f32 %v22656_v24, %v1005_v53  ;;  %v1007_v55 = vpop.f32.mrb[61].mxu0  ;;  %v21764_v31 = vld [vmem:[#allocation6 + $0x30] sm:$0xff]   ;;  %v1489_v38 = vpack.c.bf16 %v1461_v26, %v1460_v37  ;;  %v21766_v44 = vld [vmem:[#allocation6 + $0x38] sm:$0xff]   ;;  %v1465_v53 = vld [vmem:[#allocation3 + $0x80] sm:$0xff] }
 0x1b2   : > { %18688 = vmatmul.mubr.msk.bf16.gmra.mrb[108].mxu0 %vm516_vm3, %v1555_v51  ;;  %v1283_v57 = vadd.f32 %v22663_v25, %v1007_v55  ;;  %v1009_v58 = vpop.f32.mrb[62].mxu0  ;;  %v2340_v35 = vld [vmem:[#allocation3 + $0x6b] sm:$0xff] }
 0x1b3   : > { %18764 = vmatmul.mubr.msk.bf16.gmra.mrb[44].mxu1 %vm516_vm3, %v2064_v52  ;;  %18697 = vmatprep.mubr.msk.bf16.mxu0 %vm516_vm3, %v1486_v49  ;;  %v1244_v62 = vmax.f32 %v1212_v54, 0.0  ;;  %v1213_v63 = vadd.f32 %v22656_v24, %v1009_v58  ;;  %v1011_v1 = vpop.f32.mrb[63].mxu0  ;;  %v2367_v43 = vpack.c.bf16 %v2340_v35, %v2339_v34  ;;  %v22998_v47 = vld [vmem:[%s25765_s5 + $0x78] sm:$0xff]  }
 0x1b4   : > { %18773 = vmatprep.mubr.msk.bf16.mxu1 %vm516_vm3, %v2363_v50  ;;  %v1315_v2 = vmax.f32 %v1283_v57, 0.0  ;;  %v1284_v4 = vadd.f32 %v22663_v25, %v1011_v1  ;;  %v21762_v25 = vld [vmem:[#allocation6 + $0x28] sm:$0xff]   ;;  %v1464_v1 = vld [vmem:[#allocation3 + $0x78] sm:$0xff] }
 0x1b5   : > { %16207 = vst.msk [vmem:[%s22671_s16 + $0x1e0] sm:$0xff] %vm572_vm2, %v1244_v62  ;;  %v1245_v5 = vmax.f32 %v1213_v63, 0.0  ;;  %v2342_v57 = vld [vmem:[#allocation3 + $0x83] sm:$0xff]  ;;  %v2344_v62 = vld [vmem:[#allocation3 + $0x9b] sm:$0xff]  ;;  %v2348_v26 = vld [vmem:[#allocation3 + $0xcb] sm:$0xff] }
 0x1b6   : > { %1419 = vst.msk [vmem:[#allocation3 + $0x19a] sm:$0xff] %vm516_vm3, %v1315_v2  ;;  %v1316_v9 = vmax.f32 %v1284_v4, 0.0  ;;  %v1491_v2 = vpack.c.bf16 %v1465_v53, %v1464_v1  ;;  %v2368_v4 = vpack.c.bf16 %v2342_v57, %v2341_v56  ;;  %v1477_v57 = vld [vmem:[#allocation3 + $0x110] sm:$0xff]  ;;  %v1476_v1 = vld [vmem:[#allocation3 + $0x108] sm:$0xff] }
 0x1b7   : > { %16208 = vst.msk [vmem:[%s22671_s16 + $0x1f0] sm:$0xff] %vm572_vm2, %v1245_v5  ;;  %v1466_v5 = vld [vmem:[#allocation3 + $0x90] sm:$0xff] }
 0x1b8   : > { %1420 = vst.msk [vmem:[#allocation3 + $0x1a2] sm:$0xff] %vm516_vm3, %v1316_v9  ;;  %v18623_v24 = vpop.f32.mrb[64].mxu0  ;;  %v1492_v8 = vpack.c.bf16 %v1467_v60, %v1466_v5  ;;  %v2369_v9 = vpack.c.bf16 %v2344_v62, %v2343_v61  ;;  %v2354_v60 = vld [vmem:[#allocation3 + $0x113] sm:$0xff]  ;;  %v1479_v61 = vld [vmem:[#allocation3 + $0x128] sm:$0xff]  ;;  %v1478_v5 = vld [vmem:[#allocation3 + $0x120] sm:$0xff] }
 0x1b9   : > { %v1326_v15 = vadd.f32 %v18623_v24, %v22856_v3  ;;  %v1048_v16 = vpop.f32.mrb[65].mxu0  ;;  %v2355_v62 = vld [vmem:[#allocation3 + $0x123] sm:$0xff] }
 0x1ba   : > { %18698 = vmatmul.mubr.msk.bf16.vlgmr.msra.gmra.mrb[80].mxu0 %vm516_vm3, %v22967_v6  ;;  %v1324_v18 = vadd.f32 %v22856_v3, %v1048_v16  ;;  %v18624_v19 = vpop.f32.mrb[66].mxu0 }
 0x1bb   : > { %18774 = vmatmul.mubr.msk.bf16.vlgmr.msra.gmra.mrb[16].mxu1 %vm516_vm3, %v2364_v7  ;;  %18701 = vmatprep.mubr.msk.bf16.mxu0 %vm516_vm3, %v1488_v13  ;;  %v1358_v20 = vmax.f32 %v1326_v15, 0.0  ;;  %v1327_v21 = vadd.f32 %v18624_v19, %v22856_v3  ;;  %v1051_v22 = vpop.f32.mrb[67].mxu0  ;;  %v2346_v19 = vld [vmem:[#allocation3 + $0xb3] sm:$0xff] }
 0x1bc   : > { %18806 = vmatpush3.bf16.msra.mxu1 %v22649_v23  ;;  %18777 = vmatprep.mubr.msk.bf16.mxu1 %vm516_vm3, %v2365_v17  ;;  %v1356_v28 = vmax.f32 %v1324_v18, 0.0  ;;  %v1325_v29 = vadd.f32 %v22856_v3, %v1051_v22  ;;  %v2338_v23 = vld [vmem:[#allocation3 + $0x53] sm:$0xff]  ;;  %v2345_v18 = vld [vmem:[#allocation3 + $0xab] sm:$0xff]  ;;  %v2347_v22 = vld [vmem:[#allocation3 + $0xc3] sm:$0xff] }
 0x1bd   : > { %19604 = vmatpush3.bf16.msra.mxu0 %v22669_v36  ;;  %18807 = vmatprep.subr.bf16.mxu1 %v21763_v14  ;;  %1424 = vst.msk [vmem:[#allocation4 + $0x31] sm:$0xff] %vm572_vm2, %v1358_v20  ;;  %v1359_v32 = vmax.f32 %v1327_v21, 0.0  ;;  %v2366_v39 = vpack.c.bf16 %v2338_v23, %v2337_v30  ;;  %v1469_v17 = vld [vmem:[#allocation3 + $0xb0] sm:$0xff]  ;;  %v1471_v21 = vld [vmem:[#allocation3 + $0xc8] sm:$0xff]  ;;  %v2370_v30 = vpack.c.bf16 %v2346_v19, %v2345_v18  ;;  %v1470_v23 = vld [vmem:[#allocation3 + $0xc0] sm:$0xff] }
 0x1be   : > { %19605 = vmatprep.subr.bf16.mxu0 %v21762_v25  ;;  %1422 = vst.msk [vmem:[#allocation4 + $0x19] sm:$0xff] %vm572_vm2, %v1356_v28  ;;  %v1357_v36 = vmax.f32 %v1325_v29, 0.0  ;;  %v1468_v28 = vld [vmem:[#allocation3 + $0xa8] sm:$0xff]  ;;  %v2371_v33 = vpack.c.bf16 %v2348_v26, %v2347_v22  ;;  %v1485_v26 = vld [vmem:[#allocation3 + $0x170] sm:$0xff] }
 0x1bf   : > { %1425 = vst.msk [vmem:[#allocation4 + $0x39] sm:$0xff] %vm572_vm2, %v1359_v32  ;;  %v23026_v29 = vpack.c.bf16 %v1469_v17, %v1468_v28  ;;  %v1494_v32 = vpack.c.bf16 %v1471_v21, %v1470_v23  ;;  %v2645_v19 = vld [vmem:[#allocation3 + $0x4] sm:$0xff]  ;;  %v2362_v28 = vld [vmem:[#allocation3 + $0x173] sm:$0xff] }
 0x1c0   : > { %18808 = vmatpush3.bf16.msra.mxu1 %v21763_v14  ;;  %1423 = vst.msk [vmem:[#allocation4 + $0x21] sm:$0xff] %vm572_vm2, %v1357_v36  ;;  %v18627_v41 = vpop.f32.mrb[68].mxu0  ;;  %v9369_v21 = vld [vmem:[#allocation4 + $0x1] sm:$0xff]  ;;  %v9370_v22 = vld [vmem:[#allocation4 + $0x9] sm:$0xff] }
 0x1c1   : > { %19606 = vmatpush3.bf16.msra.mxu0 %v21762_v25  ;;  %18809 = vmatprep.subr.bf16.mxu1 %v21765_v27  ;;  %v1330_v45 = vadd.f32 %v18627_v41, %v22856_v3  ;;  %v1064_v46 = vpop.f32.mrb[69].mxu0 }
 0x1c2   : > { %19607 = vmatprep.subr.bf16.mxu0 %v21764_v31  ;;  %18702 = vmatmul.mubr.msk.bf16.gmra.mrb[84].mxu0 %vm516_vm3, %v1489_v38  ;;  %v1328_v48 = vadd.f32 %v22856_v3, %v1064_v46  ;;  %v18628_v49 = vpop.f32.mrb[70].mxu0 }
 0x1c3   : > { %18778 = vmatmul.mubr.msk.bf16.gmra.mrb[20].mxu1 %vm516_vm3, %v2366_v39  ;;  %18705 = vmatprep.mubr.msk.bf16.mxu0 %vm516_vm3, %v1490_v42  ;;  %v1362_v50 = vmax.f32 %v1330_v45, 0.0  ;;  %v1331_v51 = vadd.f32 %v18628_v49, %v22856_v3  ;;  %v1067_v52 = vpop.f32.mrb[71].mxu0  ;;  %v2350_v45 = vld [vmem:[#allocation3 + $0xe3] sm:$0xff]  ;;  %v2351_v49 = vld [vmem:[#allocation3 + $0xf3] sm:$0xff] }
 0x1c4   : > { %18781 = vmatprep.mubr.msk.bf16.mxu1 %vm516_vm3, %v2367_v43  ;;  %18810 = vmatpush3.bf16.msra.mxu1 %v21765_v27  ;;  %v1360_v54 = vmax.f32 %v1328_v48, 0.0  ;;  %v1329_v55 = vadd.f32 %v22856_v3, %v1067_v52  ;;  %v1473_v43 = vld [vmem:[#allocation3 + $0xe0] sm:$0xff]  ;;  %v1475_v48 = vld [vmem:[#allocation3 + $0xf8] sm:$0xff] }
 0x1c5   : > { %19608 = vmatpush3.bf16.msra.mxu0 %v21764_v31  ;;  %1428 = vst.msk [vmem:[#allocation4 + $0x61] sm:$0xff] %vm572_vm2, %v1362_v50  ;;  %v1363_v58 = vmax.f32 %v1331_v51, 0.0  ;;  %18843 = vmatprep.subr.bf16.mxu1 %v22998_v47  ;;  %v2352_v50 = vld [vmem:[#allocation3 + $0xfb] sm:$0xff] }
 0x1c6   : > { %19609 = vmatprep.subr.bf16.mxu0 %v21766_v44  ;;  %1426 = vst.msk [vmem:[#allocation4 + $0x49] sm:$0xff] %vm572_vm2, %v1360_v54  ;;  %v1361_v63 = vmax.f32 %v1329_v55, 0.0  ;;  %v1472_v52 = vld [vmem:[#allocation3 + $0xd8] sm:$0xff]  ;;  %v1474_v55 = vld [vmem:[#allocation3 + $0xf0] sm:$0xff]  ;;  %v2373_v56 = vpack.c.bf16 %v2352_v50, %v2351_v49 }
 0x1c7   : > { %1429 = vst.msk [vmem:[#allocation4 + $0x69] sm:$0xff] %vm572_vm2, %v1363_v58  ;;  %v1495_v53 = vpack.c.bf16 %v1473_v43, %v1472_v52  ;;  %v2353_v58 = vld [vmem:[#allocation3 + $0x10b] sm:$0xff]  ;;  %v2650_v43 = vld [vmem:[#allocation3 + $0x3c] sm:$0xff] }
 0x1c8   : > { %1427 = vst.msk [vmem:[#allocation4 + $0x51] sm:$0xff] %vm572_vm2, %v1361_v63  ;;  %v18631_v7 = vpop.f32.mrb[72].mxu0  ;;  %v2356_v63 = vld [vmem:[#allocation3 + $0x12b] sm:$0xff] }
 0x1c9   : > { %19610 = vmatpush3.bf16.msra.mxu0 %v21766_v44  ;;  %v1334_v10 = vadd.f32 %v18631_v7, %v22856_v3  ;;  %v1080_v11 = vpop.f32.mrb[73].mxu0  ;;  %v2349_v44 = vld [vmem:[#allocation3 + $0xdb] sm:$0xff]  ;;  %v23051_v7 = vpack.c.bf16 %v1479_v61, %v1478_v5 }
 0x1ca   : > { %19643 = vmatprep.subr.bf16.mxu0 %v23009_v59  ;;  %18706 = vmatmul.mubr.msk.bf16.gmra.mrb[88].mxu0 %vm516_vm3, %v1491_v2  ;;  %v1332_v12 = vadd.f32 %v22856_v3, %v1080_v11  ;;  %v18632_v24 = vpop.f32.mrb[74].mxu0  ;;  %v2372_v54 = vpack.c.bf16 %v2350_v45, %v2349_v44  ;;  %v23049_v2 = vpack.c.bf16 %v1477_v57, %v1476_v1  ;;  %v2358_v11 = vld [vmem:[#allocation3 + $0x143] sm:$0xff] }
 0x1cb   : > { %18782 = vmatmul.mubr.msk.bf16.gmra.mrb[24].mxu1 %vm516_vm3, %v2368_v4  ;;  %18709 = vmatprep.mubr.msk.bf16.mxu0 %vm516_vm3, %v1492_v8  ;;  %v1366_v13 = vmax.f32 %v1334_v10, 0.0  ;;  %v1335_v25 = vadd.f32 %v18632_v24, %v22856_v3  ;;  %v1083_v14 = vpop.f32.mrb[75].mxu0  ;;  %v2374_v4 = vpack.c.bf16 %v2354_v60, %v2353_v58  ;;  %v2375_v8 = vpack.c.bf16 %v2356_v63, %v2355_v62  ;;  %v2357_v10 = vld [vmem:[#allocation3 + $0x13b] sm:$0xff]  ;;  %v2359_v24 = vld [vmem:[#allocation3 + $0x153] sm:$0xff]  ;;  %v2653_v57 = vld [vmem:[#allocation3 + $0x64] sm:$0xff] }
 0x1cc   : > { %18785 = vmatprep.mubr.msk.bf16.mxu1 %vm516_vm3, %v2369_v9  ;;  %v1364_v15 = vmax.f32 %v1332_v12, 0.0  ;;  %v1333_v16 = vadd.f32 %v22856_v3, %v1083_v14  ;;  %v1481_v9 = vld [vmem:[#allocation3 + $0x140] sm:$0xff]  ;;  %v1483_v12 = vld [vmem:[#allocation3 + $0x158] sm:$0xff]  ;;  %v2654_v58 = vld [vmem:[#allocation3 + $0x6c] sm:$0xff] }
 0x1cd   : > { %1432 = vst.msk [vmem:[#allocation4 + $0x91] sm:$0xff] %vm572_vm2, %v1366_v13  ;;  %v1367_v20 = vmax.f32 %v1335_v25, 0.0  ;;  %v2360_v13 = vld [vmem:[#allocation3 + $0x15b] sm:$0xff]  ;;  %v9375_v49 = vld [vmem:[#allocation4 + $0x49] sm:$0xff] }
 0x1ce   : > { %1430 = vst.msk [vmem:[#allocation4 + $0x79] sm:$0xff] %vm572_vm2, %v1364_v15  ;;  %v1365_v27 = vmax.f32 %v1333_v16, 0.0  ;;  %v1480_v25 = vld [vmem:[#allocation3 + $0x138] sm:$0xff]  ;;  %v2376_v15 = vpack.c.bf16 %v2358_v11, %v2357_v10  ;;  %v1482_v16 = vld [vmem:[#allocation3 + $0x150] sm:$0xff]  ;;  %v2377_v18 = vpack.c.bf16 %v2360_v13, %v2359_v24  ;;  %v23091_v63 = vld [vmem:[%s25765_s5 + $0x90] sm:$0xff]  }
 0x1cf   : > { %1433 = vst.msk [vmem:[#allocation4 + $0x99] sm:$0xff] %vm572_vm2, %v1367_v20  ;;  %v23059_v14 = vpack.c.bf16 %v1481_v9, %v1480_v25  ;;  %v23061_v17 = vpack.c.bf16 %v1483_v12, %v1482_v16  ;;  %v2646_v20 = vld [vmem:[#allocation3 + $0xc] sm:$0xff]  ;;  %v21773_v62 = vld [vmem:[#allocation6 + $0x18] sm:$0xff]   ;;  %v2656_v10 = vld [vmem:[#allocation3 + $0x84] sm:$0xff] }
 0x1d0   : > { %1431 = vst.msk [vmem:[#allocation4 + $0x81] sm:$0xff] %vm572_vm2, %v1365_v27  ;;  %v18635_v31 = vpop.f32.mrb[76].mxu0  ;;  %v2361_v27 = vld [vmem:[#allocation3 + $0x16b] sm:$0xff]  ;;  %v2677_v23 = vpack.c.bf16 %v2646_v20, %v2645_v19  ;;  %v2655_v9 = vld [vmem:[#allocation3 + $0x7c] sm:$0xff]  ;;  %v2657_v24 = vld [vmem:[#allocation3 + $0x94] sm:$0xff] }
 0x1d1   : > { %v1338_v34 = vadd.f32 %v18635_v31, %v22856_v3  ;;  %v1096_v35 = vpop.f32.mrb[77].mxu0  ;;  %v9401_v31 = vpack.c.bf16 %v9370_v22, %v9369_v21  ;;  %v9376_v50 = vld [vmem:[#allocation4 + $0x51] sm:$0xff]  ;;  %v9378_v52 = vld [vmem:[#allocation4 + $0x69] sm:$0xff]  ;;  %v23098_v11 = vld [vmem:[#allocation6 + $0x40] sm:$0xff]  }
 0x1d2   : > { %18710 = vmatmul.mubr.msk.bf16.gmra.mrb[92].mxu0 %vm516_vm3, %v23026_v29  ;;  %v1336_v36 = vadd.f32 %v22856_v3, %v1096_v35  ;;  %v18636_v37 = vpop.f32.mrb[78].mxu0  ;;  %v2648_v35 = vld [vmem:[#allocation3 + $0x24] sm:$0xff]  ;;  %v2658_v13 = vld [vmem:[#allocation3 + $0x9c] sm:$0xff]  ;;  %v2659_v22 = vld [vmem:[#allocation3 + $0xac] sm:$0xff] }
 0x1d3   : > { %18786 = vmatmul.mubr.msk.bf16.gmra.mrb[28].mxu1 %vm516_vm3, %v2370_v30  ;;  %18713 = vmatprep.mubr.msk.bf16.mxu0 %vm516_vm3, %v1494_v32  ;;  %v1370_v38 = vmax.f32 %v1338_v34, 0.0  ;;  %v1339_v39 = vadd.f32 %v18636_v37, %v22856_v3  ;;  %v1099_v40 = vpop.f32.mrb[79].mxu0  ;;  %v1484_v30 = vld [vmem:[#allocation3 + $0x168] sm:$0xff]  ;;  %v2647_v34 = vld [vmem:[#allocation3 + $0x1c] sm:$0xff]  ;;  %v2683_v16 = vpack.c.bf16 %v2658_v13, %v2657_v24  ;;  %v9400_v13 = vld [vmem:[#allocation4 + $0x171] sm:$0xff] }
 0x1d4   : > { %18789 = vmatprep.mubr.msk.bf16.mxu1 %vm516_vm3, %v2371_v33  ;;  %v1368_v41 = vmax.f32 %v1336_v36, 0.0  ;;  %v1337_v42 = vadd.f32 %v22856_v3, %v1099_v40  ;;  %v23042_v3 = vpack.c.bf16 %v1475_v48, %v1474_v55  ;;  %v23069_v32 = vpack.c.bf16 %v1485_v26, %v1484_v30  ;;  %v9371_v36 = vld [vmem:[#allocation4 + $0x19] sm:$0xff]  ;;  %v9372_v37 = vld [vmem:[#allocation4 + $0x21] sm:$0xff]  ;;  %v9381_v5 = vld [vmem:[#allocation4 + $0x91] sm:$0xff] }
 0x1d5   : > { %1436 = vst.msk [vmem:[#allocation4 + $0xc1] sm:$0xff] %vm572_vm2, %v1370_v38  ;;  %v1371_v46 = vmax.f32 %v1339_v39, 0.0  ;;  %v2378_v33 = vpack.c.bf16 %v2362_v28, %v2361_v27  ;;  %v9373_v38 = vld [vmem:[#allocation4 + $0x31] sm:$0xff]  ;;  %v9374_v39 = vld [vmem:[#allocation4 + $0x39] sm:$0xff]  ;;  %v2678_v40 = vpack.c.bf16 %v2648_v35, %v2647_v34  ;;  %v2661_v28 = vld [vmem:[#allocation3 + $0xc4] sm:$0xff] }
 0x1d6   : > { %1434 = vst.msk [vmem:[#allocation4 + $0xa9] sm:$0xff] %vm572_vm2, %v1368_v41  ;;  %v1369_v51 = vmax.f32 %v1337_v42, 0.0  ;;  %v9402_v41 = vpack.c.bf16 %v9372_v37, %v9371_v36  ;;  %v2649_v42 = vld [vmem:[#allocation3 + $0x34] sm:$0xff]  ;;  %v9403_v44 = vpack.c.bf16 %v9374_v39, %v9373_v38  ;;  %v2662_v30 = vld [vmem:[#allocation3 + $0xcc] sm:$0xff]  ;;  %v9388_v35 = vld [vmem:[#allocation4 + $0xe1] sm:$0xff] }
 0x1d7   : > { %1437 = vst.msk [vmem:[#allocation4 + $0xc9] sm:$0xff] %vm572_vm2, %v1371_v46  ;;  %v2679_v45 = vpack.c.bf16 %v2650_v43, %v2649_v42  ;;  %v21769_v46 = vld [vmem:[#allocation6 + $0x8] sm:$0xff]   ;;  %v21770_v48 = vld [vmem:[%s25765_s5 + $0x80] sm:$0xff]  }
 0x1d8   : > { %1435 = vst.msk [vmem:[#allocation4 + $0xb1] sm:$0xff] %vm572_vm2, %v1369_v51  ;;  %v9377_v51 = vld [vmem:[#allocation4 + $0x61] sm:$0xff]  ;;  %v2652_v55 = vld [vmem:[#allocation3 + $0x54] sm:$0xff]  ;;  %v9399_v24 = vld [vmem:[#allocation4 + $0x169] sm:$0xff] }
 0x1d9   : > { %v9405_v60 = vpack.c.bf16 %v9378_v52, %v9377_v51  ;;  %v9379_v1 = vld [vmem:[#allocation4 + $0x79] sm:$0xff]  ;;  %v9389_v36 = vld [vmem:[#allocation4 + $0xf1] sm:$0xff]  ;;  %v2664_v39 = vld [vmem:[#allocation3 + $0xe4] sm:$0xff] }
 0x1da   : > { %18714 = vmatmul.mubr.msk.bf16.gmra.mrb[96].mxu0 %vm516_vm3, %v1495_v53  ;;  %v21772_v53 = vld [vmem:[%s25765_s5 + $0x88] sm:$0xff]   ;;  %v2660_v26 = vld [vmem:[#allocation3 + $0xb4] sm:$0xff]  ;;  %v2667_v51 = vld [vmem:[#allocation3 + $0x10c] sm:$0xff] }
 0x1db   : > { %18790 = vmatmul.mubr.msk.bf16.gmra.mrb[32].mxu1 %vm516_vm3, %v2372_v54  ;;  %18717 = vmatprep.mubr.msk.bf16.mxu0 %vm516_vm3, %v23042_v3  ;;  %v2651_v54 = vld [vmem:[#allocation3 + $0x4c] sm:$0xff]  ;;  %v9387_v34 = vld [vmem:[#allocation4 + $0xd9] sm:$0xff] }
 0x1dc   : > { %18793 = vmatprep.mubr.msk.bf16.mxu1 %vm516_vm3, %v2373_v56  ;;  %v21771_v56 = vld [vmem:[#allocation6 + $0x10] sm:$0xff]   ;;  %v2680_v61 = vpack.c.bf16 %v2652_v55, %v2651_v54  ;;  %v9385_v20 = vld [vmem:[#allocation4 + $0xc1] sm:$0xff]  ;;  %v9390_v37 = vld [vmem:[#allocation4 + $0xf9] sm:$0xff] }
 0x1dd   : > { %v2663_v38 = vld [vmem:[#allocation3 + $0xdc] sm:$0xff]  ;;  %v9411_v43 = vpack.c.bf16 %v9390_v37, %v9389_v36  ;;  %v2668_v52 = vld [vmem:[#allocation3 + $0x114] sm:$0xff]  ;;  %v2669_v54 = vld [vmem:[#allocation3 + $0x124] sm:$0xff] }
 0x1de   : > { %v9386_v21 = vld [vmem:[#allocation4 + $0xc9] sm:$0xff]  ;;  %v2666_v42 = vld [vmem:[#allocation3 + $0xfc] sm:$0xff] }
 0x1df   : > { %v9384_v19 = vld [vmem:[#allocation4 + $0xb1] sm:$0xff]  ;;  %v21776_v37 = vld [vmem:[#allocation6 + $0x48] sm:$0xff]  }
 0x1e0   : > { %v2670_v55 = vld [vmem:[#allocation3 + $0x12c] sm:$0xff] }
 0x1e2   : > { %18718 = vmatmul.mubr.msk.bf16.gmra.mrb[100].mxu0 %vm516_vm3, %v23049_v2 }
 0x1e3   : > { %18794 = vmatmul.mubr.msk.bf16.gmra.mrb[36].mxu1 %vm516_vm3, %v2374_v4  ;;  %18721 = vmatprep.mubr.msk.bf16.mxu0 %vm516_vm3, %v23051_v7  ;;  %v9380_v4 = vld [vmem:[#allocation4 + $0x81] sm:$0xff] }
 0x1e4   : > { %18797 = vmatprep.mubr.msk.bf16.mxu1 %vm516_vm3, %v2375_v8  ;;  %v9382_v8 = vld [vmem:[#allocation4 + $0x99] sm:$0xff]  ;;  %v9406_v12 = vpack.c.bf16 %v9380_v4, %v9379_v1  ;;  %v2672_v1 = vld [vmem:[#allocation3 + $0x144] sm:$0xff] }
 0x1e5   : > { %v9407_v25 = vpack.c.bf16 %v9382_v8, %v9381_v5  ;;  %v2673_v5 = vld [vmem:[#allocation3 + $0x154] sm:$0xff]  ;;  %v2674_v8 = vld [vmem:[#allocation3 + $0x15c] sm:$0xff] }
 0x1ea   : > { %18722 = vmatmul.mubr.msk.bf16.gmra.mrb[104].mxu0 %vm516_vm3, %v23059_v14 }
 0x1eb   : > { %18798 = vmatmul.mubr.msk.bf16.gmra.mrb[40].mxu1 %vm516_vm3, %v2376_v15  ;;  %18725 = vmatprep.mubr.msk.bf16.mxu0 %vm516_vm3, %v23061_v17  ;;  %v2682_v15 = vpack.c.bf16 %v2656_v10, %v2655_v9 }
 0x1ec   : > { %18801 = vmatprep.mubr.msk.bf16.mxu1 %vm516_vm3, %v2377_v18  ;;  %v9383_v18 = vld [vmem:[#allocation4 + $0xa9] sm:$0xff] }
 0x1ed   : > { %v9408_v27 = vpack.c.bf16 %v9384_v19, %v9383_v18  ;;  %v2676_v18 = vld [vmem:[#allocation3 + $0x174] sm:$0xff]  ;;  %v9416_v19 = vpack.c.bf16 %v9400_v13, %v9399_v24 }
 0x1f2   : > { %18726 = vmatmul.mubr.msk.bf16.gmra.mrb[108].mxu0 %vm516_vm3, %v23069_v32 }
 0x1f3   : > { %18802 = vmatmul.mubr.msk.bf16.gmra.mrb[44].mxu1 %vm516_vm3, %v2378_v33  ;;  %19611 = vmatprep.mubr.msk.bf16.mxu0 %vm572_vm2, %v9401_v31  ;;  %v2684_v31 = vpack.c.bf16 %v2660_v26, %v2659_v22  ;;  %v2685_v33 = vpack.c.bf16 %v2662_v30, %v2661_v28  ;;  %v2963_v22 = vld [vmem:[#allocation3 + $0x38] sm:$0xff]  ;;  %v2965_v28 = vld [vmem:[#allocation3 + $0x50] sm:$0xff] }
 0x1f4   : > { %18811 = vmatprep.mubr.msk.bf16.mxu1 %vm516_vm3, %v2677_v23  ;;  %v9409_v23 = vpack.c.bf16 %v9386_v21, %v9385_v20  ;;  %v9315_v26 = vld [vmem:[#allocation4 + $0x18] sm:$0xff]  ;;  %v2962_v30 = vld [vmem:[#allocation3 + $0x30] sm:$0xff] }
 0x1fa   : > { %19612 = vmatmul.mubr.msk.bf16.vlgmr.msra.gmra.mrb[112].mxu0 %vm572_vm2, %v9402_v41  ;;  %v2665_v41 = vld [vmem:[#allocation3 + $0xf4] sm:$0xff] }
 0x1fb   : > { %18812 = vmatmul.mubr.msk.bf16.vlgmr.msra.gmra.mrb[16].mxu1 %vm516_vm3, %v2678_v40  ;;  %19615 = vmatprep.mubr.msk.bf16.mxu0 %vm572_vm2, %v9403_v44  ;;  %v9410_v40 = vpack.c.bf16 %v9388_v35, %v9387_v34  ;;  %v2686_v44 = vpack.c.bf16 %v2664_v39, %v2663_v38  ;;  %v2964_v35 = vld [vmem:[#allocation3 + $0x48] sm:$0xff]  ;;  %v21777_v38 = vld [vmem:[%s25765_s5 + $0x98] sm:$0xff]  }
 0x1fc   : > { %18844 = vmatpush3.bf16.msra.mxu1 %v22998_v47  ;;  %18815 = vmatprep.mubr.msk.bf16.mxu1 %vm516_vm3, %v2679_v45  ;;  %v9404_v47 = vpack.c.bf16 %v9376_v50, %v9375_v49  ;;  %v2687_v45 = vpack.c.bf16 %v2666_v42, %v2665_v41  ;;  %v9393_v49 = vld [vmem:[#allocation4 + $0x121] sm:$0xff]  ;;  %v9394_v50 = vld [vmem:[#allocation4 + $0x129] sm:$0xff]  ;;  %v2994_v36 = vpack.c.bf16 %v2965_v28, %v2964_v35  ;;  %v9342_v35 = vld [vmem:[#allocation4 + $0x158] sm:$0xff] }
 0x1fd   : > { %19644 = vmatpush3.bf16.msra.mxu0 %v23009_v59  ;;  %18845 = vmatprep.subr.bf16.mxu1 %v21770_v48  ;;  %v2681_v59 = vpack.c.bf16 %v2654_v58, %v2653_v57  ;;  %v2689_v57 = vpack.c.bf16 %v2670_v55, %v2669_v54  ;;  %v9395_v58 = vld [vmem:[#allocation4 + $0x139] sm:$0xff]  ;;  %v2967_v39 = vld [vmem:[#allocation3 + $0x68] sm:$0xff]  ;;  %v9320_v42 = vld [vmem:[#allocation4 + $0x50] sm:$0xff] }
 0x1fe   : > { %19645 = vmatprep.subr.bf16.mxu0 %v21769_v46  ;;  %v9319_v41 = vld [vmem:[#allocation4 + $0x48] sm:$0xff]  ;;  %v2971_v54 = vld [vmem:[#allocation3 + $0x98] sm:$0xff]  ;;  %v9337_v28 = vld [vmem:[#allocation4 + $0x120] sm:$0xff] }
 0x1ff   : > { %v9323_v55 = vld [vmem:[#allocation4 + $0x78] sm:$0xff] }
 0x200   : > { %18846 = vmatpush3.bf16.msra.mxu1 %v21770_v48  ;;  %v9392_v48 = vld [vmem:[#allocation4 + $0x111] sm:$0xff] }
 0x201   : > { %19646 = vmatpush3.bf16.msra.mxu0 %v21769_v46  ;;  %18847 = vmatprep.subr.bf16.mxu1 %v21772_v53  ;;  %v9391_v46 = vld [vmem:[#allocation4 + $0x109] sm:$0xff] }
 0x202   : > { %19647 = vmatprep.subr.bf16.mxu0 %v21771_v56  ;;  %19616 = vmatmul.mubr.msk.bf16.gmra.mrb[116].mxu0 %vm572_vm2, %v9404_v47  ;;  %v2688_v47 = vpack.c.bf16 %v2668_v52, %v2667_v51  ;;  %v21780_v52 = vld [vmem:[#allocation6 + $0x58] sm:$0xff]  }
 0x203   : > { %18816 = vmatmul.mubr.msk.bf16.gmra.mrb[20].mxu1 %vm516_vm3, %v2680_v61  ;;  %19619 = vmatprep.mubr.msk.bf16.mxu0 %vm572_vm2, %v9405_v60  ;;  %v9396_v60 = vld [vmem:[#allocation4 + $0x141] sm:$0xff]  ;;  %v9397_v61 = vld [vmem:[#allocation4 + $0x151] sm:$0xff] }
 0x204   : > { %18819 = vmatprep.mubr.msk.bf16.mxu1 %vm516_vm3, %v2681_v59  ;;  %18848 = vmatpush3.bf16.msra.mxu1 %v21772_v53  ;;  %v9412_v53 = vpack.c.bf16 %v9392_v48, %v9391_v46  ;;  %v9398_v59 = vld [vmem:[#allocation4 + $0x159] sm:$0xff]  ;;  %v9414_v4 = vpack.c.bf16 %v9396_v60, %v9395_v58  ;;  %v2970_v60 = vld [vmem:[#allocation3 + $0x90] sm:$0xff] }
 0x205   : > { %19648 = vmatpush3.bf16.msra.mxu0 %v21771_v56  ;;  %18881 = vmatprep.subr.bf16.mxu1 %v23091_v63  ;;  %v9413_v56 = vpack.c.bf16 %v9394_v50, %v9393_v49  ;;  %v9415_v9 = vpack.c.bf16 %v9398_v59, %v9397_v61  ;;  %v2966_v46 = vld [vmem:[#allocation3 + $0x60] sm:$0xff]  ;;  %v23144_v49 = vpack.c.bf16 %v9320_v42, %v9319_v41  ;;  %v2968_v50 = vld [vmem:[#allocation3 + $0x78] sm:$0xff]  ;;  %v2991_v42 = vld [vmem:[#allocation3 + $0x188] sm:$0xff] }
 0x206   : > { %19649 = vmatprep.subr.bf16.mxu0 %v21773_v62  ;;  %v2995_v48 = vpack.c.bf16 %v2967_v39, %v2966_v46  ;;  %v9326_v58 = vld [vmem:[#allocation4 + $0x98] sm:$0xff]  ;;  %v2997_v61 = vpack.c.bf16 %v2971_v54, %v2970_v60  ;;  %v9892_v39 = vld [vmem:[#allocation4 + $0x2] sm:$0xff] }
 0x207   : > { %v2990_v41 = vld [vmem:[#allocation3 + $0x180] sm:$0xff]  ;;  %v21783_v60 = vld [vmem:[#allocation6 + $0x68] sm:$0xff]  }
 0x208   : > { %v9894_v46 = vld [vmem:[#allocation4 + $0x1a] sm:$0xff] }
 0x209   : > { %19650 = vmatpush3.bf16.msra.mxu0 %v21773_v62  ;;  %v2671_v62 = vld [vmem:[#allocation3 + $0x13c] sm:$0xff] }
 0x20a   : > { %19683 = vmatprep.subr.bf16.mxu0 %v23098_v11  ;;  %19620 = vmatmul.mubr.msk.bf16.gmra.mrb[120].mxu0 %vm572_vm2, %v9406_v12  ;;  %v2690_v10 = vpack.c.bf16 %v2672_v1, %v2671_v62  ;;  %v2691_v12 = vpack.c.bf16 %v2674_v8, %v2673_v5  ;;  %v2975_v1 = vld [vmem:[#allocation3 + $0xc8] sm:$0xff]  ;;  %v9328_v5 = vld [vmem:[#allocation4 + $0xb0] sm:$0xff]  ;;  %v2977_v8 = vld [vmem:[#allocation3 + $0xe0] sm:$0xff] }
 0x20b   : > { %18820 = vmatmul.mubr.msk.bf16.gmra.mrb[24].mxu1 %vm516_vm3, %v2682_v15  ;;  %19623 = vmatprep.mubr.msk.bf16.mxu0 %vm572_vm2, %v9407_v25  ;;  %v9313_v25 = vld [vmem:[#allocation4] sm:$0xff]  ;;  %v9314_v15 = vld [vmem:[#allocation4 + $0x8] sm:$0xff] }
 0x20c   : > { %18823 = vmatprep.mubr.msk.bf16.mxu1 %vm516_vm3, %v2683_v16  ;;  %v2675_v16 = vld [vmem:[#allocation3 + $0x16c] sm:$0xff]  ;;  %v9345_v20 = vpack.c.bf16 %v9314_v15, %v9313_v25  ;;  %v2976_v25 = vld [vmem:[#allocation3 + $0xd8] sm:$0xff] }
 0x20d   : > { %v2692_v21 = vpack.c.bf16 %v2676_v18, %v2675_v16  ;;  %v3000_v15 = vpack.c.bf16 %v2977_v8, %v2976_v25  ;;  %v9332_v18 = vld [vmem:[#allocation4 + $0xe0] sm:$0xff]  ;;  %v9898_v8 = vld [vmem:[#allocation4 + $0x4a] sm:$0xff] }
 0x20e   : > { %v9897_v54 = vld [vmem:[#allocation4 + $0x3a] sm:$0xff]  ;;  %v9901_v25 = vld [vmem:[#allocation4 + $0x6a] sm:$0xff] }
 0x212   : > { %19624 = vmatmul.mubr.msk.bf16.gmra.mrb[124].mxu0 %vm572_vm2, %v9408_v27  ;;  %v9316_v27 = vld [vmem:[#allocation4 + $0x20] sm:$0xff] }
 0x213   : > { %18824 = vmatmul.mubr.msk.bf16.gmra.mrb[28].mxu1 %vm516_vm3, %v2684_v31  ;;  %19627 = vmatprep.mubr.msk.bf16.mxu0 %vm572_vm2, %v9409_v23  ;;  %v9317_v23 = vld [vmem:[#allocation4 + $0x30] sm:$0xff]  ;;  %v9318_v31 = vld [vmem:[#allocation4 + $0x38] sm:$0xff]  ;;  %v23126_v34 = vpack.c.bf16 %v9316_v27, %v9315_v26  ;;  %v9335_v26 = vld [vmem:[#allocation4 + $0x108] sm:$0xff] }
 0x214   : > { %18827 = vmatprep.mubr.msk.bf16.mxu1 %vm516_vm3, %v2685_v33  ;;  %v2993_v33 = vpack.c.bf16 %v2963_v22, %v2962_v30  ;;  %v9336_v27 = vld [vmem:[#allocation4 + $0x110] sm:$0xff]  ;;  %v9338_v30 = vld [vmem:[#allocation4 + $0x128] sm:$0xff] }
 0x21a   : > { %19628 = vmatmul.mubr.msk.bf16.gmra.mrb[128].mxu0 %vm572_vm2, %v9410_v40  ;;  %v21779_v40 = vld [vmem:[%s25765_s5 + $0xa0] sm:$0xff]  }
 0x21b   : > { %18828 = vmatmul.mubr.msk.bf16.gmra.mrb[32].mxu1 %vm516_vm3, %v2686_v44  ;;  %19631 = vmatprep.mubr.msk.bf16.mxu0 %vm572_vm2, %v9411_v43  ;;  %v21778_v43 = vld [vmem:[#allocation6 + $0x50] sm:$0xff]   ;;  %v2969_v44 = vld [vmem:[#allocation3 + $0x80] sm:$0xff] }
 0x21c   : > { %18831 = vmatprep.mubr.msk.bf16.mxu1 %vm516_vm3, %v2687_v45  ;;  %v9321_v45 = vld [vmem:[#allocation4 + $0x60] sm:$0xff] }
 0x222   : > { %19632 = vmatmul.mubr.msk.bf16.gmra.mrb[132].mxu0 %vm572_vm2, %v9412_v53  ;;  %v23151_v53 = vld [vmem:[%s25765_s5 + $0xa8] sm:$0xff]  }
 0x223   : > { %18832 = vmatmul.mubr.msk.bf16.gmra.mrb[36].mxu1 %vm516_vm3, %v2688_v47  ;;  %19635 = vmatprep.mubr.msk.bf16.mxu0 %vm572_vm2, %v9413_v56  ;;  %v9324_v56 = vld [vmem:[#allocation4 + $0x80] sm:$0xff] }
 0x224   : > { %18835 = vmatprep.mubr.msk.bf16.mxu1 %vm516_vm3, %v2689_v57  ;;  %v23160_v47 = vld [vmem:[#allocation6 + $0x60] sm:$0xff]   ;;  %v9325_v57 = vld [vmem:[#allocation4 + $0x90] sm:$0xff]  ;;  %v23162_v59 = vpack.c.bf16 %v9324_v56, %v9323_v55 }
 0x225   : > { %v23164_v62 = vpack.c.bf16 %v9326_v58, %v9325_v57  ;;  %v3278_v57 = vld [vmem:[#allocation3 + $0x49] sm:$0xff] }
 0x22a   : > { %19636 = vmatmul.mubr.msk.bf16.gmra.mrb[136].mxu0 %vm572_vm2, %v9414_v4  ;;  %v9327_v4 = vld [vmem:[#allocation4 + $0xa8] sm:$0xff] }
 0x22b   : > { %18836 = vmatmul.mubr.msk.bf16.gmra.mrb[40].mxu1 %vm516_vm3, %v2690_v10  ;;  %19639 = vmatprep.mubr.msk.bf16.mxu0 %vm572_vm2, %v9415_v9  ;;  %v9329_v9 = vld [vmem:[#allocation4 + $0xc0] sm:$0xff]  ;;  %v9330_v10 = vld [vmem:[#allocation4 + $0xc8] sm:$0xff]  ;;  %v23174_v13 = vpack.c.bf16 %v9328_v5, %v9327_v4  ;;  %v21786_v5 = vld [vmem:[%s25765_s5 + $0xb8] sm:$0xff]  }
 0x22c   : > { %18839 = vmatprep.mubr.msk.bf16.mxu1 %vm516_vm3, %v2691_v12  ;;  %v2974_v12 = vld [vmem:[#allocation3 + $0xc0] sm:$0xff]  ;;  %v23176_v16 = vpack.c.bf16 %v9330_v10, %v9329_v9  ;;  %v3281_v4 = vld [vmem:[#allocation3 + $0x69] sm:$0xff]  ;;  %v9899_v9 = vld [vmem:[#allocation4 + $0x52] sm:$0xff] }
 0x22d   : > { %v2999_v24 = vpack.c.bf16 %v2975_v1, %v2974_v12  ;;  %v21785_v10 = vld [vmem:[#allocation6 + $0x70] sm:$0xff]   ;;  %v3283_v12 = vld [vmem:[#allocation3 + $0x81] sm:$0xff] }
 0x232   : > { %19640 = vmatmul.mubr.msk.bf16.gmra.mrb[140].mxu0 %vm572_vm2, %v9416_v19  ;;  %v9333_v19 = vld [vmem:[#allocation4 + $0xf0] sm:$0xff] }
 0x233   : > { %18840 = vmatmul.mubr.msk.bf16.gmra.mrb[44].mxu1 %vm516_vm3, %v2692_v21  ;;  %19651 = vmatprep.mubr.msk.bf16.mxu0 %vm572_vm2, %v9345_v20  ;;  %v9334_v20 = vld [vmem:[#allocation4 + $0xf8] sm:$0xff] }
 0x234   : > { %18849 = vmatprep.mubr.msk.bf16.mxu1 %vm516_vm3, %v22967_v6  ;;  %v23134_v6 = vpack.c.bf16 %v9318_v31, %v9317_v23  ;;  %v23186_v22 = vpack.c.bf16 %v9334_v20, %v9333_v19  ;;  %v23196_v23 = vpack.c.bf16 %v9336_v27, %v9335_v26  ;;  %v23198_v31 = vpack.c.bf16 %v9338_v30, %v9337_v28  ;;  %v21787_v20 = vld [vmem:[#allocation6 + $0x78] sm:$0xff]   ;;  %v9903_v30 = vld [vmem:[#allocation4 + $0x82] sm:$0xff] }
 0x235   : > { %v23247_v26 = vld [vmem:[%s25765_s5 + $0xc0] sm:$0xff]  }
 0x236   : > { %v3285_v27 = vld [vmem:[#allocation3 + $0x99] sm:$0xff] }
 0x237   : > { %v9902_v28 = vld [vmem:[#allocation4 + $0x7a] sm:$0xff] }
 0x23a   : > { %19652 = vmatmul.mubr.msk.bf16.vlgmr.msra.gmra.mrb[112].mxu0 %vm572_vm2, %v23126_v34 }
 0x23b   : > { %18850 = vmatmul.mubr.msk.bf16.vlgmr.msra.gmra.mrb[16].mxu1 %vm516_vm3, %v2993_v33  ;;  %19655 = vmatprep.mubr.msk.bf16.mxu0 %vm572_vm2, %v23134_v6  ;;  %v9341_v33 = vld [vmem:[#allocation4 + $0x150] sm:$0xff] }
 0x23c   : > { %18882 = vmatpush3.bf16.msra.mxu1 %v23091_v63  ;;  %18853 = vmatprep.mubr.msk.bf16.mxu1 %vm516_vm3, %v2994_v36  ;;  %v9322_v63 = vld [vmem:[#allocation4 + $0x68] sm:$0xff] }
 0x23d   : > { %19684 = vmatpush3.bf16.msra.mxu0 %v23098_v11  ;;  %18883 = vmatprep.subr.bf16.mxu1 %v21777_v38  ;;  %v2996_v11 = vpack.c.bf16 %v2969_v44, %v2968_v50  ;;  %v23146_v51 = vpack.c.bf16 %v9322_v63, %v9321_v45  ;;  %v3279_v50 = vld [vmem:[#allocation3 + $0x51] sm:$0xff] }
 0x23e   : > { %19685 = vmatprep.subr.bf16.mxu0 %v21776_v37  ;;  %v3308_v58 = vpack.c.bf16 %v3279_v50, %v3278_v57  ;;  %v3290_v57 = vld [vmem:[#allocation3 + $0xd9] sm:$0xff] }
 0x240   : > { %18884 = vmatpush3.bf16.msra.mxu1 %v21777_v38  ;;  %v3275_v38 = vld [vmem:[#allocation3 + $0x21] sm:$0xff] }
 0x241   : > { %19686 = vmatpush3.bf16.msra.mxu0 %v21776_v37  ;;  %18885 = vmatprep.subr.bf16.mxu1 %v21779_v40  ;;  %v23210_v37 = vpack.c.bf16 %v9342_v35, %v9341_v33  ;;  %v9904_v33 = vld [vmem:[#allocation4 + $0x92] sm:$0xff]  ;;  %v9905_v35 = vld [vmem:[#allocation4 + $0x9a] sm:$0xff] }
 0x242   : > { %19687 = vmatprep.subr.bf16.mxu0 %v21778_v43  ;;  %19656 = vmatmul.mubr.msk.bf16.gmra.mrb[116].mxu0 %vm572_vm2, %v23144_v49 }
 0x243   : > { %18854 = vmatmul.mubr.msk.bf16.gmra.mrb[20].mxu1 %vm516_vm3, %v2995_v48  ;;  %19659 = vmatprep.mubr.msk.bf16.mxu0 %vm572_vm2, %v23146_v51  ;;  %v9895_v48 = vld [vmem:[#allocation4 + $0x22] sm:$0xff] }
 0x244   : > { %18857 = vmatprep.mubr.msk.bf16.mxu1 %vm516_vm3, %v2996_v11  ;;  %18886 = vmatpush3.bf16.msra.mxu1 %v21779_v40  ;;  %v9893_v40 = vld [vmem:[#allocation4 + $0xa] sm:$0xff]  ;;  %v23227_v56 = vpack.c.bf16 %v9895_v48, %v9894_v46  ;;  %v9908_v46 = vld [vmem:[#allocation4 + $0xc2] sm:$0xff] }
 0x245   : > { %19688 = vmatpush3.bf16.msra.mxu0 %v21778_v43  ;;  %18919 = vmatprep.subr.bf16.mxu1 %v23151_v53  ;;  %v9344_v43 = vld [vmem:[#allocation4 + $0x170] sm:$0xff]  ;;  %v9924_v45 = vpack.c.bf16 %v9893_v40, %v9892_v39 }
 0x246   : > { %19689 = vmatprep.subr.bf16.mxu0 %v21780_v52  ;;  %v3276_v11 = vld [vmem:[#allocation3 + $0x31] sm:$0xff]  ;;  %v3286_v39 = vld [vmem:[#allocation3 + $0xa9] sm:$0xff] }
 0x247   : > { %v9909_v48 = vld [vmem:[#allocation4 + $0xca] sm:$0xff] }
 0x249   : > { %19690 = vmatpush3.bf16.msra.mxu0 %v21780_v52  ;;  %v9896_v52 = vld [vmem:[#allocation4 + $0x32] sm:$0xff] }
 0x24a   : > { %19723 = vmatprep.subr.bf16.mxu0 %v23160_v47  ;;  %19660 = vmatmul.mubr.msk.bf16.gmra.mrb[120].mxu0 %vm572_vm2, %v23162_v59  ;;  %v9926_v1 = vpack.c.bf16 %v9897_v54, %v9896_v52 }
 0x24b   : > { %18858 = vmatmul.mubr.msk.bf16.gmra.mrb[24].mxu1 %vm516_vm3, %v2997_v61  ;;  %19663 = vmatprep.mubr.msk.bf16.mxu0 %vm572_vm2, %v23164_v62  ;;  %v21784_v61 = vld [vmem:[%s25765_s5 + $0xb0] sm:$0xff]  }
 0x24c   : > { %18861 = vmatprep.mubr.msk.bf16.mxu1 %vm516_vm3, %v23026_v29  ;;  %v9331_v29 = vld [vmem:[#allocation4 + $0xd8] sm:$0xff] }
 0x24d   : > { %v23184_v21 = vpack.c.bf16 %v9332_v18, %v9331_v29  ;;  %v23242_v29 = vpack.c.bf16 %v9899_v9, %v9898_v8  ;;  %v3282_v18 = vld [vmem:[#allocation3 + $0x79] sm:$0xff]  ;;  %v3295_v9 = vld [vmem:[#allocation3 + $0x111] sm:$0xff] }
 0x252   : > { %19664 = vmatmul.mubr.msk.bf16.gmra.mrb[124].mxu0 %vm572_vm2, %v23174_v13 }
 0x253   : > { %18862 = vmatmul.mubr.msk.bf16.gmra.mrb[28].mxu1 %vm516_vm3, %v2999_v24  ;;  %19667 = vmatprep.mubr.msk.bf16.mxu0 %vm572_vm2, %v23176_v16  ;;  %v9900_v24 = vld [vmem:[#allocation4 + $0x62] sm:$0xff] }
 0x254   : > { %18865 = vmatprep.mubr.msk.bf16.mxu1 %vm516_vm3, %v3000_v15  ;;  %v9928_v19 = vpack.c.bf16 %v9901_v25, %v9900_v24  ;;  %v3292_v25 = vld [vmem:[#allocation3 + $0xf1] sm:$0xff] }
 0x25a   : > { %19668 = vmatmul.mubr.msk.bf16.gmra.mrb[128].mxu0 %vm572_vm2, %v23184_v21 }
 0x25b   : > { %18866 = vmatmul.mubr.msk.bf16.gmra.mrb[32].mxu1 %vm516_vm3, %v23042_v3  ;;  %19671 = vmatprep.mubr.msk.bf16.mxu0 %vm572_vm2, %v23186_v22  ;;  %v9339_v3 = vld [vmem:[#allocation4 + $0x138] sm:$0xff] }
 0x25c   : > { %18869 = vmatprep.mubr.msk.bf16.mxu1 %vm516_vm3, %v23049_v2  ;;  %v9340_v2 = vld [vmem:[#allocation4 + $0x140] sm:$0xff] }
 0x25d   : > { %v23208_v36 = vpack.c.bf16 %v9340_v2, %v9339_v3  ;;  %v23255_v3 = vld [vmem:[#allocation6 + $0x80] sm:$0xff]   ;;  %v3287_v2 = vld [vmem:[#allocation3 + $0xb1] sm:$0xff] }
 0x25e   : > { %v3312_v40 = vpack.c.bf16 %v3287_v2, %v3286_v39  ;;  %v9915_v2 = vld [vmem:[#allocation4 + $0x112] sm:$0xff]  ;;  %v3296_v39 = vld [vmem:[#allocation3 + $0x121] sm:$0xff] }
 0x262   : > { %19672 = vmatmul.mubr.msk.bf16.gmra.mrb[132].mxu0 %vm572_vm2, %v23196_v23 }
 0x263   : > { %18870 = vmatmul.mubr.msk.bf16.gmra.mrb[36].mxu1 %vm516_vm3, %v23051_v7  ;;  %19675 = vmatprep.mubr.msk.bf16.mxu0 %vm572_vm2, %v23198_v31  ;;  %v9343_v7 = vld [vmem:[#allocation4 + $0x168] sm:$0xff] }
 0x264   : > { %18873 = vmatprep.mubr.msk.bf16.mxu1 %vm516_vm3, %v23059_v14  ;;  %v3274_v14 = vld [vmem:[#allocation3 + $0x19] sm:$0xff]  ;;  %v23220_v63 = vpack.c.bf16 %v9344_v43, %v9343_v7  ;;  %v3284_v7 = vld [vmem:[#allocation3 + $0x91] sm:$0xff]  ;;  %v3289_v43 = vld [vmem:[#allocation3 + $0xc9] sm:$0xff] }
 0x265   : > { %v3306_v44 = vpack.c.bf16 %v3275_v38, %v3274_v14  ;;  %v3311_v14 = vpack.c.bf16 %v3285_v27, %v3284_v7  ;;  %v9929_v38 = vpack.c.bf16 %v9903_v30, %v9902_v28  ;;  %v3297_v28 = vld [vmem:[#allocation3 + $0x129] sm:$0xff] }
 0x266   : > { %v9914_v30 = vld [vmem:[#allocation4 + $0x10a] sm:$0xff]  ;;  %v9916_v7 = vld [vmem:[#allocation4 + $0x122] sm:$0xff] }
 0x26a   : > { %19676 = vmatmul.mubr.msk.bf16.gmra.mrb[136].mxu0 %vm572_vm2, %v23208_v36 }
 0x26b   : > { %18874 = vmatmul.mubr.msk.bf16.gmra.mrb[40].mxu1 %vm516_vm3, %v23061_v17  ;;  %19679 = vmatprep.mubr.msk.bf16.mxu0 %vm572_vm2, %v23210_v37  ;;  %v3007_v17 = vpack.c.bf16 %v2991_v42, %v2990_v41  ;;  %v9930_v41 = vpack.c.bf16 %v9905_v35, %v9904_v33  ;;  %v3299_v35 = vld [vmem:[#allocation3 + $0x141] sm:$0xff] }
 0x26c   : > { %18877 = vmatprep.mubr.msk.bf16.mxu1 %vm516_vm3, %v23069_v32  ;;  %v3277_v32 = vld [vmem:[#allocation3 + $0x39] sm:$0xff] }
 0x26d   : > { %v3307_v55 = vpack.c.bf16 %v3277_v32, %v3276_v11  ;;  %v3291_v32 = vld [vmem:[#allocation3 + $0xe1] sm:$0xff] }
 0x26e   : > { %v3288_v11 = vld [vmem:[#allocation3 + $0xc1] sm:$0xff] }
 0x26f   : > { %v3313_v54 = vpack.c.bf16 %v3289_v43, %v3288_v11  ;;  %v23306_v43 = vpack.c.bf16 %v9915_v2, %v9914_v30  ;;  %v9918_v11 = vld [vmem:[#allocation4 + $0x13a] sm:$0xff]  ;;  %v3589_v2 = vld [vmem:[#allocation3 + $0x22] sm:$0xff] }
 0x270   : > { %v3588_v30 = vld [vmem:[#allocation3 + $0x1a] sm:$0xff] }
 0x272   : > { %19680 = vmatmul.mubr.msk.bf16.gmra.mrb[140].mxu0 %vm572_vm2, %v23220_v63 }
 0x273   : > { %18878 = vmatmul.mubr.msk.bf16.gmra.mrb[44].mxu1 %vm516_vm3, %v3007_v17  ;;  %19691 = vmatprep.mubr.msk.bf16.mxu0 %vm572_vm2, %v9924_v45  ;;  %v9907_v45 = vld [vmem:[#allocation4 + $0xb2] sm:$0xff] }
 0x274   : > { %18887 = vmatprep.mubr.msk.bf16.mxu1 %vm516_vm3, %v3306_v44  ;;  %v9906_v44 = vld [vmem:[#allocation4 + $0xaa] sm:$0xff] }
 0x27a   : > { %19692 = vmatmul.mubr.msk.bf16.vlgmr.msra.gmra.mrb[112].mxu0 %vm572_vm2, %v23227_v56 }
 0x27b   : > { %18888 = vmatmul.mubr.msk.bf16.vlgmr.msra.gmra.mrb[16].mxu1 %vm516_vm3, %v3307_v55  ;;  %19695 = vmatprep.mubr.msk.bf16.mxu0 %vm572_vm2, %v9926_v1  ;;  %v23270_v55 = vpack.c.bf16 %v9907_v45, %v9906_v44  ;;  %v3293_v1 = vld [vmem:[#allocation3 + $0xf9] sm:$0xff] }
 0x27c   : > { %18920 = vmatpush3.bf16.msra.mxu1 %v23151_v53  ;;  %18891 = vmatprep.mubr.msk.bf16.mxu1 %vm516_vm3, %v3308_v58  ;;  %v3280_v53 = vld [vmem:[#allocation3 + $0x61] sm:$0xff]  ;;  %v3314_v58 = vpack.c.bf16 %v3291_v32, %v3290_v57  ;;  %v3298_v44 = vld [vmem:[#allocation3 + $0x139] sm:$0xff] }
 0x27d   : > { %19724 = vmatpush3.bf16.msra.mxu0 %v23160_v47  ;;  %18921 = vmatprep.subr.bf16.mxu1 %v21784_v61  ;;  %v3309_v15 = vpack.c.bf16 %v3281_v4, %v3280_v53  ;;  %v3310_v47 = vpack.c.bf16 %v3283_v12, %v3282_v18  ;;  %v9910_v4 = vld [vmem:[#allocation4 + $0xda] sm:$0xff]  ;;  %v3318_v45 = vpack.c.bf16 %v3299_v35, %v3298_v44 }
 0x27e   : > { %19725 = vmatprep.subr.bf16.mxu0 %v21783_v60  ;;  %v9913_v12 = vld [vmem:[#allocation4 + $0xfa] sm:$0xff] }
 0x280   : > { %18922 = vmatpush3.bf16.msra.mxu1 %v21784_v61 }
 0x281   : > { %19726 = vmatpush3.bf16.msra.mxu0 %v21783_v60  ;;  %18923 = vmatprep.subr.bf16.mxu1 %v21786_v5  ;;  %v23272_v60 = vpack.c.bf16 %v9909_v48, %v9908_v46  ;;  %v3301_v48 = vld [vmem:[#allocation3 + $0x159] sm:$0xff] }
 0x282   : > { %19727 = vmatprep.subr.bf16.mxu0 %v21785_v10  ;;  %19696 = vmatmul.mubr.msk.bf16.gmra.mrb[116].mxu0 %vm572_vm2, %v23242_v29 }
 0x283   : > { %18892 = vmatmul.mubr.msk.bf16.gmra.mrb[20].mxu1 %vm516_vm3, %v3309_v15  ;;  %19699 = vmatprep.mubr.msk.bf16.mxu0 %vm572_vm2, %v9928_v19  ;;  %v3315_v15 = vpack.c.bf16 %v3293_v1, %v3292_v25  ;;  %v9920_v1 = vld [vmem:[#allocation4 + $0x152] sm:$0xff] }
 0x284   : > { %18895 = vmatprep.mubr.msk.bf16.mxu1 %vm516_vm3, %v3310_v47  ;;  %18924 = vmatpush3.bf16.msra.mxu1 %v21786_v5  ;;  %v9911_v5 = vld [vmem:[#allocation4 + $0xe2] sm:$0xff] }
 0x285   : > { %19728 = vmatpush3.bf16.msra.mxu0 %v21785_v10  ;;  %18957 = vmatprep.subr.bf16.mxu1 %v23247_v26  ;;  %v9912_v10 = vld [vmem:[#allocation4 + $0xf2] sm:$0xff]  ;;  %v23288_v18 = vpack.c.bf16 %v9911_v5, %v9910_v4  ;;  %v3294_v47 = vld [vmem:[#allocation3 + $0x109] sm:$0xff]  ;;  %v9921_v4 = vld [vmem:[#allocation4 + $0x15a] sm:$0xff] }
 0x286   : > { %19729 = vmatprep.subr.bf16.mxu0 %v21787_v20  ;;  %v3316_v19 = vpack.c.bf16 %v3295_v9, %v3294_v47  ;;  %v3300_v9 = vld [vmem:[#allocation3 + $0x151] sm:$0xff] }
 0x289   : > { %19730 = vmatpush3.bf16.msra.mxu0 %v21787_v20  ;;  %v23290_v20 = vpack.c.bf16 %v9913_v12, %v9912_v10  ;;  %v3319_v12 = vpack.c.bf16 %v3301_v48, %v3300_v9  ;;  %v3593_v9 = vld [vmem:[#allocation3 + $0x52] sm:$0xff] }
 0x28a   : > { %19763 = vmatprep.subr.bf16.mxu0 %v23255_v3  ;;  %19700 = vmatmul.mubr.msk.bf16.gmra.mrb[120].mxu0 %vm572_vm2, %v9929_v38 }
 0x28b   : > { %18896 = vmatmul.mubr.msk.bf16.gmra.mrb[24].mxu1 %vm516_vm3, %v3311_v14  ;;  %19703 = vmatprep.mubr.msk.bf16.mxu0 %vm572_vm2, %v9930_v41  ;;  %v9917_v14 = vld [vmem:[#allocation4 + $0x12a] sm:$0xff]  ;;  %v3317_v41 = vpack.c.bf16 %v3297_v28, %v3296_v39  ;;  %v3304_v28 = vld [vmem:[#allocation3 + $0x181] sm:$0xff]  ;;  %v9923_v39 = vld [vmem:[#allocation4 + $0x172] sm:$0xff] }
 0x28c   : > { %18899 = vmatprep.mubr.msk.bf16.mxu1 %vm516_vm3, %v3312_v40  ;;  %v23308_v32 = vpack.c.bf16 %v9917_v14, %v9916_v7  ;;  %v3305_v7 = vld [vmem:[#allocation3 + $0x189] sm:$0xff] }
 0x28d   : > { %v23262_v42 = vpop.f32.mrb[80].mxu0  ;;  %v9922_v14 = vld [vmem:[#allocation4 + $0x16a] sm:$0xff] }
 0x28e   : > { %25809 = vst [vmem:[#allocation21_spill] sm:$0xff] %v23262_v42  ;;  %v23264_v17 = vpop.f32.mrb[81].mxu0 }
 0x28f   : > { %25810 = vst [vmem:[#allocation22_spill] sm:$0xff] %v23264_v17  ;;  %v23266_v50 = vpop.f32.mrb[82].mxu0  ;;  %v24782_v17 = vld [vmem:[#allocation2 + $0x79] sm:$0xff] }
 0x290   : > { %25811 = vst [vmem:[#allocation23_spill] sm:$0xff] %v23266_v50  ;;  %v23268_v52 = vpop.f32.mrb[83].mxu0 }
 0x291   : > { %25812 = vst [vmem:[#allocation24_spill] sm:$0xff] %v23268_v52  ;;  %v24776_v52 = vld [vmem:[#allocation2 + $0x62] sm:$0xff] }
 0x292   : > { %19704 = vmatmul.mubr.msk.bf16.gmra.mrb[124].mxu0 %vm572_vm2, %v23270_v55 }
 0x293   : > { %18900 = vmatmul.mubr.msk.bf16.gmra.mrb[28].mxu1 %vm516_vm3, %v3313_v54  ;;  %19707 = vmatprep.mubr.msk.bf16.mxu0 %vm572_vm2, %v23272_v60  ;;  %v9919_v54 = vld [vmem:[#allocation4 + $0x142] sm:$0xff] }
 0x294   : > { %18903 = vmatprep.mubr.msk.bf16.mxu1 %vm516_vm3, %v3314_v58  ;;  %v3303_v58 = vld [vmem:[#allocation3 + $0x171] sm:$0xff]  ;;  %v23324_v25 = vpack.c.bf16 %v9919_v54, %v9918_v11  ;;  %v3321_v11 = vpack.c.bf16 %v3305_v7, %v3304_v28  ;;  %v23342_v54 = vpack.c.bf16 %v9923_v39, %v9922_v14  ;;  %v21790_v7 = vld [vmem:[#allocation6 + $0x88] sm:$0xff]  }
 0x295   : > { %v23280_v61 = vpop.f32.mrb[84].mxu0  ;;  %v21793_v14 = vld [vmem:[%s25765_s5 + $0xd0] sm:$0xff]  }
 0x296   : > { %25813 = vst [vmem:[#allocation25_spill] sm:$0xff] %v23280_v61  ;;  %v23282_v8 = vpop.f32.mrb[85].mxu0 }
 0x297   : > { %25814 = vst [vmem:[#allocation26_spill] sm:$0xff] %v23282_v8  ;;  %v23284_v24 = vpop.f32.mrb[86].mxu0 }
 0x298   : > { %25815 = vst [vmem:[#allocation27_spill] sm:$0xff] %v23284_v24  ;;  %v23286_v53 = vpop.f32.mrb[87].mxu0  ;;  %v24772_v24 = vld [vmem:[#allocation3 + $0x1a4] sm:$0xff] }
 0x299   : > { %25816 = vst [vmem:[#allocation28_spill] sm:$0xff] %v23286_v53  ;;  %25847 = vst [vmem:[#allocation58_spill] sm:$0xff] %v24772_v24  ;;  %v24867_v24 = vld [vmem:[#allocation2 + $0x92] sm:$0xff] }
 0x29a   : > { %19708 = vmatmul.mubr.msk.bf16.gmra.mrb[128].mxu0 %vm572_vm2, %v23288_v18 }
 0x29b   : > { %18904 = vmatmul.mubr.msk.bf16.gmra.mrb[32].mxu1 %vm516_vm3, %v3315_v15  ;;  %19711 = vmatprep.mubr.msk.bf16.mxu0 %vm572_vm2, %v23290_v20  ;;  %v3302_v15 = vld [vmem:[#allocation3 + $0x169] sm:$0xff] }
 0x29c   : > { %18907 = vmatprep.mubr.msk.bf16.mxu1 %vm516_vm3, %v3316_v19  ;;  %v3320_v47 = vpack.c.bf16 %v3303_v58, %v3302_v15  ;;  %v23326_v19 = vpack.c.bf16 %v9921_v4, %v9920_v1  ;;  %v3591_v1 = vld [vmem:[#allocation3 + $0x3a] sm:$0xff]  ;;  %v3590_v15 = vld [vmem:[#allocation3 + $0x32] sm:$0xff] }
 0x29d   : > { %v23298_v27 = vpop.f32.mrb[88].mxu0  ;;  %v3621_v28 = vpack.c.bf16 %v3591_v1, %v3590_v15  ;;  %v3596_v15 = vld [vmem:[#allocation3 + $0x7a] sm:$0xff] }
 0x29e   : > { %25817 = vst [vmem:[#allocation29_spill] sm:$0xff] %v23298_v27  ;;  %v23300_v33 = vpop.f32.mrb[89].mxu0 }
 0x29f   : > { %25818 = vst [vmem:[#allocation30_spill] sm:$0xff] %v23300_v33  ;;  %v23302_v38 = vpop.f32.mrb[90].mxu0 }
 0x2a0   : > { %25819 = vst [vmem:[#allocation31_spill] sm:$0xff] %v23302_v38  ;;  %v23304_v40 = vpop.f32.mrb[91].mxu0  ;;  %v24749_v38 = vld [vmem:[#allocation2 + $0x69] sm:$0xff] }
 0x2a1   : > { %25820 = vst [vmem:[#allocation32_spill] sm:$0xff] %v23304_v40 }
 0x2a2   : > { %19712 = vmatmul.mubr.msk.bf16.gmra.mrb[132].mxu0 %vm572_vm2, %v23306_v43 }
 0x2a3   : > { %18908 = vmatmul.mubr.msk.bf16.gmra.mrb[36].mxu1 %vm516_vm3, %v3317_v41  ;;  %19715 = vmatprep.mubr.msk.bf16.mxu0 %vm572_vm2, %v23308_v32 }
 0x2a4   : > { %18911 = vmatprep.mubr.msk.bf16.mxu1 %vm516_vm3, %v3318_v45  ;;  %v3620_v45 = vpack.c.bf16 %v3589_v2, %v3588_v30  ;;  %v3592_v30 = vld [vmem:[#allocation3 + $0x4a] sm:$0xff] }
 0x2a5   : > { %v23316_v46 = vpop.f32.mrb[92].mxu0  ;;  %v3622_v2 = vpack.c.bf16 %v3593_v9, %v3592_v30  ;;  %v3594_v9 = vld [vmem:[#allocation3 + $0x62] sm:$0xff]  ;;  %v21794_v30 = vld [vmem:[#allocation6 + $0x98] sm:$0xff]  }
 0x2a6   : > { %25821 = vst [vmem:[#allocation33_spill] sm:$0xff] %v23316_v46  ;;  %v23318_v57 = vpop.f32.mrb[93].mxu0 }
 0x2a7   : > { %25822 = vst [vmem:[#allocation34_spill] sm:$0xff] %v23318_v57  ;;  %v23320_v5 = vpop.f32.mrb[94].mxu0  ;;  %v24731_v57 = vld [vmem:[#allocation3 + $0x174] sm:$0xff] }
 0x2a8   : > { %25823 = vst [vmem:[#allocation35_spill] sm:$0xff] %v23320_v5  ;;  %v23322_v10 = vpop.f32.mrb[95].mxu0  ;;  %v24729_v5 = vld [vmem:[#allocation3 + $0x16c] sm:$0xff]  ;;  %25843 = vst [vmem:[#allocation54_spill] sm:$0xff] %v24731_v57 }
 0x2a9   : > { %25824 = vst [vmem:[#allocation36_spill] sm:$0xff] %v23322_v10  ;;  %v24720_v10 = vld [vmem:[#allocation3 + $0x15c] sm:$0xff]  ;;  %25842 = vst [vmem:[#allocation53_spill] sm:$0xff] %v24729_v5  ;;  %v24819_v57 = vld [vmem:[#allocation2 + $0x7a] sm:$0xff] }
 0x2aa   : > { %19716 = vmatmul.mubr.msk.bf16.gmra.mrb[136].mxu0 %vm572_vm2, %v23324_v25 }
 0x2ab   : > { %18912 = vmatmul.mubr.msk.bf16.gmra.mrb[40].mxu1 %vm516_vm3, %v3319_v12  ;;  %19719 = vmatprep.mubr.msk.bf16.mxu0 %vm572_vm2, %v23326_v19 }
 0x2ac   : > { %18915 = vmatprep.mubr.msk.bf16.mxu1 %vm516_vm3, %v3320_v47 }
 0x2ad   : > { %v23334_v35 = vpop.f32.mrb[96].mxu0 }
 0x2ae   : > { %25825 = vst [vmem:[#allocation37_spill] sm:$0xff] %v23334_v35  ;;  %v23336_v41 = vpop.f32.mrb[97].mxu0  ;;  %v24716_v35 = vld [vmem:[#allocation3 + $0x154] sm:$0xff] }
 0x2af   : > { %25826 = vst [vmem:[#allocation38_spill] sm:$0xff] %v23336_v41  ;;  %v23338_v44 = vpop.f32.mrb[98].mxu0  ;;  %v24714_v41 = vld [vmem:[#allocation3 + $0x144] sm:$0xff] }
 0x2b0   : > { %25827 = vst [vmem:[#allocation39_spill] sm:$0xff] %v23338_v44  ;;  %v23340_v48 = vpop.f32.mrb[99].mxu0 }
 0x2b1   : > { %25828 = vst [vmem:[#allocation40_spill] sm:$0xff] %v23340_v48 }
 0x2b2   : > { %19720 = vmatmul.mubr.msk.bf16.gmra.mrb[140].mxu0 %vm572_vm2, %v23342_v54 }
 0x2b3   : > { %18916 = vmatmul.mubr.msk.bf16.gmra.mrb[44].mxu1 %vm516_vm3, %v3321_v11  ;;  %19731 = vmatprep.mubr.msk.bf16.mxu0 %vm572_vm2, %v23126_v34  ;;  %v21791_v34 = vld [vmem:[%s25765_s5 + $0xc8] sm:$0xff]   ;;  %v21792_v11 = vld [vmem:[#allocation6 + $0x90] sm:$0xff]  }
 0x2b4   : > { %18925 = vmatprep.mubr.msk.bf16.mxu1 %vm516_vm3, %v3620_v45  ;;  %v3595_v45 = vld [vmem:[#allocation3 + $0x6a] sm:$0xff] }
 0x2b5   : > { %v23350_v58 = vpop.f32.mrb[100].mxu0 }
 0x2b6   : > { %25829 = vst [vmem:[#allocation41_spill] sm:$0xff] %v23350_v58  ;;  %v23352_v4 = vpop.f32.mrb[101].mxu0  ;;  %v23558_v58 = vld [vmem:[%s25765_s5 + $0x108] sm:$0xff]  }
 0x2b7   : > { %25830 = vst [vmem:[#allocation42_spill] sm:$0xff] %v23352_v4  ;;  %v23354_v12 = vpop.f32.mrb[102].mxu0  ;;  %v4221_v4 = vld [vmem:[#allocation3 + $0x54] sm:$0xff] }
 0x2b8   : > { %25831 = vst [vmem:[#allocation43_spill] sm:$0xff] %v23354_v12  ;;  %v23356_v47 = vpop.f32.mrb[103].mxu0  ;;  %v3933_v12 = vld [vmem:[#allocation3 + $0x18b] sm:$0xff] }
 0x2b9   : > { %25832 = vst [vmem:[#allocation44_spill] sm:$0xff] %v23356_v47  ;;  %v4217_v47 = vld [vmem:[#allocation3 + $0x24] sm:$0xff] }
 0x2ba   : > { %19732 = vmatmul.mubr.msk.bf16.vlgmr.msra.gmra.mrb[112].mxu0 %vm572_vm2, %v23134_v6 }
 0x2bb   : > { %18926 = vmatmul.mubr.msk.bf16.vlgmr.msra.gmra.mrb[16].mxu1 %vm516_vm3, %v3621_v28  ;;  %19735 = vmatprep.mubr.msk.bf16.mxu0 %vm572_vm2, %v23144_v49 }
 0x2bc   : > { %18958 = vmatpush3.bf16.msra.mxu1 %v23247_v26  ;;  %18929 = vmatprep.mubr.msk.bf16.mxu1 %vm516_vm3, %v3622_v2  ;;  %v3597_v26 = vld [vmem:[#allocation3 + $0x82] sm:$0xff]  ;;  %v23383_v2 = vld [vmem:[%s25765_s5 + $0xd8] sm:$0xff]  }
 0x2bd   : > { %19764 = vmatpush3.bf16.msra.mxu0 %v23255_v3  ;;  %v23372_v39 = vpop.f32.mrb[104].mxu0  ;;  %18959 = vmatprep.subr.bf16.mxu1 %v21791_v34  ;;  %v3623_v3 = vpack.c.bf16 %v3595_v45, %v3594_v9  ;;  %v3624_v28 = vpack.c.bf16 %v3597_v26, %v3596_v15  ;;  %v23394_v45 = vld [vmem:[#allocation6 + $0xa0] sm:$0xff]   ;;  %v3601_v9 = vld [vmem:[#allocation3 + $0xb2] sm:$0xff] }
 0x2be   : > { %25833 = vst [vmem:[#allocation45_spill] sm:$0xff] %v23372_v39  ;;  %19765 = vmatprep.subr.bf16.mxu0 %v21790_v7  ;;  %v23374_v6 = vpop.f32.mrb[105].mxu0  ;;  %v10563_v39 = vld [vmem:[#allocation4 + $0x159] sm:$0xff] }
 0x2bf   : > { %25834 = vst [vmem:[#allocation46_spill] sm:$0xff] %v23374_v6  ;;  %v23376_v1 = vpop.f32.mrb[106].mxu0  ;;  %v10562_v6 = vld [vmem:[#allocation4 + $0x151] sm:$0xff] }
 0x2c0   : > { %25835 = vst [vmem:[#allocation47_spill] sm:$0xff] %v23376_v1  ;;  %18960 = vmatpush3.bf16.msra.mxu1 %v21791_v34  ;;  %v23378_v49 = vpop.f32.mrb[107].mxu0  ;;  %v3599_v34 = vld [vmem:[#allocation3 + $0x9a] sm:$0xff]  ;;  %v10559_v1 = vld [vmem:[#allocation4 + $0x129] sm:$0xff] }
 0x2c1   : > { %25836 = vst [vmem:[#allocation48_spill] sm:$0xff] %v23378_v49  ;;  %19766 = vmatpush3.bf16.msra.mxu0 %v21790_v7  ;;  %18961 = vmatprep.subr.bf16.mxu1 %v21793_v14  ;;  %v10558_v49 = vld [vmem:[#allocation4 + $0x121] sm:$0xff] }
 0x2c2   : > { %19767 = vmatprep.subr.bf16.mxu0 %v21792_v11  ;;  %19736 = vmatmul.mubr.msk.bf16.gmra.mrb[116].mxu0 %vm572_vm2, %v23146_v51  ;;  %v3598_v51 = vld [vmem:[#allocation3 + $0x92] sm:$0xff] }
 0x2c3   : > { %18930 = vmatmul.mubr.msk.bf16.gmra.mrb[20].mxu1 %vm516_vm3, %v3623_v3  ;;  %19739 = vmatprep.mubr.msk.bf16.mxu0 %vm572_vm2, %v23162_v59  ;;  %v3600_v59 = vld [vmem:[#allocation3 + $0xaa] sm:$0xff] }
 0x2c4   : > { %18933 = vmatprep.mubr.msk.bf16.mxu1 %vm516_vm3, %v3624_v28  ;;  %18962 = vmatpush3.bf16.msra.mxu1 %v21793_v14  ;;  %v3625_v28 = vpack.c.bf16 %v3599_v34, %v3598_v51  ;;  %v3626_v14 = vpack.c.bf16 %v3601_v9, %v3600_v59  ;;  %v3604_v34 = vld [vmem:[#allocation3 + $0xda] sm:$0xff]  ;;  %v3606_v9 = vld [vmem:[#allocation3 + $0xf2] sm:$0xff] }
 0x2c5   : > { %19768 = vmatpush3.bf16.msra.mxu0 %v21792_v11  ;;  %v23391_v7 = vpop.f32.mrb[108].mxu0  ;;  %18995 = vmatprep.subr.bf16.mxu1 %v23383_v2  ;;  %v3603_v11 = vld [vmem:[#allocation3 + $0xca] sm:$0xff]  ;;  %v3628_v51 = vpack.c.bf16 %v3605_v0, %v3604_v34  ;;  %v3614_v34 = vld [vmem:[#allocation3 + $0x152] sm:$0xff] }
 0x2c6   : > { %25837 = vst [vmem:[#allocation49_spill] sm:$0xff] %v23391_v7  ;;  %19769 = vmatprep.subr.bf16.mxu0 %v21794_v30  ;;  %v23396_v26 = vpop.f32.mrb[109].mxu0  ;;  %v3611_v0 = vld [vmem:[#allocation3 + $0x12a] sm:$0xff]  ;;  %v10555_v7 = vld [vmem:[#allocation4 + $0xf9] sm:$0xff] }
 0x2c7   : > { %25838 = vst [vmem:[#allocation50_spill] sm:$0xff] %v23396_v26  ;;  %v23398_v3 = vpop.f32.mrb[110].mxu0  ;;  %v10554_v26 = vld [vmem:[#allocation4 + $0xf1] sm:$0xff] }
 0x2c8   : > { %25839 = vst [vmem:[#allocation51_spill] sm:$0xff] %v23398_v3  ;;  %v23400_v15 = vpop.f32.mrb[111].mxu0  ;;  %v3602_v3 = vld [vmem:[#allocation3 + $0xc2] sm:$0xff] }
 0x2c9   : > { %25840 = vst [vmem:[#allocation52_spill] sm:$0xff] %v23400_v15  ;;  %19770 = vmatpush3.bf16.msra.mxu0 %v21794_v30  ;;  %v3627_v15 = vpack.c.bf16 %v3603_v11, %v3602_v3  ;;  %v3609_v30 = vld [vmem:[#allocation3 + $0x112] sm:$0xff]  ;;  %v3610_v3 = vld [vmem:[#allocation3 + $0x122] sm:$0xff] }
 0x2ca   : > { %19803 = vmatprep.subr.bf16.mxu0 %v23394_v45  ;;  %19740 = vmatmul.mubr.msk.bf16.gmra.mrb[120].mxu0 %vm572_vm2, %v23164_v62  ;;  %v3607_v62 = vld [vmem:[#allocation3 + $0xfa] sm:$0xff]  ;;  %v3617_v11 = vld [vmem:[#allocation3 + $0x172] sm:$0xff] }
 0x2cb   : > { %18934 = vmatmul.mubr.msk.bf16.gmra.mrb[24].mxu1 %vm516_vm3, %v3625_v28  ;;  %19743 = vmatprep.mubr.msk.bf16.mxu0 %vm572_vm2, %v23174_v13  ;;  %v3629_v13 = vpack.c.bf16 %v3607_v62, %v3606_v9  ;;  %v3608_v28 = vld [vmem:[#allocation3 + $0x10a] sm:$0xff] }
 0x2cc   : > { %18937 = vmatprep.mubr.msk.bf16.mxu1 %vm516_vm3, %v3626_v14  ;;  %v3630_v59 = vpack.c.bf16 %v3609_v30, %v3608_v28  ;;  %v3902_v30 = vld [vmem:[#allocation3 + $0x1b] sm:$0xff]  ;;  %v3903_v9 = vld [vmem:[#allocation3 + $0x23] sm:$0xff] }
 0x2cd   : > { %v10245_v28 = vld [vmem:[#allocation4 + $0x188] sm:$0xff] }
 0x2d2   : > { %19744 = vmatmul.mubr.msk.bf16.gmra.mrb[124].mxu0 %vm572_vm2, %v23176_v16  ;;  %v3613_v16 = vld [vmem:[#allocation3 + $0x142] sm:$0xff] }
 0x2d3   : > { %18938 = vmatmul.mubr.msk.bf16.gmra.mrb[28].mxu1 %vm516_vm3, %v3627_v15  ;;  %19747 = vmatprep.mubr.msk.bf16.mxu0 %vm572_vm2, %v23184_v21  ;;  %v3631_v21 = vpack.c.bf16 %v3611_v0, %v3610_v3  ;;  %v3612_v15 = vld [vmem:[#allocation3 + $0x13a] sm:$0xff] }
 0x2d4   : > { %18941 = vmatprep.mubr.msk.bf16.mxu1 %vm516_vm3, %v3628_v51  ;;  %v3632_v14 = vpack.c.bf16 %v3613_v16, %v3612_v15  ;;  %v3616_v51 = vld [vmem:[#allocation3 + $0x16a] sm:$0xff]  ;;  %v10537_v0 = vld [vmem:[#allocation4 + $0x21] sm:$0xff]  ;;  %v3934_v16 = vpack.c.bf16 %v3903_v9, %v3902_v30 }
 0x2d5   : > { %v3634_v62 = vpack.c.bf16 %v3617_v11, %v3616_v51  ;;  %v3906_v11 = vld [vmem:[#allocation3 + $0x4b] sm:$0xff] }
 0x2d6   : > { %v10541_v51 = vld [vmem:[#allocation4 + $0x51] sm:$0xff]  ;;  %v21797_v9 = vld [vmem:[#allocation6 + $0xa8] sm:$0xff]  }
 0x2da   : > { %19748 = vmatmul.mubr.msk.bf16.gmra.mrb[128].mxu0 %vm572_vm2, %v23186_v22  ;;  %v3615_v22 = vld [vmem:[#allocation3 + $0x15a] sm:$0xff] }
 0x2db   : > { %18942 = vmatmul.mubr.msk.bf16.gmra.mrb[32].mxu1 %vm516_vm3, %v3629_v13  ;;  %19751 = vmatprep.mubr.msk.bf16.mxu0 %vm572_vm2, %v23196_v23  ;;  %v3633_v23 = vpack.c.bf16 %v3615_v22, %v3614_v34  ;;  %v10244_v13 = vld [vmem:[#allocation4 + $0x180] sm:$0xff]  ;;  %v3907_v34 = vld [vmem:[#allocation3 + $0x53] sm:$0xff] }
 0x2dc   : > { %18945 = vmatprep.mubr.msk.bf16.mxu1 %vm516_vm3, %v3630_v59  ;;  %v10536_v59 = vld [vmem:[#allocation4 + $0x19] sm:$0xff]  ;;  %v3936_v30 = vpack.c.bf16 %v3907_v34, %v3906_v11 }
 0x2dd   : > { %v10568_v15 = vpack.c.bf16 %v10537_v0, %v10536_v59  ;;  %v10539_v22 = vld [vmem:[#allocation4 + $0x39] sm:$0xff]  ;;  %v3909_v59 = vld [vmem:[#allocation3 + $0x6b] sm:$0xff] }
 0x2de   : > { %v3910_v0 = vld [vmem:[#allocation3 + $0x7b] sm:$0xff] }
 0x2e2   : > { %19752 = vmatmul.mubr.msk.bf16.gmra.mrb[132].mxu0 %vm572_vm2, %v23198_v31  ;;  %v3618_v31 = vld [vmem:[#allocation3 + $0x182] sm:$0xff] }
 0x2e3   : > { %18946 = vmatmul.mubr.msk.bf16.gmra.mrb[36].mxu1 %vm516_vm3, %v3631_v21  ;;  %19755 = vmatprep.mubr.msk.bf16.mxu0 %vm572_vm2, %v23208_v36  ;;  %v3619_v36 = vld [vmem:[#allocation3 + $0x18a] sm:$0xff]  ;;  %v23433_v21 = vpack.c.bf16 %v10245_v28, %v10244_v13 }
 0x2e4   : > { %18949 = vmatprep.mubr.msk.bf16.mxu1 %vm516_vm3, %v3632_v14  ;;  %v3635_v3 = vpack.c.bf16 %v3619_v36, %v3618_v31  ;;  %v10538_v14 = vld [vmem:[#allocation4 + $0x31] sm:$0xff]  ;;  %v3908_v28 = vld [vmem:[#allocation3 + $0x63] sm:$0xff] }
 0x2e5   : > { %v23440_v31 = vpack.c.bf16 %v10539_v22, %v10538_v14  ;;  %v21798_v36 = vld [vmem:[%s25765_s5 + $0xe0] sm:$0xff]   ;;  %v10545_v14 = vld [vmem:[#allocation4 + $0x81] sm:$0xff]  ;;  %v3937_v22 = vpack.c.bf16 %v3909_v59, %v3908_v28 }
 0x2e6   : > { %v10547_v28 = vld [vmem:[#allocation4 + $0x99] sm:$0xff] }
 0x2e7   : > { %v23474_v59 = vld [vmem:[#allocation6 + $0xc0] sm:$0xff]  }
 0x2ea   : > { %19756 = vmatmul.mubr.msk.bf16.gmra.mrb[136].mxu0 %vm572_vm2, %v23210_v37  ;;  %v3904_v37 = vld [vmem:[#allocation3 + $0x33] sm:$0xff] }
 0x2eb   : > { %18950 = vmatmul.mubr.msk.bf16.gmra.mrb[40].mxu1 %vm516_vm3, %v3633_v23  ;;  %19759 = vmatprep.mubr.msk.bf16.mxu0 %vm572_vm2, %v23220_v63  ;;  %v3905_v63 = vld [vmem:[#allocation3 + $0x3b] sm:$0xff]  ;;  %v10540_v23 = vld [vmem:[#allocation4 + $0x49] sm:$0xff] }
 0x2ec   : > { %18953 = vmatprep.mubr.msk.bf16.mxu1 %vm516_vm3, %v3634_v62  ;;  %v3935_v62 = vpack.c.bf16 %v3905_v63, %v3904_v37  ;;  %v23448_v13 = vpack.c.bf16 %v10541_v51, %v10540_v23  ;;  %v21799_v37 = vld [vmem:[#allocation6 + $0xb0] sm:$0xff]   ;;  %v10544_v63 = vld [vmem:[#allocation4 + $0x79] sm:$0xff]  ;;  %v23465_v51 = vld [vmem:[%s25765_s5 + $0xf0] sm:$0xff]  }
 0x2ed   : > { %v23460_v34 = vpack.c.bf16 %v10545_v14, %v10544_v63  ;;  %v21801_v23 = vld [vmem:[#allocation6 + $0xb8] sm:$0xff]  }
 0x2f2   : > { %19760 = vmatmul.mubr.msk.bf16.gmra.mrb[140].mxu0 %vm572_vm2, %v23433_v21 }
 0x2f3   : > { %18954 = vmatmul.mubr.msk.bf16.gmra.mrb[44].mxu1 %vm516_vm3, %v3635_v3  ;;  %19771 = vmatprep.mubr.msk.bf16.mxu0 %vm572_vm2, %v10568_v15  ;;  %v10542_v3 = vld [vmem:[#allocation4 + $0x61] sm:$0xff]  ;;  %v10543_v15 = vld [vmem:[#allocation4 + $0x69] sm:$0xff] }
 0x2f4   : > { %18963 = vmatprep.mubr.msk.bf16.mxu1 %vm516_vm3, %v3934_v16  ;;  %v21800_v16 = vld [vmem:[%s25765_s5 + $0xe8] sm:$0xff]   ;;  %v23458_v11 = vpack.c.bf16 %v10543_v15, %v10542_v3  ;;  %v10548_v3 = vld [vmem:[#allocation4 + $0xa9] sm:$0xff]  ;;  %v10549_v15 = vld [vmem:[#allocation4 + $0xb1] sm:$0xff] }
 0x2fa   : > { %19772 = vmatmul.mubr.msk.bf16.vlgmr.msra.gmra.mrb[112].mxu0 %vm572_vm2, %v23440_v31 }
 0x2fb   : > { %18964 = vmatmul.mubr.msk.bf16.vlgmr.msra.gmra.mrb[16].mxu1 %vm516_vm3, %v3935_v62  ;;  %19775 = vmatprep.mubr.msk.bf16.mxu0 %vm572_vm2, %v23448_v13  ;;  %v3912_v62 = vld [vmem:[#allocation3 + $0x93] sm:$0xff] }
 0x2fc   : > { %18996 = vmatpush3.bf16.msra.mxu1 %v23383_v2  ;;  %18967 = vmatprep.mubr.msk.bf16.mxu1 %vm516_vm3, %v3936_v30  ;;  %v3911_v2 = vld [vmem:[#allocation3 + $0x83] sm:$0xff]  ;;  %v3913_v30 = vld [vmem:[#allocation3 + $0x9b] sm:$0xff] }
 0x2fd   : > { %19804 = vmatpush3.bf16.msra.mxu0 %v23394_v45  ;;  %18997 = vmatprep.subr.bf16.mxu1 %v21798_v36  ;;  %v3938_v45 = vpack.c.bf16 %v3911_v2, %v3910_v0  ;;  %v3915_v0 = vld [vmem:[#allocation3 + $0xb3] sm:$0xff]  ;;  %v3939_v2 = vpack.c.bf16 %v3913_v30, %v3912_v62  ;;  %v10551_v62 = vld [vmem:[#allocation4 + $0xc9] sm:$0xff] }
 0x2fe   : > { %19805 = vmatprep.subr.bf16.mxu0 %v21797_v9  ;;  %v3919_v30 = vld [vmem:[#allocation3 + $0xe3] sm:$0xff] }
 0x300   : > { %18998 = vmatpush3.bf16.msra.mxu1 %v21798_v36  ;;  %v10546_v36 = vld [vmem:[#allocation4 + $0x91] sm:$0xff] }
 0x301   : > { %19806 = vmatpush3.bf16.msra.mxu0 %v21797_v9  ;;  %18999 = vmatprep.subr.bf16.mxu1 %v21800_v16  ;;  %v3914_v9 = vld [vmem:[#allocation3 + $0xab] sm:$0xff]  ;;  %v23476_v63 = vpack.c.bf16 %v10547_v28, %v10546_v36  ;;  %v10553_v36 = vld [vmem:[#allocation4 + $0xe1] sm:$0xff] }
 0x302   : > { %19807 = vmatprep.subr.bf16.mxu0 %v21799_v37  ;;  %19776 = vmatmul.mubr.msk.bf16.gmra.mrb[116].mxu0 %vm572_vm2, %v23458_v11  ;;  %v3940_v14 = vpack.c.bf16 %v3915_v0, %v3914_v9  ;;  %v10552_v9 = vld [vmem:[#allocation4 + $0xd9] sm:$0xff] }
 0x303   : > { %18968 = vmatmul.mubr.msk.bf16.gmra.mrb[20].mxu1 %vm516_vm3, %v3937_v22  ;;  %19779 = vmatprep.mubr.msk.bf16.mxu0 %vm572_vm2, %v23460_v34  ;;  %v23478_v22 = vpack.c.bf16 %v10549_v15, %v10548_v3  ;;  %v23489_v15 = vpack.c.bf16 %v10553_v36, %v10552_v9 }
 0x304   : > { %18971 = vmatprep.mubr.msk.bf16.mxu1 %vm516_vm3, %v3938_v45  ;;  %19000 = vmatpush3.bf16.msra.mxu1 %v21800_v16  ;;  %v3916_v16 = vld [vmem:[#allocation3 + $0xc3] sm:$0xff] }
 0x305   : > { %19808 = vmatpush3.bf16.msra.mxu0 %v21799_v37  ;;  %19033 = vmatprep.subr.bf16.mxu1 %v23465_v51  ;;  %v3917_v37 = vld [vmem:[#allocation3 + $0xcb] sm:$0xff]  ;;  %v10550_v45 = vld [vmem:[#allocation4 + $0xc1] sm:$0xff] }
 0x306   : > { %19809 = vmatprep.subr.bf16.mxu0 %v21801_v23  ;;  %v3941_v28 = vpack.c.bf16 %v3917_v37, %v3916_v16  ;;  %v23487_v0 = vpack.c.bf16 %v10551_v62, %v10550_v45  ;;  %v3922_v16 = vld [vmem:[#allocation3 + $0x10b] sm:$0xff]  ;;  %v3923_v37 = vld [vmem:[#allocation3 + $0x113] sm:$0xff] }
 0x307   : > { %v10556_v45 = vld [vmem:[#allocation4 + $0x109] sm:$0xff]  ;;  %v10557_v62 = vld [vmem:[#allocation4 + $0x111] sm:$0xff]  ;;  %v3944_v9 = vpack.c.bf16 %v3923_v37, %v3922_v16  ;;  %v23507_v37 = vpack.c.bf16 %v10559_v1, %v10558_v49 }
 0x308   : > { %v23499_v36 = vpack.c.bf16 %v10557_v62, %v10556_v45  ;;  %v3931_v1 = vld [vmem:[#allocation3 + $0x173] sm:$0xff]  ;;  %v10564_v49 = vld [vmem:[#allocation4 + $0x169] sm:$0xff] }
 0x309   : > { %19810 = vmatpush3.bf16.msra.mxu0 %v21801_v23  ;;  %v3918_v23 = vld [vmem:[#allocation3 + $0xdb] sm:$0xff] }
 0x30a   : > { %19843 = vmatprep.subr.bf16.mxu0 %v23474_v59  ;;  %19780 = vmatmul.mubr.msk.bf16.gmra.mrb[120].mxu0 %vm572_vm2, %v23476_v63  ;;  %v3942_v3 = vpack.c.bf16 %v3919_v30, %v3918_v23  ;;  %v23497_v30 = vpack.c.bf16 %v10555_v7, %v10554_v26  ;;  %v3927_v7 = vld [vmem:[#allocation3 + $0x143] sm:$0xff]  ;;  %v10560_v26 = vld [vmem:[#allocation4 + $0x139] sm:$0xff] }
 0x30b   : > { %18972 = vmatmul.mubr.msk.bf16.gmra.mrb[24].mxu1 %vm516_vm3, %v3939_v2  ;;  %19783 = vmatprep.mubr.msk.bf16.mxu0 %vm572_vm2, %v23478_v22  ;;  %v3920_v2 = vld [vmem:[#allocation3 + $0xf3] sm:$0xff] }
 0x30c   : > { %18975 = vmatprep.mubr.msk.bf16.mxu1 %vm516_vm3, %v3940_v14  ;;  %v3921_v14 = vld [vmem:[#allocation3 + $0xfb] sm:$0xff] }
 0x30d   : > { %v3943_v23 = vpack.c.bf16 %v3921_v14, %v3920_v2  ;;  %v3926_v2 = vld [vmem:[#allocation3 + $0x13b] sm:$0xff] }
 0x30e   : > { %v10561_v14 = vld [vmem:[#allocation4 + $0x141] sm:$0xff]  ;;  %v3946_v45 = vpack.c.bf16 %v3927_v7, %v3926_v2  ;;  %v23517_v7 = vpack.c.bf16 %v10563_v39, %v10562_v6  ;;  %v10567_v39 = vld [vmem:[#allocation4 + $0x189] sm:$0xff] }
 0x30f   : > { %v23509_v62 = vpack.c.bf16 %v10561_v14, %v10560_v26 }
 0x312   : > { %19784 = vmatmul.mubr.msk.bf16.gmra.mrb[124].mxu0 %vm572_vm2, %v23487_v0 }
 0x313   : > { %18976 = vmatmul.mubr.msk.bf16.gmra.mrb[28].mxu1 %vm516_vm3, %v3941_v28  ;;  %19787 = vmatprep.mubr.msk.bf16.mxu0 %vm572_vm2, %v23489_v15  ;;  %v3924_v28 = vld [vmem:[#allocation3 + $0x123] sm:$0xff] }
 0x314   : > { %18979 = vmatprep.mubr.msk.bf16.mxu1 %vm516_vm3, %v3942_v3  ;;  %v3925_v3 = vld [vmem:[#allocation3 + $0x12b] sm:$0xff] }
 0x315   : > { %v3945_v16 = vpack.c.bf16 %v3925_v3, %v3924_v28  ;;  %v3930_v28 = vld [vmem:[#allocation3 + $0x16b] sm:$0xff] }
 0x316   : > { %v10565_v3 = vld [vmem:[#allocation4 + $0x171] sm:$0xff]  ;;  %v3948_v26 = vpack.c.bf16 %v3931_v1, %v3930_v28 }
 0x317   : > { %v23519_v14 = vpack.c.bf16 %v10565_v3, %v10564_v49  ;;  %v4218_v1 = vld [vmem:[#allocation3 + $0x34] sm:$0xff]  ;;  %v4219_v49 = vld [vmem:[#allocation3 + $0x3c] sm:$0xff] }
 0x318   : > { %v10860_v3 = vld [vmem:[#allocation4 + $0x32] sm:$0xff] }
 0x31a   : > { %19788 = vmatmul.mubr.msk.bf16.gmra.mrb[128].mxu0 %vm572_vm2, %v23497_v30 }
 0x31b   : > { %18980 = vmatmul.mubr.msk.bf16.gmra.mrb[32].mxu1 %vm516_vm3, %v3943_v23  ;;  %19791 = vmatprep.mubr.msk.bf16.mxu0 %vm572_vm2, %v23499_v36  ;;  %v3928_v23 = vld [vmem:[#allocation3 + $0x153] sm:$0xff] }
 0x31c   : > { %18983 = vmatprep.mubr.msk.bf16.mxu1 %vm516_vm3, %v3944_v9  ;;  %v3929_v9 = vld [vmem:[#allocation3 + $0x15b] sm:$0xff] }
 0x31d   : > { %v3947_v2 = vpack.c.bf16 %v3929_v9, %v3928_v23  ;;  %v10566_v23 = vld [vmem:[#allocation4 + $0x181] sm:$0xff] }
 0x31e   : > { %v23527_v28 = vpack.c.bf16 %v10567_v39, %v10566_v23  ;;  %v21805_v23 = vld [vmem:[%s25765_s5 + $0xf8] sm:$0xff]   ;;  %v4224_v39 = vld [vmem:[#allocation3 + $0x7c] sm:$0xff] }
 0x322   : > { %19792 = vmatmul.mubr.msk.bf16.gmra.mrb[132].mxu0 %vm572_vm2, %v23507_v37 }
 0x323   : > { %18984 = vmatmul.mubr.msk.bf16.gmra.mrb[36].mxu1 %vm516_vm3, %v3945_v16  ;;  %19795 = vmatprep.mubr.msk.bf16.mxu0 %vm572_vm2, %v23509_v62  ;;  %v3932_v16 = vld [vmem:[#allocation3 + $0x183] sm:$0xff] }
 0x324   : > { %18987 = vmatprep.mubr.msk.bf16.mxu1 %vm516_vm3, %v3946_v45  ;;  %v4216_v45 = vld [vmem:[#allocation3 + $0x1c] sm:$0xff]  ;;  %v3949_v9 = vpack.c.bf16 %v3933_v12, %v3932_v16 }
 0x325   : > { %v4248_v6 = vpack.c.bf16 %v4217_v47, %v4216_v45  ;;  %v4249_v47 = vpack.c.bf16 %v4219_v49, %v4218_v1  ;;  %v21804_v45 = vld [vmem:[#allocation6 + $0xc8] sm:$0xff]   ;;  %v21806_v49 = vld [vmem:[#allocation6 + $0xd0] sm:$0xff]  }
 0x326   : > { %v10865_v1 = vld [vmem:[#allocation4 + $0x6a] sm:$0xff] }
 0x32a   : > { %19796 = vmatmul.mubr.msk.bf16.gmra.mrb[136].mxu0 %vm572_vm2, %v23517_v7 }
 0x32b   : > { %18988 = vmatmul.mubr.msk.bf16.gmra.mrb[40].mxu1 %vm516_vm3, %v3947_v2  ;;  %19799 = vmatprep.mubr.msk.bf16.mxu0 %vm572_vm2, %v23519_v14  ;;  %v10861_v2 = vld [vmem:[#allocation4 + $0x3a] sm:$0xff] }
 0x32c   : > { %18991 = vmatprep.mubr.msk.bf16.mxu1 %vm516_vm3, %v3948_v26  ;;  %v4220_v26 = vld [vmem:[#allocation3 + $0x4c] sm:$0xff]  ;;  %v23535_v12 = vpack.c.bf16 %v10861_v2, %v10860_v3  ;;  %v10866_v3 = vld [vmem:[#allocation4 + $0x7a] sm:$0xff]  ;;  %v10867_v2 = vld [vmem:[#allocation4 + $0x82] sm:$0xff] }
 0x32d   : > { %v4250_v16 = vpack.c.bf16 %v4221_v4, %v4220_v26  ;;  %v4223_v4 = vld [vmem:[#allocation3 + $0x6c] sm:$0xff] }
 0x332   : > { %19800 = vmatmul.mubr.msk.bf16.gmra.mrb[140].mxu0 %vm572_vm2, %v23527_v28 }
 0x333   : > { %18992 = vmatmul.mubr.msk.bf16.gmra.mrb[44].mxu1 %vm516_vm3, %v3949_v9  ;;  %19811 = vmatprep.mubr.msk.bf16.mxu0 %vm572_vm2, %v23227_v56  ;;  %v4222_v56 = vld [vmem:[#allocation3 + $0x64] sm:$0xff] }
 0x334   : > { %19001 = vmatprep.mubr.msk.bf16.mxu1 %vm516_vm3, %v4248_v6  ;;  %v21807_v6 = vld [vmem:[%s25765_s5 + $0x100] sm:$0xff]   ;;  %v10864_v9 = vld [vmem:[#allocation4 + $0x62] sm:$0xff]  ;;  %v4251_v26 = vpack.c.bf16 %v4223_v4, %v4222_v56 }
 0x335   : > { %v10868_v56 = vld [vmem:[#allocation4 + $0x92] sm:$0xff]  ;;  %v10869_v4 = vld [vmem:[#allocation4 + $0x9a] sm:$0xff] }
 0x33a   : > { %19812 = vmatmul.mubr.msk.bf16.vlgmr.msra.gmra.mrb[112].mxu0 %vm572_vm2, %v23535_v12 }
 0x33b   : > { %19002 = vmatmul.mubr.msk.bf16.vlgmr.msra.gmra.mrb[16].mxu1 %vm516_vm3, %v4249_v47  ;;  %19815 = vmatprep.mubr.msk.bf16.mxu0 %vm572_vm2, %v23242_v29  ;;  %v23551_v47 = vpack.c.bf16 %v10865_v1, %v10864_v9  ;;  %v4228_v9 = vld [vmem:[#allocation3 + $0xac] sm:$0xff]  ;;  %v4229_v1 = vld [vmem:[#allocation3 + $0xb4] sm:$0xff] }
 0x33c   : > { %19034 = vmatpush3.bf16.msra.mxu1 %v23465_v51  ;;  %19005 = vmatprep.mubr.msk.bf16.mxu1 %vm516_vm3, %v4250_v16  ;;  %v4225_v51 = vld [vmem:[#allocation3 + $0x84] sm:$0xff]  ;;  %v21808_v16 = vld [vmem:[#allocation6 + $0xd8] sm:$0xff]  }
 0x33d   : > { %19844 = vmatpush3.bf16.msra.mxu0 %v23474_v59  ;;  %19035 = vmatprep.subr.bf16.mxu1 %v21805_v23  ;;  %v4252_v29 = vpack.c.bf16 %v4225_v51, %v4224_v39  ;;  %v23553_v59 = vpack.c.bf16 %v10867_v2, %v10866_v3  ;;  %v23567_v39 = vld [vmem:[#allocation6 + $0xe0] sm:$0xff]   ;;  %v23569_v3 = vpack.c.bf16 %v10869_v4, %v10868_v56  ;;  %v4236_v4 = vld [vmem:[#allocation3 + $0x10c] sm:$0xff] }
 0x33e   : > { %19845 = vmatprep.subr.bf16.mxu0 %v21804_v45  ;;  %v4254_v2 = vpack.c.bf16 %v4229_v1, %v4228_v9  ;;  %v4235_v56 = vld [vmem:[#allocation3 + $0xfc] sm:$0xff] }
 0x340   : > { %19036 = vmatpush3.bf16.msra.mxu1 %v21805_v23  ;;  %v4227_v23 = vld [vmem:[#allocation3 + $0x9c] sm:$0xff] }
 0x341   : > { %19846 = vmatpush3.bf16.msra.mxu0 %v21804_v45  ;;  %19037 = vmatprep.subr.bf16.mxu1 %v21807_v6  ;;  %v4226_v45 = vld [vmem:[#allocation3 + $0x94] sm:$0xff] }
 0x342   : > { %19847 = vmatprep.subr.bf16.mxu0 %v21806_v49  ;;  %19816 = vmatmul.mubr.msk.bf16.gmra.mrb[116].mxu0 %vm572_vm2, %v23551_v47  ;;  %v4253_v51 = vpack.c.bf16 %v4227_v23, %v4226_v45 }
 0x343   : > { %19006 = vmatmul.mubr.msk.bf16.gmra.mrb[20].mxu1 %vm516_vm3, %v4251_v26  ;;  %19819 = vmatprep.mubr.msk.bf16.mxu0 %vm572_vm2, %v23553_v59  ;;  %v4232_v26 = vld [vmem:[#allocation3 + $0xdc] sm:$0xff] }
 0x344   : > { %19009 = vmatprep.mubr.msk.bf16.mxu1 %vm516_vm3, %v4252_v29  ;;  %19038 = vmatpush3.bf16.msra.mxu1 %v21807_v6  ;;  %v4230_v6 = vld [vmem:[#allocation3 + $0xc4] sm:$0xff] }
 0x345   : > { %19848 = vmatpush3.bf16.msra.mxu0 %v21806_v49  ;;  %19071 = vmatprep.subr.bf16.mxu1 %v23558_v58  ;;  %v4231_v49 = vld [vmem:[#allocation3 + $0xcc] sm:$0xff]  ;;  %v4233_v29 = vld [vmem:[#allocation3 + $0xe4] sm:$0xff] }
 0x346   : > { %19849 = vmatprep.subr.bf16.mxu0 %v21808_v16  ;;  %v4255_v45 = vpack.c.bf16 %v4231_v49, %v4230_v6  ;;  %v4256_v23 = vpack.c.bf16 %v4233_v29, %v4232_v26  ;;  %v4243_v26 = vld [vmem:[#allocation3 + $0x15c] sm:$0xff]  ;;  %v4244_v29 = vld [vmem:[#allocation3 + $0x16c] sm:$0xff] }
 0x349   : > { %19850 = vmatpush3.bf16.msra.mxu0 %v21808_v16  ;;  %v4234_v16 = vld [vmem:[#allocation3 + $0xf4] sm:$0xff] }
 0x34a   : > { %19883 = vmatprep.subr.bf16.mxu0 %v23567_v39  ;;  %19820 = vmatmul.mubr.msk.bf16.gmra.mrb[120].mxu0 %vm572_vm2, %v23569_v3  ;;  %v4257_v9 = vpack.c.bf16 %v4235_v56, %v4234_v16  ;;  %v4247_v16 = vld [vmem:[#allocation3 + $0x18c] sm:$0xff]  ;;  %v10888_v56 = vld [vmem:[#allocation4 + $0x182] sm:$0xff] }
 0x34b   : > { %19010 = vmatmul.mubr.msk.bf16.gmra.mrb[24].mxu1 %vm516_vm3, %v4253_v51  ;;  %19823 = vmatprep.mubr.msk.bf16.mxu0 %vm572_vm2, %v23270_v55  ;;  %v4237_v55 = vld [vmem:[#allocation3 + $0x114] sm:$0xff]  ;;  %v4239_v51 = vld [vmem:[#allocation3 + $0x12c] sm:$0xff] }
 0x34c   : > { %19013 = vmatprep.mubr.msk.bf16.mxu1 %vm516_vm3, %v4254_v2  ;;  %v4258_v1 = vpack.c.bf16 %v4237_v55, %v4236_v4  ;;  %v4240_v2 = vld [vmem:[#allocation3 + $0x13c] sm:$0xff]  ;;  %v11181_v55 = vld [vmem:[#allocation4 + $0x30] sm:$0xff] }
 0x34d   : > { %v4531_v4 = vld [vmem:[#allocation3 + $0x38] sm:$0xff] }
 0x352   : > { %19824 = vmatmul.mubr.msk.bf16.gmra.mrb[124].mxu0 %vm572_vm2, %v23272_v60  ;;  %v4238_v60 = vld [vmem:[#allocation3 + $0x124] sm:$0xff] }
 0x353   : > { %19014 = vmatmul.mubr.msk.bf16.gmra.mrb[28].mxu1 %vm516_vm3, %v4255_v45  ;;  %19827 = vmatprep.mubr.msk.bf16.mxu0 %vm572_vm2, %v23288_v18  ;;  %v4241_v18 = vld [vmem:[#allocation3 + $0x144] sm:$0xff]  ;;  %v4259_v6 = vpack.c.bf16 %v4239_v51, %v4238_v60  ;;  %v4530_v51 = vld [vmem:[#allocation3 + $0x30] sm:$0xff] }
 0x354   : > { %19017 = vmatprep.mubr.msk.bf16.mxu1 %vm516_vm3, %v4256_v23  ;;  %v4260_v49 = vpack.c.bf16 %v4241_v18, %v4240_v2  ;;  %v4562_v2 = vpack.c.bf16 %v4531_v4, %v4530_v51  ;;  %v4537_v4 = vld [vmem:[#allocation3 + $0x80] sm:$0xff]  ;;  %v21813_v51 = vld [vmem:[#allocation6 + $0xf0] sm:$0xff]  }
 0x35a   : > { %19828 = vmatmul.mubr.msk.bf16.gmra.mrb[128].mxu0 %vm572_vm2, %v23290_v20  ;;  %v4242_v20 = vld [vmem:[#allocation3 + $0x154] sm:$0xff] }
 0x35b   : > { %19018 = vmatmul.mubr.msk.bf16.gmra.mrb[32].mxu1 %vm516_vm3, %v4257_v9  ;;  %19831 = vmatprep.mubr.msk.bf16.mxu0 %vm572_vm2, %v23306_v43  ;;  %v4245_v43 = vld [vmem:[#allocation3 + $0x174] sm:$0xff]  ;;  %v4261_v45 = vpack.c.bf16 %v4243_v26, %v4242_v20  ;;  %v4532_v20 = vld [vmem:[#allocation3 + $0x48] sm:$0xff]  ;;  %v11185_v26 = vld [vmem:[#allocation4 + $0x60] sm:$0xff] }
 0x35c   : > { %19021 = vmatprep.mubr.msk.bf16.mxu1 %vm516_vm3, %v4258_v1  ;;  %v4262_v23 = vpack.c.bf16 %v4245_v43, %v4244_v29  ;;  %v11182_v9 = vld [vmem:[#allocation4 + $0x38] sm:$0xff]  ;;  %v11186_v29 = vld [vmem:[#allocation4 + $0x68] sm:$0xff] }
 0x35d   : > { %v11213_v18 = vpack.c.bf16 %v11182_v9, %v11181_v55  ;;  %v21814_v55 = vld [vmem:[%s25765_s5 + $0x118] sm:$0xff]   ;;  %v11187_v9 = vld [vmem:[#allocation4 + $0x78] sm:$0xff] }
 0x362   : > { %19832 = vmatmul.mubr.msk.bf16.gmra.mrb[132].mxu0 %vm572_vm2, %v23308_v32  ;;  %v4246_v32 = vld [vmem:[#allocation3 + $0x184] sm:$0xff] }
 0x363   : > { %19022 = vmatmul.mubr.msk.bf16.gmra.mrb[36].mxu1 %vm516_vm3, %v4259_v6  ;;  %19835 = vmatprep.mubr.msk.bf16.mxu0 %vm572_vm2, %v23324_v25  ;;  %v10889_v25 = vld [vmem:[#allocation4 + $0x18a] sm:$0xff]  ;;  %v4263_v1 = vpack.c.bf16 %v4247_v16, %v4246_v32 }
 0x364   : > { %19025 = vmatprep.mubr.msk.bf16.mxu1 %vm516_vm3, %v4260_v49  ;;  %v23602_v60 = vpack.c.bf16 %v10889_v25, %v10888_v56  ;;  %v11184_v6 = vld [vmem:[#allocation4 + $0x50] sm:$0xff]  ;;  %v4535_v49 = vld [vmem:[#allocation3 + $0x68] sm:$0xff]  ;;  %v11215_v25 = vpack.c.bf16 %v11186_v29, %v11185_v26  ;;  %v21815_v26 = vld [vmem:[#allocation6 + $0xf8] sm:$0xff]  }
 0x365   : > { %v21811_v16 = vld [vmem:[#allocation6 + $0xe8] sm:$0xff]   ;;  %v23624_v29 = vld [vmem:[%s25765_s5 + $0x120] sm:$0xff]  }
 0x366   : > { %v21812_v56 = vld [vmem:[%s25765_s5 + $0x110] sm:$0xff]  }
 0x36a   : > { %19836 = vmatmul.mubr.msk.bf16.gmra.mrb[136].mxu0 %vm572_vm2, %v23326_v19  ;;  %v4533_v19 = vld [vmem:[#allocation3 + $0x50] sm:$0xff] }
 0x36b   : > { %19026 = vmatmul.mubr.msk.bf16.gmra.mrb[40].mxu1 %vm516_vm3, %v4261_v45  ;;  %19839 = vmatprep.mubr.msk.bf16.mxu0 %vm572_vm2, %v23342_v54  ;;  %v11183_v54 = vld [vmem:[#allocation4 + $0x48] sm:$0xff]  ;;  %v4563_v43 = vpack.c.bf16 %v4533_v19, %v4532_v20  ;;  %v11190_v19 = vld [vmem:[#allocation4 + $0x98] sm:$0xff] }
 0x36c   : > { %19029 = vmatprep.mubr.msk.bf16.mxu1 %vm516_vm3, %v4262_v23  ;;  %v11214_v45 = vpack.c.bf16 %v11184_v6, %v11183_v54  ;;  %v4534_v23 = vld [vmem:[#allocation3 + $0x60] sm:$0xff] }
 0x36d   : > { %v4564_v32 = vpack.c.bf16 %v4535_v49, %v4534_v23  ;;  %v4538_v49 = vld [vmem:[#allocation3 + $0x90] sm:$0xff] }
 0x36e   : > { %v11192_v23 = vld [vmem:[#allocation4 + $0xb0] sm:$0xff] }
 0x372   : > { %19840 = vmatmul.mubr.msk.bf16.gmra.mrb[140].mxu0 %vm572_vm2, %v23602_v60 }
 0x373   : > { %19030 = vmatmul.mubr.msk.bf16.gmra.mrb[44].mxu1 %vm516_vm3, %v4263_v1  ;;  %19851 = vmatprep.mubr.msk.bf16.mxu0 %vm572_vm2, %v11213_v18  ;;  %v11188_v1 = vld [vmem:[#allocation4 + $0x80] sm:$0xff]  ;;  %v11189_v18 = vld [vmem:[#allocation4 + $0x90] sm:$0xff] }
 0x374   : > { %19039 = vmatprep.mubr.msk.bf16.mxu1 %vm516_vm3, %v4562_v2  ;;  %v4539_v2 = vld [vmem:[#allocation3 + $0x98] sm:$0xff]  ;;  %v11216_v6 = vpack.c.bf16 %v11188_v1, %v11187_v9  ;;  %v11217_v20 = vpack.c.bf16 %v11190_v19, %v11189_v18 }
 0x37a   : > { %19852 = vmatmul.mubr.msk.bf16.vlgmr.msra.gmra.mrb[112].mxu0 %vm572_vm2, %v11214_v45  ;;  %v11191_v45 = vld [vmem:[#allocation4 + $0xa8] sm:$0xff] }
 0x37b   : > { %19040 = vmatmul.mubr.msk.bf16.vlgmr.msra.gmra.mrb[16].mxu1 %vm516_vm3, %v4563_v43  ;;  %19855 = vmatprep.mubr.msk.bf16.mxu0 %vm572_vm2, %v11215_v25  ;;  %v4541_v43 = vld [vmem:[#allocation3 + $0xb0] sm:$0xff]  ;;  %v11194_v25 = vld [vmem:[#allocation4 + $0xc8] sm:$0xff]  ;;  %v11218_v1 = vpack.c.bf16 %v11192_v23, %v11191_v45 }
 0x37c   : > { %19072 = vmatpush3.bf16.msra.mxu1 %v23558_v58  ;;  %19043 = vmatprep.mubr.msk.bf16.mxu1 %vm516_vm3, %v4564_v32  ;;  %v4536_v58 = vld [vmem:[#allocation3 + $0x78] sm:$0xff]  ;;  %v23631_v32 = vld [vmem:[#allocation6 + $0x100] sm:$0xff]  }
 0x37d   : > { %19884 = vmatpush3.bf16.msra.mxu0 %v23567_v39  ;;  %19073 = vmatprep.subr.bf16.mxu1 %v21812_v56  ;;  %v4565_v54 = vpack.c.bf16 %v4537_v4, %v4536_v58  ;;  %v4566_v39 = vpack.c.bf16 %v4539_v2, %v4538_v49  ;;  %v4540_v4 = vld [vmem:[#allocation3 + $0xa8] sm:$0xff]  ;;  %v4542_v2 = vld [vmem:[#allocation3 + $0xc0] sm:$0xff]  ;;  %v11198_v49 = vld [vmem:[#allocation4 + $0xf8] sm:$0xff] }
 0x37e   : > { %19885 = vmatprep.subr.bf16.mxu0 %v21811_v16  ;;  %v4567_v9 = vpack.c.bf16 %v4541_v43, %v4540_v4  ;;  %v11196_v58 = vld [vmem:[#allocation4 + $0xe0] sm:$0xff]  ;;  %v4546_v43 = vld [vmem:[#allocation3 + $0xf0] sm:$0xff]  ;;  %v4551_v4 = vld [vmem:[#allocation3 + $0x128] sm:$0xff] }
 0x380   : > { %19074 = vmatpush3.bf16.msra.mxu1 %v21812_v56  ;;  %v11193_v56 = vld [vmem:[#allocation4 + $0xc0] sm:$0xff] }
 0x381   : > { %19886 = vmatpush3.bf16.msra.mxu0 %v21811_v16  ;;  %19075 = vmatprep.subr.bf16.mxu1 %v21814_v55  ;;  %v4543_v16 = vld [vmem:[#allocation3 + $0xc8] sm:$0xff]  ;;  %v11219_v19 = vpack.c.bf16 %v11194_v25, %v11193_v56  ;;  %v11200_v25 = vld [vmem:[#allocation4 + $0x110] sm:$0xff] }
 0x382   : > { %19887 = vmatprep.subr.bf16.mxu0 %v21813_v51  ;;  %19856 = vmatmul.mubr.msk.bf16.gmra.mrb[116].mxu0 %vm572_vm2, %v11216_v6  ;;  %v4568_v18 = vpack.c.bf16 %v4543_v16, %v4542_v2  ;;  %v11197_v6 = vld [vmem:[#allocation4 + $0xf0] sm:$0xff]  ;;  %v11199_v56 = vld [vmem:[#allocation4 + $0x108] sm:$0xff] }
 0x383   : > { %19044 = vmatmul.mubr.msk.bf16.gmra.mrb[20].mxu1 %vm516_vm3, %v4565_v54  ;;  %19859 = vmatprep.mubr.msk.bf16.mxu0 %vm572_vm2, %v11217_v20  ;;  %v4547_v54 = vld [vmem:[#allocation3 + $0xf8] sm:$0xff]  ;;  %v11221_v23 = vpack.c.bf16 %v11198_v49, %v11197_v6  ;;  %v4549_v16 = vld [vmem:[#allocation3 + $0x110] sm:$0xff]  ;;  %v4548_v2 = vld [vmem:[#allocation3 + $0x108] sm:$0xff] }
 0x384   : > { %19047 = vmatprep.mubr.msk.bf16.mxu1 %vm516_vm3, %v4566_v39  ;;  %19076 = vmatpush3.bf16.msra.mxu1 %v21814_v55  ;;  %v4545_v55 = vld [vmem:[#allocation3 + $0xe0] sm:$0xff]  ;;  %v4544_v39 = vld [vmem:[#allocation3 + $0xd8] sm:$0xff]  ;;  %v4570_v45 = vpack.c.bf16 %v4547_v54, %v4546_v43 }
 0x385   : > { %19888 = vmatpush3.bf16.msra.mxu0 %v21813_v51  ;;  %19109 = vmatprep.subr.bf16.mxu1 %v23624_v29  ;;  %v11195_v51 = vld [vmem:[#allocation4 + $0xd8] sm:$0xff]  ;;  %v4569_v20 = vpack.c.bf16 %v4545_v55, %v4544_v39  ;;  %v4550_v55 = vld [vmem:[#allocation3 + $0x120] sm:$0xff] }
 0x386   : > { %19889 = vmatprep.subr.bf16.mxu0 %v21815_v26  ;;  %v4553_v54 = vld [vmem:[#allocation3 + $0x140] sm:$0xff]  ;;  %v11203_v6 = vld [vmem:[#allocation4 + $0x138] sm:$0xff] }
 0x387   : > { %v11204_v49 = vld [vmem:[#allocation4 + $0x140] sm:$0xff]  ;;  %v4555_v39 = vld [vmem:[#allocation3 + $0x158] sm:$0xff] }
 0x388   : > { %v4552_v43 = vld [vmem:[#allocation3 + $0x138] sm:$0xff] }
 0x389   : > { %19890 = vmatpush3.bf16.msra.mxu0 %v21815_v26  ;;  %v11220_v26 = vpack.c.bf16 %v11196_v58, %v11195_v51  ;;  %v4572_v51 = vpack.c.bf16 %v4551_v4, %v4550_v55  ;;  %v4557_v4 = vld [vmem:[#allocation3 + $0x170] sm:$0xff] }
 0x38a   : > { %19923 = vmatprep.subr.bf16.mxu0 %v23631_v32  ;;  %19860 = vmatmul.mubr.msk.bf16.gmra.mrb[120].mxu0 %vm572_vm2, %v11218_v1  ;;  %v11202_v1 = vld [vmem:[#allocation4 + $0x128] sm:$0xff] }
 0x38b   : > { %19048 = vmatmul.mubr.msk.bf16.gmra.mrb[24].mxu1 %vm516_vm3, %v4567_v9  ;;  %19863 = vmatprep.mubr.msk.bf16.mxu0 %vm572_vm2, %v11219_v19  ;;  %v11201_v9 = vld [vmem:[#allocation4 + $0x120] sm:$0xff]  ;;  %v11222_v19 = vpack.c.bf16 %v11200_v25, %v11199_v56 }
 0x38c   : > { %19051 = vmatprep.mubr.msk.bf16.mxu1 %vm516_vm3, %v4568_v18  ;;  %v4571_v18 = vpack.c.bf16 %v4549_v16, %v4548_v2  ;;  %v11223_v58 = vpack.c.bf16 %v11202_v1, %v11201_v9  ;;  %v4554_v16 = vld [vmem:[#allocation3 + $0x150] sm:$0xff]  ;;  %v11207_v9 = vld [vmem:[#allocation4 + $0x168] sm:$0xff]  ;;  %v4558_v2 = vld [vmem:[#allocation3 + $0x180] sm:$0xff] }
 0x38d   : > { %v4574_v56 = vpack.c.bf16 %v4555_v39, %v4554_v16  ;;  %v11208_v1 = vld [vmem:[#allocation4 + $0x170] sm:$0xff]  ;;  %v4561_v39 = vld [vmem:[#allocation3 + $0x1a0] sm:$0xff] }
 0x38e   : > { %v4847_v16 = vld [vmem:[#allocation3 + $0x51] sm:$0xff] }
 0x392   : > { %19864 = vmatmul.mubr.msk.bf16.gmra.mrb[124].mxu0 %vm572_vm2, %v11220_v26  ;;  %v11206_v26 = vld [vmem:[#allocation4 + $0x158] sm:$0xff] }
 0x393   : > { %19052 = vmatmul.mubr.msk.bf16.gmra.mrb[28].mxu1 %vm516_vm3, %v4569_v20  ;;  %19867 = vmatprep.mubr.msk.bf16.mxu0 %vm572_vm2, %v11221_v23  ;;  %v11205_v20 = vld [vmem:[#allocation4 + $0x150] sm:$0xff]  ;;  %v11224_v23 = vpack.c.bf16 %v11204_v49, %v11203_v6  ;;  %v11212_v6 = vld [vmem:[#allocation4 + $0x1a0] sm:$0xff]  ;;  %v4560_v49 = vld [vmem:[#allocation3 + $0x198] sm:$0xff] }
 0x394   : > { %19055 = vmatprep.mubr.msk.bf16.mxu1 %vm516_vm3, %v4570_v45  ;;  %v4573_v45 = vpack.c.bf16 %v4553_v54, %v4552_v43  ;;  %v11225_v25 = vpack.c.bf16 %v11206_v26, %v11205_v20  ;;  %v11211_v54 = vld [vmem:[#allocation4 + $0x198] sm:$0xff]  ;;  %v4577_v43 = vpack.c.bf16 %v4561_v39, %v4560_v49  ;;  %v4854_v49 = vld [vmem:[#allocation3 + $0xa9] sm:$0xff] }
 0x395   : > { %v11228_v20 = vpack.c.bf16 %v11212_v6, %v11211_v54  ;;  %v4845_v26 = vld [vmem:[#allocation3 + $0x39] sm:$0xff]  ;;  %v4855_v54 = vld [vmem:[#allocation3 + $0xb1] sm:$0xff]  ;;  %v4857_v6 = vld [vmem:[#allocation3 + $0xc9] sm:$0xff] }
 0x396   : > { %v4881_v39 = vpack.c.bf16 %v4855_v54, %v4854_v49 }
 0x39a   : > { %19868 = vmatmul.mubr.msk.bf16.gmra.mrb[128].mxu0 %vm572_vm2, %v11222_v19  ;;  %v4556_v19 = vld [vmem:[#allocation3 + $0x168] sm:$0xff] }
 0x39b   : > { %19056 = vmatmul.mubr.msk.bf16.gmra.mrb[32].mxu1 %vm516_vm3, %v4571_v18  ;;  %19871 = vmatprep.mubr.msk.bf16.mxu0 %vm572_vm2, %v11223_v58  ;;  %v4559_v18 = vld [vmem:[#allocation3 + $0x188] sm:$0xff]  ;;  %v4575_v55 = vpack.c.bf16 %v4557_v4, %v4556_v19  ;;  %v21820_v19 = vld [vmem:[#allocation6 + $0x110] sm:$0xff]  }
 0x39c   : > { %19059 = vmatprep.mubr.msk.bf16.mxu1 %vm516_vm3, %v4572_v51  ;;  %v11226_v51 = vpack.c.bf16 %v11208_v1, %v11207_v9  ;;  %v4576_v58 = vpack.c.bf16 %v4559_v18, %v4558_v2  ;;  %v4848_v4 = vld [vmem:[#allocation3 + $0x61] sm:$0xff] }
 0x39d   : > { %v21818_v1 = vld [vmem:[#allocation6 + $0x108] sm:$0xff]   ;;  %v21819_v2 = vld [vmem:[%s25765_s5 + $0x128] sm:$0xff]  }
 0x39e   : > { %v4851_v18 = vld [vmem:[#allocation3 + $0x81] sm:$0xff] }
 0x3a2   : > { %19872 = vmatmul.mubr.msk.bf16.gmra.mrb[132].mxu0 %vm572_vm2, %v11224_v23 }
 0x3a3   : > { %19060 = vmatmul.mubr.msk.bf16.gmra.mrb[36].mxu1 %vm516_vm3, %v4573_v45  ;;  %19875 = vmatprep.mubr.msk.bf16.mxu0 %vm572_vm2, %v11225_v25  ;;  %v4844_v45 = vld [vmem:[#allocation3 + $0x31] sm:$0xff] }
 0x3a4   : > { %19063 = vmatprep.mubr.msk.bf16.mxu1 %vm516_vm3, %v4574_v56  ;;  %v4876_v23 = vpack.c.bf16 %v4845_v26, %v4844_v45  ;;  %v4846_v56 = vld [vmem:[#allocation3 + $0x49] sm:$0xff] }
 0x3a5   : > { %v4877_v25 = vpack.c.bf16 %v4847_v16, %v4846_v56  ;;  %v4862_v56 = vld [vmem:[#allocation3 + $0x109] sm:$0xff] }
 0x3aa   : > { %19876 = vmatmul.mubr.msk.bf16.gmra.mrb[136].mxu0 %vm572_vm2, %v11226_v51  ;;  %v4850_v51 = vld [vmem:[#allocation3 + $0x79] sm:$0xff] }
 0x3ab   : > { %19064 = vmatmul.mubr.msk.bf16.gmra.mrb[40].mxu1 %vm516_vm3, %v4575_v55  ;;  %19879 = vmatprep.mubr.msk.bf16.mxu0 %vm572_vm2, %v23433_v21  ;;  %v4849_v21 = vld [vmem:[#allocation3 + $0x69] sm:$0xff]  ;;  %v4853_v55 = vld [vmem:[#allocation3 + $0x99] sm:$0xff] }
 0x3ac   : > { %19067 = vmatprep.mubr.msk.bf16.mxu1 %vm516_vm3, %v4576_v58  ;;  %v4878_v9 = vpack.c.bf16 %v4849_v21, %v4848_v4  ;;  %v4865_v21 = vld [vmem:[#allocation3 + $0x129] sm:$0xff] }
 0x3b2   : > { %19880 = vmatmul.mubr.msk.bf16.gmra.mrb[140].mxu0 %vm572_vm2, %v11228_v20  ;;  %v4856_v20 = vld [vmem:[#allocation3 + $0xc1] sm:$0xff] }
 0x3b3   : > { %19068 = vmatmul.mubr.msk.bf16.gmra.mrb[44].mxu1 %vm516_vm3, %v4577_v43  ;;  %19891 = vmatprep.mubr.msk.bf16.mxu0 %vm572_vm2, %v23440_v31  ;;  %v21821_v31 = vld [vmem:[%s25765_s5 + $0x130] sm:$0xff]   ;;  %v4882_v26 = vpack.c.bf16 %v4857_v6, %v4856_v20  ;;  %v4858_v43 = vld [vmem:[#allocation3 + $0xd9] sm:$0xff] }
 0x3b4   : > { %19077 = vmatprep.mubr.msk.bf16.mxu1 %vm516_vm3, %v4876_v23  ;;  %v4860_v23 = vld [vmem:[#allocation3 + $0xf1] sm:$0xff] }
 0x3b5   : > { %v5158_v6 = vld [vmem:[#allocation3 + $0x32] sm:$0xff]  ;;  %v5163_v20 = vld [vmem:[#allocation3 + $0x6a] sm:$0xff] }
 0x3ba   : > { %19892 = vmatmul.mubr.msk.bf16.vlgmr.msra.gmra.mrb[112].mxu0 %vm572_vm2, %v23448_v13  ;;  %v4879_v13 = vpack.c.bf16 %v4851_v18, %v4850_v51  ;;  %v4872_v18 = vld [vmem:[#allocation3 + $0x181] sm:$0xff] }
 0x3bb   : > { %19078 = vmatmul.mubr.msk.bf16.vlgmr.msra.gmra.mrb[16].mxu1 %vm516_vm3, %v4877_v25  ;;  %19895 = vmatprep.mubr.msk.bf16.mxu0 %vm572_vm2, %v23458_v11  ;;  %v21822_v11 = vld [vmem:[#allocation6 + $0x118] sm:$0xff]   ;;  %v4864_v25 = vld [vmem:[#allocation3 + $0x121] sm:$0xff] }
 0x3bc   : > { %19110 = vmatpush3.bf16.msra.mxu1 %v23624_v29  ;;  %19081 = vmatprep.mubr.msk.bf16.mxu1 %vm516_vm3, %v4878_v9  ;;  %v4852_v29 = vld [vmem:[#allocation3 + $0x91] sm:$0xff]  ;;  %v4886_v4 = vpack.c.bf16 %v4865_v21, %v4864_v25  ;;  %v4869_v9 = vld [vmem:[#allocation3 + $0x159] sm:$0xff] }
 0x3bd   : > { %19924 = vmatpush3.bf16.msra.mxu0 %v23631_v32  ;;  %19111 = vmatprep.subr.bf16.mxu1 %v21819_v2  ;;  %v4880_v58 = vpack.c.bf16 %v4853_v55, %v4852_v29  ;;  %v23677_v32 = vld [vmem:[%s25765_s5 + $0x138] sm:$0xff]   ;;  %v4874_v29 = vld [vmem:[#allocation3 + $0x199] sm:$0xff] }
 0x3be   : > { %19925 = vmatprep.subr.bf16.mxu0 %v21818_v1  ;;  %v5164_v21 = vld [vmem:[#allocation3 + $0x7a] sm:$0xff] }
 0x3c0   : > { %19112 = vmatpush3.bf16.msra.mxu1 %v21819_v2  ;;  %v4868_v2 = vld [vmem:[#allocation3 + $0x151] sm:$0xff] }
 0x3c1   : > { %19926 = vmatpush3.bf16.msra.mxu0 %v21818_v1  ;;  %19113 = vmatprep.subr.bf16.mxu1 %v21821_v31  ;;  %v4866_v1 = vld [vmem:[#allocation3 + $0x139] sm:$0xff] }
 0x3c2   : > { %19927 = vmatprep.subr.bf16.mxu0 %v21820_v19  ;;  %19896 = vmatmul.mubr.msk.bf16.gmra.mrb[116].mxu0 %vm572_vm2, %v23460_v34  ;;  %v4859_v34 = vld [vmem:[#allocation3 + $0xe1] sm:$0xff] }
 0x3c3   : > { %19082 = vmatmul.mubr.msk.bf16.gmra.mrb[20].mxu1 %vm516_vm3, %v4879_v13  ;;  %19899 = vmatprep.mubr.msk.bf16.mxu0 %vm572_vm2, %v23476_v63  ;;  %v4861_v63 = vld [vmem:[#allocation3 + $0xf9] sm:$0xff]  ;;  %v4883_v45 = vpack.c.bf16 %v4859_v34, %v4858_v43  ;;  %v11534_v13 = vld [vmem:[#allocation4 + $0x1a1] sm:$0xff] }
 0x3c4   : > { %19085 = vmatprep.mubr.msk.bf16.mxu1 %vm516_vm3, %v4880_v58  ;;  %19114 = vmatpush3.bf16.msra.mxu1 %v21821_v31  ;;  %v4884_v16 = vpack.c.bf16 %v4861_v63, %v4860_v23  ;;  %v4888_v31 = vpack.c.bf16 %v4869_v9, %v4868_v2  ;;  %v5162_v43 = vld [vmem:[#allocation3 + $0x62] sm:$0xff]  ;;  %v5171_v9 = vld [vmem:[#allocation3 + $0xca] sm:$0xff] }
 0x3c5   : > { %19928 = vmatpush3.bf16.msra.mxu0 %v21820_v19  ;;  %19147 = vmatprep.subr.bf16.mxu1 %v23677_v32  ;;  %v4873_v19 = vld [vmem:[#allocation3 + $0x189] sm:$0xff]  ;;  %v5192_v23 = vpack.c.bf16 %v5163_v20, %v5162_v43 }
 0x3c6   : > { %19929 = vmatprep.subr.bf16.mxu0 %v21822_v11  ;;  %v4890_v51 = vpack.c.bf16 %v4873_v19, %v4872_v18  ;;  %v5168_v2 = vld [vmem:[#allocation3 + $0xaa] sm:$0xff]  ;;  %v5170_v18 = vld [vmem:[#allocation3 + $0xc2] sm:$0xff] }
 0x3c7   : > { %v5196_v19 = vpack.c.bf16 %v5171_v9, %v5170_v18  ;;  %v11845_v20 = vld [vmem:[#allocation4 + $0x122] sm:$0xff]  ;;  %v5182_v9 = vld [vmem:[#allocation3 + $0x152] sm:$0xff] }
 0x3c8   : > { %v11852_v18 = vld [vmem:[#allocation4 + $0x172] sm:$0xff] }
 0x3c9   : > { %19930 = vmatpush3.bf16.msra.mxu0 %v21822_v11  ;;  %v5159_v11 = vld [vmem:[#allocation3 + $0x3a] sm:$0xff] }
 0x3ca   : > { %19900 = vmatmul.mubr.msk.bf16.gmra.mrb[120].mxu0 %vm572_vm2, %v23478_v22  ;;  %v4863_v22 = vld [vmem:[#allocation3 + $0x111] sm:$0xff]  ;;  %v5190_v49 = vpack.c.bf16 %v5159_v11, %v5158_v6 }
 0x3cb   : > { %19086 = vmatmul.mubr.msk.bf16.gmra.mrb[24].mxu1 %vm516_vm3, %v4881_v39  ;;  %19903 = vmatprep.mubr.msk.bf16.mxu0 %vm572_vm2, %v23487_v0  ;;  %v4885_v0 = vpack.c.bf16 %v4863_v22, %v4862_v56  ;;  %v11828_v39 = vld [vmem:[#allocation4 + $0x52] sm:$0xff]  ;;  %v5167_v22 = vld [vmem:[#allocation3 + $0x9a] sm:$0xff] }
 0x3cc   : > { %19089 = vmatprep.mubr.msk.bf16.mxu1 %vm516_vm3, %v4882_v26  ;;  %v5160_v26 = vld [vmem:[#allocation3 + $0x4a] sm:$0xff]  ;;  %v5174_v11 = vld [vmem:[#allocation3 + $0xf2] sm:$0xff] }
 0x3d2   : > { %19904 = vmatmul.mubr.msk.bf16.gmra.mrb[124].mxu0 %vm572_vm2, %v23489_v15  ;;  %v4867_v15 = vld [vmem:[#allocation3 + $0x141] sm:$0xff] }
 0x3d3   : > { %19090 = vmatmul.mubr.msk.bf16.gmra.mrb[28].mxu1 %vm516_vm3, %v4883_v45  ;;  %19907 = vmatprep.mubr.msk.bf16.mxu0 %vm572_vm2, %v23497_v30  ;;  %v4887_v30 = vpack.c.bf16 %v4867_v15, %v4866_v1  ;;  %v21824_v45 = vld [vmem:[%s25765_s5 + $0x140] sm:$0xff]   ;;  %v11837_v1 = vld [vmem:[#allocation4 + $0xc2] sm:$0xff] }
 0x3d4   : > { %19093 = vmatprep.mubr.msk.bf16.mxu1 %vm516_vm3, %v4884_v16  ;;  %v5165_v16 = vld [vmem:[#allocation3 + $0x82] sm:$0xff]  ;;  %v11836_v15 = vld [vmem:[#allocation4 + $0xb2] sm:$0xff] }
 0x3d5   : > { %v5193_v56 = vpack.c.bf16 %v5165_v16, %v5164_v21  ;;  %v5181_v16 = vld [vmem:[#allocation3 + $0x142] sm:$0xff] }
 0x3d6   : > { %v11848_v21 = vld [vmem:[#allocation4 + $0x142] sm:$0xff] }
 0x3da   : > { %19908 = vmatmul.mubr.msk.bf16.gmra.mrb[128].mxu0 %vm572_vm2, %v23499_v36  ;;  %v4871_v36 = vld [vmem:[#allocation3 + $0x171] sm:$0xff] }
 0x3db   : > { %19094 = vmatmul.mubr.msk.bf16.gmra.mrb[32].mxu1 %vm516_vm3, %v4885_v0  ;;  %19911 = vmatprep.mubr.msk.bf16.mxu0 %vm572_vm2, %v23507_v37  ;;  %v4870_v37 = vld [vmem:[#allocation3 + $0x169] sm:$0xff]  ;;  %v5166_v0 = vld [vmem:[#allocation3 + $0x92] sm:$0xff] }
 0x3dc   : > { %19097 = vmatprep.mubr.msk.bf16.mxu1 %vm516_vm3, %v4886_v4  ;;  %v4889_v55 = vpack.c.bf16 %v4871_v36, %v4870_v37  ;;  %v5194_v25 = vpack.c.bf16 %v5167_v22, %v5166_v0  ;;  %v11835_v4 = vld [vmem:[#allocation4 + $0xaa] sm:$0xff]  ;;  %v11839_v37 = vld [vmem:[#allocation4 + $0xda] sm:$0xff]  ;;  %v11849_v0 = vld [vmem:[#allocation4 + $0x152] sm:$0xff] }
 0x3dd   : > { %v11862_v36 = vpack.c.bf16 %v11836_v15, %v11835_v4  ;;  %v11847_v22 = vld [vmem:[#allocation4 + $0x13a] sm:$0xff] }
 0x3de   : > { %v11868_v15 = vpack.c.bf16 %v11848_v21, %v11847_v22  ;;  %v5481_v22 = vld [vmem:[#allocation3 + $0x9b] sm:$0xff] }
 0x3e2   : > { %19912 = vmatmul.mubr.msk.bf16.gmra.mrb[132].mxu0 %vm572_vm2, %v23509_v62  ;;  %v11533_v62 = vld [vmem:[#allocation4 + $0x199] sm:$0xff] }
 0x3e3   : > { %19098 = vmatmul.mubr.msk.bf16.gmra.mrb[36].mxu1 %vm516_vm3, %v4887_v30  ;;  %19915 = vmatprep.mubr.msk.bf16.mxu0 %vm572_vm2, %v23517_v7  ;;  %v4875_v7 = vld [vmem:[#allocation3 + $0x1a1] sm:$0xff]  ;;  %v11550_v58 = vpack.c.bf16 %v11534_v13, %v11533_v62  ;;  %v11838_v30 = vld [vmem:[#allocation4 + $0xca] sm:$0xff]  ;;  %v11841_v62 = vld [vmem:[#allocation4 + $0xf2] sm:$0xff] }
 0x3e4   : > { %19101 = vmatprep.mubr.msk.bf16.mxu1 %vm516_vm3, %v4888_v31  ;;  %v4891_v54 = vpack.c.bf16 %v4875_v7, %v4874_v29  ;;  %v11842_v13 = vld [vmem:[#allocation4 + $0xfa] sm:$0xff] }
 0x3e5   : > { %v5172_v29 = vld [vmem:[#allocation3 + $0xda] sm:$0xff]  ;;  %v11865_v6 = vpack.c.bf16 %v11842_v13, %v11841_v62  ;;  %v11856_v13 = vld [vmem:[#allocation4 + $0x1a2] sm:$0xff] }
 0x3e6   : > { %v11855_v62 = vld [vmem:[#allocation4 + $0x19a] sm:$0xff] }
 0x3ea   : > { %19916 = vmatmul.mubr.msk.bf16.gmra.mrb[136].mxu0 %vm572_vm2, %v23519_v14  ;;  %v5161_v14 = vld [vmem:[#allocation3 + $0x52] sm:$0xff] }
 0x3eb   : > { %19102 = vmatmul.mubr.msk.bf16.gmra.mrb[40].mxu1 %vm516_vm3, %v4889_v55  ;;  %19919 = vmatprep.mubr.msk.bf16.mxu0 %vm572_vm2, %v23527_v28  ;;  %v11827_v28 = vld [vmem:[#allocation4 + $0x4a] sm:$0xff]  ;;  %v5191_v34 = vpack.c.bf16 %v5161_v14, %v5160_v26  ;;  %v11840_v55 = vld [vmem:[#allocation4 + $0xe2] sm:$0xff] }
 0x3ec   : > { %19105 = vmatprep.mubr.msk.bf16.mxu1 %vm516_vm3, %v4890_v51  ;;  %v11858_v63 = vpack.c.bf16 %v11828_v39, %v11827_v28  ;;  %v5175_v51 = vld [vmem:[#allocation3 + $0xfa] sm:$0xff]  ;;  %v11843_v14 = vld [vmem:[#allocation4 + $0x10a] sm:$0xff]  ;;  %v11844_v28 = vld [vmem:[#allocation4 + $0x112] sm:$0xff] }
 0x3ed   : > { %v5179_v39 = vld [vmem:[#allocation3 + $0x12a] sm:$0xff]  ;;  %v11866_v43 = vpack.c.bf16 %v11844_v28, %v11843_v14  ;;  %v21835_v28 = vld [vmem:[#allocation9 + $0x40] sm:$0xff]  }
 0x3ee   : > { %v11846_v26 = vld [vmem:[#allocation4 + $0x12a] sm:$0xff] }
 0x3f2   : > { %19920 = vmatmul.mubr.msk.bf16.gmra.mrb[140].mxu0 %vm572_vm2, %v11550_v58  ;;  %v11864_v58 = vpack.c.bf16 %v11840_v55, %v11839_v37 }
 0x3f3   : > { %19106 = vmatmul.mubr.msk.bf16.gmra.mrb[44].mxu1 %vm516_vm3, %v4891_v54  ;;  %19931 = vmatprep.mubr.msk.bf16.mxu0 %vm572_vm2, %v23535_v12  ;;  %v21825_v12 = vld [vmem:[%s25765_s5 + $0x148] sm:$0xff]   ;;  %v5198_v54 = vpack.c.bf16 %v5175_v51, %v5174_v11  ;;  %v11872_v11 = vpack.c.bf16 %v11856_v13, %v11855_v62  ;;  %v5493_v62 = vld [vmem:[#allocation3 + $0x12b] sm:$0xff] }
 0x3f4   : > { %19115 = vmatprep.mubr.msk.bf16.mxu1 %vm516_vm3, %v5190_v49  ;;  %v5177_v49 = vld [vmem:[#allocation3 + $0x112] sm:$0xff] }
 0x3fa   : > { %19932 = vmatmul.mubr.msk.bf16.vlgmr.msra.gmra.mrb[112].mxu0 %vm572_vm2, %v11858_v63 }
 0x3fb   : > { %19116 = vmatmul.mubr.msk.bf16.vlgmr.msra.gmra.mrb[16].mxu1 %vm516_vm3, %v5191_v34  ;;  %19935 = vmatprep.mubr.msk.bf16.mxu0 %vm572_vm2, %v23551_v47  ;;  %v5169_v47 = vld [vmem:[#allocation3 + $0xb2] sm:$0xff]  ;;  %v5176_v34 = vld [vmem:[#allocation3 + $0x10a] sm:$0xff] }
 0x3fc   : > { %19148 = vmatpush3.bf16.msra.mxu1 %v23677_v32  ;;  %19119 = vmatprep.mubr.msk.bf16.mxu1 %vm516_vm3, %v5192_v23  ;;  %v23736_v32 = vld [vmem:[%s25765_s5 + $0x150] sm:$0xff]   ;;  %v5195_v31 = vpack.c.bf16 %v5169_v47, %v5168_v2  ;;  %v5199_v63 = vpack.c.bf16 %v5177_v49, %v5176_v34  ;;  %v5180_v47 = vld [vmem:[#allocation3 + $0x13a] sm:$0xff]  ;;  %v21831_v2 = vld [vmem:[#allocation9 + $0x30] sm:$0xff]  }
 0x3fd   : > { %19149 = vmatprep.subr.bf16.mxu1 %v21824_v45  ;;  %v5201_v4 = vpack.c.bf16 %v5181_v16, %v5180_v47  ;;  %19963 = vmatprep.subr.bf16.mxu0 %v21831_v2  ;;  %v5480_v16 = vld [vmem:[#allocation3 + $0x93] sm:$0xff] }
 0x3fe   : > { %19964 = vmatpush3.bf16.msra.mxu0 %v21831_v2  ;;  %v5483_v47 = vld [vmem:[#allocation3 + $0xb3] sm:$0xff]  ;;  %v5486_v2 = vld [vmem:[#allocation3 + $0xdb] sm:$0xff] }
 0x400   : > { %19150 = vmatpush3.bf16.msra.mxu1 %v21824_v45  ;;  %v5178_v45 = vld [vmem:[#allocation3 + $0x122] sm:$0xff] }
 0x401   : > { %19151 = vmatprep.subr.bf16.mxu1 %v21825_v12  ;;  %v5200_v23 = vpack.c.bf16 %v5179_v39, %v5178_v45  ;;  %v5475_v39 = vld [vmem:[#allocation3 + $0x53] sm:$0xff] }
 0x402   : > { %19936 = vmatmul.mubr.msk.bf16.gmra.mrb[116].mxu0 %vm572_vm2, %v23553_v59  ;;  %v11863_v59 = vpack.c.bf16 %v11838_v30, %v11837_v1  ;;  %v21828_v45 = vld [vmem:[%s25765_s5 + $0x160] sm:$0xff]  }
 0x403   : > { %19120 = vmatmul.mubr.msk.bf16.gmra.mrb[20].mxu1 %vm516_vm3, %v5193_v56  ;;  %19939 = vmatprep.mubr.msk.bf16.mxu0 %vm572_vm2, %v23569_v3  ;;  %v5173_v3 = vld [vmem:[#allocation3 + $0xe2] sm:$0xff]  ;;  %v5183_v56 = vld [vmem:[#allocation3 + $0x15a] sm:$0xff] }
 0x404   : > { %19123 = vmatprep.mubr.msk.bf16.mxu1 %vm516_vm3, %v5194_v25  ;;  %19152 = vmatpush3.bf16.msra.mxu1 %v21825_v12  ;;  %v5197_v7 = vpack.c.bf16 %v5173_v3, %v5172_v29  ;;  %v11867_v12 = vpack.c.bf16 %v11846_v26, %v11845_v20  ;;  %v11850_v25 = vld [vmem:[#allocation4 + $0x15a] sm:$0xff]  ;;  %v5202_v1 = vpack.c.bf16 %v5183_v56, %v5182_v9  ;;  %v5184_v3 = vld [vmem:[#allocation3 + $0x16a] sm:$0xff] }
 0x405   : > { %19185 = vmatprep.subr.bf16.mxu1 %v23736_v32  ;;  %v11869_v30 = vpack.c.bf16 %v11850_v25, %v11849_v0  ;;  %v21833_v29 = vld [vmem:[#allocation9 + $0x38] sm:$0xff]   ;;  %v5476_v20 = vld [vmem:[#allocation3 + $0x63] sm:$0xff]  ;;  %v5477_v26 = vld [vmem:[#allocation3 + $0x6b] sm:$0xff] }
 0x406   : > { %19965 = vmatprep.subr.bf16.mxu0 %v21833_v29  ;;  %v23781_v56 = vld [vmem:[%s25765_s5 + $0x168] sm:$0xff]   ;;  %v21836_v0 = vld [vmem:[#allocation9 + $0x48] sm:$0xff]  }
 0x407   : > { %19966 = vmatpush3.bf16.msra.mxu0 %v21833_v29  ;;  %v5482_v25 = vld [vmem:[#allocation3 + $0xab] sm:$0xff] }
 0x408   : > { %19967 = vmatprep.subr.bf16.mxu0 %v21835_v28  ;;  %v5509_v9 = vpack.c.bf16 %v5483_v47, %v5482_v25  ;;  %v5788_v25 = vld [vmem:[#allocation3 + $0x4c] sm:$0xff]  ;;  %v5789_v47 = vld [vmem:[#allocation3 + $0x54] sm:$0xff] }
 0x40a   : > { %19940 = vmatmul.mubr.msk.bf16.gmra.mrb[120].mxu0 %vm572_vm2, %v11862_v36  ;;  %v11851_v36 = vld [vmem:[#allocation4 + $0x16a] sm:$0xff] }
 0x40b   : > { %19124 = vmatmul.mubr.msk.bf16.gmra.mrb[24].mxu1 %vm516_vm3, %v5195_v31  ;;  %19943 = vmatprep.mubr.msk.bf16.mxu0 %vm572_vm2, %v11863_v59  ;;  %v5185_v31 = vld [vmem:[#allocation3 + $0x172] sm:$0xff]  ;;  %v5187_v59 = vld [vmem:[#allocation3 + $0x18a] sm:$0xff]  ;;  %v11870_v55 = vpack.c.bf16 %v11852_v18, %v11851_v36  ;;  %v5489_v18 = vld [vmem:[#allocation3 + $0xfb] sm:$0xff] }
 0x40c   : > { %19127 = vmatprep.mubr.msk.bf16.mxu1 %vm516_vm3, %v5196_v19  ;;  %v5186_v19 = vld [vmem:[#allocation3 + $0x182] sm:$0xff]  ;;  %v5203_v37 = vpack.c.bf16 %v5185_v31, %v5184_v3  ;;  %19968 = vmatpush3.bf16.msra.mxu0 %v21835_v28  ;;  %v5488_v36 = vld [vmem:[#allocation3 + $0xf3] sm:$0xff]  ;;  %v5498_v28 = vld [vmem:[#allocation3 + $0x16b] sm:$0xff] }
 0x40d   : > { %v5204_v51 = vpack.c.bf16 %v5187_v59, %v5186_v19  ;;  %19969 = vmatprep.subr.bf16.mxu0 %v21836_v0  ;;  %v5487_v31 = vld [vmem:[#allocation3 + $0xe3] sm:$0xff]  ;;  %v5512_v59 = vpack.c.bf16 %v5489_v18, %v5488_v36  ;;  %v21837_v3 = vld [vmem:[#allocation9 + $0x50] sm:$0xff]  }
 0x40e   : > { %v5511_v19 = vpack.c.bf16 %v5487_v31, %v5486_v2  ;;  %v21832_v31 = vld [vmem:[%s25765_s5 + $0x178] sm:$0xff]   ;;  %v5792_v36 = vld [vmem:[#allocation3 + $0x7c] sm:$0xff]  ;;  %v5793_v18 = vld [vmem:[#allocation3 + $0x84] sm:$0xff] }
 0x410   : > { %19970 = vmatpush3.bf16.msra.mxu0 %v21836_v0 }
 0x411   : > { %19971 = vmatprep.subr.bf16.mxu0 %v21837_v3 }
 0x412   : > { %19944 = vmatmul.mubr.msk.bf16.gmra.mrb[124].mxu0 %vm572_vm2, %v11864_v58  ;;  %v5189_v58 = vld [vmem:[#allocation3 + $0x1a2] sm:$0xff] }
 0x413   : > { %19128 = vmatmul.mubr.msk.bf16.gmra.mrb[28].mxu1 %vm516_vm3, %v5197_v7  ;;  %19947 = vmatprep.mubr.msk.bf16.mxu0 %vm572_vm2, %v11865_v6  ;;  %v5188_v7 = vld [vmem:[#allocation3 + $0x19a] sm:$0xff] }
 0x414   : > { %19131 = vmatprep.mubr.msk.bf16.mxu1 %vm516_vm3, %v5198_v54  ;;  %v5472_v54 = vld [vmem:[#allocation3 + $0x33] sm:$0xff]  ;;  %v5473_v6 = vld [vmem:[#allocation3 + $0x3b] sm:$0xff]  ;;  %v5205_v49 = vpack.c.bf16 %v5189_v58, %v5188_v7  ;;  %19972 = vmatpush3.bf16.msra.mxu0 %v21837_v3  ;;  %v5495_v58 = vld [vmem:[#allocation3 + $0x143] sm:$0xff]  ;;  %v5821_v3 = vpack.c.bf16 %v5793_v18, %v5792_v36 }
 0x415   : > { %v5504_v14 = vpack.c.bf16 %v5473_v6, %v5472_v54  ;;  %v5494_v7 = vld [vmem:[#allocation3 + $0x13b] sm:$0xff]  ;;  %v5496_v54 = vld [vmem:[#allocation3 + $0x153] sm:$0xff]  ;;  %v6104_v18 = vld [vmem:[#allocation3 + $0x68] sm:$0xff] }
 0x416   : > { %v5497_v6 = vld [vmem:[#allocation3 + $0x15b] sm:$0xff] }
 0x41a   : > { %19948 = vmatmul.mubr.msk.bf16.gmra.mrb[128].mxu0 %vm572_vm2, %v11866_v43  ;;  %v5506_v43 = vpack.c.bf16 %v5477_v26, %v5476_v20  ;;  %v5500_v20 = vld [vmem:[#allocation3 + $0x183] sm:$0xff]  ;;  %v5501_v26 = vld [vmem:[#allocation3 + $0x18b] sm:$0xff] }
 0x41b   : > { %19132 = vmatmul.mubr.msk.bf16.gmra.mrb[32].mxu1 %vm516_vm3, %v5199_v63  ;;  %19951 = vmatprep.mubr.msk.bf16.mxu0 %vm572_vm2, %v11867_v12  ;;  %v21827_v63 = vld [vmem:[%s25765_s5 + $0x158] sm:$0xff]   ;;  %v5479_v12 = vld [vmem:[#allocation3 + $0x83] sm:$0xff] }
 0x41c   : > { %19135 = vmatprep.mubr.msk.bf16.mxu1 %vm516_vm3, %v5200_v23  ;;  %v5478_v23 = vld [vmem:[#allocation3 + $0x7b] sm:$0xff] }
 0x41d   : > { %v5507_v21 = vpack.c.bf16 %v5479_v12, %v5478_v23  ;;  %v5502_v12 = vld [vmem:[#allocation3 + $0x19b] sm:$0xff] }
 0x422   : > { %19952 = vmatmul.mubr.msk.bf16.gmra.mrb[132].mxu0 %vm572_vm2, %v11868_v15  ;;  %v5485_v15 = vld [vmem:[#allocation3 + $0xcb] sm:$0xff] }
 0x423   : > { %19136 = vmatmul.mubr.msk.bf16.gmra.mrb[36].mxu1 %vm516_vm3, %v5201_v4  ;;  %19955 = vmatprep.mubr.msk.bf16.mxu0 %vm572_vm2, %v11869_v30  ;;  %v5484_v4 = vld [vmem:[#allocation3 + $0xc3] sm:$0xff]  ;;  %v25841_v30 = vmov 0.0  }
 0x424   : > { %19139 = vmatprep.mubr.msk.bf16.mxu1 %vm516_vm3, %v5202_v1  ;;  %v5510_v1 = vpack.c.bf16 %v5485_v15, %v5484_v4  ;;  %619 = vst.msk [vmem:[#allocation5] sm:$0xff] %vm618_vm8, %v25841_v30  ;;  %620 = vst.msk [vmem:[#allocation5 + $0x8] sm:$0xff] %vm618_vm8, %v25841_v30  ;;  %v5790_v4 = vld [vmem:[#allocation3 + $0x64] sm:$0xff]  ;;  %v5791_v15 = vld [vmem:[#allocation3 + $0x6c] sm:$0xff] }
 0x425   : > { %624 = vst.msk [vmem:[#allocation5 + $0x198] sm:$0xff] %vm618_vm8, %v25841_v30  ;;  %625 = vst.msk [vmem:[#allocation5 + $0x1a0] sm:$0xff] %vm618_vm8, %v25841_v30  ;;  %v5820_v2 = vpack.c.bf16 %v5791_v15, %v5790_v4  ;;  %v5816_v15 = vld [vmem:[#allocation3 + $0x19c] sm:$0xff] }
 0x426   : > { %622 = vst.msk [vmem:[#allocation5 + $0x10] sm:$0x3] %vm621_vm9, %v25841_v30  ;;  %626 = vst.msk [vmem:[#allocation5 + $0x1a8] sm:$0x3] %vm621_vm9, %v25841_v30 }
 0x427   : > { %628 = vst.msk [vmem:[#allocation5] sm:$0x1] %vm627_vm10, %v25841_v30  ;;  %629 = vst.msk [vmem:[#allocation5 + $0x18] sm:$0x1] %vm627_vm10, %v25841_v30 }
 0x428   : > { %630 = vst.msk [vmem:[#allocation5 + $0x30] sm:$0x1] %vm627_vm10, %v25841_v30  ;;  %631 = vst.msk [vmem:[#allocation5 + $0x48] sm:$0x1] %vm627_vm10, %v25841_v30 }
 0x429   : > { %632 = vst.msk [vmem:[#allocation5 + $0x60] sm:$0x1] %vm627_vm10, %v25841_v30  ;;  %633 = vst.msk [vmem:[#allocation5 + $0x78] sm:$0x1] %vm627_vm10, %v25841_v30 }
 0x42a   : > { %19956 = vmatmul.mubr.msk.bf16.gmra.mrb[136].mxu0 %vm572_vm2, %v11870_v55  ;;  %v5491_v55 = vld [vmem:[#allocation3 + $0x113] sm:$0xff]  ;;  %634 = vst.msk [vmem:[#allocation5 + $0x90] sm:$0x1] %vm627_vm10, %v25841_v30  ;;  %635 = vst.msk [vmem:[#allocation5 + $0xa8] sm:$0x1] %vm627_vm10, %v25841_v30 }
 0x42b   : > { %19140 = vmatmul.mubr.msk.bf16.gmra.mrb[40].mxu1 %vm516_vm3, %v5203_v37  ;;  %19959 = vmatprep.mubr.msk.bf16.mxu0 %vm572_vm2, %v23602_v60  ;;  %v5474_v60 = vld [vmem:[#allocation3 + $0x4b] sm:$0xff]  ;;  %636 = vst.msk [vmem:[#allocation5 + $0xc0] sm:$0x1] %vm627_vm10, %v25841_v30  ;;  %637 = vst.msk [vmem:[#allocation5 + $0xd8] sm:$0x1] %vm627_vm10, %v25841_v30 }
 0x42c   : > { %19143 = vmatprep.mubr.msk.bf16.mxu1 %vm516_vm3, %v5204_v51  ;;  %v5505_v34 = vpack.c.bf16 %v5475_v39, %v5474_v60  ;;  %v5490_v37 = vld [vmem:[#allocation3 + $0x10b] sm:$0xff]  ;;  %v5492_v51 = vld [vmem:[#allocation3 + $0x123] sm:$0xff]  ;;  %v5499_v60 = vld [vmem:[#allocation3 + $0x173] sm:$0xff]  ;;  %638 = vst.msk [vmem:[#allocation5 + $0xf0] sm:$0x1] %vm627_vm10, %v25841_v30 }
 0x42d   : > { %v5513_v13 = vpack.c.bf16 %v5491_v55, %v5490_v37  ;;  %v5514_v29 = vpack.c.bf16 %v5493_v62, %v5492_v51  ;;  %v23804_v39 = vld [vmem:[#allocation9] sm:$0xff]   ;;  %v23824_v37 = vld [vmem:[%s25765_s5 + $0x180] sm:$0xff]   ;;  %v5796_v55 = vld [vmem:[#allocation3 + $0xac] sm:$0xff]  ;;  %639 = vst.msk [vmem:[#allocation5 + $0x108] sm:$0x1] %vm627_vm10, %v25841_v30 }
 0x42e   : > { %v5797_v51 = vld [vmem:[#allocation3 + $0xb4] sm:$0xff]  ;;  %v5798_v62 = vld [vmem:[#allocation3 + $0xc4] sm:$0xff]  ;;  %640 = vst.msk [vmem:[#allocation5 + $0x120] sm:$0x1] %vm627_vm10, %v25841_v30  ;;  %641 = vst.msk [vmem:[#allocation5 + $0x138] sm:$0x1] %vm627_vm10, %v25841_v30 }
 0x42f   : > { %642 = vst.msk [vmem:[#allocation5 + $0x150] sm:$0x1] %vm627_vm10, %v25841_v30  ;;  %643 = vst.msk [vmem:[#allocation5 + $0x168] sm:$0x1] %vm627_vm10, %v25841_v30 }
 0x430   : > { %644 = vst.msk [vmem:[#allocation5 + $0x180] sm:$0x1] %vm627_vm10, %v25841_v30  ;;  %645 = vst.msk [vmem:[#allocation5 + $0x198] sm:$0x1] %vm627_vm10, %v25841_v30 }
 0x431   : > { %646 = vst.msk [vmem:[#allocation5 + $0x11] sm:$0x1] %vm627_vm10, %v25841_v30  ;;  %647 = vst.msk [vmem:[#allocation5 + $0x29] sm:$0x1] %vm627_vm10, %v25841_v30 }
 0x432   : > { %19960 = vmatmul.mubr.msk.bf16.gmra.mrb[140].mxu0 %vm572_vm2, %v11872_v11  ;;  %v21839_v11 = vld [vmem:[#allocation9 + $0x58] sm:$0xff]   ;;  %648 = vst.msk [vmem:[#allocation5 + $0x41] sm:$0x1] %vm627_vm10, %v25841_v30  ;;  %649 = vst.msk [vmem:[#allocation5 + $0x59] sm:$0x1] %vm627_vm10, %v25841_v30 }
 0x433   : > { %19144 = vmatmul.mubr.msk.bf16.gmra.mrb[44].mxu1 %vm516_vm3, %v5205_v49  ;;  %19973 = vmatprep.subr.bf16.mxu0 %v21839_v11  ;;  %v5515_v49 = vpack.c.bf16 %v5495_v58, %v5494_v7  ;;  %v5800_v58 = vld [vmem:[#allocation3 + $0xdc] sm:$0xff]  ;;  %650 = vst.msk [vmem:[#allocation5 + $0x71] sm:$0x1] %vm627_vm10, %v25841_v30  ;;  %651 = vst.msk [vmem:[#allocation5 + $0x89] sm:$0x1] %vm627_vm10, %v25841_v30 }
 0x434   : > { %19153 = vmatprep.mubr.msk.bf16.mxu1 %vm516_vm3, %v5504_v14  ;;  %19974 = vmatpush3.bf16.msra.mxu0 %v21839_v11  ;;  %v5516_v14 = vpack.c.bf16 %v5497_v6, %v5496_v54  ;;  %v5801_v11 = vld [vmem:[#allocation3 + $0xe4] sm:$0xff]  ;;  %v5802_v54 = vld [vmem:[#allocation3 + $0xf4] sm:$0xff]  ;;  %v5803_v6 = vld [vmem:[#allocation3 + $0xfc] sm:$0xff]  ;;  %652 = vst.msk [vmem:[#allocation5 + $0xa1] sm:$0x1] %vm627_vm10, %v25841_v30 }
 0x435   : > { %20007 = vmatprep.subr.bf16.mxu0 %v23804_v39  ;;  %653 = vst.msk [vmem:[#allocation5 + $0xb9] sm:$0x1] %vm627_vm10, %v25841_v30  ;;  %654 = vst.msk [vmem:[#allocation5 + $0xd1] sm:$0x1] %vm627_vm10, %v25841_v30 }
 0x436   : > { %655 = vst.msk [vmem:[#allocation5 + $0xe9] sm:$0x1] %vm627_vm10, %v25841_v30  ;;  %656 = vst.msk [vmem:[#allocation5 + $0x101] sm:$0x1] %vm627_vm10, %v25841_v30 }
 0x437   : > { %657 = vst.msk [vmem:[#allocation5 + $0x119] sm:$0x1] %vm627_vm10, %v25841_v30  ;;  %658 = vst.msk [vmem:[#allocation5 + $0x131] sm:$0x1] %vm627_vm10, %v25841_v30 }
 0x438   : > { %659 = vst.msk [vmem:[#allocation5 + $0x149] sm:$0x1] %vm627_vm10, %v25841_v30  ;;  %660 = vst.msk [vmem:[#allocation5 + $0x161] sm:$0x1] %vm627_vm10, %v25841_v30 }
 0x439   : > { %661 = vst.msk [vmem:[#allocation5 + $0x179] sm:$0x1] %vm627_vm10, %v25841_v30  ;;  %662 = vst.msk [vmem:[#allocation5 + $0x191] sm:$0x1] %vm627_vm10, %v25841_v30 }
 0x43a   : > { %663 = vst.msk [vmem:[#allocation5 + $0x1a9] sm:$0x1] %vm627_vm10, %v25841_v30 }
 0x43b   : > { %19154 = vmatmul.mubr.msk.bf16.vlgmr.msra.gmra.mrb[16].mxu1 %vm516_vm3, %v5505_v34  ;;  %v5517_v34 = vpack.c.bf16 %v5499_v60, %v5498_v28  ;;  %v5804_v28 = vld [vmem:[#allocation3 + $0x10c] sm:$0xff]  ;;  %v5805_v60 = vld [vmem:[#allocation3 + $0x114] sm:$0xff]  ;;  %474 = vst.msk [vmem:[#allocation2 + $0x10] sm:$0x3] %vm473_vm11, %v25841_v30  ;;  %478 = vst.msk [vmem:[#allocation2 + $0x1a8] sm:$0x3] %vm473_vm11, %v25841_v30 }
 0x43c   : > { %19186 = vmatpush3.bf16.msra.mxu1 %v23736_v32  ;;  %19157 = vmatprep.mubr.msk.bf16.mxu1 %vm516_vm3, %v5506_v43  ;;  %v5508_v32 = vpack.c.bf16 %v5481_v22, %v5480_v16  ;;  %v12311_v43 = vld [vmem:[#allocation5 + $0x1] sm:$0xff]  ;;  %v5503_v16 = vld [vmem:[#allocation3 + $0x1a3] sm:$0xff]  ;;  %480 = vst.msk [vmem:[#allocation2] sm:$0x1] %vm479_vm12, %v25841_v30  ;;  %481 = vst.msk [vmem:[#allocation2 + $0x18] sm:$0x1] %vm479_vm12, %v25841_v30 }
 0x43d   : > { %19187 = vmatprep.subr.bf16.mxu1 %v21827_v63  ;;  %v5786_v22 = vld [vmem:[#allocation3 + $0x34] sm:$0xff]  ;;  %482 = vst.msk [vmem:[#allocation2 + $0x30] sm:$0x1] %vm479_vm12, %v25841_v30  ;;  %499 = vst.msk [vmem:[#allocation2 + $0x29] sm:$0x1] %vm479_vm12, %v25841_v30 }
 0x43e   : > { %500 = vst.msk [vmem:[#allocation2 + $0x41] sm:$0x1] %vm479_vm12, %v25841_v30  ;;  %483 = vst.msk [vmem:[#allocation2 + $0x48] sm:$0x1] %vm479_vm12, %v25841_v30 }
 0x43f   : > { %484 = vst.msk [vmem:[#allocation2 + $0x60] sm:$0x1] %vm479_vm12, %v25841_v30  ;;  %485 = vst.msk [vmem:[#allocation2 + $0x78] sm:$0x1] %vm479_vm12, %v25841_v30 }
 0x440   : > { %19188 = vmatpush3.bf16.msra.mxu1 %v21827_v63  ;;  %v5518_v63 = vpack.c.bf16 %v5501_v26, %v5500_v20  ;;  %v5806_v20 = vld [vmem:[#allocation3 + $0x124] sm:$0xff]  ;;  %v5807_v26 = vld [vmem:[#allocation3 + $0x12c] sm:$0xff]  ;;  %486 = vst.msk [vmem:[#allocation2 + $0x90] sm:$0x1] %vm479_vm12, %v25841_v30  ;;  %487 = vst.msk [vmem:[#allocation2 + $0xa8] sm:$0x1] %vm479_vm12, %v25841_v30 }
 0x441   : > { %19189 = vmatprep.subr.bf16.mxu1 %v21828_v45  ;;  %488 = vst.msk [vmem:[#allocation2 + $0xc0] sm:$0x1] %vm479_vm12, %v25841_v30  ;;  %489 = vst.msk [vmem:[#allocation2 + $0xd8] sm:$0x1] %vm479_vm12, %v25841_v30 }
 0x442   : > { %490 = vst.msk [vmem:[#allocation2 + $0xf0] sm:$0x1] %vm479_vm12, %v25841_v30  ;;  %491 = vst.msk [vmem:[#allocation2 + $0x108] sm:$0x1] %vm479_vm12, %v25841_v30 }
 0x443   : > { %19158 = vmatmul.mubr.msk.bf16.gmra.mrb[20].mxu1 %vm516_vm3, %v5507_v21  ;;  %v5787_v21 = vld [vmem:[#allocation3 + $0x3c] sm:$0xff]  ;;  %492 = vst.msk [vmem:[#allocation2 + $0x120] sm:$0x1] %vm479_vm12, %v25841_v30  ;;  %493 = vst.msk [vmem:[#allocation2 + $0x138] sm:$0x1] %vm479_vm12, %v25841_v30 }
 0x444   : > { %19161 = vmatprep.mubr.msk.bf16.mxu1 %vm516_vm3, %v5508_v32  ;;  %19190 = vmatpush3.bf16.msra.mxu1 %v21828_v45  ;;  %v12312_v45 = vld [vmem:[#allocation5 + $0x9] sm:$0xff]  ;;  %v5519_v32 = vpack.c.bf16 %v5503_v16, %v5502_v12  ;;  %v5818_v0 = vpack.c.bf16 %v5787_v21, %v5786_v22  ;;  %v5812_v21 = vld [vmem:[#allocation3 + $0x16c] sm:$0xff]  ;;  %494 = vst.msk [vmem:[#allocation2 + $0x150] sm:$0x1] %vm479_vm12, %v25841_v30  ;;  %495 = vst.msk [vmem:[#allocation2 + $0x168] sm:$0x1] %vm479_vm12, %v25841_v30 }
 0x445   : > { %19223 = vmatprep.subr.bf16.mxu1 %v23781_v56  ;;  %v12343_v23 = vpack.c.bf16 %v12312_v45, %v12311_v43  ;;  %v5808_v43 = vld [vmem:[#allocation3 + $0x13c] sm:$0xff]  ;;  %v5809_v45 = vld [vmem:[#allocation3 + $0x144] sm:$0xff]  ;;  %496 = vst.msk [vmem:[#allocation2 + $0x180] sm:$0x1] %vm479_vm12, %v25841_v30  ;;  %497 = vst.msk [vmem:[#allocation2 + $0x198] sm:$0x1] %vm479_vm12, %v25841_v30 }
 0x446   : > { %v5811_v12 = vld [vmem:[#allocation3 + $0x15c] sm:$0xff]  ;;  %v5829_v16 = vpack.c.bf16 %v5809_v45, %v5808_v43  ;;  %501 = vst.msk [vmem:[#allocation2 + $0x59] sm:$0x1] %vm479_vm12, %v25841_v30  ;;  %502 = vst.msk [vmem:[#allocation2 + $0x71] sm:$0x1] %vm479_vm12, %v25841_v30  ;;  %v24780_v50 = vld [vmem:[#allocation2 + $0x78] sm:$0xff] }
 0x447   : > { %19975 = vmatprep.mubr.msk.bf16.mxu0 %vm618_vm8, %v12343_v23  ;;  %v5810_v23 = vld [vmem:[#allocation3 + $0x154] sm:$0xff]  ;;  %503 = vst.msk [vmem:[#allocation2 + $0x89] sm:$0x1] %vm479_vm12, %v25841_v30  ;;  %504 = vst.msk [vmem:[#allocation2 + $0xa1] sm:$0x1] %vm479_vm12, %v25841_v30 }
 0x448   : > { %v5830_v22 = vpack.c.bf16 %v5811_v12, %v5810_v23  ;;  %v6118_v23 = vld [vmem:[#allocation3 + $0x110] sm:$0xff]  ;;  %505 = vst.msk [vmem:[#allocation2 + $0xb9] sm:$0x1] %vm479_vm12, %v25841_v30  ;;  %506 = vst.msk [vmem:[#allocation2 + $0xd1] sm:$0x1] %vm479_vm12, %v25841_v30 }
 0x449   : > { %507 = vst.msk [vmem:[#allocation2 + $0xe9] sm:$0x1] %vm479_vm12, %v25841_v30  ;;  %508 = vst.msk [vmem:[#allocation2 + $0x101] sm:$0x1] %vm479_vm12, %v25841_v30 }
 0x44a   : > { %509 = vst.msk [vmem:[#allocation2 + $0x119] sm:$0x1] %vm479_vm12, %v25841_v30  ;;  %510 = vst.msk [vmem:[#allocation2 + $0x131] sm:$0x1] %vm479_vm12, %v25841_v30 }
 0x44b   : > { %19162 = vmatmul.mubr.msk.bf16.gmra.mrb[24].mxu1 %vm516_vm3, %v5509_v9  ;;  %v5819_v9 = vpack.c.bf16 %v5789_v47, %v5788_v25  ;;  %v5815_v25 = vld [vmem:[#allocation3 + $0x18c] sm:$0xff]  ;;  %511 = vst.msk [vmem:[#allocation2 + $0x149] sm:$0x1] %vm479_vm12, %v25841_v30  ;;  %512 = vst.msk [vmem:[#allocation2 + $0x161] sm:$0x1] %vm479_vm12, %v25841_v30 }
 0x44c   : > { %19165 = vmatprep.mubr.msk.bf16.mxu1 %vm516_vm3, %v5510_v1  ;;  %v21830_v1 = vld [vmem:[%s25765_s5 + $0x170] sm:$0xff]   ;;  %513 = vst.msk [vmem:[#allocation2 + $0x179] sm:$0x1] %vm479_vm12, %v25841_v30  ;;  %514 = vst.msk [vmem:[#allocation2 + $0x191] sm:$0x1] %vm479_vm12, %v25841_v30 }
 0x44d   : > { %498 = vst.msk [vmem:[#allocation2 + $0x11] sm:$0x1] %vm479_vm12, %v25841_v30  ;;  %515 = vst.msk [vmem:[#allocation2 + $0x1a9] sm:$0x1] %vm479_vm12, %v25841_v30 }
 0x453   : > { %19166 = vmatmul.mubr.msk.bf16.gmra.mrb[28].mxu1 %vm516_vm3, %v5511_v19  ;;  %v5794_v19 = vld [vmem:[#allocation3 + $0x94] sm:$0xff] }
 0x454   : > { %19169 = vmatprep.mubr.msk.bf16.mxu1 %vm516_vm3, %v5512_v59  ;;  %v5795_v59 = vld [vmem:[#allocation3 + $0x9c] sm:$0xff] }
 0x45b   : > { %19170 = vmatmul.mubr.msk.bf16.gmra.mrb[32].mxu1 %vm516_vm3, %v5513_v13  ;;  %v5799_v13 = vld [vmem:[#allocation3 + $0xcc] sm:$0xff] }
 0x45c   : > { %19173 = vmatprep.mubr.msk.bf16.mxu1 %vm516_vm3, %v5514_v29  ;;  %v5823_v29 = vpack.c.bf16 %v5797_v51, %v5796_v55  ;;  %v5824_v7 = vpack.c.bf16 %v5799_v13, %v5798_v62  ;;  %v21838_v55 = vld [vmem:[%s25765_s5 + $0x188] sm:$0xff]   ;;  %v21841_v62 = vld [vmem:[%s25765_s5 + $0x190] sm:$0xff]   ;;  %v6108_v13 = vld [vmem:[#allocation3 + $0x98] sm:$0xff] }
 0x463   : > { %19174 = vmatmul.mubr.msk.bf16.gmra.mrb[36].mxu1 %vm516_vm3, %v5515_v49  ;;  %v5825_v49 = vpack.c.bf16 %v5801_v11, %v5800_v58  ;;  %v6109_v11 = vld [vmem:[#allocation3 + $0xa8] sm:$0xff] }
 0x464   : > { %19177 = vmatprep.mubr.msk.bf16.mxu1 %vm516_vm3, %v5516_v14  ;;  %v5826_v14 = vpack.c.bf16 %v5803_v6, %v5802_v54  ;;  %v23925_v54 = vld [vmem:[%s25765_s5 + $0x198] sm:$0xff]   ;;  %v6112_v6 = vld [vmem:[#allocation3 + $0xc8] sm:$0xff] }
 0x46b   : > { %19178 = vmatmul.mubr.msk.bf16.gmra.mrb[40].mxu1 %vm516_vm3, %v5517_v34  ;;  %v5827_v34 = vpack.c.bf16 %v5805_v60, %v5804_v28  ;;  %v6113_v60 = vld [vmem:[#allocation3 + $0xd8] sm:$0xff] }
 0x46c   : > { %19181 = vmatprep.mubr.msk.bf16.mxu1 %vm516_vm3, %v5518_v63  ;;  %v5828_v63 = vpack.c.bf16 %v5807_v26, %v5806_v20  ;;  %v23935_v26 = vld [vmem:[%s25768_s8] ss:$0 sm:$0xff] }
 0x473   : > { %19182 = vmatmul.mubr.msk.bf16.gmra.mrb[44].mxu1 %vm516_vm3, %v5519_v32  ;;  %v5813_v32 = vld [vmem:[#allocation3 + $0x174] sm:$0xff] }
 0x474   : > { %19191 = vmatprep.mubr.msk.bf16.mxu1 %vm516_vm3, %v5818_v0  ;;  %v5814_v0 = vld [vmem:[#allocation3 + $0x184] sm:$0xff]  ;;  %v5831_v47 = vpack.c.bf16 %v5813_v32, %v5812_v21 }
 0x475   : > { %v5832_v4 = vpack.c.bf16 %v5815_v25, %v5814_v0 }
 0x47b   : > { %19192 = vmatmul.mubr.msk.bf16.vlgmr.msra.gmra.mrb[16].mxu1 %vm516_vm3, %v5819_v9  ;;  %v5817_v9 = vld [vmem:[#allocation3 + $0x1a4] sm:$0xff] }
 0x47c   : > { %19224 = vmatpush3.bf16.msra.mxu1 %v23781_v56  ;;  %19195 = vmatprep.mubr.msk.bf16.mxu1 %vm516_vm3, %v5820_v2  ;;  %v5822_v56 = vpack.c.bf16 %v5795_v59, %v5794_v19  ;;  %v5833_v2 = vpack.c.bf16 %v5817_v9, %v5816_v15  ;;  %v6106_v19 = vld [vmem:[#allocation3 + $0x80] sm:$0xff] }
 0x47d   : > { %19225 = vmatprep.subr.bf16.mxu1 %v21830_v1  ;;  %v6103_v59 = vld [vmem:[#allocation3 + $0x60] sm:$0xff] }
 0x480   : > { %19226 = vmatpush3.bf16.msra.mxu1 %v21830_v1  ;;  %v6102_v1 = vld [vmem:[#allocation3 + $0x50] sm:$0xff] }
 0x481   : > { %19227 = vmatprep.subr.bf16.mxu1 %v21832_v31 }
 0x483   : > { %19196 = vmatmul.mubr.msk.bf16.gmra.mrb[20].mxu1 %vm516_vm3, %v5821_v3  ;;  %v6134_v3 = vpack.c.bf16 %v6104_v18, %v6103_v59  ;;  %v6122_v59 = vld [vmem:[#allocation3 + $0x140] sm:$0xff] }
 0x484   : > { %19199 = vmatprep.mubr.msk.bf16.mxu1 %vm516_vm3, %v5822_v56  ;;  %19228 = vmatpush3.bf16.msra.mxu1 %v21832_v31  ;;  %v6101_v31 = vld [vmem:[#allocation3 + $0x48] sm:$0xff]  ;;  %v6105_v56 = vld [vmem:[#allocation3 + $0x78] sm:$0xff] }
 0x485   : > { %19261 = vmatprep.subr.bf16.mxu1 %v23824_v37  ;;  %v6133_v36 = vpack.c.bf16 %v6102_v1, %v6101_v31  ;;  %v6135_v51 = vpack.c.bf16 %v6106_v19, %v6105_v56 }
 0x48b   : > { %19200 = vmatmul.mubr.msk.bf16.gmra.mrb[24].mxu1 %vm516_vm3, %v5823_v29  ;;  %v6110_v29 = vld [vmem:[#allocation3 + $0xb0] sm:$0xff] }
 0x48c   : > { %19203 = vmatprep.mubr.msk.bf16.mxu1 %vm516_vm3, %v5824_v7  ;;  %v6107_v7 = vld [vmem:[#allocation3 + $0x90] sm:$0xff] }
 0x48d   : > { %v6136_v58 = vpack.c.bf16 %v6108_v13, %v6107_v7  ;;  %v6121_v7 = vld [vmem:[#allocation3 + $0x138] sm:$0xff] }
 0x493   : > { %19204 = vmatmul.mubr.msk.bf16.gmra.mrb[28].mxu1 %vm516_vm3, %v5825_v49  ;;  %v6114_v49 = vld [vmem:[#allocation3 + $0xe0] sm:$0xff] }
 0x494   : > { %19207 = vmatprep.mubr.msk.bf16.mxu1 %vm516_vm3, %v5826_v14  ;;  %v6111_v14 = vld [vmem:[#allocation3 + $0xc0] sm:$0xff]  ;;  %v6139_v20 = vpack.c.bf16 %v6114_v49, %v6113_v60 }
 0x495   : > { %v6138_v28 = vpack.c.bf16 %v6112_v6, %v6111_v14 }
 0x49b   : > { %19208 = vmatmul.mubr.msk.bf16.gmra.mrb[32].mxu1 %vm516_vm3, %v5827_v34 }
 0x49c   : > { %19211 = vmatprep.mubr.msk.bf16.mxu1 %vm516_vm3, %v5828_v63  ;;  %v6116_v63 = vld [vmem:[#allocation3 + $0xf8] sm:$0xff] }
 0x4a3   : > { %19212 = vmatmul.mubr.msk.bf16.gmra.mrb[36].mxu1 %vm516_vm3, %v5829_v16 }
 0x4a4   : > { %19215 = vmatprep.mubr.msk.bf16.mxu1 %vm516_vm3, %v5830_v22  ;;  %v6115_v22 = vld [vmem:[#allocation3 + $0xf0] sm:$0xff] }
 0x4a5   : > { %v6140_v25 = vpack.c.bf16 %v6116_v63, %v6115_v22  ;;  %v6126_v22 = vld [vmem:[#allocation3 + $0x170] sm:$0xff] }
 0x4ab   : > { %19216 = vmatmul.mubr.msk.bf16.gmra.mrb[40].mxu1 %vm516_vm3, %v5831_v47  ;;  %v6117_v47 = vld [vmem:[#allocation3 + $0x108] sm:$0xff] }
 0x4ac   : > { %19219 = vmatprep.mubr.msk.bf16.mxu1 %vm516_vm3, %v5832_v4  ;;  %v6141_v9 = vpack.c.bf16 %v6118_v23, %v6117_v47 }
 0x4b3   : > { %19220 = vmatmul.mubr.msk.bf16.gmra.mrb[44].mxu1 %vm516_vm3, %v5833_v2 }
 0x4b4   : > { %19229 = vmatprep.mubr.msk.bf16.mxu1 %vm516_vm3, %v6133_v36  ;;  %v6120_v36 = vld [vmem:[#allocation3 + $0x128] sm:$0xff] }
 0x4bb   : > { %19230 = vmatmul.mubr.msk.bf16.vlgmr.msra.gmra.mrb[16].mxu1 %vm516_vm3, %v6134_v3 }
 0x4bc   : > { %19262 = vmatpush3.bf16.msra.mxu1 %v23824_v37  ;;  %19233 = vmatprep.mubr.msk.bf16.mxu1 %vm516_vm3, %v6135_v51  ;;  %v6137_v37 = vpack.c.bf16 %v6110_v29, %v6109_v11 }
 0x4bd   : > { %19263 = vmatprep.subr.bf16.mxu1 %v21838_v55 }
 0x4c0   : > { %19264 = vmatpush3.bf16.msra.mxu1 %v21838_v55  ;;  %v6119_v55 = vld [vmem:[#allocation3 + $0x120] sm:$0xff] }
 0x4c1   : > { %19265 = vmatprep.subr.bf16.mxu1 %v21841_v62  ;;  %v6142_v29 = vpack.c.bf16 %v6120_v36, %v6119_v55  ;;  %v21844_v36 = vld [vmem:[#allocation9 + $0x10] sm:$0xff]  }
 0x4c3   : > { %19234 = vmatmul.mubr.msk.bf16.gmra.mrb[20].mxu1 %vm516_vm3, %v6136_v58 }
 0x4c4   : > { %19237 = vmatprep.mubr.msk.bf16.mxu1 %vm516_vm3, %v6137_v37  ;;  %19266 = vmatpush3.bf16.msra.mxu1 %v21841_v62  ;;  %v6143_v37 = vpack.c.bf16 %v6122_v59, %v6121_v7 }
 0x4c5   : > { %19299 = vmatprep.subr.bf16.mxu1 %v23925_v54 }
 0x4cb   : > { %19238 = vmatmul.mubr.msk.bf16.gmra.mrb[24].mxu1 %vm516_vm3, %v6138_v28 }
 0x4cc   : > { %19241 = vmatprep.mubr.msk.bf16.mxu1 %vm516_vm3, %v6139_v20 }
 0x4cd   : > { %v19933_v34 = vpop.f32.mrb[112].mxu0 }
 0x4ce   : > { %v12156_v43 = vadd.f32 %v19933_v34, %v23935_v26  ;;  %v11988_v45 = vpop.f32.mrb[113].mxu0 }
 0x4cf   : > { %v12154_v12 = vadd.f32 %v23935_v26, %v11988_v45  ;;  %v19934_v16 = vpop.f32.mrb[114].mxu0  ;;  %v21842_v45 = vld [vmem:[#allocation9 + $0x8] sm:$0xff]  }
 0x4d0   : > { %v12188_v21 = vmax.f32 %v12156_v43, 0.0  ;;  %v12157_v32 = vadd.f32 %v19934_v16, %v23935_v26  ;;  %v11991_v0 = vpop.f32.mrb[115].mxu0  ;;  %v6124_v43 = vld [vmem:[#allocation3 + $0x158] sm:$0xff] }
 0x4d1   : > { %v12186_v4 = vmax.f32 %v12154_v12, 0.0  ;;  %v12155_v15 = vadd.f32 %v23935_v26, %v11991_v0  ;;  %v6123_v0 = vld [vmem:[#allocation3 + $0x150] sm:$0xff] }
 0x4d2   : > { %12221 = vst.msk [vmem:[#allocation5 + $0x31] sm:$0xff] %vm618_vm8, %v12188_v21  ;;  %v12189_v1 = vmax.f32 %v12157_v32, 0.0 }
 0x4d3   : > { %19242 = vmatmul.mubr.msk.bf16.gmra.mrb[28].mxu1 %vm516_vm3, %v6140_v25  ;;  %12219 = vst.msk [vmem:[#allocation5 + $0x19] sm:$0xff] %vm618_vm8, %v12186_v4  ;;  %v12187_v2 = vmax.f32 %v12155_v15, 0.0  ;;  %v6144_v15 = vpack.c.bf16 %v6124_v43, %v6123_v0 }
 0x4d4   : > { %19245 = vmatprep.mubr.msk.bf16.mxu1 %vm516_vm3, %v6141_v9  ;;  %12222 = vst.msk [vmem:[#allocation5 + $0x39] sm:$0xff] %vm618_vm8, %v12189_v1  ;;  %v6125_v9 = vld [vmem:[#allocation3 + $0x168] sm:$0xff] }
 0x4d5   : > { %12220 = vst.msk [vmem:[#allocation5 + $0x21] sm:$0xff] %vm618_vm8, %v12187_v2  ;;  %v19937_v31 = vpop.f32.mrb[116].mxu0 }
 0x4d6   : > { %v12160_v18 = vadd.f32 %v19937_v31, %v23935_v26  ;;  %v12004_v19 = vpop.f32.mrb[117].mxu0  ;;  %v6145_v31 = vpack.c.bf16 %v6126_v22, %v6125_v9  ;;  %v21848_v9 = vld [vmem:[#allocation9 + $0x28] sm:$0xff]  }
 0x4d7   : > { %v12158_v3 = vadd.f32 %v23935_v26, %v12004_v19  ;;  %v19938_v56 = vpop.f32.mrb[118].mxu0 }
 0x4d8   : > { %v12192_v51 = vmax.f32 %v12160_v18, 0.0  ;;  %v12161_v62 = vadd.f32 %v19938_v56, %v23935_v26  ;;  %v12007_v13 = vpop.f32.mrb[119].mxu0  ;;  %v6127_v56 = vld [vmem:[#allocation3 + $0x180] sm:$0xff] }
 0x4d9   : > { %v12190_v58 = vmax.f32 %v12158_v3, 0.0  ;;  %v12159_v11 = vadd.f32 %v23935_v26, %v12007_v13  ;;  %v12315_v63 = vld [vmem:[#allocation5 + $0x31] sm:$0xff] }
 0x4da   : > { %12225 = vst.msk [vmem:[#allocation5 + $0x61] sm:$0xff] %vm618_vm8, %v12192_v51  ;;  %v12193_v6 = vmax.f32 %v12161_v62, 0.0  ;;  %v12313_v28 = vld [vmem:[#allocation5 + $0x19] sm:$0xff] }
 0x4db   : > { %19246 = vmatmul.mubr.msk.bf16.gmra.mrb[32].mxu1 %vm516_vm3, %v6142_v29  ;;  %12223 = vst.msk [vmem:[#allocation5 + $0x49] sm:$0xff] %vm618_vm8, %v12190_v58  ;;  %v12191_v49 = vmax.f32 %v12159_v11, 0.0  ;;  %v12316_v14 = vld [vmem:[#allocation5 + $0x39] sm:$0xff]  ;;  %v21845_v29 = vld [vmem:[#allocation9 + $0x18] sm:$0xff]  }
 0x4dc   : > { %19249 = vmatprep.mubr.msk.bf16.mxu1 %vm516_vm3, %v6143_v37  ;;  %12226 = vst.msk [vmem:[#allocation5 + $0x69] sm:$0xff] %vm618_vm8, %v12193_v6  ;;  %v12314_v60 = vld [vmem:[#allocation5 + $0x21] sm:$0xff]  ;;  %v12345_v16 = vpack.c.bf16 %v12316_v14, %v12315_v63  ;;  %v6128_v13 = vld [vmem:[#allocation3 + $0x188] sm:$0xff]  ;;  %v6130_v6 = vld [vmem:[#allocation3 + $0x1a0] sm:$0xff] }
 0x4dd   : > { %12224 = vst.msk [vmem:[#allocation5 + $0x51] sm:$0xff] %vm618_vm8, %v12191_v49  ;;  %v19941_v20 = vpop.f32.mrb[120].mxu0  ;;  %v12344_v34 = vpack.c.bf16 %v12314_v60, %v12313_v28  ;;  %v6129_v37 = vld [vmem:[#allocation3 + $0x198] sm:$0xff] }
 0x4de   : > { %v12164_v23 = vadd.f32 %v19941_v20, %v23935_v26  ;;  %v12020_v12 = vpop.f32.mrb[121].mxu0 }
 0x4df   : > { %v12162_v21 = vadd.f32 %v23935_v26, %v12020_v12  ;;  %v19942_v32 = vpop.f32.mrb[122].mxu0  ;;  %19976 = vmatmul.mubr.msk.bf16.vlgmr.msra.gmra.mrb[144].mxu0 %vm618_vm8, %v12344_v34  ;;  %v6146_v34 = vpack.c.bf16 %v6128_v13, %v6127_v56 }
 0x4e0   : > { %v12196_v25 = vmax.f32 %v12164_v23, 0.0  ;;  %v12165_v47 = vadd.f32 %v19942_v32, %v23935_v26  ;;  %v12023_v4 = vpop.f32.mrb[123].mxu0  ;;  %19979 = vmatprep.mubr.msk.bf16.mxu0 %vm618_vm8, %v12345_v16  ;;  %20008 = vmatpush3.bf16.msra.mxu0 %v23804_v39  ;;  %v21846_v23 = vld [vmem:[#allocation9 + $0x20] sm:$0xff]   ;;  %v6132_v32 = vld [vmem:[#allocation3 + $0x1b8] sm:$0xff] }
 0x4e1   : > { %v12194_v1 = vmax.f32 %v12162_v21, 0.0  ;;  %v12163_v2 = vadd.f32 %v23935_v26, %v12023_v4  ;;  %20009 = vmatprep.subr.bf16.mxu0 %v21842_v45  ;;  %v12319_v62 = vld [vmem:[#allocation5 + $0x61] sm:$0xff] }
 0x4e2   : > { %12229 = vst.msk [vmem:[#allocation5 + $0x91] sm:$0xff] %vm618_vm8, %v12196_v25  ;;  %v12197_v18 = vmax.f32 %v12165_v47, 0.0  ;;  %v12317_v39 = vld [vmem:[#allocation5 + $0x49] sm:$0xff]  ;;  %v6131_v21 = vld [vmem:[#allocation3 + $0x1b0] sm:$0xff] }
 0x4e3   : > { %19250 = vmatmul.mubr.msk.bf16.gmra.mrb[36].mxu1 %vm516_vm3, %v6144_v15  ;;  %12227 = vst.msk [vmem:[#allocation5 + $0x79] sm:$0xff] %vm618_vm8, %v12194_v1  ;;  %v12195_v19 = vmax.f32 %v12163_v2, 0.0  ;;  %v12320_v59 = vld [vmem:[#allocation5 + $0x69] sm:$0xff] }
 0x4e4   : > { %19253 = vmatprep.mubr.msk.bf16.mxu1 %vm516_vm3, %v6145_v31  ;;  %12230 = vst.msk [vmem:[#allocation5 + $0x99] sm:$0xff] %vm618_vm8, %v12197_v18  ;;  %v12318_v3 = vld [vmem:[#allocation5 + $0x51] sm:$0xff]  ;;  %20010 = vmatpush3.bf16.msra.mxu0 %v21842_v45  ;;  %v12347_v11 = vpack.c.bf16 %v12320_v59, %v12319_v62  ;;  %v6147_v45 = vpack.c.bf16 %v6130_v6, %v6129_v37  ;;  %v6416_v18 = vld [vmem:[#allocation3 + $0x51] sm:$0xff] }
 0x4e5   : > { %12228 = vst.msk [vmem:[#allocation5 + $0x81] sm:$0xff] %vm618_vm8, %v12195_v19  ;;  %v19945_v55 = vpop.f32.mrb[124].mxu0  ;;  %v12346_v51 = vpack.c.bf16 %v12318_v3, %v12317_v39  ;;  %20011 = vmatprep.subr.bf16.mxu0 %v21844_v36 }
 0x4e6   : > { %v12168_v7 = vadd.f32 %v19945_v55, %v23935_v26  ;;  %v12036_v58 = vpop.f32.mrb[125].mxu0  ;;  %v6415_v55 = vld [vmem:[#allocation3 + $0x49] sm:$0xff] }
 0x4e7   : > { %v12166_v49 = vadd.f32 %v23935_v26, %v12036_v58  ;;  %v19946_v14 = vpop.f32.mrb[126].mxu0  ;;  %19980 = vmatmul.mubr.msk.bf16.gmra.mrb[148].mxu0 %vm618_vm8, %v12346_v51  ;;  %v6447_v13 = vpack.c.bf16 %v6416_v18, %v6415_v55  ;;  %v21850_v18 = vld [vmem:[%s25765_s5 + $0x1a8] sm:$0xff]  }
 0x4e8   : > { %v12200_v28 = vmax.f32 %v12168_v7, 0.0  ;;  %v12169_v60 = vadd.f32 %v19946_v14, %v23935_v26  ;;  %v12039_v20 = vpop.f32.mrb[127].mxu0  ;;  %19983 = vmatprep.mubr.msk.bf16.mxu0 %vm618_vm8, %v12347_v11  ;;  %20012 = vmatpush3.bf16.msra.mxu0 %v21844_v36  ;;  %v6148_v36 = vpack.c.bf16 %v6132_v32, %v6131_v21 }
 0x4e9   : > { %v12198_v63 = vmax.f32 %v12166_v49, 0.0  ;;  %v12167_v43 = vadd.f32 %v23935_v26, %v12039_v20  ;;  %20013 = vmatprep.subr.bf16.mxu0 %v21845_v29  ;;  %v12323_v15 = vld [vmem:[#allocation5 + $0x91] sm:$0xff] }
 0x4ea   : > { %12233 = vst.msk [vmem:[#allocation5 + $0xc1] sm:$0xff] %vm618_vm8, %v12200_v28  ;;  %v12201_v12 = vmax.f32 %v12169_v60, 0.0  ;;  %v12321_v0 = vld [vmem:[#allocation5 + $0x79] sm:$0xff] }
 0x4eb   : > { %19254 = vmatmul.mubr.msk.bf16.gmra.mrb[40].mxu1 %vm516_vm3, %v6146_v34  ;;  %12231 = vst.msk [vmem:[#allocation5 + $0xa9] sm:$0xff] %vm618_vm8, %v12198_v63  ;;  %v12199_v16 = vmax.f32 %v12167_v43, 0.0  ;;  %v12324_v22 = vld [vmem:[#allocation5 + $0x99] sm:$0xff]  ;;  %v6420_v43 = vld [vmem:[#allocation3 + $0x81] sm:$0xff] }
 0x4ec   : > { %19257 = vmatprep.mubr.msk.bf16.mxu1 %vm516_vm3, %v6147_v45  ;;  %12234 = vst.msk [vmem:[#allocation5 + $0xc9] sm:$0xff] %vm618_vm8, %v12201_v12  ;;  %v12322_v25 = vld [vmem:[#allocation5 + $0x81] sm:$0xff]  ;;  %20014 = vmatpush3.bf16.msra.mxu0 %v21845_v29  ;;  %v12349_v31 = vpack.c.bf16 %v12324_v22, %v12323_v15  ;;  %v23988_v29 = vld [vmem:[#allocation9 + $0x60] sm:$0xff]   ;;  %v6418_v60 = vld [vmem:[#allocation3 + $0x69] sm:$0xff] }
 0x4ed   : > { %12232 = vst.msk [vmem:[#allocation5 + $0xb1] sm:$0xff] %vm618_vm8, %v12199_v16  ;;  %v19949_v47 = vpop.f32.mrb[128].mxu0  ;;  %v12348_v4 = vpack.c.bf16 %v12322_v25, %v12321_v0  ;;  %20015 = vmatprep.subr.bf16.mxu0 %v21846_v23  ;;  %v6417_v12 = vld [vmem:[#allocation3 + $0x61] sm:$0xff]  ;;  %v6419_v0 = vld [vmem:[#allocation3 + $0x79] sm:$0xff]  ;;  %v14559_v30 = vld [vmem:[#allocation5 + $0x79] sm:$0xff] }
 0x4ee   : > { %v12172_v1 = vadd.f32 %v19949_v47, %v23935_v26  ;;  %v12052_v2 = vpop.f32.mrb[129].mxu0  ;;  %v6448_v32 = vpack.c.bf16 %v6418_v60, %v6417_v12  ;;  %v21847_v25 = vld [vmem:[%s25765_s5 + $0x1a0] sm:$0xff]   ;;  %v6449_v15 = vpack.c.bf16 %v6420_v43, %v6419_v0 }
 0x4ef   : > { %v12170_v19 = vadd.f32 %v23935_v26, %v12052_v2  ;;  %v19950_v59 = vpop.f32.mrb[130].mxu0  ;;  %19984 = vmatmul.mubr.msk.bf16.gmra.mrb[152].mxu0 %vm618_vm8, %v12348_v4 }
 0x4f0   : > { %v12204_v39 = vmax.f32 %v12172_v1, 0.0  ;;  %v12173_v3 = vadd.f32 %v19950_v59, %v23935_v26  ;;  %v12055_v56 = vpop.f32.mrb[131].mxu0  ;;  %19987 = vmatprep.mubr.msk.bf16.mxu0 %vm618_vm8, %v12349_v31  ;;  %20016 = vmatpush3.bf16.msra.mxu0 %v21846_v23 }
 0x4f1   : > { %v12202_v51 = vmax.f32 %v12170_v19, 0.0  ;;  %v12171_v62 = vadd.f32 %v23935_v26, %v12055_v56  ;;  %20017 = vmatprep.subr.bf16.mxu0 %v21848_v9  ;;  %v12327_v28 = vld [vmem:[#allocation5 + $0xc1] sm:$0xff] }
 0x4f2   : > { %12237 = vst.msk [vmem:[#allocation5 + $0xf1] sm:$0xff] %vm618_vm8, %v12204_v39  ;;  %v12205_v7 = vmax.f32 %v12173_v3, 0.0  ;;  %v12325_v37 = vld [vmem:[#allocation5 + $0xa9] sm:$0xff] }
 0x4f3   : > { %19258 = vmatmul.mubr.msk.bf16.gmra.mrb[44].mxu1 %vm516_vm3, %v6148_v36  ;;  %12235 = vst.msk [vmem:[#allocation5 + $0xd9] sm:$0xff] %vm618_vm8, %v12202_v51  ;;  %v12203_v58 = vmax.f32 %v12171_v62, 0.0  ;;  %v12328_v11 = vld [vmem:[#allocation5 + $0xc9] sm:$0xff]  ;;  %v6424_v51 = vld [vmem:[#allocation3 + $0xb1] sm:$0xff] }
 0x4f4   : > { %19267 = vmatprep.mubr.msk.bf16.mxu1 %vm516_vm3, %v6447_v13  ;;  %12238 = vst.msk [vmem:[#allocation5 + $0xf9] sm:$0xff] %vm618_vm8, %v12205_v7  ;;  %v12326_v6 = vld [vmem:[#allocation5 + $0xb1] sm:$0xff]  ;;  %20018 = vmatpush3.bf16.msra.mxu0 %v21848_v9  ;;  %v12351_v63 = vpack.c.bf16 %v12328_v11, %v12327_v28  ;;  %v6422_v3 = vld [vmem:[#allocation3 + $0x99] sm:$0xff]  ;;  %v6421_v7 = vld [vmem:[#allocation3 + $0x91] sm:$0xff] }
 0x4f5   : > { %12236 = vst.msk [vmem:[#allocation5 + $0xe1] sm:$0xff] %vm618_vm8, %v12203_v58  ;;  %v19953_v49 = vpop.f32.mrb[132].mxu0  ;;  %v12350_v14 = vpack.c.bf16 %v12326_v6, %v12325_v37  ;;  %20051 = vmatprep.subr.bf16.mxu0 %v23988_v29  ;;  %v6450_v6 = vpack.c.bf16 %v6422_v3, %v6421_v7 }
 0x4f6   : > { %v12176_v20 = vadd.f32 %v19953_v49, %v23935_v26  ;;  %v12068_v34 = vpop.f32.mrb[133].mxu0  ;;  %v6423_v49 = vld [vmem:[#allocation3 + $0xa9] sm:$0xff] }
 0x4f7   : > { %v12174_v45 = vadd.f32 %v23935_v26, %v12068_v34  ;;  %v19954_v23 = vpop.f32.mrb[134].mxu0  ;;  %19988 = vmatmul.mubr.msk.bf16.gmra.mrb[156].mxu0 %vm618_vm8, %v12350_v14  ;;  %v24024_v14 = vld [vmem:[%s25765_s5 + $0x1b0] sm:$0xff]  }
 0x4f8   : > { %v12208_v16 = vmax.f32 %v12176_v20, 0.0  ;;  %v12177_v22 = vadd.f32 %v19954_v23, %v23935_v26  ;;  %v12071_v21 = vpop.f32.mrb[135].mxu0  ;;  %19991 = vmatprep.mubr.msk.bf16.mxu0 %vm618_vm8, %v12351_v63  ;;  %v6451_v20 = vpack.c.bf16 %v6424_v51, %v6423_v49 }
 0x4f9   : > { %v12206_v47 = vmax.f32 %v12174_v45, 0.0  ;;  %v12175_v4 = vadd.f32 %v23935_v26, %v12071_v21  ;;  %v12331_v39 = vld [vmem:[#allocation5 + $0xf1] sm:$0xff]  ;;  %v6426_v21 = vld [vmem:[#allocation3 + $0xc9] sm:$0xff] }
 0x4fa   : > { %12241 = vst.msk [vmem:[#allocation5 + $0x121] sm:$0xff] %vm618_vm8, %v12208_v16  ;;  %v12209_v9 = vmax.f32 %v12177_v22, 0.0  ;;  %v12329_v31 = vld [vmem:[#allocation5 + $0xd9] sm:$0xff] }
 0x4fb   : > { %19268 = vmatmul.mubr.msk.bf16.vlgmr.msra.gmra.mrb[16].mxu1 %vm516_vm3, %v6448_v32  ;;  %12239 = vst.msk [vmem:[#allocation5 + $0x109] sm:$0xff] %vm618_vm8, %v12206_v47  ;;  %v12207_v1 = vmax.f32 %v12175_v4, 0.0  ;;  %v12332_v2 = vld [vmem:[#allocation5 + $0xf9] sm:$0xff]  ;;  %v6428_v47 = vld [vmem:[#allocation3 + $0xe1] sm:$0xff] }
 0x4fc   : > { %19300 = vmatpush3.bf16.msra.mxu1 %v23925_v54  ;;  %19271 = vmatprep.mubr.msk.bf16.mxu1 %vm516_vm3, %v6449_v15  ;;  %12242 = vst.msk [vmem:[#allocation5 + $0x129] sm:$0xff] %vm618_vm8, %v12209_v9  ;;  %v12330_v36 = vld [vmem:[#allocation5 + $0xe1] sm:$0xff]  ;;  %v12353_v55 = vpack.c.bf16 %v12332_v2, %v12331_v39  ;;  %v6425_v9 = vld [vmem:[#allocation3 + $0xc1] sm:$0xff] }
 0x4fd   : > { %19301 = vmatprep.subr.bf16.mxu1 %v21847_v25  ;;  %12240 = vst.msk [vmem:[#allocation5 + $0x111] sm:$0xff] %vm618_vm8, %v12207_v1  ;;  %v19957_v19 = vpop.f32.mrb[136].mxu0  ;;  %v12352_v59 = vpack.c.bf16 %v12330_v36, %v12329_v31  ;;  %v6452_v36 = vpack.c.bf16 %v6426_v21, %v6425_v9  ;;  %v21851_v9 = vld [vmem:[#allocation9 + $0x68] sm:$0xff]  }
 0x4fe   : > { %v12180_v54 = vadd.f32 %v19957_v19, %v23935_v26  ;;  %v12084_v56 = vpop.f32.mrb[137].mxu0 }
 0x4ff   : > { %v12178_v62 = vadd.f32 %v23935_v26, %v12084_v56  ;;  %v19958_v13 = vpop.f32.mrb[138].mxu0  ;;  %19992 = vmatmul.mubr.msk.bf16.gmra.mrb[160].mxu0 %vm618_vm8, %v12352_v59 }
 0x500   : > { %19302 = vmatpush3.bf16.msra.mxu1 %v21847_v25  ;;  %v12212_v58 = vmax.f32 %v12180_v54, 0.0  ;;  %v12181_v11 = vadd.f32 %v19958_v13, %v23935_v26  ;;  %v12087_v37 = vpop.f32.mrb[139].mxu0  ;;  %19995 = vmatprep.mubr.msk.bf16.mxu0 %vm618_vm8, %v12353_v55  ;;  %v6430_v13 = vld [vmem:[#allocation3 + $0xf9] sm:$0xff] }
 0x501   : > { %19303 = vmatprep.subr.bf16.mxu1 %v21850_v18  ;;  %v12210_v28 = vmax.f32 %v12178_v62, 0.0  ;;  %v12179_v60 = vadd.f32 %v23935_v26, %v12087_v37  ;;  %v12335_v22 = vld [vmem:[#allocation5 + $0x121] sm:$0xff] }
 0x502   : > { %12245 = vst.msk [vmem:[#allocation5 + $0x151] sm:$0xff] %vm618_vm8, %v12212_v58  ;;  %v12213_v34 = vmax.f32 %v12181_v11, 0.0  ;;  %v12333_v45 = vld [vmem:[#allocation5 + $0x109] sm:$0xff]  ;;  %v6432_v58 = vld [vmem:[#allocation3 + $0x111] sm:$0xff] }
 0x503   : > { %19272 = vmatmul.mubr.msk.bf16.gmra.mrb[20].mxu1 %vm516_vm3, %v6450_v6  ;;  %12243 = vst.msk [vmem:[#allocation5 + $0x139] sm:$0xff] %vm618_vm8, %v12210_v28  ;;  %v12211_v63 = vmax.f32 %v12179_v60, 0.0  ;;  %v12336_v43 = vld [vmem:[#allocation5 + $0x129] sm:$0xff]  ;;  %v6429_v11 = vld [vmem:[#allocation3 + $0xf1] sm:$0xff]  ;;  %v6431_v6 = vld [vmem:[#allocation3 + $0x109] sm:$0xff] }
 0x504   : > { %19275 = vmatprep.mubr.msk.bf16.mxu1 %vm516_vm3, %v6451_v20  ;;  %19304 = vmatpush3.bf16.msra.mxu1 %v21850_v18  ;;  %12246 = vst.msk [vmem:[#allocation5 + $0x159] sm:$0xff] %vm618_vm8, %v12213_v34  ;;  %v12334_v23 = vld [vmem:[#allocation5 + $0x111] sm:$0xff]  ;;  %v12355_v25 = vpack.c.bf16 %v12336_v43, %v12335_v22  ;;  %v6427_v18 = vld [vmem:[#allocation3 + $0xd9] sm:$0xff]  ;;  %v6454_v37 = vpack.c.bf16 %v6430_v13, %v6429_v11  ;;  %v12251_v28 = vld [vmem:[#allocation5] sm:$0xff] }
 0x505   : > { %19337 = vmatprep.subr.bf16.mxu1 %v24024_v14  ;;  %12244 = vst.msk [vmem:[#allocation5 + $0x141] sm:$0xff] %vm618_vm8, %v12211_v63  ;;  %v19961_v12 = vpop.f32.mrb[140].mxu0  ;;  %v12354_v16 = vpack.c.bf16 %v12334_v23, %v12333_v45  ;;  %v6453_v39 = vpack.c.bf16 %v6428_v47, %v6427_v18  ;;  %v6455_v49 = vpack.c.bf16 %v6432_v58, %v6431_v6  ;;  %v12252_v60 = vld [vmem:[#allocation5 + $0x8] sm:$0xff]  ;;  %v6434_v45 = vld [vmem:[#allocation3 + $0x129] sm:$0xff]  ;;  %v6436_v23 = vld [vmem:[#allocation3 + $0x141] sm:$0xff] }
 0x506   : > { %v12184_v32 = vadd.f32 %v19961_v12, %v23935_v26  ;;  %v12100_v0 = vpop.f32.mrb[141].mxu0  ;;  %v12283_v63 = vpack.c.bf16 %v12252_v60, %v12251_v28  ;;  %v6433_v12 = vld [vmem:[#allocation3 + $0x121] sm:$0xff]  ;;  %v6435_v22 = vld [vmem:[#allocation3 + $0x139] sm:$0xff]  ;;  %v6439_v18 = vld [vmem:[#allocation3 + $0x169] sm:$0xff] }
 0x507   : > { %v12182_v4 = vadd.f32 %v23935_v26, %v12100_v0  ;;  %v19962_v15 = vpop.f32.mrb[142].mxu0  ;;  %19996 = vmatmul.mubr.msk.bf16.gmra.mrb[164].mxu0 %vm618_vm8, %v12354_v16  ;;  %v6456_v16 = vpack.c.bf16 %v6434_v45, %v6433_v12  ;;  %v6457_v21 = vpack.c.bf16 %v6436_v23, %v6435_v22  ;;  %v12256_v0 = vld [vmem:[#allocation5 + $0x38] sm:$0xff]  ;;  %v12262_v6 = vld [vmem:[#allocation5 + $0x80] sm:$0xff]  ;;  %v6446_v60 = vld [vmem:[#allocation3 + $0x1b9] sm:$0xff] }
 0x508   : > { %v12216_v1 = vmax.f32 %v12184_v32, 0.0  ;;  %v12185_v2 = vadd.f32 %v19962_v15, %v23935_v26  ;;  %v12103_v31 = vpop.f32.mrb[143].mxu0  ;;  %19999 = vmatprep.mubr.msk.bf16.mxu0 %vm618_vm8, %v12355_v25  ;;  %v12254_v32 = vld [vmem:[#allocation5 + $0x20] sm:$0xff]  ;;  %v12253_v25 = vld [vmem:[#allocation5 + $0x18] sm:$0xff]  ;;  %v6438_v15 = vld [vmem:[#allocation3 + $0x159] sm:$0xff] }
 0x509   : > { %v12214_v19 = vmax.f32 %v12182_v4, 0.0  ;;  %v12183_v59 = vadd.f32 %v23935_v26, %v12103_v31  ;;  %v12339_v26 = vld [vmem:[#allocation5 + $0x151] sm:$0xff]  ;;  %v24054_v47 = vpack.c.bf16 %v12254_v32, %v12253_v25  ;;  %v6437_v31 = vld [vmem:[#allocation3 + $0x151] sm:$0xff] }
 0x50a   : > { %12249 = vst.msk [vmem:[#allocation5 + $0x181] sm:$0xff] %vm618_vm8, %v12216_v1  ;;  %v12217_v3 = vmax.f32 %v12185_v2, 0.0  ;;  %v12337_v55 = vld [vmem:[#allocation5 + $0x139] sm:$0xff]  ;;  %v12255_v4 = vld [vmem:[#allocation5 + $0x30] sm:$0xff]  ;;  %v6440_v2 = vld [vmem:[#allocation3 + $0x171] sm:$0xff] }
 0x50b   : > { %19276 = vmatmul.mubr.msk.bf16.gmra.mrb[24].mxu1 %vm516_vm3, %v6452_v36  ;;  %12247 = vst.msk [vmem:[#allocation5 + $0x169] sm:$0xff] %vm618_vm8, %v12214_v19  ;;  %v12215_v54 = vmax.f32 %v12183_v59, 0.0  ;;  %v12340_v56 = vld [vmem:[#allocation5 + $0x159] sm:$0xff]  ;;  %v24056_v1 = vpack.c.bf16 %v12256_v0, %v12255_v4  ;;  %v6458_v36 = vpack.c.bf16 %v6438_v15, %v6437_v31  ;;  %v6459_v19 = vpack.c.bf16 %v6440_v2, %v6439_v18  ;;  %v6445_v28 = vld [vmem:[#allocation3 + $0x1b1] sm:$0xff]  ;;  %v12266_v32 = vld [vmem:[#allocation5 + $0xb0] sm:$0xff] }
 0x50c   : > { %19279 = vmatprep.mubr.msk.bf16.mxu1 %vm516_vm3, %v6453_v39  ;;  %12250 = vst.msk [vmem:[#allocation5 + $0x189] sm:$0xff] %vm618_vm8, %v12217_v3  ;;  %v12338_v51 = vld [vmem:[#allocation5 + $0x141] sm:$0xff]  ;;  %v12357_v7 = vpack.c.bf16 %v12340_v56, %v12339_v26  ;;  %v12258_v39 = vld [vmem:[#allocation5 + $0x50] sm:$0xff]  ;;  %v6462_v23 = vpack.c.bf16 %v6446_v60, %v6445_v28 }
 0x50d   : > { %12248 = vst.msk [vmem:[#allocation5 + $0x171] sm:$0xff] %vm618_vm8, %v12215_v54  ;;  %v12356_v62 = vpack.c.bf16 %v12338_v51, %v12337_v55  ;;  %v21853_v59 = vld [vmem:[#allocation9 + $0x70] sm:$0xff]   ;;  %v12260_v3 = vld [vmem:[#allocation5 + $0x68] sm:$0xff]  ;;  %v6441_v56 = vld [vmem:[#allocation3 + $0x181] sm:$0xff] }
 0x50e   : > { %v12257_v54 = vld [vmem:[#allocation5 + $0x48] sm:$0xff]  ;;  %v12259_v51 = vld [vmem:[#allocation5 + $0x60] sm:$0xff]  ;;  %v6734_v31 = vld [vmem:[#allocation3 + $0x82] sm:$0xff] }
 0x50f   : > { %20000 = vmatmul.mubr.msk.bf16.gmra.mrb[168].mxu0 %vm618_vm8, %v12356_v62  ;;  %v24065_v55 = vpack.c.bf16 %v12258_v39, %v12257_v54  ;;  %v6442_v62 = vld [vmem:[#allocation3 + $0x189] sm:$0xff]  ;;  %v21854_v26 = vld [vmem:[#allocation9 + $0x78] sm:$0xff]   ;;  %v24067_v13 = vpack.c.bf16 %v12260_v3, %v12259_v51  ;;  %v12274_v28 = vld [vmem:[#allocation5 + $0x110] sm:$0xff] }
 0x510   : > { %20003 = vmatprep.mubr.msk.bf16.mxu0 %vm618_vm8, %v12357_v7  ;;  %v6444_v7 = vld [vmem:[#allocation3 + $0x1a1] sm:$0xff]  ;;  %v6460_v58 = vpack.c.bf16 %v6442_v62, %v6441_v56  ;;  %v6730_v12 = vld [vmem:[#allocation3 + $0x52] sm:$0xff]  ;;  %v24765_v33 = vld [vmem:[#allocation5 + $0x13a] sm:$0xff] }
 0x511   : > { %v12268_v0 = vld [vmem:[#allocation5 + $0xc8] sm:$0xff]  ;;  %v12267_v15 = vld [vmem:[#allocation5 + $0xc0] sm:$0xff]  ;;  %v12272_v54 = vld [vmem:[#allocation5 + $0xf8] sm:$0xff] }
 0x512   : > { %v12341_v20 = vld [vmem:[#allocation5 + $0x169] sm:$0xff]  ;;  %v24090_v2 = vpack.c.bf16 %v12268_v0, %v12267_v15  ;;  %v12270_v3 = vld [vmem:[#allocation5 + $0xe0] sm:$0xff]  ;;  %v12269_v56 = vld [vmem:[#allocation5 + $0xd8] sm:$0xff] }
 0x513   : > { %19280 = vmatmul.mubr.msk.bf16.gmra.mrb[28].mxu1 %vm516_vm3, %v6454_v37  ;;  %v21855_v37 = vld [vmem:[#allocation9 + $0x80] sm:$0xff]   ;;  %v12265_v25 = vld [vmem:[#allocation5 + $0xa8] sm:$0xff]  ;;  %v24105_v62 = vpack.c.bf16 %v12270_v3, %v12269_v56  ;;  %v12278_v15 = vld [vmem:[#allocation5 + $0x140] sm:$0xff] }
 0x514   : > { %19283 = vmatprep.mubr.msk.bf16.mxu1 %vm516_vm3, %v6455_v49  ;;  %v12342_v34 = vld [vmem:[#allocation5 + $0x171] sm:$0xff]  ;;  %v24087_v4 = vpack.c.bf16 %v12266_v32, %v12265_v25  ;;  %v21859_v51 = vld [vmem:[%s25765_s5 + $0x1c0] sm:$0xff]   ;;  %v6745_v56 = vld [vmem:[#allocation3 + $0x10a] sm:$0xff] }
 0x515   : > { %v12358_v43 = vpack.c.bf16 %v12342_v34, %v12341_v20  ;;  %v12264_v49 = vld [vmem:[#allocation5 + $0x98] sm:$0xff]  ;;  %v12276_v60 = vld [vmem:[#allocation5 + $0x128] sm:$0xff] }
 0x516   : > { %v12261_v20 = vld [vmem:[#allocation5 + $0x78] sm:$0xff]  ;;  %v6741_v0 = vld [vmem:[#allocation3 + $0xda] sm:$0xff]  ;;  %v6743_v3 = vld [vmem:[#allocation3 + $0xf2] sm:$0xff] }
 0x517   : > { %20004 = vmatmul.mubr.msk.bf16.gmra.mrb[172].mxu0 %vm618_vm8, %v12358_v43  ;;  %v24075_v34 = vpack.c.bf16 %v12262_v6, %v12261_v20  ;;  %v21857_v43 = vld [vmem:[#allocation9 + $0x88] sm:$0xff]   ;;  %v24116_v6 = vld [vmem:[%s25765_s5 + $0x1c8] sm:$0xff]   ;;  %v12273_v20 = vld [vmem:[#allocation5 + $0x108] sm:$0xff] }
 0x518   : > { %20019 = vmatprep.mubr.msk.bf16.mxu0 %vm618_vm8, %v12283_v63  ;;  %v12263_v63 = vld [vmem:[#allocation5 + $0x90] sm:$0xff]  ;;  %v24767_v27 = vld [vmem:[#allocation5 + $0x142] sm:$0xff] }
 0x519   : > { %v24077_v45 = vpack.c.bf16 %v12264_v49, %v12263_v63  ;;  %v24121_v63 = vpack.c.bf16 %v12274_v28, %v12273_v20  ;;  %v6750_v28 = vld [vmem:[#allocation3 + $0x142] sm:$0xff]  ;;  %v14909_v44 = vld [vmem:[#allocation5 + $0x10a] sm:$0xff]  ;;  %v14934_v42 = vpack.c.bf16 %v24767_v27, %v24765_v33 }
 0x51a   : > { %v14910_v48 = vld [vmem:[#allocation5 + $0x112] sm:$0xff] }
 0x51b   : > { %19284 = vmatmul.mubr.msk.bf16.gmra.mrb[32].mxu1 %vm516_vm3, %v6456_v16  ;;  %v6729_v16 = vld [vmem:[#allocation3 + $0x4a] sm:$0xff] }
 0x51c   : > { %19287 = vmatprep.mubr.msk.bf16.mxu1 %vm516_vm3, %v6457_v21  ;;  %v6761_v22 = vpack.c.bf16 %v6730_v12, %v6729_v16  ;;  %v24083_v21 = vld [vmem:[#allocation9 + $0x90] sm:$0xff]   ;;  %v6742_v16 = vld [vmem:[#allocation3 + $0xe2] sm:$0xff] }
 0x51d   : > { %v6767_v25 = vpack.c.bf16 %v6742_v16, %v6741_v0  ;;  %v12864_v16 = vld [vmem:[#allocation5 + $0x1a] sm:$0xff] }
 0x51e   : > { %v12867_v0 = vld [vmem:[#allocation5 + $0x3a] sm:$0xff] }
 0x51f   : > { %20020 = vmatmul.mubr.msk.bf16.vlgmr.msra.gmra.mrb[144].mxu0 %vm618_vm8, %v24054_v47 }
 0x520   : > { %20023 = vmatprep.mubr.msk.bf16.mxu0 %vm618_vm8, %v24056_v1  ;;  %20052 = vmatpush3.bf16.msra.mxu0 %v23988_v29  ;;  %v6443_v29 = vld [vmem:[#allocation3 + $0x199] sm:$0xff] }
 0x521   : > { %20053 = vmatprep.subr.bf16.mxu0 %v21851_v9  ;;  %v6461_v11 = vpack.c.bf16 %v6444_v7, %v6443_v29  ;;  %v6736_v29 = vld [vmem:[#allocation3 + $0x9a] sm:$0xff] }
 0x523   : > { %19288 = vmatmul.mubr.msk.bf16.gmra.mrb[36].mxu1 %vm516_vm3, %v6458_v36  ;;  %v6731_v36 = vld [vmem:[#allocation3 + $0x62] sm:$0xff] }
 0x524   : > { %19291 = vmatprep.mubr.msk.bf16.mxu1 %vm516_vm3, %v6459_v19  ;;  %20054 = vmatpush3.bf16.msra.mxu0 %v21851_v9  ;;  %v6732_v9 = vld [vmem:[#allocation3 + $0x6a] sm:$0xff]  ;;  %v6733_v19 = vld [vmem:[#allocation3 + $0x7a] sm:$0xff] }
 0x525   : > { %20055 = vmatprep.subr.bf16.mxu0 %v21853_v59  ;;  %v6762_v18 = vpack.c.bf16 %v6732_v9, %v6731_v36  ;;  %v6763_v39 = vpack.c.bf16 %v6734_v31, %v6733_v19  ;;  %v12280_v9 = vld [vmem:[#allocation5 + $0x158] sm:$0xff]  ;;  %v6744_v19 = vld [vmem:[#allocation3 + $0xfa] sm:$0xff] }
 0x526   : > { %v12277_v31 = vld [vmem:[#allocation5 + $0x138] sm:$0xff] }
 0x527   : > { %20024 = vmatmul.mubr.msk.bf16.gmra.mrb[148].mxu0 %vm618_vm8, %v24065_v55  ;;  %v24131_v36 = vpack.c.bf16 %v12278_v15, %v12277_v31  ;;  %v6752_v15 = vld [vmem:[#allocation3 + $0x15a] sm:$0xff] }
 0x528   : > { %20027 = vmatprep.mubr.msk.bf16.mxu0 %vm618_vm8, %v24067_v13  ;;  %20056 = vmatpush3.bf16.msra.mxu0 %v21853_v59  ;;  %v21856_v59 = vld [vmem:[%s25765_s5 + $0x1b8] sm:$0xff]  }
 0x529   : > { %20057 = vmatprep.subr.bf16.mxu0 %v21854_v26 }
 0x52b   : > { %19292 = vmatmul.mubr.msk.bf16.gmra.mrb[40].mxu1 %vm516_vm3, %v6460_v58  ;;  %v6738_v58 = vld [vmem:[#allocation3 + $0xb2] sm:$0xff] }
 0x52c   : > { %19295 = vmatprep.mubr.msk.bf16.mxu1 %vm516_vm3, %v6461_v11  ;;  %20058 = vmatpush3.bf16.msra.mxu0 %v21854_v26  ;;  %v12271_v26 = vld [vmem:[#allocation5 + $0xf0] sm:$0xff] }
 0x52d   : > { %20059 = vmatprep.subr.bf16.mxu0 %v21855_v37  ;;  %v24107_v7 = vpack.c.bf16 %v12272_v54, %v12271_v26  ;;  %v6768_v54 = vpack.c.bf16 %v6744_v19, %v6743_v3  ;;  %v12862_v26 = vld [vmem:[#allocation5 + $0x2] sm:$0xff]  ;;  %v6753_v3 = vld [vmem:[#allocation3 + $0x16a] sm:$0xff] }
 0x52e   : > { %v6751_v19 = vld [vmem:[#allocation3 + $0x152] sm:$0xff] }
 0x52f   : > { %20028 = vmatmul.mubr.msk.bf16.gmra.mrb[152].mxu0 %vm618_vm8, %v24075_v34 }
 0x530   : > { %20031 = vmatprep.mubr.msk.bf16.mxu0 %vm618_vm8, %v24077_v45  ;;  %20060 = vmatpush3.bf16.msra.mxu0 %v21855_v37  ;;  %v6737_v37 = vld [vmem:[#allocation3 + $0xaa] sm:$0xff] }
 0x531   : > { %20061 = vmatprep.subr.bf16.mxu0 %v21857_v43  ;;  %v6765_v49 = vpack.c.bf16 %v6738_v58, %v6737_v37  ;;  %v12282_v58 = vld [vmem:[#allocation5 + $0x170] sm:$0xff] }
 0x533   : > { %19296 = vmatmul.mubr.msk.bf16.gmra.mrb[44].mxu1 %vm516_vm3, %v6462_v23  ;;  %v6740_v23 = vld [vmem:[#allocation3 + $0xca] sm:$0xff] }
 0x534   : > { %19305 = vmatprep.mubr.msk.bf16.mxu1 %vm516_vm3, %v6761_v22  ;;  %20062 = vmatpush3.bf16.msra.mxu0 %v21857_v43  ;;  %v12275_v43 = vld [vmem:[#allocation5 + $0x120] sm:$0xff]  ;;  %v6739_v22 = vld [vmem:[#allocation3 + $0xc2] sm:$0xff] }
 0x535   : > { %20095 = vmatprep.subr.bf16.mxu0 %v24083_v21  ;;  %v24123_v12 = vpack.c.bf16 %v12276_v60, %v12275_v43  ;;  %v6766_v32 = vpack.c.bf16 %v6740_v23, %v6739_v22  ;;  %v6747_v60 = vld [vmem:[#allocation3 + $0x122] sm:$0xff]  ;;  %v6749_v43 = vld [vmem:[#allocation3 + $0x13a] sm:$0xff]  ;;  %v12865_v22 = vld [vmem:[#allocation5 + $0x22] sm:$0xff] }
 0x536   : > { %v6771_v23 = vpack.c.bf16 %v6750_v28, %v6749_v43  ;;  %v21863_v28 = vld [vmem:[#allocation9 + $0xa8] sm:$0xff]  }
 0x537   : > { %20032 = vmatmul.mubr.msk.bf16.gmra.mrb[156].mxu0 %vm618_vm8, %v24087_v4 }
 0x538   : > { %20035 = vmatprep.mubr.msk.bf16.mxu0 %vm618_vm8, %v24090_v2 }
 0x53b   : > { %19306 = vmatmul.mubr.msk.bf16.vlgmr.msra.gmra.mrb[16].mxu1 %vm516_vm3, %v6762_v18  ;;  %v12279_v18 = vld [vmem:[#allocation5 + $0x150] sm:$0xff] }
 0x53c   : > { %19338 = vmatpush3.bf16.msra.mxu1 %v24024_v14  ;;  %19309 = vmatprep.mubr.msk.bf16.mxu1 %vm516_vm3, %v6763_v39  ;;  %v6735_v14 = vld [vmem:[#allocation3 + $0x92] sm:$0xff] }
 0x53d   : > { %19339 = vmatprep.subr.bf16.mxu1 %v21856_v59  ;;  %v6764_v11 = vpack.c.bf16 %v6736_v29, %v6735_v14  ;;  %v6746_v39 = vld [vmem:[#allocation3 + $0x112] sm:$0xff]  ;;  %v12863_v29 = vld [vmem:[#allocation5 + $0xa] sm:$0xff] }
 0x53e   : > { %v12281_v14 = vld [vmem:[#allocation5 + $0x168] sm:$0xff] }
 0x53f   : > { %20036 = vmatmul.mubr.msk.bf16.gmra.mrb[160].mxu0 %vm618_vm8, %v24105_v62  ;;  %v24141_v37 = vpack.c.bf16 %v12282_v58, %v12281_v14  ;;  %v12871_v58 = vld [vmem:[#allocation5 + $0x6a] sm:$0xff] }
 0x540   : > { %19340 = vmatpush3.bf16.msra.mxu1 %v21856_v59  ;;  %20039 = vmatprep.mubr.msk.bf16.mxu0 %vm618_vm8, %v24107_v7  ;;  %v24133_v59 = vpack.c.bf16 %v12280_v9, %v12279_v18  ;;  %v21860_v9 = vld [vmem:[#allocation9 + $0x98] sm:$0xff]  }
 0x541   : > { %19341 = vmatprep.subr.bf16.mxu1 %v21859_v51  ;;  %v6754_v18 = vld [vmem:[#allocation3 + $0x172] sm:$0xff] }
 0x543   : > { %19310 = vmatmul.mubr.msk.bf16.gmra.mrb[20].mxu1 %vm516_vm3, %v6764_v11  ;;  %v12894_v11 = vpack.c.bf16 %v12863_v29, %v12862_v26  ;;  %v12869_v26 = vld [vmem:[#allocation5 + $0x52] sm:$0xff]  ;;  %v12870_v29 = vld [vmem:[#allocation5 + $0x62] sm:$0xff] }
 0x544   : > { %19313 = vmatprep.mubr.msk.bf16.mxu1 %vm516_vm3, %v6765_v49  ;;  %19342 = vmatpush3.bf16.msra.mxu1 %v21859_v51  ;;  %v6769_v51 = vpack.c.bf16 %v6746_v39, %v6745_v56  ;;  %v6748_v49 = vld [vmem:[#allocation3 + $0x12a] sm:$0xff]  ;;  %v6772_v39 = vpack.c.bf16 %v6752_v15, %v6751_v19  ;;  %v21862_v56 = vld [vmem:[#allocation9 + $0xa0] sm:$0xff]   ;;  %v21866_v19 = vld [vmem:[#allocation9 + $0xb8] sm:$0xff]  }
 0x545   : > { %19375 = vmatprep.subr.bf16.mxu1 %v24116_v6  ;;  %v6770_v20 = vpack.c.bf16 %v6748_v49, %v6747_v60  ;;  %v6756_v49 = vld [vmem:[#allocation3 + $0x18a] sm:$0xff]  ;;  %v12898_v60 = vpack.c.bf16 %v12871_v58, %v12870_v29  ;;  %v12876_v29 = vld [vmem:[#allocation5 + $0xaa] sm:$0xff]  ;;  %v12877_v58 = vld [vmem:[#allocation5 + $0xb2] sm:$0xff] }
 0x546   : > { %v12875_v15 = vld [vmem:[#allocation5 + $0x9a] sm:$0xff] }
 0x547   : > { %20040 = vmatmul.mubr.msk.bf16.gmra.mrb[164].mxu0 %vm618_vm8, %v24121_v63 }
 0x548   : > { %20043 = vmatprep.mubr.msk.bf16.mxu0 %vm618_vm8, %v24123_v12 }
 0x54b   : > { %19314 = vmatmul.mubr.msk.bf16.gmra.mrb[24].mxu1 %vm516_vm3, %v6766_v32  ;;  %v12866_v32 = vld [vmem:[#allocation5 + $0x32] sm:$0xff] }
 0x54c   : > { %19317 = vmatprep.mubr.msk.bf16.mxu1 %vm516_vm3, %v6767_v25  ;;  %v24148_v25 = vpack.c.bf16 %v12865_v22, %v12864_v16  ;;  %v12896_v31 = vpack.c.bf16 %v12867_v0, %v12866_v32  ;;  %v21864_v16 = vld [vmem:[#allocation9 + $0xb0] sm:$0xff]   ;;  %v12874_v0 = vld [vmem:[#allocation5 + $0x92] sm:$0xff] }
 0x54d   : > { %v12872_v22 = vld [vmem:[#allocation5 + $0x7a] sm:$0xff]  ;;  %v12873_v32 = vld [vmem:[#allocation5 + $0x82] sm:$0xff] }
 0x54f   : > { %20044 = vmatmul.mubr.msk.bf16.gmra.mrb[168].mxu0 %vm618_vm8, %v24131_v36 }
 0x550   : > { %20047 = vmatprep.mubr.msk.bf16.mxu0 %vm618_vm8, %v24133_v59 }
 0x553   : > { %19318 = vmatmul.mubr.msk.bf16.gmra.mrb[28].mxu1 %vm516_vm3, %v6768_v54  ;;  %v6773_v54 = vpack.c.bf16 %v6754_v18, %v6753_v3  ;;  %v24163_v18 = vpack.c.bf16 %v12873_v32, %v12872_v22  ;;  %v21865_v22 = vld [vmem:[%s25765_s5 + $0x1d0] sm:$0xff]  }
 0x554   : > { %19321 = vmatprep.mubr.msk.bf16.mxu1 %vm516_vm3, %v6769_v51  ;;  %v12868_v51 = vld [vmem:[#allocation5 + $0x4a] sm:$0xff] }
 0x555   : > { %v24156_v14 = vpack.c.bf16 %v12869_v26, %v12868_v51  ;;  %v24171_v26 = vld [vmem:[#allocation9 + $0xc0] sm:$0xff]  }
 0x557   : > { %20048 = vmatmul.mubr.msk.bf16.gmra.mrb[172].mxu0 %vm618_vm8, %v24141_v37 }
 0x558   : > { %20063 = vmatprep.mubr.msk.bf16.mxu0 %vm618_vm8, %v12894_v11  ;;  %v6755_v11 = vld [vmem:[#allocation3 + $0x182] sm:$0xff] }
 0x559   : > { %v6774_v43 = vpack.c.bf16 %v6756_v49, %v6755_v11  ;;  %v12878_v11 = vld [vmem:[#allocation5 + $0xc2] sm:$0xff]  ;;  %v12879_v49 = vld [vmem:[#allocation5 + $0xca] sm:$0xff] }
 0x55b   : > { %19322 = vmatmul.mubr.msk.bf16.gmra.mrb[32].mxu1 %vm516_vm3, %v6770_v20  ;;  %v6758_v20 = vld [vmem:[#allocation3 + $0x1a2] sm:$0xff] }
 0x55c   : > { %19325 = vmatprep.mubr.msk.bf16.mxu1 %vm516_vm3, %v6771_v23 }
 0x55f   : > { %20064 = vmatmul.mubr.msk.bf16.vlgmr.msra.gmra.mrb[144].mxu0 %vm618_vm8, %v24148_v25 }
 0x560   : > { %20067 = vmatprep.mubr.msk.bf16.mxu0 %vm618_vm8, %v12896_v31  ;;  %20096 = vmatpush3.bf16.msra.mxu0 %v24083_v21  ;;  %v6757_v21 = vld [vmem:[#allocation3 + $0x19a] sm:$0xff] }
 0x561   : > { %20097 = vmatprep.subr.bf16.mxu0 %v21860_v9  ;;  %v6775_v23 = vpack.c.bf16 %v6758_v20, %v6757_v21  ;;  %v6760_v31 = vld [vmem:[#allocation3 + $0x1ba] sm:$0xff]  ;;  %v7046_v21 = vld [vmem:[#allocation3 + $0x6b] sm:$0xff]  ;;  %v12902_v20 = vpack.c.bf16 %v12879_v49, %v12878_v11 }
 0x562   : > { %v24198_v11 = vld [vmem:[%s25765_s5 + $0x1e0] sm:$0xff]  }
 0x563   : > { %19326 = vmatmul.mubr.msk.bf16.gmra.mrb[36].mxu1 %vm516_vm3, %v6772_v39  ;;  %v24165_v39 = vpack.c.bf16 %v12875_v15, %v12874_v0  ;;  %v12880_v0 = vld [vmem:[#allocation5 + $0xda] sm:$0xff]  ;;  %v12881_v15 = vld [vmem:[#allocation5 + $0xe2] sm:$0xff] }
 0x564   : > { %19329 = vmatprep.mubr.msk.bf16.mxu1 %vm516_vm3, %v6773_v54  ;;  %20098 = vmatpush3.bf16.msra.mxu0 %v21860_v9  ;;  %v6759_v9 = vld [vmem:[#allocation3 + $0x1b2] sm:$0xff] }
 0x565   : > { %20099 = vmatprep.subr.bf16.mxu0 %v21862_v56  ;;  %v6776_v3 = vpack.c.bf16 %v6760_v31, %v6759_v9  ;;  %v7043_v54 = vld [vmem:[#allocation3 + $0x4b] sm:$0xff]  ;;  %v12882_v9 = vld [vmem:[#allocation5 + $0xf2] sm:$0xff] }
 0x566   : > { %v12883_v31 = vld [vmem:[#allocation5 + $0xfa] sm:$0xff] }
 0x567   : > { %20068 = vmatmul.mubr.msk.bf16.gmra.mrb[148].mxu0 %vm618_vm8, %v24156_v14 }
 0x568   : > { %20071 = vmatprep.mubr.msk.bf16.mxu0 %vm618_vm8, %v12898_v60  ;;  %20100 = vmatpush3.bf16.msra.mxu0 %v21862_v56  ;;  %v7044_v56 = vld [vmem:[#allocation3 + $0x53] sm:$0xff]  ;;  %v7045_v60 = vld [vmem:[#allocation3 + $0x63] sm:$0xff] }
 0x569   : > { %20101 = vmatprep.subr.bf16.mxu0 %v21863_v28  ;;  %v7075_v51 = vpack.c.bf16 %v7044_v56, %v7043_v54  ;;  %v7049_v54 = vld [vmem:[#allocation3 + $0x93] sm:$0xff]  ;;  %v7050_v56 = vld [vmem:[#allocation3 + $0x9b] sm:$0xff] }
 0x56b   : > { %19330 = vmatmul.mubr.msk.bf16.gmra.mrb[40].mxu1 %vm516_vm3, %v6774_v43  ;;  %v7047_v43 = vld [vmem:[#allocation3 + $0x7b] sm:$0xff] }
 0x56c   : > { %19333 = vmatprep.mubr.msk.bf16.mxu1 %vm516_vm3, %v6775_v23  ;;  %20102 = vmatpush3.bf16.msra.mxu0 %v21863_v28  ;;  %v24175_v28 = vpack.c.bf16 %v12877_v58, %v12876_v29  ;;  %v7048_v23 = vld [vmem:[#allocation3 + $0x83] sm:$0xff]  ;;  %v7051_v29 = vld [vmem:[#allocation3 + $0xab] sm:$0xff]  ;;  %v7052_v58 = vld [vmem:[#allocation3 + $0xb3] sm:$0xff] }
 0x56d   : > { %20103 = vmatprep.subr.bf16.mxu0 %v21864_v16  ;;  %v7077_v32 = vpack.c.bf16 %v7048_v23, %v7047_v43  ;;  %v7079_v49 = vpack.c.bf16 %v7052_v58, %v7051_v29  ;;  %v12887_v43 = vld [vmem:[#allocation5 + $0x12a] sm:$0xff] }
 0x56e   : > { %v7057_v58 = vld [vmem:[#allocation3 + $0xf3] sm:$0xff] }
 0x56f   : > { %20072 = vmatmul.mubr.msk.bf16.gmra.mrb[152].mxu0 %vm618_vm8, %v24163_v18 }
 0x570   : > { %20075 = vmatprep.mubr.msk.bf16.mxu0 %vm618_vm8, %v24165_v39  ;;  %20104 = vmatpush3.bf16.msra.mxu0 %v21864_v16  ;;  %v7076_v16 = vpack.c.bf16 %v7046_v21, %v7045_v60  ;;  %v12884_v60 = vld [vmem:[#allocation5 + $0x10a] sm:$0xff]  ;;  %v12885_v21 = vld [vmem:[#allocation5 + $0x112] sm:$0xff] }
 0x571   : > { %20105 = vmatprep.subr.bf16.mxu0 %v21866_v19  ;;  %v24203_v23 = vpack.c.bf16 %v12885_v21, %v12884_v60  ;;  %v7059_v60 = vld [vmem:[#allocation3 + $0x10b] sm:$0xff]  ;;  %v7060_v21 = vld [vmem:[#allocation3 + $0x113] sm:$0xff] }
 0x573   : > { %19334 = vmatmul.mubr.msk.bf16.gmra.mrb[44].mxu1 %vm516_vm3, %v6776_v3  ;;  %v24190_v3 = vpack.c.bf16 %v12881_v15, %v12880_v0  ;;  %v7055_v0 = vld [vmem:[#allocation3 + $0xdb] sm:$0xff]  ;;  %v7056_v15 = vld [vmem:[#allocation3 + $0xe3] sm:$0xff] }
 0x574   : > { %19343 = vmatprep.mubr.msk.bf16.mxu1 %vm516_vm3, %v7075_v51  ;;  %20106 = vmatpush3.bf16.msra.mxu0 %v21866_v19  ;;  %v21868_v19 = vld [vmem:[%s25765_s5 + $0x1d8] sm:$0xff]   ;;  %v12904_v51 = vpack.c.bf16 %v12883_v31, %v12882_v9  ;;  %v7081_v31 = vpack.c.bf16 %v7056_v15, %v7055_v0  ;;  %v7061_v0 = vld [vmem:[#allocation3 + $0x123] sm:$0xff] }
 0x575   : > { %20139 = vmatprep.subr.bf16.mxu0 %v24171_v26  ;;  %v7062_v15 = vld [vmem:[#allocation3 + $0x12b] sm:$0xff] }
 0x577   : > { %20076 = vmatmul.mubr.msk.bf16.gmra.mrb[156].mxu0 %vm618_vm8, %v24175_v28 }
 0x578   : > { %20079 = vmatprep.mubr.msk.bf16.mxu0 %vm618_vm8, %v12902_v20  ;;  %v12886_v20 = vld [vmem:[#allocation5 + $0x122] sm:$0xff] }
 0x57b   : > { %19344 = vmatmul.mubr.msk.bf16.vlgmr.msra.gmra.mrb[16].mxu1 %vm516_vm3, %v7076_v16  ;;  %v7053_v16 = vld [vmem:[#allocation3 + $0xc3] sm:$0xff] }
 0x57c   : > { %19376 = vmatpush3.bf16.msra.mxu1 %v24116_v6  ;;  %19347 = vmatprep.mubr.msk.bf16.mxu1 %vm516_vm3, %v7077_v32  ;;  %v7078_v6 = vpack.c.bf16 %v7050_v56, %v7049_v54  ;;  %v12906_v32 = vpack.c.bf16 %v12887_v43, %v12886_v20  ;;  %v12888_v54 = vld [vmem:[#allocation5 + $0x13a] sm:$0xff]  ;;  %v12890_v56 = vld [vmem:[#allocation5 + $0x152] sm:$0xff]  ;;  %v7083_v43 = vpack.c.bf16 %v7060_v21, %v7059_v60 }
 0x57d   : > { %19377 = vmatprep.subr.bf16.mxu1 %v21865_v22  ;;  %v21871_v21 = vld [vmem:[#allocation9 + $0xd0] sm:$0xff]  }
 0x57f   : > { %20080 = vmatmul.mubr.msk.bf16.gmra.mrb[160].mxu0 %vm618_vm8, %v24190_v3 }
 0x580   : > { %19378 = vmatpush3.bf16.msra.mxu1 %v21865_v22  ;;  %20083 = vmatprep.mubr.msk.bf16.mxu0 %vm618_vm8, %v12904_v51  ;;  %v7054_v22 = vld [vmem:[#allocation3 + $0xcb] sm:$0xff] }
 0x581   : > { %19379 = vmatprep.subr.bf16.mxu1 %v21868_v19  ;;  %v7080_v9 = vpack.c.bf16 %v7054_v22, %v7053_v16  ;;  %v12891_v51 = vld [vmem:[#allocation5 + $0x15a] sm:$0xff]  ;;  %v12892_v16 = vld [vmem:[#allocation5 + $0x16a] sm:$0xff]  ;;  %v12893_v22 = vld [vmem:[#allocation5 + $0x172] sm:$0xff] }
 0x583   : > { %19348 = vmatmul.mubr.msk.bf16.gmra.mrb[20].mxu1 %vm516_vm3, %v7078_v6  ;;  %v7058_v6 = vld [vmem:[#allocation3 + $0xfb] sm:$0xff] }
 0x584   : > { %19351 = vmatprep.mubr.msk.bf16.mxu1 %vm516_vm3, %v7079_v49  ;;  %19380 = vmatpush3.bf16.msra.mxu1 %v21868_v19  ;;  %v12889_v19 = vld [vmem:[#allocation5 + $0x142] sm:$0xff]  ;;  %v12908_v49 = vpack.c.bf16 %v12891_v51, %v12890_v56  ;;  %v7082_v20 = vpack.c.bf16 %v7058_v6, %v7057_v58  ;;  %v7066_v51 = vld [vmem:[#allocation3 + $0x15b] sm:$0xff]  ;;  %v21869_v58 = vld [vmem:[#allocation9 + $0xc8] sm:$0xff]  }
 0x585   : > { %19413 = vmatprep.subr.bf16.mxu1 %v24198_v11  ;;  %v24210_v29 = vpack.c.bf16 %v12889_v19, %v12888_v54  ;;  %v7084_v54 = vpack.c.bf16 %v7062_v15, %v7061_v0  ;;  %v7065_v56 = vld [vmem:[#allocation3 + $0x153] sm:$0xff]  ;;  %v7067_v6 = vld [vmem:[#allocation3 + $0x16b] sm:$0xff]  ;;  %v21873_v0 = vld [vmem:[#allocation9 + $0xe0] sm:$0xff]  }
 0x586   : > { %v7086_v60 = vpack.c.bf16 %v7066_v51, %v7065_v56  ;;  %v7073_v15 = vld [vmem:[#allocation3 + $0x1b3] sm:$0xff]  ;;  %v7359_v51 = vld [vmem:[#allocation3 + $0x64] sm:$0xff] }
 0x587   : > { %20084 = vmatmul.mubr.msk.bf16.gmra.mrb[164].mxu0 %vm618_vm8, %v24203_v23  ;;  %v24242_v56 = vld [vmem:[#allocation9 + $0xf0] sm:$0xff]  }
 0x588   : > { %20087 = vmatprep.mubr.msk.bf16.mxu0 %vm618_vm8, %v12906_v32  ;;  %v24217_v32 = vpack.c.bf16 %v12893_v22, %v12892_v16  ;;  %v21872_v16 = vld [vmem:[#allocation9 + $0xd8] sm:$0xff]  }
 0x589   : > { %v7071_v22 = vld [vmem:[#allocation3 + $0x19b] sm:$0xff] }
 0x58b   : > { %19352 = vmatmul.mubr.msk.bf16.gmra.mrb[24].mxu1 %vm516_vm3, %v7080_v9  ;;  %v7063_v9 = vld [vmem:[#allocation3 + $0x13b] sm:$0xff] }
 0x58c   : > { %19355 = vmatprep.mubr.msk.bf16.mxu1 %vm516_vm3, %v7081_v31  ;;  %v7064_v31 = vld [vmem:[#allocation3 + $0x143] sm:$0xff] }
 0x58d   : > { %v7085_v19 = vpack.c.bf16 %v7064_v31, %v7063_v9  ;;  %v7074_v9 = vld [vmem:[#allocation3 + $0x1bb] sm:$0xff]  ;;  %v21875_v31 = vld [vmem:[#allocation9 + $0xe8] sm:$0xff]  }
 0x58f   : > { %20088 = vmatmul.mubr.msk.bf16.gmra.mrb[168].mxu0 %vm618_vm8, %v24210_v29 }
 0x590   : > { %20091 = vmatprep.mubr.msk.bf16.mxu0 %vm618_vm8, %v12908_v49  ;;  %v7068_v49 = vld [vmem:[#allocation3 + $0x173] sm:$0xff] }
 0x593   : > { %19356 = vmatmul.mubr.msk.bf16.gmra.mrb[28].mxu1 %vm516_vm3, %v7082_v20  ;;  %v7069_v20 = vld [vmem:[#allocation3 + $0x183] sm:$0xff] }
 0x594   : > { %19359 = vmatprep.mubr.msk.bf16.mxu1 %vm516_vm3, %v7083_v43  ;;  %v7070_v43 = vld [vmem:[#allocation3 + $0x18b] sm:$0xff] }
 0x597   : > { %20092 = vmatmul.mubr.msk.bf16.gmra.mrb[172].mxu0 %vm618_vm8, %v24217_v32 }
 0x598   : > { %20107 = vmatprep.mubr.msk.bf16.mxu0 %vm618_vm8, %v24054_v47  ;;  %v7087_v47 = vpack.c.bf16 %v7068_v49, %v7067_v6  ;;  %v7361_v6 = vld [vmem:[#allocation3 + $0x7c] sm:$0xff]  ;;  %v7362_v49 = vld [vmem:[#allocation3 + $0x84] sm:$0xff] }
 0x59b   : > { %19360 = vmatmul.mubr.msk.bf16.gmra.mrb[32].mxu1 %vm516_vm3, %v7084_v54  ;;  %v7090_v54 = vpack.c.bf16 %v7074_v9, %v7073_v15  ;;  %v7372_v15 = vld [vmem:[#allocation3 + $0xfc] sm:$0xff]  ;;  %v7373_v9 = vld [vmem:[#allocation3 + $0x10c] sm:$0xff] }
 0x59c   : > { %19363 = vmatprep.mubr.msk.bf16.mxu1 %vm516_vm3, %v7085_v19  ;;  %v7357_v19 = vld [vmem:[#allocation3 + $0x4c] sm:$0xff] }
 0x59f   : > { %20108 = vmatmul.mubr.msk.bf16.vlgmr.msra.gmra.mrb[144].mxu0 %vm618_vm8, %v24056_v1  ;;  %v7072_v1 = vld [vmem:[#allocation3 + $0x1a3] sm:$0xff] }
 0x5a0   : > { %20111 = vmatprep.mubr.msk.bf16.mxu0 %vm618_vm8, %v24065_v55  ;;  %20140 = vmatpush3.bf16.msra.mxu0 %v24171_v26  ;;  %v7088_v55 = vpack.c.bf16 %v7070_v43, %v7069_v20  ;;  %v7089_v26 = vpack.c.bf16 %v7072_v1, %v7071_v22  ;;  %v7366_v20 = vld [vmem:[#allocation3 + $0xb4] sm:$0xff]  ;;  %v7368_v22 = vld [vmem:[#allocation3 + $0xcc] sm:$0xff]  ;;  %v7369_v1 = vld [vmem:[#allocation3 + $0xdc] sm:$0xff] }
 0x5a1   : > { %20141 = vmatprep.subr.bf16.mxu0 %v21869_v58 }
 0x5a3   : > { %19364 = vmatmul.mubr.msk.bf16.gmra.mrb[36].mxu1 %vm516_vm3, %v7086_v60  ;;  %v7391_v60 = vpack.c.bf16 %v7362_v49, %v7361_v6  ;;  %v7376_v6 = vld [vmem:[#allocation3 + $0x12c] sm:$0xff] }
 0x5a4   : > { %19367 = vmatprep.mubr.msk.bf16.mxu1 %vm516_vm3, %v7087_v47  ;;  %20142 = vmatpush3.bf16.msra.mxu0 %v21869_v58  ;;  %v7360_v58 = vld [vmem:[#allocation3 + $0x6c] sm:$0xff]  ;;  %v7363_v47 = vld [vmem:[#allocation3 + $0x94] sm:$0xff] }
 0x5a5   : > { %20143 = vmatprep.subr.bf16.mxu0 %v21871_v21 }
 0x5a7   : > { %20112 = vmatmul.mubr.msk.bf16.gmra.mrb[148].mxu0 %vm618_vm8, %v24067_v13  ;;  %v7358_v13 = vld [vmem:[#allocation3 + $0x54] sm:$0xff] }
 0x5a8   : > { %20115 = vmatprep.mubr.msk.bf16.mxu0 %vm618_vm8, %v24075_v34  ;;  %20144 = vmatpush3.bf16.msra.mxu0 %v21871_v21  ;;  %v7389_v34 = vpack.c.bf16 %v7358_v13, %v7357_v19  ;;  %v7364_v21 = vld [vmem:[#allocation3 + $0x9c] sm:$0xff]  ;;  %v13539_v19 = vld [vmem:[#allocation5 + $0x21] sm:$0xff] }
 0x5a9   : > { %20145 = vmatprep.subr.bf16.mxu0 %v21872_v16  ;;  %v7392_v43 = vpack.c.bf16 %v7364_v21, %v7363_v47  ;;  %v13230_v13 = vld [vmem:[#allocation5 + $0x180] sm:$0xff]  ;;  %v13540_v47 = vld [vmem:[#allocation5 + $0x31] sm:$0xff] }
 0x5aa   : > { %v7379_v21 = vld [vmem:[#allocation3 + $0x154] sm:$0xff] }
 0x5ab   : > { %19368 = vmatmul.mubr.msk.bf16.gmra.mrb[40].mxu1 %vm516_vm3, %v7088_v55  ;;  %v7370_v55 = vld [vmem:[#allocation3 + $0xe4] sm:$0xff] }
 0x5ac   : > { %19371 = vmatprep.mubr.msk.bf16.mxu1 %vm516_vm3, %v7089_v26  ;;  %20146 = vmatpush3.bf16.msra.mxu0 %v21872_v16  ;;  %v7395_v26 = vpack.c.bf16 %v7370_v55, %v7369_v1  ;;  %v7382_v1 = vld [vmem:[#allocation3 + $0x174] sm:$0xff] }
 0x5ad   : > { %20147 = vmatprep.subr.bf16.mxu0 %v21873_v0 }
 0x5af   : > { %20116 = vmatmul.mubr.msk.bf16.gmra.mrb[152].mxu0 %vm618_vm8, %v24077_v45  ;;  %v7390_v45 = vpack.c.bf16 %v7360_v58, %v7359_v51  ;;  %v13538_v51 = vld [vmem:[#allocation5 + $0x19] sm:$0xff] }
 0x5b0   : > { %20119 = vmatprep.mubr.msk.bf16.mxu0 %vm618_vm8, %v24087_v4  ;;  %20148 = vmatpush3.bf16.msra.mxu0 %v21873_v0  ;;  %v21874_v4 = vld [vmem:[%s25765_s5 + $0x1e8] sm:$0xff]   ;;  %v7371_v0 = vld [vmem:[#allocation3 + $0xf4] sm:$0xff]  ;;  %v13570_v49 = vpack.c.bf16 %v13539_v19, %v13538_v51  ;;  %v21881_v19 = vld [vmem:[#allocation9 + $0x108] sm:$0xff]  }
 0x5b1   : > { %20149 = vmatprep.subr.bf16.mxu0 %v21875_v31  ;;  %v7375_v58 = vld [vmem:[#allocation3 + $0x124] sm:$0xff] }
 0x5b2   : > { %v7386_v51 = vld [vmem:[#allocation3 + $0x1a4] sm:$0xff] }
 0x5b3   : > { %19372 = vmatmul.mubr.msk.bf16.gmra.mrb[44].mxu1 %vm516_vm3, %v7090_v54 }
 0x5b4   : > { %19381 = vmatprep.mubr.msk.bf16.mxu1 %vm516_vm3, %v7389_v34  ;;  %20150 = vmatpush3.bf16.msra.mxu0 %v21875_v31  ;;  %v7374_v31 = vld [vmem:[#allocation3 + $0x114] sm:$0xff] }
 0x5b5   : > { %20183 = vmatprep.subr.bf16.mxu0 %v24242_v56  ;;  %v7397_v54 = vpack.c.bf16 %v7374_v31, %v7373_v9  ;;  %v13544_v9 = vld [vmem:[#allocation5 + $0x61] sm:$0xff]  ;;  %v7383_v31 = vld [vmem:[#allocation3 + $0x184] sm:$0xff] }
 0x5b7   : > { %20120 = vmatmul.mubr.msk.bf16.gmra.mrb[156].mxu0 %vm618_vm8, %v24090_v2  ;;  %v21877_v2 = vld [vmem:[%s25765_s5 + $0x1f0] sm:$0xff]  }
 0x5b8   : > { %20123 = vmatprep.mubr.msk.bf16.mxu0 %vm618_vm8, %v24105_v62  ;;  %v7365_v62 = vld [vmem:[#allocation3 + $0xac] sm:$0xff] }
 0x5b9   : > { %v7393_v16 = vpack.c.bf16 %v7366_v20, %v7365_v62  ;;  %v13542_v20 = vld [vmem:[#allocation5 + $0x49] sm:$0xff] }
 0x5bb   : > { %19382 = vmatmul.mubr.msk.bf16.vlgmr.msra.gmra.mrb[16].mxu1 %vm516_vm3, %v7390_v45  ;;  %v7377_v45 = vld [vmem:[#allocation3 + $0x13c] sm:$0xff] }
 0x5bc   : > { %19414 = vmatpush3.bf16.msra.mxu1 %v24198_v11  ;;  %19385 = vmatprep.mubr.msk.bf16.mxu1 %vm516_vm3, %v7391_v60  ;;  %v24267_v11 = vld [vmem:[%s25765_s5 + $0x1f8] sm:$0xff]  }
 0x5bd   : > { %19415 = vmatprep.subr.bf16.mxu1 %v21874_v4  ;;  %v13541_v60 = vld [vmem:[#allocation5 + $0x39] sm:$0xff] }
 0x5be   : > { %v24291_v62 = vpack.c.bf16 %v13541_v60, %v13540_v47  ;;  %v13548_v60 = vld [vmem:[#allocation5 + $0x91] sm:$0xff]  ;;  %v13550_v47 = vld [vmem:[#allocation5 + $0xa9] sm:$0xff] }
 0x5bf   : > { %20124 = vmatmul.mubr.msk.bf16.gmra.mrb[160].mxu0 %vm618_vm8, %v24107_v7  ;;  %v7367_v7 = vld [vmem:[#allocation3 + $0xc4] sm:$0xff] }
 0x5c0   : > { %19416 = vmatpush3.bf16.msra.mxu1 %v21874_v4  ;;  %20127 = vmatprep.mubr.msk.bf16.mxu0 %vm618_vm8, %v24121_v63  ;;  %v7394_v63 = vpack.c.bf16 %v7368_v22, %v7367_v7  ;;  %v7381_v22 = vld [vmem:[#allocation3 + $0x16c] sm:$0xff] }
 0x5c1   : > { %19417 = vmatprep.subr.bf16.mxu1 %v21877_v2 }
 0x5c3   : > { %19386 = vmatmul.mubr.msk.bf16.gmra.mrb[20].mxu1 %vm516_vm3, %v7392_v43  ;;  %v7380_v43 = vld [vmem:[#allocation3 + $0x15c] sm:$0xff] }
 0x5c4   : > { %19389 = vmatprep.mubr.msk.bf16.mxu1 %vm516_vm3, %v7393_v16  ;;  %19418 = vmatpush3.bf16.msra.mxu1 %v21877_v2  ;;  %v13543_v2 = vld [vmem:[#allocation5 + $0x51] sm:$0xff]  ;;  %v21878_v16 = vld [vmem:[#allocation9 + $0xf8] sm:$0xff]   ;;  %v7400_v55 = vpack.c.bf16 %v7380_v43, %v7379_v21 }
 0x5c5   : > { %19451 = vmatprep.subr.bf16.mxu1 %v24267_v11  ;;  %v13572_v7 = vpack.c.bf16 %v13543_v2, %v13542_v20  ;;  %v21884_v21 = vld [vmem:[#allocation9 + $0x118] sm:$0xff]  }
 0x5c7   : > { %20128 = vmatmul.mubr.msk.bf16.gmra.mrb[164].mxu0 %vm618_vm8, %v24123_v12  ;;  %v7396_v12 = vpack.c.bf16 %v7372_v15, %v7371_v0  ;;  %v13545_v0 = vld [vmem:[#allocation5 + $0x69] sm:$0xff]  ;;  %v13547_v15 = vld [vmem:[#allocation5 + $0x81] sm:$0xff] }
 0x5c8   : > { %20131 = vmatprep.mubr.msk.bf16.mxu0 %vm618_vm8, %v24131_v36  ;;  %v13231_v36 = vld [vmem:[#allocation5 + $0x188] sm:$0xff] }
 0x5c9   : > { %v24284_v34 = vpack.c.bf16 %v13231_v36, %v13230_v13  ;;  %v7384_v36 = vld [vmem:[#allocation3 + $0x18c] sm:$0xff] }
 0x5cb   : > { %19390 = vmatmul.mubr.msk.bf16.gmra.mrb[24].mxu1 %vm516_vm3, %v7394_v63  ;;  %v7401_v63 = vpack.c.bf16 %v7382_v1, %v7381_v22  ;;  %v24314_v1 = vld [vmem:[#allocation9 + $0x120] sm:$0xff]  }
 0x5cc   : > { %19393 = vmatprep.mubr.msk.bf16.mxu1 %vm516_vm3, %v7395_v26  ;;  %v21880_v26 = vld [vmem:[#allocation9 + $0x100] sm:$0xff]  }
 0x5cf   : > { %20132 = vmatmul.mubr.msk.bf16.gmra.mrb[168].mxu0 %vm618_vm8, %v24133_v59  ;;  %v7378_v59 = vld [vmem:[#allocation3 + $0x144] sm:$0xff] }
 0x5d0   : > { %20135 = vmatprep.mubr.msk.bf16.mxu0 %vm618_vm8, %v24141_v37  ;;  %v7398_v37 = vpack.c.bf16 %v7376_v6, %v7375_v58  ;;  %v7399_v4 = vpack.c.bf16 %v7378_v59, %v7377_v45  ;;  %v7402_v58 = vpack.c.bf16 %v7384_v36, %v7383_v31  ;;  %v13549_v45 = vld [vmem:[#allocation5 + $0x99] sm:$0xff]  ;;  %v13551_v59 = vld [vmem:[#allocation5 + $0xb1] sm:$0xff]  ;;  %v7674_v36 = vld [vmem:[#allocation3 + $0x78] sm:$0xff] }
 0x5d1   : > { %v24306_v2 = vpack.c.bf16 %v13549_v45, %v13548_v60  ;;  %v24308_v20 = vpack.c.bf16 %v13551_v59, %v13550_v47  ;;  %v21886_v45 = vld [vmem:[%s25765_s5 + $0x208] sm:$0xff]   ;;  %v7681_v47 = vld [vmem:[#allocation3 + $0xc8] sm:$0xff] }
 0x5d3   : > { %19394 = vmatmul.mubr.msk.bf16.gmra.mrb[28].mxu1 %vm516_vm3, %v7396_v12  ;;  %v24299_v12 = vpack.c.bf16 %v13545_v0, %v13544_v9  ;;  %v7675_v9 = vld [vmem:[#allocation3 + $0x80] sm:$0xff] }
 0x5d4   : > { %19397 = vmatprep.mubr.msk.bf16.mxu1 %vm516_vm3, %v7397_v54  ;;  %v13546_v54 = vld [vmem:[#allocation5 + $0x79] sm:$0xff] }
 0x5d5   : > { %v13574_v13 = vpack.c.bf16 %v13547_v15, %v13546_v54  ;;  %v13554_v15 = vld [vmem:[#allocation5 + $0xd9] sm:$0xff]  ;;  %v7677_v54 = vld [vmem:[#allocation3 + $0x98] sm:$0xff] }
 0x5d7   : > { %20136 = vmatmul.mubr.msk.bf16.gmra.mrb[172].mxu0 %vm618_vm8, %v24284_v34 }
 0x5d8   : > { %20151 = vmatprep.mubr.msk.bf16.mxu0 %vm618_vm8, %v13570_v49  ;;  %v21882_v49 = vld [vmem:[#allocation9 + $0x110] sm:$0xff]  }
 0x5db   : > { %19398 = vmatmul.mubr.msk.bf16.gmra.mrb[32].mxu1 %vm516_vm3, %v7398_v37  ;;  %v7387_v37 = vld [vmem:[#allocation3 + $0x1b4] sm:$0xff] }
 0x5dc   : > { %19401 = vmatprep.mubr.msk.bf16.mxu1 %vm516_vm3, %v7399_v4  ;;  %v7388_v4 = vld [vmem:[#allocation3 + $0x1bc] sm:$0xff] }
 0x5dd   : > { %v7404_v43 = vpack.c.bf16 %v7388_v4, %v7387_v37  ;;  %v13558_v37 = vld [vmem:[#allocation5 + $0x109] sm:$0xff]  ;;  %v7679_v4 = vld [vmem:[#allocation3 + $0xb0] sm:$0xff] }
 0x5df   : > { %20152 = vmatmul.mubr.msk.bf16.vlgmr.msra.gmra.mrb[144].mxu0 %vm618_vm8, %v24291_v62 }
 0x5e0   : > { %20155 = vmatprep.mubr.msk.bf16.mxu0 %vm618_vm8, %v13572_v7  ;;  %20184 = vmatpush3.bf16.msra.mxu0 %v24242_v56  ;;  %v7385_v56 = vld [vmem:[#allocation3 + $0x19c] sm:$0xff] }
 0x5e1   : > { %20185 = vmatprep.subr.bf16.mxu0 %v21878_v16  ;;  %v7403_v6 = vpack.c.bf16 %v7386_v51, %v7385_v56  ;;  %v7672_v7 = vld [vmem:[#allocation3 + $0x60] sm:$0xff]  ;;  %v21883_v56 = vld [vmem:[%s25765_s5 + $0x200] sm:$0xff]  }
 0x5e3   : > { %19402 = vmatmul.mubr.msk.bf16.gmra.mrb[36].mxu1 %vm516_vm3, %v7400_v55  ;;  %v13553_v55 = vld [vmem:[#allocation5 + $0xc9] sm:$0xff] }
 0x5e4   : > { %19405 = vmatprep.mubr.msk.bf16.mxu1 %vm516_vm3, %v7401_v63  ;;  %20186 = vmatpush3.bf16.msra.mxu0 %v21878_v16  ;;  %v7673_v16 = vld [vmem:[#allocation3 + $0x68] sm:$0xff]  ;;  %v13555_v63 = vld [vmem:[#allocation5 + $0xe1] sm:$0xff] }
 0x5e5   : > { %20187 = vmatprep.subr.bf16.mxu0 %v21880_v26  ;;  %v7704_v22 = vpack.c.bf16 %v7673_v16, %v7672_v7  ;;  %v13578_v31 = vpack.c.bf16 %v13555_v63, %v13554_v15  ;;  %v24341_v16 = vld [vmem:[%s25765_s5 + $0x210] sm:$0xff]   ;;  %v13560_v63 = vld [vmem:[#allocation5 + $0x121] sm:$0xff] }
 0x5e6   : > { %v13562_v15 = vld [vmem:[#allocation5 + $0x139] sm:$0xff] }
 0x5e7   : > { %20156 = vmatmul.mubr.msk.bf16.gmra.mrb[148].mxu0 %vm618_vm8, %v24299_v12 }
 0x5e8   : > { %20159 = vmatprep.mubr.msk.bf16.mxu0 %vm618_vm8, %v13574_v13  ;;  %20188 = vmatpush3.bf16.msra.mxu0 %v21880_v26  ;;  %v13552_v26 = vld [vmem:[#allocation5 + $0xc1] sm:$0xff] }
 0x5e9   : > { %20189 = vmatprep.subr.bf16.mxu0 %v21881_v19  ;;  %v24318_v0 = vpack.c.bf16 %v13553_v55, %v13552_v26  ;;  %v7676_v13 = vld [vmem:[#allocation3 + $0x90] sm:$0xff] }
 0x5ea   : > { %v7706_v51 = vpack.c.bf16 %v7677_v54, %v7676_v13  ;;  %v13563_v55 = vld [vmem:[#allocation5 + $0x141] sm:$0xff] }
 0x5eb   : > { %19406 = vmatmul.mubr.msk.bf16.gmra.mrb[40].mxu1 %vm516_vm3, %v7402_v58  ;;  %v13557_v58 = vld [vmem:[#allocation5 + $0xf9] sm:$0xff]  ;;  %v7685_v54 = vld [vmem:[#allocation3 + $0xf8] sm:$0xff] }
 0x5ec   : > { %19409 = vmatprep.mubr.msk.bf16.mxu1 %vm516_vm3, %v7403_v6  ;;  %20190 = vmatpush3.bf16.msra.mxu0 %v21881_v19  ;;  %v7705_v19 = vpack.c.bf16 %v7675_v9, %v7674_v36  ;;  %v13559_v6 = vld [vmem:[#allocation5 + $0x111] sm:$0xff]  ;;  %v7682_v36 = vld [vmem:[#allocation3 + $0xd8] sm:$0xff]  ;;  %v7684_v13 = vld [vmem:[#allocation3 + $0xf0] sm:$0xff] }
 0x5ed   : > { %20191 = vmatprep.subr.bf16.mxu0 %v21882_v49  ;;  %v13580_v60 = vpack.c.bf16 %v13559_v6, %v13558_v37  ;;  %v7683_v9 = vld [vmem:[#allocation3 + $0xe0] sm:$0xff]  ;;  %v7687_v37 = vld [vmem:[#allocation3 + $0x110] sm:$0xff] }
 0x5ee   : > { %v13564_v6 = vld [vmem:[#allocation5 + $0x151] sm:$0xff] }
 0x5ef   : > { %20160 = vmatmul.mubr.msk.bf16.gmra.mrb[152].mxu0 %vm618_vm8, %v24306_v2 }
 0x5f0   : > { %20163 = vmatprep.mubr.msk.bf16.mxu0 %vm618_vm8, %v24308_v20  ;;  %20192 = vmatpush3.bf16.msra.mxu0 %v21882_v49  ;;  %v13556_v49 = vld [vmem:[#allocation5 + $0xf1] sm:$0xff] }
 0x5f1   : > { %20193 = vmatprep.subr.bf16.mxu0 %v21884_v21  ;;  %v24333_v59 = vpack.c.bf16 %v13557_v58, %v13556_v49  ;;  %v13567_v58 = vld [vmem:[#allocation5 + $0x171] sm:$0xff] }
 0x5f3   : > { %19410 = vmatmul.mubr.msk.bf16.gmra.mrb[44].mxu1 %vm516_vm3, %v7404_v43  ;;  %v7680_v43 = vld [vmem:[#allocation3 + $0xc0] sm:$0xff] }
 0x5f4   : > { %19419 = vmatprep.mubr.msk.bf16.mxu1 %vm516_vm3, %v7704_v22  ;;  %20194 = vmatpush3.bf16.msra.mxu0 %v21884_v21  ;;  %v7678_v21 = vld [vmem:[#allocation3 + $0xa8] sm:$0xff]  ;;  %v7708_v7 = vpack.c.bf16 %v7681_v47, %v7680_v43  ;;  %v13561_v22 = vld [vmem:[#allocation5 + $0x129] sm:$0xff] }
 0x5f5   : > { %20227 = vmatprep.subr.bf16.mxu0 %v24314_v1  ;;  %v24346_v26 = vpack.c.bf16 %v13561_v22, %v13560_v63  ;;  %v7686_v47 = vld [vmem:[#allocation3 + $0x108] sm:$0xff]  ;;  %v13568_v22 = vld [vmem:[#allocation5 + $0x181] sm:$0xff]  ;;  %v7691_v63 = vld [vmem:[#allocation3 + $0x140] sm:$0xff] }
 0x5f7   : > { %20164 = vmatmul.mubr.msk.bf16.gmra.mrb[156].mxu0 %vm618_vm8, %v24318_v0 }
 0x5f8   : > { %20167 = vmatprep.mubr.msk.bf16.mxu0 %vm618_vm8, %v13578_v31  ;;  %v13582_v31 = vpack.c.bf16 %v13563_v55, %v13562_v15  ;;  %v7693_v15 = vld [vmem:[#allocation3 + $0x158] sm:$0xff] }
 0x5fb   : > { %19420 = vmatmul.mubr.msk.bf16.vlgmr.msra.gmra.mrb[16].mxu1 %vm516_vm3, %v7705_v19  ;;  %v7709_v19 = vpack.c.bf16 %v7683_v9, %v7682_v36  ;;  %v7690_v9 = vld [vmem:[#allocation3 + $0x138] sm:$0xff] }
 0x5fc   : > { %19452 = vmatpush3.bf16.msra.mxu1 %v24267_v11  ;;  %19423 = vmatprep.mubr.msk.bf16.mxu1 %vm516_vm3, %v7706_v51  ;;  %v7707_v11 = vpack.c.bf16 %v7679_v4, %v7678_v21  ;;  %v13565_v51 = vld [vmem:[#allocation5 + $0x159] sm:$0xff]  ;;  %v7711_v21 = vpack.c.bf16 %v7687_v37, %v7686_v47  ;;  %v13882_v47 = vld [vmem:[#allocation5 + $0x62] sm:$0xff] }
 0x5fd   : > { %19453 = vmatprep.subr.bf16.mxu1 %v21883_v56  ;;  %v24353_v49 = vpack.c.bf16 %v13565_v51, %v13564_v6  ;;  %v7695_v51 = vld [vmem:[#allocation3 + $0x170] sm:$0xff]  ;;  %v7696_v6 = vld [vmem:[#allocation3 + $0x180] sm:$0xff]  ;;  %v7694_v37 = vld [vmem:[#allocation3 + $0x168] sm:$0xff] }
 0x5ff   : > { %20168 = vmatmul.mubr.msk.bf16.gmra.mrb[160].mxu0 %vm618_vm8, %v24333_v59 }
 0x600   : > { %19454 = vmatpush3.bf16.msra.mxu1 %v21883_v56  ;;  %20171 = vmatprep.mubr.msk.bf16.mxu0 %vm618_vm8, %v13580_v60  ;;  %v7710_v56 = vpack.c.bf16 %v7685_v54, %v7684_v13  ;;  %v7689_v60 = vld [vmem:[#allocation3 + $0x128] sm:$0xff]  ;;  %v7692_v54 = vld [vmem:[#allocation3 + $0x150] sm:$0xff] }
 0x601   : > { %19455 = vmatprep.subr.bf16.mxu1 %v21886_v45  ;;  %v7714_v36 = vpack.c.bf16 %v7693_v15, %v7692_v54  ;;  %v13879_v13 = vld [vmem:[#allocation5 + $0x3a] sm:$0xff] }
 0x602   : > { %v7703_v54 = vld [vmem:[#allocation3 + $0x1d0] sm:$0xff] }
 0x603   : > { %19424 = vmatmul.mubr.msk.bf16.gmra.mrb[20].mxu1 %vm516_vm3, %v7707_v11  ;;  %v7688_v11 = vld [vmem:[#allocation3 + $0x120] sm:$0xff] }
 0x604   : > { %19427 = vmatprep.mubr.msk.bf16.mxu1 %vm516_vm3, %v7708_v7  ;;  %19456 = vmatpush3.bf16.msra.mxu1 %v21886_v45  ;;  %v13566_v45 = vld [vmem:[#allocation5 + $0x169] sm:$0xff]  ;;  %v7712_v43 = vpack.c.bf16 %v7689_v60, %v7688_v11  ;;  %v21889_v60 = vld [vmem:[#allocation9 + $0x130] sm:$0xff]  }
 0x605   : > { %19489 = vmatprep.subr.bf16.mxu1 %v24341_v16  ;;  %v13584_v4 = vpack.c.bf16 %v13567_v58, %v13566_v45  ;;  %v13569_v7 = vld [vmem:[#allocation5 + $0x189] sm:$0xff]  ;;  %v21887_v58 = vld [vmem:[#allocation9 + $0x128] sm:$0xff]   ;;  %v7700_v11 = vld [vmem:[#allocation3 + $0x1b0] sm:$0xff] }
 0x606   : > { %v24360_v55 = vpack.c.bf16 %v13569_v7, %v13568_v22  ;;  %v7697_v45 = vld [vmem:[#allocation3 + $0x188] sm:$0xff]  ;;  %v7698_v22 = vld [vmem:[#allocation3 + $0x198] sm:$0xff] }
 0x607   : > { %20172 = vmatmul.mubr.msk.bf16.gmra.mrb[164].mxu0 %vm618_vm8, %v24346_v26 }
 0x608   : > { %20175 = vmatprep.mubr.msk.bf16.mxu0 %vm618_vm8, %v13582_v31  ;;  %v7713_v31 = vpack.c.bf16 %v7691_v63, %v7690_v9  ;;  %v7699_v63 = vld [vmem:[#allocation3 + $0x1a0] sm:$0xff] }
 0x609   : > { %v7717_v15 = vpack.c.bf16 %v7699_v63, %v7698_v22  ;;  %v21891_v9 = vld [vmem:[#allocation9 + $0x140] sm:$0xff]   ;;  %v7993_v63 = vld [vmem:[#allocation3 + $0xb1] sm:$0xff] }
 0x60b   : > { %19428 = vmatmul.mubr.msk.bf16.gmra.mrb[24].mxu1 %vm516_vm3, %v7709_v19  ;;  %v13878_v19 = vld [vmem:[#allocation5 + $0x32] sm:$0xff] }
 0x60c   : > { %19431 = vmatprep.mubr.msk.bf16.mxu1 %vm516_vm3, %v7710_v56  ;;  %v24368_v56 = vpack.c.bf16 %v13879_v13, %v13878_v19  ;;  %v7987_v13 = vld [vmem:[#allocation3 + $0x69] sm:$0xff] }
 0x60f   : > { %20176 = vmatmul.mubr.msk.bf16.gmra.mrb[168].mxu0 %vm618_vm8, %v24353_v49 }
 0x610   : > { %20179 = vmatprep.mubr.msk.bf16.mxu0 %vm618_vm8, %v13584_v4  ;;  %v7716_v4 = vpack.c.bf16 %v7697_v45, %v7696_v6  ;;  %v13890_v6 = vld [vmem:[#allocation5 + $0xc2] sm:$0xff]  ;;  %v13891_v45 = vld [vmem:[#allocation5 + $0xca] sm:$0xff] }
 0x613   : > { %19432 = vmatmul.mubr.msk.bf16.gmra.mrb[28].mxu1 %vm516_vm3, %v7711_v21  ;;  %v13883_v21 = vld [vmem:[#allocation5 + $0x6a] sm:$0xff] }
 0x614   : > { %19435 = vmatprep.mubr.msk.bf16.mxu1 %vm516_vm3, %v7712_v43  ;;  %v7701_v43 = vld [vmem:[#allocation3 + $0x1b8] sm:$0xff]  ;;  %v24377_v7 = vpack.c.bf16 %v13883_v21, %v13882_v47  ;;  %v21892_v47 = vld [vmem:[%s25765_s5 + $0x218] sm:$0xff]  }
 0x617   : > { %20180 = vmatmul.mubr.msk.bf16.gmra.mrb[172].mxu0 %vm618_vm8, %v24360_v55 }
 0x618   : > { %20195 = vmatprep.mubr.msk.bf16.mxu0 %vm618_vm8, %v24148_v25  ;;  %v7715_v25 = vpack.c.bf16 %v7695_v51, %v7694_v37  ;;  %v24393_v37 = vpack.c.bf16 %v13891_v45, %v13890_v6  ;;  %v7998_v6 = vld [vmem:[#allocation3 + $0xf1] sm:$0xff] }
 0x61b   : > { %19436 = vmatmul.mubr.msk.bf16.gmra.mrb[32].mxu1 %vm516_vm3, %v7713_v31  ;;  %v7702_v31 = vld [vmem:[#allocation3 + $0x1c8] sm:$0xff] }
 0x61c   : > { %19439 = vmatprep.mubr.msk.bf16.mxu1 %vm516_vm3, %v7714_v36  ;;  %v21893_v36 = vld [vmem:[#allocation9 + $0x148] sm:$0xff]   ;;  %v7719_v19 = vpack.c.bf16 %v7703_v54, %v7702_v31  ;;  %v13898_v54 = vld [vmem:[#allocation5 + $0x122] sm:$0xff] }
 0x61f   : > { %20196 = vmatmul.mubr.msk.bf16.vlgmr.msra.gmra.mrb[144].mxu0 %vm618_vm8, %v24368_v56 }
 0x620   : > { %20199 = vmatprep.mubr.msk.bf16.mxu0 %vm618_vm8, %v24156_v14  ;;  %20228 = vmatpush3.bf16.msra.mxu0 %v24314_v1  ;;  %v21890_v14 = vld [vmem:[#allocation9 + $0x138] sm:$0xff]   ;;  %v7718_v1 = vpack.c.bf16 %v7701_v43, %v7700_v11  ;;  %v13894_v11 = vld [vmem:[#allocation5 + $0xf2] sm:$0xff]  ;;  %v13895_v43 = vld [vmem:[#allocation5 + $0xfa] sm:$0xff] }
 0x621   : > { %20229 = vmatprep.subr.bf16.mxu0 %v21887_v58  ;;  %v24409_v22 = vpack.c.bf16 %v13895_v43, %v13894_v11  ;;  %v13906_v43 = vld [vmem:[#allocation5 + $0x182] sm:$0xff] }
 0x623   : > { %19440 = vmatmul.mubr.msk.bf16.gmra.mrb[36].mxu1 %vm516_vm3, %v7715_v25  ;;  %v7989_v25 = vld [vmem:[#allocation3 + $0x81] sm:$0xff] }
 0x624   : > { %19443 = vmatprep.mubr.msk.bf16.mxu1 %vm516_vm3, %v7716_v4  ;;  %20230 = vmatpush3.bf16.msra.mxu0 %v21887_v58  ;;  %v24389_v58 = vld [vmem:[#allocation9 + $0x150] sm:$0xff]  }
 0x625   : > { %20231 = vmatprep.subr.bf16.mxu0 %v21889_v60 }
 0x627   : > { %20200 = vmatmul.mubr.msk.bf16.gmra.mrb[148].mxu0 %vm618_vm8, %v24377_v7 }
 0x628   : > { %20203 = vmatprep.mubr.msk.bf16.mxu0 %vm618_vm8, %v24163_v18  ;;  %20232 = vmatpush3.bf16.msra.mxu0 %v21889_v60  ;;  %v7986_v18 = vld [vmem:[#allocation3 + $0x61] sm:$0xff]  ;;  %v7990_v60 = vld [vmem:[#allocation3 + $0x91] sm:$0xff] }
 0x629   : > { %20233 = vmatprep.subr.bf16.mxu0 %v21890_v14  ;;  %v8018_v51 = vpack.c.bf16 %v7987_v13, %v7986_v18  ;;  %v7999_v13 = vld [vmem:[#allocation3 + $0xf9] sm:$0xff] }
 0x62a   : > { %v7996_v18 = vld [vmem:[#allocation3 + $0xd9] sm:$0xff]  ;;  %v8024_v45 = vpack.c.bf16 %v7999_v13, %v7998_v6 }
 0x62b   : > { %19444 = vmatmul.mubr.msk.bf16.gmra.mrb[40].mxu1 %vm516_vm3, %v7717_v15  ;;  %v7994_v15 = vld [vmem:[#allocation3 + $0xc1] sm:$0xff] }
 0x62c   : > { %19447 = vmatprep.mubr.msk.bf16.mxu1 %vm516_vm3, %v7718_v1  ;;  %20234 = vmatpush3.bf16.msra.mxu0 %v21890_v14  ;;  %v7995_v14 = vld [vmem:[#allocation3 + $0xc9] sm:$0xff]  ;;  %v14218_v13 = vld [vmem:[#allocation5 + $0x50] sm:$0xff] }
 0x62d   : > { %20235 = vmatprep.subr.bf16.mxu0 %v21891_v9  ;;  %v7992_v1 = vld [vmem:[#allocation3 + $0xa9] sm:$0xff]  ;;  %v8022_v31 = vpack.c.bf16 %v7995_v14, %v7994_v15 }
 0x62f   : > { %20204 = vmatmul.mubr.msk.bf16.gmra.mrb[152].mxu0 %vm618_vm8, %v24165_v39  ;;  %v7991_v39 = vld [vmem:[#allocation3 + $0x99] sm:$0xff] }
 0x630   : > { %20207 = vmatprep.mubr.msk.bf16.mxu0 %vm618_vm8, %v24175_v28  ;;  %20236 = vmatpush3.bf16.msra.mxu0 %v21891_v9  ;;  %v7988_v28 = vld [vmem:[#allocation3 + $0x79] sm:$0xff]  ;;  %v8020_v21 = vpack.c.bf16 %v7991_v39, %v7990_v60  ;;  %v13903_v39 = vld [vmem:[#allocation5 + $0x15a] sm:$0xff] }
 0x631   : > { %20237 = vmatprep.subr.bf16.mxu0 %v21893_v36  ;;  %v8019_v4 = vpack.c.bf16 %v7989_v25, %v7988_v28  ;;  %v24418_v9 = vld [vmem:[%s25765_s5 + $0x228] sm:$0xff]   ;;  %v8003_v60 = vld [vmem:[#allocation3 + $0x129] sm:$0xff] }
 0x632   : > { %v13902_v25 = vld [vmem:[#allocation5 + $0x152] sm:$0xff] }
 0x633   : > { %19448 = vmatmul.mubr.msk.bf16.gmra.mrb[44].mxu1 %vm516_vm3, %v7719_v19  ;;  %v24431_v28 = vpack.c.bf16 %v13903_v39, %v13902_v25  ;;  %v8009_v25 = vld [vmem:[#allocation3 + $0x171] sm:$0xff] }
 0x634   : > { %19457 = vmatprep.mubr.msk.bf16.mxu1 %vm516_vm3, %v8018_v51  ;;  %20238 = vmatpush3.bf16.msra.mxu0 %v21893_v36  ;;  %v13899_v36 = vld [vmem:[#allocation5 + $0x12a] sm:$0xff] }
 0x635   : > { %20271 = vmatprep.subr.bf16.mxu0 %v24389_v58  ;;  %v24423_v19 = vpack.c.bf16 %v13899_v36, %v13898_v54  ;;  %v8006_v36 = vld [vmem:[#allocation3 + $0x151] sm:$0xff] }
 0x636   : > { %v21896_v39 = vld [vmem:[#allocation9 + $0x158] sm:$0xff]  }
 0x637   : > { %20208 = vmatmul.mubr.msk.bf16.gmra.mrb[156].mxu0 %vm618_vm8, %v24393_v37 }
 0x638   : > { %20211 = vmatprep.mubr.msk.bf16.mxu0 %vm618_vm8, %v24190_v3  ;;  %v21895_v3 = vld [vmem:[%s25765_s5 + $0x220] sm:$0xff]  }
 0x63b   : > { %19458 = vmatmul.mubr.msk.bf16.vlgmr.msra.gmra.mrb[16].mxu1 %vm516_vm3, %v8019_v4  ;;  %v8001_v4 = vld [vmem:[#allocation3 + $0x111] sm:$0xff] }
 0x63c   : > { %19490 = vmatpush3.bf16.msra.mxu1 %v24341_v16  ;;  %19461 = vmatprep.mubr.msk.bf16.mxu1 %vm516_vm3, %v8020_v21  ;;  %v8021_v16 = vpack.c.bf16 %v7993_v63, %v7992_v1  ;;  %v8002_v21 = vld [vmem:[#allocation3 + $0x121] sm:$0xff] }
 0x63d   : > { %19491 = vmatprep.subr.bf16.mxu1 %v21892_v47  ;;  %v8026_v11 = vpack.c.bf16 %v8003_v60, %v8002_v21  ;;  %v14216_v63 = vld [vmem:[#allocation5 + $0x38] sm:$0xff]  ;;  %v14215_v1 = vld [vmem:[#allocation5 + $0x30] sm:$0xff] }
 0x63e   : > { %v14247_v15 = vpack.c.bf16 %v14216_v63, %v14215_v1  ;;  %v8010_v60 = vld [vmem:[#allocation3 + $0x181] sm:$0xff]  ;;  %v8012_v1 = vld [vmem:[#allocation3 + $0x199] sm:$0xff] }
 0x63f   : > { %20212 = vmatmul.mubr.msk.bf16.gmra.mrb[160].mxu0 %vm618_vm8, %v24409_v22  ;;  %v14224_v63 = vld [vmem:[#allocation5 + $0x98] sm:$0xff] }
 0x640   : > { %19492 = vmatpush3.bf16.msra.mxu1 %v21892_v47  ;;  %20215 = vmatprep.mubr.msk.bf16.mxu0 %vm618_vm8, %v24203_v23  ;;  %v7997_v23 = vld [vmem:[#allocation3 + $0xe1] sm:$0xff]  ;;  %v8000_v47 = vld [vmem:[#allocation3 + $0x109] sm:$0xff] }
 0x641   : > { %19493 = vmatprep.subr.bf16.mxu1 %v21895_v3  ;;  %v8023_v51 = vpack.c.bf16 %v7997_v23, %v7996_v18  ;;  %v14220_v18 = vld [vmem:[#allocation5 + $0x68] sm:$0xff] }
 0x643   : > { %19462 = vmatmul.mubr.msk.bf16.gmra.mrb[20].mxu1 %vm516_vm3, %v8021_v16  ;;  %v8005_v16 = vld [vmem:[#allocation3 + $0x141] sm:$0xff] }
 0x644   : > { %19465 = vmatprep.mubr.msk.bf16.mxu1 %vm516_vm3, %v8022_v31  ;;  %19494 = vmatpush3.bf16.msra.mxu1 %v21895_v3  ;;  %v13907_v3 = vld [vmem:[#allocation5 + $0x18a] sm:$0xff] }
 0x645   : > { %19527 = vmatprep.subr.bf16.mxu1 %v24418_v9  ;;  %v24439_v14 = vpack.c.bf16 %v13907_v3, %v13906_v43  ;;  %v8007_v31 = vld [vmem:[#allocation3 + $0x159] sm:$0xff]  ;;  %v14222_v3 = vld [vmem:[#allocation5 + $0x80] sm:$0xff] }
 0x646   : > { %v8028_v23 = vpack.c.bf16 %v8007_v31, %v8006_v36  ;;  %v21898_v43 = vld [vmem:[#allocation9 + $0x160] sm:$0xff]  }
 0x647   : > { %20216 = vmatmul.mubr.msk.bf16.gmra.mrb[164].mxu0 %vm618_vm8, %v24423_v19  ;;  %v8015_v31 = vld [vmem:[#allocation3 + $0x1b9] sm:$0xff]  ;;  %v8013_v36 = vld [vmem:[#allocation3 + $0x1a1] sm:$0xff] }
 0x648   : > { %20219 = vmatprep.mubr.msk.bf16.mxu0 %vm618_vm8, %v24210_v29  ;;  %v8025_v29 = vpack.c.bf16 %v8001_v4, %v8000_v47  ;;  %v8011_v47 = vld [vmem:[#allocation3 + $0x189] sm:$0xff] }
 0x64b   : > { %19466 = vmatmul.mubr.msk.bf16.gmra.mrb[24].mxu1 %vm516_vm3, %v8023_v51  ;;  %v14217_v51 = vld [vmem:[#allocation5 + $0x48] sm:$0xff] }
 0x64c   : > { %19469 = vmatprep.mubr.msk.bf16.mxu1 %vm516_vm3, %v8024_v45  ;;  %v14248_v6 = vpack.c.bf16 %v14218_v13, %v14217_v51  ;;  %v14219_v45 = vld [vmem:[#allocation5 + $0x60] sm:$0xff] }
 0x64d   : > { %v14249_v4 = vpack.c.bf16 %v14220_v18, %v14219_v45  ;;  %v8031_v18 = vpack.c.bf16 %v8013_v36, %v8012_v1  ;;  %v21900_v51 = vld [vmem:[#allocation9 + $0x170] sm:$0xff]   ;;  %v14228_v45 = vld [vmem:[#allocation5 + $0xc8] sm:$0xff]  ;;  %v24457_v1 = vld [vmem:[#allocation9 + $0x180] sm:$0xff]  }
 0x64e   : > { %v8303_v36 = vld [vmem:[#allocation3 + $0x82] sm:$0xff] }
 0x64f   : > { %20220 = vmatmul.mubr.msk.bf16.gmra.mrb[168].mxu0 %vm618_vm8, %v24431_v28 }
 0x650   : > { %20223 = vmatprep.mubr.msk.bf16.mxu0 %vm618_vm8, %v24217_v32  ;;  %v8004_v32 = vld [vmem:[#allocation3 + $0x139] sm:$0xff] }
 0x651   : > { %v8027_v54 = vpack.c.bf16 %v8005_v16, %v8004_v32  ;;  %v14221_v16 = vld [vmem:[#allocation5 + $0x78] sm:$0xff] }
 0x652   : > { %v14250_v32 = vpack.c.bf16 %v14222_v3, %v14221_v16  ;;  %v8301_v3 = vld [vmem:[#allocation3 + $0x6a] sm:$0xff] }
 0x653   : > { %19470 = vmatmul.mubr.msk.bf16.gmra.mrb[28].mxu1 %vm516_vm3, %v8025_v29  ;;  %v8008_v29 = vld [vmem:[#allocation3 + $0x169] sm:$0xff] }
 0x654   : > { %19473 = vmatprep.mubr.msk.bf16.mxu1 %vm516_vm3, %v8026_v11  ;;  %v8029_v21 = vpack.c.bf16 %v8009_v25, %v8008_v29  ;;  %v8030_v11 = vpack.c.bf16 %v8011_v47, %v8010_v60  ;;  %v8016_v25 = vld [vmem:[#allocation3 + $0x1c9] sm:$0xff]  ;;  %v21902_v29 = vld [vmem:[#allocation9 + $0x178] sm:$0xff]  }
 0x655   : > { %v14227_v47 = vld [vmem:[#allocation5 + $0xc0] sm:$0xff] }
 0x656   : > { %v14230_v16 = vld [vmem:[#allocation5 + $0xe0] sm:$0xff] }
 0x657   : > { %20224 = vmatmul.mubr.msk.bf16.gmra.mrb[172].mxu0 %vm618_vm8, %v24439_v14 }
 0x658   : > { %20239 = vmatprep.mubr.msk.bf16.mxu0 %vm618_vm8, %v14247_v15  ;;  %v8014_v15 = vld [vmem:[#allocation3 + $0x1b1] sm:$0xff] }
 0x659   : > { %v8032_v13 = vpack.c.bf16 %v8015_v31, %v8014_v15  ;;  %v14232_v15 = vld [vmem:[#allocation5 + $0xf8] sm:$0xff] }
 0x65a   : > { %v14229_v31 = vld [vmem:[#allocation5 + $0xd8] sm:$0xff] }
 0x65b   : > { %19474 = vmatmul.mubr.msk.bf16.gmra.mrb[32].mxu1 %vm516_vm3, %v8027_v54  ;;  %v14223_v54 = vld [vmem:[#allocation5 + $0x90] sm:$0xff] }
 0x65c   : > { %19477 = vmatprep.mubr.msk.bf16.mxu1 %vm516_vm3, %v8028_v23  ;;  %v21899_v23 = vld [vmem:[#allocation9 + $0x168] sm:$0xff]  }
 0x65f   : > { %20240 = vmatmul.mubr.msk.bf16.vlgmr.msra.gmra.mrb[144].mxu0 %vm618_vm8, %v14248_v6  ;;  %v14226_v6 = vld [vmem:[#allocation5 + $0xb0] sm:$0xff] }
 0x660   : > { %20243 = vmatprep.mubr.msk.bf16.mxu0 %vm618_vm8, %v14249_v4  ;;  %20272 = vmatpush3.bf16.msra.mxu0 %v24389_v58  ;;  %v14251_v58 = vpack.c.bf16 %v14224_v63, %v14223_v54  ;;  %v14225_v4 = vld [vmem:[#allocation5 + $0xa8] sm:$0xff]  ;;  %v14231_v54 = vld [vmem:[#allocation5 + $0xf0] sm:$0xff] }
 0x661   : > { %20273 = vmatprep.subr.bf16.mxu0 %v21896_v39  ;;  %v14252_v60 = vpack.c.bf16 %v14226_v6, %v14225_v4  ;;  %v21901_v6 = vld [vmem:[%s25765_s5 + $0x230] sm:$0xff]   ;;  %v14233_v4 = vld [vmem:[#allocation5 + $0x108] sm:$0xff] }
 0x663   : > { %19478 = vmatmul.mubr.msk.bf16.gmra.mrb[36].mxu1 %vm516_vm3, %v8029_v21  ;;  %v14253_v21 = vpack.c.bf16 %v14228_v45, %v14227_v47 }
 0x664   : > { %19481 = vmatprep.mubr.msk.bf16.mxu1 %vm516_vm3, %v8030_v11  ;;  %20274 = vmatpush3.bf16.msra.mxu0 %v21896_v39  ;;  %v8017_v39 = vld [vmem:[#allocation3 + $0x1d1] sm:$0xff] }
 0x665   : > { %20275 = vmatprep.subr.bf16.mxu0 %v21898_v43  ;;  %v8033_v11 = vpack.c.bf16 %v8017_v39, %v8016_v25  ;;  %v14234_v25 = vld [vmem:[#allocation5 + $0x110] sm:$0xff]  ;;  %v14236_v39 = vld [vmem:[#allocation5 + $0x128] sm:$0xff] }
 0x666   : > { %v14256_v47 = vpack.c.bf16 %v14234_v25, %v14233_v4  ;;  %v14241_v4 = vld [vmem:[#allocation5 + $0x168] sm:$0xff] }
 0x667   : > { %20244 = vmatmul.mubr.msk.bf16.gmra.mrb[148].mxu0 %vm618_vm8, %v14250_v32  ;;  %v14254_v32 = vpack.c.bf16 %v14230_v16, %v14229_v31  ;;  %v24478_v16 = vld [vmem:[%s25765_s5 + $0x240] sm:$0xff]   ;;  %v14238_v31 = vld [vmem:[#allocation5 + $0x140] sm:$0xff] }
 0x668   : > { %20247 = vmatprep.mubr.msk.bf16.mxu0 %vm618_vm8, %v14251_v58  ;;  %20276 = vmatpush3.bf16.msra.mxu0 %v21898_v43  ;;  %v8300_v43 = vld [vmem:[#allocation3 + $0x62] sm:$0xff]  ;;  %v8305_v58 = vld [vmem:[#allocation3 + $0x9a] sm:$0xff] }
 0x669   : > { %20277 = vmatprep.subr.bf16.mxu0 %v21899_v23  ;;  %v8332_v63 = vpack.c.bf16 %v8301_v3, %v8300_v43  ;;  %v8309_v3 = vld [vmem:[#allocation3 + $0xca] sm:$0xff] }
 0x66a   : > { %v8306_v43 = vld [vmem:[#allocation3 + $0xaa] sm:$0xff] }
 0x66b   : > { %19482 = vmatmul.mubr.msk.bf16.gmra.mrb[40].mxu1 %vm516_vm3, %v8031_v18 }
 0x66c   : > { %19485 = vmatprep.mubr.msk.bf16.mxu1 %vm516_vm3, %v8032_v13  ;;  %20278 = vmatpush3.bf16.msra.mxu0 %v21899_v23  ;;  %v14255_v23 = vpack.c.bf16 %v14232_v15, %v14231_v54  ;;  %v8302_v13 = vld [vmem:[#allocation3 + $0x7a] sm:$0xff]  ;;  %v14237_v54 = vld [vmem:[#allocation5 + $0x138] sm:$0xff] }
 0x66d   : > { %20279 = vmatprep.subr.bf16.mxu0 %v21900_v51  ;;  %v8333_v18 = vpack.c.bf16 %v8303_v36, %v8302_v13  ;;  %v14258_v36 = vpack.c.bf16 %v14238_v31, %v14237_v54  ;;  %v8319_v31 = vld [vmem:[#allocation3 + $0x142] sm:$0xff]  ;;  %v8318_v54 = vld [vmem:[#allocation3 + $0x13a] sm:$0xff] }
 0x66f   : > { %20248 = vmatmul.mubr.msk.bf16.gmra.mrb[152].mxu0 %vm618_vm8, %v14252_v60  ;;  %v21904_v60 = vld [vmem:[%s25765_s5 + $0x238] sm:$0xff]  }
 0x670   : > { %20251 = vmatprep.mubr.msk.bf16.mxu0 %vm618_vm8, %v14253_v21  ;;  %20280 = vmatpush3.bf16.msra.mxu0 %v21900_v51  ;;  %v8304_v51 = vld [vmem:[#allocation3 + $0x92] sm:$0xff] }
 0x671   : > { %20281 = vmatprep.subr.bf16.mxu0 %v21902_v29  ;;  %v8334_v45 = vpack.c.bf16 %v8305_v58, %v8304_v51  ;;  %v8307_v21 = vld [vmem:[#allocation3 + $0xb2] sm:$0xff]  ;;  %v8311_v58 = vld [vmem:[#allocation3 + $0xe2] sm:$0xff]  ;;  %v8310_v51 = vld [vmem:[#allocation3 + $0xda] sm:$0xff] }
 0x673   : > { %19486 = vmatmul.mubr.msk.bf16.gmra.mrb[44].mxu1 %vm516_vm3, %v8033_v11 }
 0x674   : > { %19495 = vmatprep.mubr.msk.bf16.mxu1 %vm516_vm3, %v8332_v63  ;;  %20282 = vmatpush3.bf16.msra.mxu0 %v21902_v29  ;;  %v14235_v29 = vld [vmem:[#allocation5 + $0x120] sm:$0xff]  ;;  %v8308_v63 = vld [vmem:[#allocation3 + $0xc2] sm:$0xff] }
 0x675   : > { %20315 = vmatprep.subr.bf16.mxu0 %v24457_v1  ;;  %v14257_v11 = vpack.c.bf16 %v14236_v39, %v14235_v29  ;;  %v8336_v15 = vpack.c.bf16 %v8309_v3, %v8308_v63  ;;  %v14242_v39 = vld [vmem:[#allocation5 + $0x170] sm:$0xff]  ;;  %v8317_v29 = vld [vmem:[#allocation3 + $0x12a] sm:$0xff] }
 0x676   : > { %v8316_v3 = vld [vmem:[#allocation3 + $0x122] sm:$0xff] }
 0x677   : > { %20252 = vmatmul.mubr.msk.bf16.gmra.mrb[156].mxu0 %vm618_vm8, %v14254_v32  ;;  %v14240_v32 = vld [vmem:[#allocation5 + $0x158] sm:$0xff]  ;;  %v8340_v63 = vpack.c.bf16 %v8317_v29, %v8316_v3  ;;  %v8328_v29 = vld [vmem:[#allocation3 + $0x1b2] sm:$0xff]  ;;  %v8326_v3 = vld [vmem:[#allocation3 + $0x19a] sm:$0xff] }
 0x678   : > { %20255 = vmatprep.mubr.msk.bf16.mxu0 %vm618_vm8, %v14255_v23  ;;  %v14239_v23 = vld [vmem:[#allocation5 + $0x150] sm:$0xff] }
 0x679   : > { %v14259_v13 = vpack.c.bf16 %v14240_v32, %v14239_v23  ;;  %v8321_v32 = vld [vmem:[#allocation3 + $0x15a] sm:$0xff] }
 0x67b   : > { %19496 = vmatmul.mubr.msk.bf16.vlgmr.msra.gmra.mrb[16].mxu1 %vm516_vm3, %v8333_v18  ;;  %v8313_v18 = vld [vmem:[#allocation3 + $0xfa] sm:$0xff] }
 0x67c   : > { %19528 = vmatpush3.bf16.msra.mxu1 %v24418_v9  ;;  %19499 = vmatprep.mubr.msk.bf16.mxu1 %vm516_vm3, %v8334_v45  ;;  %v8335_v9 = vpack.c.bf16 %v8307_v21, %v8306_v43  ;;  %v8312_v45 = vld [vmem:[#allocation3 + $0xf2] sm:$0xff]  ;;  %v8314_v21 = vld [vmem:[#allocation3 + $0x10a] sm:$0xff] }
 0x67d   : > { %19529 = vmatprep.subr.bf16.mxu1 %v21901_v6  ;;  %v8338_v25 = vpack.c.bf16 %v8313_v18, %v8312_v45  ;;  %v14245_v43 = vld [vmem:[#allocation5 + $0x198] sm:$0xff]  ;;  %v8323_v18 = vld [vmem:[#allocation3 + $0x172] sm:$0xff] }
 0x67e   : > { %v8325_v45 = vld [vmem:[#allocation3 + $0x18a] sm:$0xff] }
 0x67f   : > { %20256 = vmatmul.mubr.msk.bf16.gmra.mrb[160].mxu0 %vm618_vm8, %v14256_v47  ;;  %v8315_v47 = vld [vmem:[#allocation3 + $0x112] sm:$0xff] }
 0x680   : > { %19530 = vmatpush3.bf16.msra.mxu1 %v21901_v6  ;;  %20259 = vmatprep.mubr.msk.bf16.mxu0 %vm618_vm8, %v14257_v11  ;;  %v8337_v6 = vpack.c.bf16 %v8311_v58, %v8310_v51  ;;  %v8339_v11 = vpack.c.bf16 %v8315_v47, %v8314_v21  ;;  %v14556_v58 = vld [vmem:[#allocation5 + $0x51] sm:$0xff]  ;;  %v14560_v47 = vld [vmem:[#allocation5 + $0x81] sm:$0xff] }
 0x681   : > { %19531 = vmatprep.subr.bf16.mxu1 %v21904_v60  ;;  %v21905_v51 = vld [vmem:[#allocation9 + $0x188] sm:$0xff]   ;;  %v8329_v21 = vld [vmem:[#allocation3 + $0x1ba] sm:$0xff] }
 0x683   : > { %19500 = vmatmul.mubr.msk.bf16.gmra.mrb[20].mxu1 %vm516_vm3, %v8335_v9  ;;  %v14246_v9 = vld [vmem:[#allocation5 + $0x1a0] sm:$0xff] }
 0x684   : > { %19503 = vmatprep.mubr.msk.bf16.mxu1 %vm516_vm3, %v8336_v15  ;;  %19532 = vmatpush3.bf16.msra.mxu1 %v21904_v60  ;;  %v14260_v60 = vpack.c.bf16 %v14242_v39, %v14241_v4  ;;  %v14262_v15 = vpack.c.bf16 %v14246_v9, %v14245_v43  ;;  %v8327_v43 = vld [vmem:[#allocation3 + $0x1a2] sm:$0xff] }
 0x685   : > { %19565 = vmatprep.subr.bf16.mxu1 %v24478_v16  ;;  %v8345_v9 = vpack.c.bf16 %v8327_v43, %v8326_v3  ;;  %v14576_v3 = vld [vmem:[#allocation5 + $0x141] sm:$0xff]  ;;  %v14575_v43 = vld [vmem:[#allocation5 + $0x139] sm:$0xff] }
 0x687   : > { %20260 = vmatmul.mubr.msk.bf16.gmra.mrb[164].mxu0 %vm618_vm8, %v14258_v36  ;;  %v8341_v36 = vpack.c.bf16 %v8319_v31, %v8318_v54  ;;  %v8331_v31 = vld [vmem:[#allocation3 + $0x1d2] sm:$0xff] }
 0x688   : > { %20263 = vmatprep.mubr.msk.bf16.mxu0 %vm618_vm8, %v14259_v13  ;;  %v14555_v13 = vld [vmem:[#allocation5 + $0x49] sm:$0xff] }
 0x68b   : > { %19504 = vmatmul.mubr.msk.bf16.gmra.mrb[24].mxu1 %vm516_vm3, %v8337_v6  ;;  %v8324_v6 = vld [vmem:[#allocation3 + $0x182] sm:$0xff] }
 0x68c   : > { %19507 = vmatprep.mubr.msk.bf16.mxu1 %vm516_vm3, %v8338_v25  ;;  %v8322_v25 = vld [vmem:[#allocation3 + $0x16a] sm:$0xff]  ;;  %v8344_v4 = vpack.c.bf16 %v8325_v45, %v8324_v6  ;;  %v21910_v45 = vld [vmem:[%s25765_s5 + $0x248] sm:$0xff]  }
 0x68d   : > { %v8343_v39 = vpack.c.bf16 %v8323_v18, %v8322_v25  ;;  %v8617_v18 = vld [vmem:[#allocation3 + $0x83] sm:$0xff] }
 0x68f   : > { %20264 = vmatmul.mubr.msk.bf16.gmra.mrb[168].mxu0 %vm618_vm8, %v14260_v60  ;;  %v21907_v60 = vld [vmem:[#allocation9 + $0x190] sm:$0xff]  }
 0x690   : > { %20267 = vmatprep.mubr.msk.bf16.mxu0 %vm618_vm8, %v24284_v34  ;;  %v8320_v34 = vld [vmem:[#allocation3 + $0x152] sm:$0xff] }
 0x691   : > { %v8342_v23 = vpack.c.bf16 %v8321_v32, %v8320_v34  ;;  %v21911_v32 = vld [vmem:[#allocation9 + $0x1a8] sm:$0xff]  }
 0x692   : > { %v8615_v34 = vld [vmem:[#allocation3 + $0x6b] sm:$0xff] }
 0x693   : > { %19508 = vmatmul.mubr.msk.bf16.gmra.mrb[28].mxu1 %vm516_vm3, %v8339_v11  ;;  %v14588_v11 = vpack.c.bf16 %v14560_v47, %v14559_v30  ;;  %v8620_v47 = vld [vmem:[#allocation3 + $0xab] sm:$0xff]  ;;  %v8621_v30 = vld [vmem:[#allocation3 + $0xb3] sm:$0xff] }
 0x694   : > { %19511 = vmatprep.mubr.msk.bf16.mxu1 %vm516_vm3, %v8340_v63  ;;  %v21909_v63 = vld [vmem:[#allocation9 + $0x1a0] sm:$0xff]  }
 0x697   : > { %20268 = vmatmul.mubr.msk.bf16.gmra.mrb[172].mxu0 %vm618_vm8, %v14262_v15  ;;  %v8330_v15 = vld [vmem:[#allocation3 + $0x1ca] sm:$0xff] }
 0x698   : > { %20283 = vmatprep.mubr.msk.bf16.mxu0 %vm618_vm8, %v24291_v62  ;;  %v14586_v62 = vpack.c.bf16 %v14556_v58, %v14555_v13  ;;  %v8347_v54 = vpack.c.bf16 %v8331_v31, %v8330_v15  ;;  %v24590_v58 = vld [vmem:[%s25771_s11] sm:$0x3]  ;;  %v14567_v13 = vld [vmem:[#allocation5 + $0xd9] sm:$0xff]  ;;  %v8627_v15 = vld [vmem:[#allocation3 + $0xfb] sm:$0xff] }
 0x69b   : > { %19512 = vmatmul.mubr.msk.bf16.gmra.mrb[32].mxu1 %vm516_vm3, %v8341_v36  ;;  %v8614_v36 = vld [vmem:[#allocation3 + $0x63] sm:$0xff] }
 0x69c   : > { %19515 = vmatprep.mubr.msk.bf16.mxu1 %vm516_vm3, %v8342_v23  ;;  %v14568_v23 = vld [vmem:[#allocation5 + $0xe1] sm:$0xff] }
 0x69f   : > { %20284 = vmatmul.mubr.msk.bf16.vlgmr.msra.gmra.mrb[144].mxu0 %vm618_vm8, %v14586_v62  ;;  %v14592_v62 = vpack.c.bf16 %v14568_v23, %v14567_v13  ;;  %v8630_v23 = vld [vmem:[#allocation3 + $0x123] sm:$0xff]  ;;  %v8631_v13 = vld [vmem:[#allocation3 + $0x12b] sm:$0xff] }
 0x6a0   : > { %20287 = vmatprep.mubr.msk.bf16.mxu0 %vm618_vm8, %v24299_v12  ;;  %20316 = vmatpush3.bf16.msra.mxu0 %v24457_v1  ;;  %v21908_v12 = vld [vmem:[#allocation9 + $0x198] sm:$0xff]   ;;  %v8346_v1 = vpack.c.bf16 %v8329_v21, %v8328_v29  ;;  %v8622_v29 = vld [vmem:[#allocation3 + $0xc3] sm:$0xff]  ;;  %v8623_v21 = vld [vmem:[#allocation3 + $0xcb] sm:$0xff] }
 0x6a1   : > { %20317 = vmatprep.subr.bf16.mxu0 %v21905_v51 }
 0x6a3   : > { %19516 = vmatmul.mubr.msk.bf16.gmra.mrb[36].mxu1 %vm516_vm3, %v8343_v39  ;;  %v14572_v39 = vld [vmem:[#allocation5 + $0x111] sm:$0xff] }
 0x6a4   : > { %19519 = vmatprep.mubr.msk.bf16.mxu1 %vm516_vm3, %v8344_v4  ;;  %20318 = vmatpush3.bf16.msra.mxu0 %v21905_v51  ;;  %v8619_v51 = vld [vmem:[#allocation3 + $0x9b] sm:$0xff] }
 0x6a5   : > { %20319 = vmatprep.subr.bf16.mxu0 %v21907_v60  ;;  %v14571_v4 = vld [vmem:[#allocation5 + $0x109] sm:$0xff] }
 0x6a7   : > { %20288 = vmatmul.mubr.msk.bf16.gmra.mrb[148].mxu0 %vm618_vm8, %v14588_v11  ;;  %v8650_v11 = vpack.c.bf16 %v8623_v21, %v8622_v29  ;;  %v15982_v29 = vsel %vm811_vm0, %v24590_v58, 0  ;;  %v8638_v21 = vld [vmem:[#allocation3 + $0x183] sm:$0xff] }
 0x6a8   : > { %20291 = vmatprep.mubr.msk.bf16.mxu0 %vm618_vm8, %v24306_v2  ;;  %20320 = vmatpush3.bf16.msra.mxu0 %v21907_v60  ;;  %v8646_v2 = vpack.c.bf16 %v8615_v34, %v8614_v36  ;;  %v21912_v60 = vld [vmem:[%s25765_s5 + $0x250] sm:$0xff]  }
 0x6a9   : > { %20321 = vmatprep.subr.bf16.mxu0 %v21908_v12  ;;  %v8628_v34 = vld [vmem:[#allocation3 + $0x10b] sm:$0xff] }
 0x6ab   : > { %19520 = vmatmul.mubr.msk.bf16.gmra.mrb[40].mxu1 %vm516_vm3, %v8345_v9  ;;  %v8625_v9 = vld [vmem:[#allocation3 + $0xe3] sm:$0xff] }
 0x6ac   : > { %19523 = vmatprep.mubr.msk.bf16.mxu1 %vm516_vm3, %v8346_v1  ;;  %20322 = vmatpush3.bf16.msra.mxu0 %v21908_v12  ;;  %v14596_v12 = vpack.c.bf16 %v14576_v3, %v14575_v43  ;;  %v8624_v1 = vld [vmem:[#allocation3 + $0xdb] sm:$0xff]  ;;  %v14897_v3 = vld [vmem:[#allocation5 + $0x7a] sm:$0xff]  ;;  %v14898_v43 = vld [vmem:[#allocation5 + $0x82] sm:$0xff] }
 0x6ad   : > { %20323 = vmatprep.subr.bf16.mxu0 %v21909_v63 }
 0x6af   : > { %20292 = vmatmul.mubr.msk.bf16.gmra.mrb[152].mxu0 %vm618_vm8, %v24308_v20  ;;  %v8616_v20 = vld [vmem:[#allocation3 + $0x7b] sm:$0xff] }
 0x6b0   : > { %20295 = vmatprep.mubr.msk.bf16.mxu0 %vm618_vm8, %v24318_v0  ;;  %20324 = vmatpush3.bf16.msra.mxu0 %v21909_v63  ;;  %v8618_v0 = vld [vmem:[#allocation3 + $0x93] sm:$0xff]  ;;  %v8647_v6 = vpack.c.bf16 %v8617_v18, %v8616_v20  ;;  %v8654_v18 = vpack.c.bf16 %v8631_v13, %v8630_v23 }
 0x6b1   : > { %20325 = vmatprep.subr.bf16.mxu0 %v21911_v32  ;;  %v8648_v25 = vpack.c.bf16 %v8619_v51, %v8618_v0  ;;  %v8626_v63 = vld [vmem:[#allocation3 + $0xf3] sm:$0xff]  ;;  %v8632_v51 = vld [vmem:[#allocation3 + $0x13b] sm:$0xff] }
 0x6b2   : > { %v8652_v31 = vpack.c.bf16 %v8627_v15, %v8626_v63  ;;  %v14584_v20 = vld [vmem:[#allocation5 + $0x1a1] sm:$0xff] }
 0x6b3   : > { %19524 = vmatmul.mubr.msk.bf16.gmra.mrb[44].mxu1 %vm516_vm3, %v8347_v54  ;;  %v14579_v54 = vld [vmem:[#allocation5 + $0x169] sm:$0xff]  ;;  %v15493_v63 = vld [vmem:[#allocation2 + $0x20] sm:$0xff] }
 0x6b4   : > { %19533 = vmatprep.mubr.msk.bf16.mxu1 %vm516_vm3, %v8646_v2  ;;  %20326 = vmatpush3.bf16.msra.mxu0 %v21911_v32  ;;  %v14580_v32 = vld [vmem:[#allocation5 + $0x171] sm:$0xff]  ;;  %v8629_v2 = vld [vmem:[#allocation3 + $0x113] sm:$0xff] }
 0x6b5   : > { %21677 = vmatprep.subr.msk.bf16.mxu0 %vm811_vm0, %v24590_v58  ;;  %v14598_v36 = vpack.c.bf16 %v14580_v32, %v14579_v54  ;;  %v8643_v58 = vld [vmem:[#allocation3 + $0x1bb] sm:$0xff]  ;;  %v24634_v15 = vld [vmem:[#allocation2 + $0x21] sm:$0xff]  ;;  %v8641_v32 = vld [vmem:[#allocation3 + $0x1a3] sm:$0xff] }
 0x6b6   : > { %v15399_v13 = vadd.f32 %v24634_v15, %v15493_v63 }
 0x6b7   : > { %20296 = vmatmul.mubr.msk.bf16.gmra.mrb[156].mxu0 %vm618_vm8, %v14592_v62  ;;  %v8653_v62 = vpack.c.bf16 %v8629_v2, %v8628_v34  ;;  %v15364_v34 = vld [vmem:[#allocation2 + $0x1] sm:$0xff]  ;;  %v15365_v2 = vld [vmem:[#allocation2 + $0x9] sm:$0xff] }
 0x6b8   : > { %20299 = vmatprep.mubr.msk.bf16.mxu0 %vm618_vm8, %v24333_v59  ;;  %v14594_v59 = vpack.c.bf16 %v14572_v39, %v14571_v4  ;;  %v14893_v4 = vld [vmem:[#allocation5 + $0x4a] sm:$0xff] }
 0x6bb   : > { %19534 = vmatmul.mubr.msk.bf16.vlgmr.msra.gmra.mrb[16].mxu1 %vm516_vm3, %v8647_v6  ;;  %v8633_v6 = vld [vmem:[#allocation3 + $0x143] sm:$0xff] }
 0x6bc   : > { %19566 = vmatpush3.bf16.msra.mxu1 %v24478_v16  ;;  %19537 = vmatprep.mubr.msk.bf16.mxu1 %vm516_vm3, %v8648_v25  ;;  %v8649_v16 = vpack.c.bf16 %v8621_v30, %v8620_v47  ;;  %v8635_v25 = vld [vmem:[#allocation3 + $0x15b] sm:$0xff]  ;;  %v8655_v39 = vpack.c.bf16 %v8633_v6, %v8632_v51  ;;  %v8636_v47 = vld [vmem:[#allocation3 + $0x16b] sm:$0xff]  ;;  %v8637_v30 = vld [vmem:[#allocation3 + $0x173] sm:$0xff] }
 0x6bd   : > { %19567 = vmatprep.subr.bf16.mxu1 %v21910_v45  ;;  %v15428_v6 = vld [vmem:[#allocation2 + $0x2] sm:$0xff] }
 0x6bf   : > { %20300 = vmatmul.mubr.msk.bf16.gmra.mrb[160].mxu0 %vm618_vm8, %v14594_v59 }
 0x6c0   : > { %19568 = vmatpush3.bf16.msra.mxu1 %v21910_v45  ;;  %20303 = vmatprep.mubr.msk.bf16.mxu0 %vm618_vm8, %v24346_v26  ;;  %v8651_v26 = vpack.c.bf16 %v8625_v9, %v8624_v1  ;;  %v8634_v45 = vld [vmem:[#allocation3 + $0x153] sm:$0xff]  ;;  %v14900_v1 = vld [vmem:[#allocation5 + $0x9a] sm:$0xff] }
 0x6c1   : > { %19569 = vmatprep.subr.bf16.mxu1 %v21912_v60  ;;  %v8642_v9 = vld [vmem:[#allocation3 + $0x1b3] sm:$0xff] }
 0x6c2   : > { %v8660_v23 = vpack.c.bf16 %v8643_v58, %v8642_v9 }
 0x6c3   : > { %19538 = vmatmul.mubr.msk.bf16.gmra.mrb[20].mxu1 %vm516_vm3, %v8649_v16  ;;  %v8639_v16 = vld [vmem:[#allocation3 + $0x18b] sm:$0xff] }
 0x6c4   : > { %19541 = vmatprep.mubr.msk.bf16.mxu1 %vm516_vm3, %v8650_v11  ;;  %19570 = vmatpush3.bf16.msra.mxu1 %v21912_v60  ;;  %v14894_v60 = vld [vmem:[#allocation5 + $0x52] sm:$0xff]  ;;  %v8658_v11 = vpack.c.bf16 %v8639_v16, %v8638_v21 }
 0x6c5   : > { %v14924_v59 = vpack.c.bf16 %v14894_v60, %v14893_v4  ;;  %v8645_v4 = vld [vmem:[#allocation3 + $0x1d3] sm:$0xff] }
 0x6c7   : > { %20304 = vmatmul.mubr.msk.bf16.gmra.mrb[164].mxu0 %vm618_vm8, %v14596_v12  ;;  %v14899_v12 = vld [vmem:[#allocation5 + $0x92] sm:$0xff] }
 0x6c8   : > { %20307 = vmatprep.mubr.msk.bf16.mxu0 %vm618_vm8, %v24353_v49  ;;  %v14583_v49 = vld [vmem:[#allocation5 + $0x199] sm:$0xff]  ;;  %v14927_v54 = vpack.c.bf16 %v14900_v1, %v14899_v12 }
 0x6c9   : > { %v14600_v0 = vpack.c.bf16 %v14584_v20, %v14583_v49  ;;  %v24639_v49 = vld [vmem:[#allocation2 + $0x22] sm:$0xff]  ;;  %v14901_v20 = vld [vmem:[#allocation5 + $0xaa] sm:$0xff]  ;;  %v24650_v12 = vld [vmem:[#allocation2 + $0x39] sm:$0xff] }
 0x6ca   : > { %v15463_v60 = vadd.f32 %v24639_v49, %v15399_v13  ;;  %v24662_v13 = vld [vmem:[#allocation3 + $0xac] sm:$0xff] }
 0x6cb   : > { %19542 = vmatmul.mubr.msk.bf16.gmra.mrb[24].mxu1 %vm516_vm3, %v8651_v26  ;;  %v14926_v26 = vpack.c.bf16 %v14898_v43, %v14897_v3  ;;  %v15620_v3 = vld [vmem:[#allocation2 + $0x1a] sm:$0xff] }
 0x6cc   : > { %19545 = vmatprep.mubr.msk.bf16.mxu1 %vm516_vm3, %v8652_v31  ;;  %v8640_v31 = vld [vmem:[#allocation3 + $0x19b] sm:$0xff] }
 0x6cf   : > { %20308 = vmatmul.mubr.msk.bf16.gmra.mrb[168].mxu0 %vm618_vm8, %v14598_v36  ;;  %v15300_v36 = vld [vmem:[#allocation2] sm:$0xff] }
 0x6d0   : > { %20311 = vmatprep.mubr.msk.bf16.mxu0 %vm618_vm8, %v24360_v55  ;;  %v8656_v55 = vpack.c.bf16 %v8635_v25, %v8634_v45  ;;  %v15429_v45 = vld [vmem:[#allocation2 + $0xa] sm:$0xff]  ;;  %v15492_v25 = vld [vmem:[#allocation2 + $0x18] sm:$0xff] }
 0x6d3   : > { %19546 = vmatmul.mubr.msk.bf16.gmra.mrb[28].mxu1 %vm516_vm3, %v8653_v62  ;;  %v8659_v62 = vpack.c.bf16 %v8641_v32, %v8640_v31  ;;  %v24654_v31 = vld [vmem:[#allocation2 + $0x31] sm:$0xff] }
 0x6d4   : > { %19549 = vmatprep.mubr.msk.bf16.mxu1 %vm516_vm3, %v8654_v18  ;;  %v14902_v18 = vld [vmem:[#allocation5 + $0xb2] sm:$0xff] }
 0x6d7   : > { %20312 = vmatmul.mubr.msk.bf16.gmra.mrb[172].mxu0 %vm618_vm8, %v14600_v0  ;;  %v15396_v0 = vadd.f32 %v15364_v34, %v15300_v36  ;;  %v8930_v34 = vld [vmem:[#allocation3 + $0x7c] sm:$0xff] }
 0x6d8   : > { %20327 = vmatprep.mubr.msk.bf16.mxu0 %vm618_vm8, %v24368_v56  ;;  %v8657_v56 = vpack.c.bf16 %v8637_v30, %v8636_v47  ;;  %v14928_v47 = vpack.c.bf16 %v14902_v18, %v14901_v20  ;;  %v24666_v20 = vld [vmem:[#allocation3 + $0xc4] sm:$0xff]  ;;  %v24668_v18 = vld [vmem:[#allocation3 + $0xcc] sm:$0xff] }
 0x6d9   : > { %v15460_v30 = vadd.f32 %v15428_v6, %v15396_v0  ;;  %v24673_v6 = vld [vmem:[#allocation3 + $0xe4] sm:$0xff] }
 0x6db   : > { %19550 = vmatmul.mubr.msk.bf16.gmra.mrb[32].mxu1 %vm516_vm3, %v8655_v39  ;;  %v15556_v39 = vld [vmem:[#allocation2 + $0x19] sm:$0xff]  ;;  %v15524_v9 = vadd.f32 %v15492_v25, %v15460_v30 }
 0x6dc   : > { %19553 = vmatprep.mubr.msk.bf16.mxu1 %vm516_vm3, %v8656_v55  ;;  %v8644_v55 = vld [vmem:[#allocation3 + $0x1cb] sm:$0xff]  ;;  %v15398_v21 = vadd.f32 %v15556_v39, %v15492_v25 }
 0x6dd   : > { %v8661_v16 = vpack.c.bf16 %v8645_v4, %v8644_v55  ;;  %v24677_v25 = vld [vmem:[#allocation2 + $0x3a] sm:$0xff]  ;;  %v15688_v55 = vld [vmem:[#allocation2 + $0x50] sm:$0xff] }
 0x6de   : > { %v15462_v32 = vadd.f32 %v15620_v3, %v15398_v21  ;;  %v24683_v21 = vld [vmem:[#allocation2 + $0x49] sm:$0xff] }
 0x6df   : > { %20328 = vmatmul.mubr.msk.bf16.vlgmr.msra.gmra.mrb[144].mxu0 %vm618_vm8, %v14924_v59  ;;  %v24644_v59 = vld [vmem:[#allocation2 + $0x38] sm:$0xff] }
 0x6e0   : > { %20331 = vmatprep.mubr.msk.bf16.mxu0 %vm618_vm8, %v24377_v7  ;;  %20360 = vmatpush3.bf16.msra.mxu0 %v15982_v29  ;;  %v15301_v7 = vld [vmem:[#allocation2 + $0x8] sm:$0xff]  ;;  %v15527_v43 = vadd.f32 %v24644_v59, %v15463_v60  ;;  %v15588_v60 = vadd.f32 %v15556_v39, %v15524_v9 }
 0x6e1   : > { %v15397_v51 = vadd.f32 %v15365_v2, %v15301_v7  ;;  %v14905_v7 = vld [vmem:[#allocation5 + $0xda] sm:$0xff] }
 0x6e2   : > { %v8931_v2 = vld [vmem:[#allocation3 + $0x84] sm:$0xff]  ;;  %v15591_v0 = vadd.f32 %v24650_v12, %v15527_v43  ;;  %v24691_v43 = vld [vmem:[#allocation3 + $0x10c] sm:$0xff] }
 0x6e3   : > { %19554 = vmatmul.mubr.msk.bf16.gmra.mrb[36].mxu1 %vm516_vm3, %v8657_v56  ;;  %v15461_v29 = vadd.f32 %v15429_v45, %v15397_v51  ;;  %v8928_v56 = vld [vmem:[#allocation3 + $0x64] sm:$0xff]  ;;  %v24671_v51 = vld [vmem:[#allocation3 + $0xdc] sm:$0xff] }
 0x6e4   : > { %19557 = vmatprep.mubr.msk.bf16.mxu1 %vm516_vm3, %v8658_v11  ;;  %v8929_v11 = vld [vmem:[#allocation3 + $0x6c] sm:$0xff]  ;;  %v24675_v45 = vld [vmem:[#allocation2 + $0x32] sm:$0xff] }
 0x6e5   : > { %v8960_v1 = vpack.c.bf16 %v8929_v11, %v8928_v56  ;;  %v15525_v58 = vadd.f32 %v15493_v63, %v15461_v29  ;;  %v8932_v63 = vld [vmem:[#allocation3 + $0x94] sm:$0xff]  ;;  %v24689_v11 = vld [vmem:[#allocation3 + $0xfc] sm:$0xff] }
 0x6e6   : > { %v24681_v29 = vld [vmem:[#allocation2 + $0x48] sm:$0xff] }
 0x6e7   : > { %20332 = vmatmul.mubr.msk.bf16.gmra.mrb[148].mxu0 %vm618_vm8, %v14926_v26  ;;  %v24652_v26 = vld [vmem:[#allocation2 + $0x30] sm:$0xff]  ;;  %v24687_v56 = vld [vmem:[#allocation3 + $0xf4] sm:$0xff] }
 0x6e8   : > { %20335 = vmatprep.mubr.msk.bf16.mxu0 %vm618_vm8, %v14927_v54  ;;  %v14906_v54 = vld [vmem:[#allocation5 + $0xe2] sm:$0xff]  ;;  %v15400_v36 = vadd.f32 %v24654_v31, %v24652_v26  ;;  %v15526_v30 = vadd.f32 %v24652_v26, %v15462_v32  ;;  %v24701_v32 = vld [vmem:[#allocation3 + $0x124] sm:$0xff] }
 0x6e9   : > { %v14930_v4 = vpack.c.bf16 %v14906_v54, %v14905_v7  ;;  %v24703_v7 = vld [vmem:[#allocation3 + $0x12c] sm:$0xff]  ;;  %v15655_v54 = vadd.f32 %v24677_v25, %v15591_v0 }
 0x6eb   : > { %19558 = vmatmul.mubr.msk.bf16.gmra.mrb[40].mxu1 %vm516_vm3, %v8659_v62  ;;  %v24664_v62 = vld [vmem:[#allocation3 + $0xb4] sm:$0xff]  ;;  %v15720_v40 = vadd.f32 %v15688_v55, %v15655_v54 }
 0x6ec   : > { %19561 = vmatprep.mubr.msk.bf16.mxu1 %vm516_vm3, %v8660_v23  ;;  %v8933_v23 = vld [vmem:[#allocation3 + $0x9c] sm:$0xff] }
 0x6ef   : > { %20336 = vmatmul.mubr.msk.bf16.gmra.mrb[152].mxu0 %vm618_vm8, %v14928_v47  ;;  %v15589_v47 = vadd.f32 %v24634_v15, %v15525_v58  ;;  %v15402_v15 = vadd.f32 %v24683_v21, %v24681_v29  ;;  %v24699_v58 = vld [vmem:[#allocation3 + $0x114] sm:$0xff] }
 0x6f0   : > { %20339 = vmatprep.mubr.msk.bf16.mxu0 %vm618_vm8, %v24393_v37  ;;  %v15401_v37 = vadd.f32 %v24650_v12, %v24644_v59 }
 0x6f2   : > { %v15465_v39 = vadd.f32 %v24677_v25, %v15401_v37  ;;  %v8962_v37 = vpack.c.bf16 %v8933_v23, %v8932_v63  ;;  %v24724_v63 = vld [vmem:[#allocation2 + $0x4a] sm:$0xff]  ;;  %v24726_v23 = vld [vmem:[#allocation2 + $0x52] sm:$0xff] }
 0x6f3   : > { %19562 = vmatmul.mubr.msk.bf16.gmra.mrb[44].mxu1 %vm516_vm3, %v8661_v16  ;;  %v24685_v16 = vld [vmem:[#allocation2 + $0x51] sm:$0xff] }
 0x6f4   : > { %19571 = vmatprep.mubr.msk.bf16.mxu1 %vm516_vm3, %v8960_v1  ;;  %v15464_v1 = vadd.f32 %v24675_v45, %v15400_v36  ;;  %v15403_v9 = vadd.f32 %v24685_v16, %v15688_v55  ;;  %v8961_v36 = vpack.c.bf16 %v8931_v2, %v8930_v34  ;;  %v15653_v34 = vadd.f32 %v24639_v49, %v15589_v47  ;;  %v24757_v47 = vld [vmem:[#allocation3 + $0x18c] sm:$0xff] }
 0x6f5   : > { %v15590_v2 = vadd.f32 %v24654_v31, %v15526_v30  ;;  %v15529_v46 = vadd.f32 %v15688_v55, %v15465_v39  ;;  %v15466_v49 = vadd.f32 %v24724_v63, %v15402_v15  ;;  %v24747_v39 = vld [vmem:[#allocation2 + $0x61] sm:$0xff]  ;;  %25845 = vst [vmem:[#allocation56_spill] sm:$0xff] %v24757_v47  ;;  %v24759_v30 = vld [vmem:[#allocation3 + $0x19c] sm:$0xff] }
 0x6f6   : > { %v15528_v0 = vadd.f32 %v24681_v29, %v15464_v1  ;;  %v24745_v1 = vld [vmem:[#allocation2 + $0x68] sm:$0xff]  ;;  %25846 = vst [vmem:[#allocation57_spill] sm:$0xff] %v24759_v30 }
 0x6f7   : > { %20340 = vmatmul.mubr.msk.bf16.gmra.mrb[156].mxu0 %vm618_vm8, %v14930_v4  ;;  %v24712_v4 = vld [vmem:[#allocation3 + $0x13c] sm:$0xff]  ;;  %v15405_v54 = vadd.f32 %v24749_v38, %v24745_v1  ;;  %v15654_v53 = vadd.f32 %v24675_v45, %v15590_v2  ;;  %v15593_v61 = vadd.f32 %v24685_v16, %v15529_v46  ;;  %v15406_v2 = vadd.f32 %v24782_v17, %v24780_v50 }
 0x6f8   : > { %20343 = vmatprep.mubr.msk.bf16.mxu0 %vm618_vm8, %v24409_v22  ;;  %v15652_v22 = vadd.f32 %v15620_v3, %v15588_v60  ;;  %v24734_v3 = vld [vmem:[#allocation2 + $0x60] sm:$0xff]  ;;  %v15467_v60 = vadd.f32 %v24726_v23, %v15403_v9  ;;  %v15718_v9 = vadd.f32 %v24644_v59, %v15653_v34  ;;  %v15592_v8 = vadd.f32 %v24683_v21, %v15528_v0  ;;  %v24790_v0 = vld [vmem:[#allocation2 + $0x6a] sm:$0xff] }
 0x6f9   : > { %v15404_v55 = vadd.f32 %v24747_v39, %v24734_v3  ;;  %v15784_v59 = vadd.f32 %v24685_v16, %v15720_v40  ;;  %v24794_v34 = vld [vmem:[#allocation2 + $0x81] sm:$0xff]  ;;  %v24802_v40 = vld [vmem:[#allocation5 + $0x172] sm:$0xff]  ;;  %v15469_v46 = vadd.f32 %v24790_v0, %v15405_v54  ;;  %v15719_v5 = vadd.f32 %v24681_v29, %v15654_v53 }
 0x6fa   : > { %v15717_v15 = vadd.f32 %v24652_v26, %v15652_v22  ;;  %v24792_v22 = vld [vmem:[#allocation2 + $0x80] sm:$0xff]  ;;  %v15782_v47 = vadd.f32 %v24650_v12, %v15718_v9  ;;  %v15656_v54 = vadd.f32 %v24724_v63, %v15592_v8  ;;  %v15657_v27 = vadd.f32 %v24726_v23, %v15593_v61  ;;  %v24831_v12 = vld [vmem:[#allocation2 + $0x98] sm:$0xff] }
 0x6fb   : > { %19572 = vmatmul.mubr.msk.bf16.vlgmr.msra.gmra.mrb[16].mxu1 %vm516_vm3, %v8961_v36  ;;  %v14932_v36 = vpack.c.bf16 %v14910_v48, %v14909_v44  ;;  %v15530_v44 = vadd.f32 %v24734_v3, %v15466_v49  ;;  %v15531_v48 = vadd.f32 %v24745_v1, %v15467_v60  ;;  %v24800_v49 = vld [vmem:[#allocation5 + $0x16a] sm:$0xff]  ;;  %v24804_v16 = vld [vmem:[#allocation5 + $0x19a] sm:$0xff]  ;;  %v15407_v26 = vadd.f32 %v24794_v34, %v24792_v22  ;;  %v24842_v8 = vld [vmem:[#allocation2 + $0x82] sm:$0xff] }
 0x6fc   : > { %19575 = vmatprep.mubr.msk.bf16.mxu1 %vm516_vm3, %v8962_v37  ;;  %v24755_v37 = vld [vmem:[#allocation3 + $0x184] sm:$0xff]  ;;  %v15470_v61 = vadd.f32 %v24819_v57, %v15406_v2  ;;  %v15846_v2 = vadd.f32 %v24677_v25, %v15782_v47  ;;  %v15721_v30 = vadd.f32 %v24734_v3, %v15656_v54  ;;  %v24875_v25 = vld [vmem:[#allocation2 + $0xa8] sm:$0xff] }
 0x6fd   : > { %25844 = vst [vmem:[#allocation55_spill] sm:$0xff] %v24755_v37  ;;  %v15781_v37 = vadd.f32 %v24654_v31, %v15717_v15  ;;  %v24821_v60 = vld [vmem:[#allocation2 + $0x90] sm:$0xff]  ;;  %v15594_v33 = vadd.f32 %v24747_v39, %v15530_v44  ;;  %v15595_v31 = vadd.f32 %v24749_v38, %v15531_v48  ;;  %v24835_v29 = vld [vmem:[#allocation2 + $0x99] sm:$0xff]  ;;  %v25849_v15 = vpack.c.bf16 %v24668_v18, %v24666_v20 }
 0x6fe   : > { %v24833_v53 = vld [vmem:[#allocation2 + $0x91] sm:$0xff]  ;;  %v15409_v9 = vadd.f32 %v24835_v29, %v24831_v12  ;;  %v15533_v20 = vadd.f32 %v24792_v22, %v15469_v46  ;;  %v15471_v18 = vadd.f32 %v24842_v8, %v15407_v26  ;;  %v15722_v44 = vadd.f32 %v24745_v1, %v15657_v27  ;;  %v24883_v1 = vld [vmem:[#allocation3 + $0x1cc] sm:$0xff] }
 0x6ff   : > { %20344 = vmatmul.mubr.msk.bf16.gmra.mrb[160].mxu0 %vm618_vm8, %v14932_v36  ;;  %v15468_v36 = vadd.f32 %v24776_v52, %v15404_v55  ;;  %v25848_v55 = vpack.c.bf16 %v24664_v62, %v24662_v13  ;;  %v15848_v13 = vadd.f32 %v24726_v23, %v15784_v59  ;;  %v15408_v62 = vadd.f32 %v24833_v53, %v24821_v60  ;;  %v24869_v23 = vld [vmem:[#allocation2 + $0x9a] sm:$0xff] }
 0x700   : > { %20347 = vmatprep.mubr.msk.bf16.mxu0 %vm618_vm8, %v24423_v19  ;;  %v24814_v19 = vld [vmem:[#allocation5 + $0x1a2] sm:$0xff]  ;;  %v15845_v59 = vadd.f32 %v24675_v45, %v15781_v37  ;;  %v15658_v46 = vadd.f32 %v24776_v52, %v15594_v33  ;;  %v15659_v26 = vadd.f32 %v24790_v0, %v15595_v31  ;;  %v15473_v47 = vadd.f32 %v24869_v23, %v15409_v9 }
 0x701   : > { %v15532_v48 = vadd.f32 %v24780_v50, %v15468_v36  ;;  %v24863_v36 = vld [vmem:[#allocation3 + $0x1bc] sm:$0xff]  ;;  %v24872_v45 = vmul.f32 0.11111111, %v15848_v13  ;;  %v15472_v3 = vadd.f32 %v24867_v24, %v15408_v62  ;;  %25850 = vst [vmem:[#allocation59_spill] sm:$0xff] %v24883_v1  ;;  %v15535_v54 = vadd.f32 %v24831_v12, %v15471_v18 }
 0x702   : > { %v24890_v33 = vmul.f32 0.11111111, %v15845_v59  ;;  %v24892_v31 = vmul.f32 0.11111111, %v15846_v2  ;;  %v24899_v62 = vld [vmem:[#allocation2 + $0xb0] sm:$0xff]  ;;  %v25851_v9 = vpack.c.bf16 %v24673_v6, %v24671_v51  ;;  %v15723_v18 = vadd.f32 %v24780_v50, %v15658_v46  ;;  %v24911_v2 = vld [vmem:[#allocation2 + $0xc1] sm:$0xff] }
 0x703   : > { %19576 = vmatmul.mubr.msk.bf16.gmra.mrb[20].mxu1 %vm516_vm3, %v25848_v55  ;;  %v15783_v55 = vadd.f32 %v24683_v21, %v15719_v5  ;;  %v15534_v5 = vadd.f32 %v24821_v60, %v15470_v61  ;;  %v24877_v21 = vld [vmem:[#allocation2 + $0xa9] sm:$0xff]  ;;  %v15596_v37 = vadd.f32 %v24782_v17, %v15532_v48  ;;  %v15785_v48 = vadd.f32 %v24747_v39, %v15721_v30  ;;  %v24909_v59 = vld [vmem:[#allocation2 + $0xb1] sm:$0xff] }
 0x704   : > { %19579 = vmatprep.mubr.msk.bf16.mxu1 %vm516_vm3, %v25849_v15  ;;  %v24859_v15 = vld [vmem:[#allocation3 + $0x1b4] sm:$0xff]  ;;  %v15410_v27 = vadd.f32 %v24877_v21, %v24875_v25  ;;  %v15537_v50 = vadd.f32 %v24899_v62, %v15473_v47  ;;  %v15411_v30 = vadd.f32 %v24909_v59, %v24899_v62 }
 0x705   : > { %v15847_v13 = vadd.f32 %v24724_v63, %v15783_v55  ;;  %v24897_v61 = vld [vmem:[#allocation3 + $0x1d4] sm:$0xff]  ;;  %v15724_v63 = vadd.f32 %v24792_v22, %v15659_v26  ;;  %v15598_v51 = vadd.f32 %v24833_v53, %v15534_v5  ;;  %v15660_v39 = vadd.f32 %v24819_v57, %v15596_v37 }
 0x706   : > { %v24913_v55 = vld [vmem:[#allocation2 + $0xc9] sm:$0xff]  ;;  %v25853_v5 = vpack.c.bf16 %v24802_v40, %v24800_v49  ;;  %v15909_v40 = vpack.c.bf16 %v24892_v31, %v24890_v33 }
 0x707   : > { %20348 = vmatmul.mubr.msk.bf16.gmra.mrb[164].mxu0 %vm618_vm8, %v14934_v42  ;;  %v15597_v42 = vadd.f32 %v24794_v34, %v15533_v20  ;;  %v15786_v20 = vadd.f32 %v24749_v38, %v15722_v44  ;;  %v24920_v6 = vld [vmem:[#allocation2 + $0xaa] sm:$0xff]  ;;  %v15536_v38 = vadd.f32 %v24875_v25, %v15472_v3  ;;  %v15599_v44 = vadd.f32 %v24835_v29, %v15535_v54 }
 0x708   : > { %20351 = vmatprep.mubr.msk.bf16.mxu0 %vm618_vm8, %v24431_v28  ;;  %v25852_v28 = vpack.c.bf16 %v24689_v11, %v24687_v56  ;;  %v15697_v56 = vld [vmem:[#allocation2 + $0xc0] sm:$0xff]  ;;  %v15698_v11 = vld [vmem:[#allocation2 + $0xc8] sm:$0xff]  ;;  %v15474_v46 = vadd.f32 %v24920_v6, %v15410_v27  ;;  %v24930_v26 = vmul.f32 0.11111111, %v15847_v13  ;;  %v15788_v54 = vadd.f32 %v24794_v34, %v15724_v63  ;;  %v24963_v63 = vld [vmem:[#allocation2 + $0xd8] sm:$0xff] }
 0x709   : > { %v15661_v22 = vadd.f32 %v24842_v8, %v15597_v42  ;;  %v15412_v3 = vadd.f32 %v24911_v2, %v15697_v56  ;;  %v15413_v47 = vadd.f32 %v24913_v55, %v15698_v11  ;;  %v15850_v37 = vadd.f32 %v24790_v0, %v15786_v20  ;;  %v24942_v27 = vld [vmem:[#allocation2 + $0xc2] sm:$0xff]  ;;  %v24944_v13 = vld [vmem:[#allocation2 + $0xca] sm:$0xff] }
 0x70a   : > { %v15787_v42 = vadd.f32 %v24782_v17, %v15723_v18  ;;  %v15662_v1 = vadd.f32 %v24867_v24, %v15598_v51  ;;  %v15601_v0 = vadd.f32 %v24909_v59, %v15537_v50  ;;  %v15725_v34 = vadd.f32 %v24821_v60, %v15660_v39  ;;  %v24965_v51 = vld [vmem:[#allocation2 + $0xe0] sm:$0xff] }
 0x70b   : > { %19580 = vmatmul.mubr.msk.bf16.gmra.mrb[24].mxu1 %vm516_vm3, %v25851_v9  ;;  %v24940_v9 = vld [vmem:[#allocation2 + $0xb2] sm:$0xff]  ;;  %v15663_v20 = vadd.f32 %v24869_v23, %v15599_v44  ;;  %v15538_v49 = vadd.f32 %v15697_v56, %v15474_v46  ;;  %v15910_v18 = vpack.c.bf16 %v24872_v45, %v24930_v26  ;;  %v25854_v60 = vpack.c.bf16 %v24699_v58, %v24691_v43  ;;  %v24981_v39 = vld [vmem:[#allocation2 + $0xe1] sm:$0xff] }
 0x70c   : > { %19583 = vmatprep.mubr.msk.bf16.mxu1 %vm516_vm3, %v25852_v28  ;;  %v15849_v28 = vadd.f32 %v24776_v52, %v15785_v48  ;;  %v15600_v52 = vadd.f32 %v24877_v21, %v15536_v38  ;;  %v15475_v17 = vadd.f32 %v24940_v9, %v15411_v30  ;;  %v15726_v48 = vadd.f32 %v24831_v12, %v15661_v22  ;;  %v24979_v30 = vld [vmem:[#allocation2 + $0xd9] sm:$0xff] }
 0x70d   : > { %v15476_v38 = vadd.f32 %v24942_v27, %v15412_v3  ;;  %v24975_v50 = vmul.f32 0.11111111, %v15850_v37  ;;  %v15851_v33 = vadd.f32 %v24819_v57, %v15787_v42  ;;  %v15852_v31 = vadd.f32 %v24842_v8, %v15788_v54  ;;  %v24992_v57 = vld [vmem:[#allocation2 + $0xf9] sm:$0xff]  ;;  %v25014_v54 = vld [vmem:[#allocation2 + $0xe2] sm:$0xff] }
 0x70e   : > { %v24973_v12 = vmul.f32 0.11111111, %v15849_v28  ;;  %v25855_v22 = vpack.c.bf16 %v24703_v7, %v24701_v32  ;;  %v15727_v43 = vadd.f32 %v24875_v25, %v15662_v1  ;;  %v15664_v58 = vadd.f32 %v24920_v6, %v15600_v52  ;;  %v25000_v1 = vld [vmem:[#allocation2 + $0xf0] sm:$0xff]  ;;  %v25002_v28 = vld [vmem:[#allocation2 + $0xf8] sm:$0xff] }
 0x70f   : > { %20352 = vmatmul.mubr.msk.bf16.gmra.mrb[168].mxu0 %vm618_vm8, %v25853_v5  ;;  %v15665_v44 = vadd.f32 %v24940_v9, %v15601_v0  ;;  %v15539_v46 = vadd.f32 %v15698_v11, %v15475_v17  ;;  %v24990_v5 = vld [vmem:[#allocation2 + $0xf1] sm:$0xff]  ;;  %v15789_v8 = vadd.f32 %v24833_v53, %v15725_v34  ;;  %v15790_v3 = vadd.f32 %v24835_v29, %v15726_v48 }
 0x710   : > { %20355 = vmatprep.mubr.msk.bf16.mxu0 %vm618_vm8, %v24439_v14  ;;  %v15477_v14 = vadd.f32 %v24944_v13, %v15413_v47  ;;  %v15728_v47 = vadd.f32 %v24899_v62, %v15663_v20  ;;  %v15602_v32 = vadd.f32 %v24911_v2, %v15538_v49  ;;  %v15540_v7 = vadd.f32 %v24963_v63, %v15476_v38  ;;  %v25012_v62 = vld [vmem:[#allocation2 + $0xda] sm:$0xff]  ;;  %v25026_v38 = vld [vmem:[#allocation2 + $0xf2] sm:$0xff] }
 0x711   : > { %v15414_v37 = vadd.f32 %v24979_v30, %v24963_v63  ;;  %v15415_v53 = vadd.f32 %v24981_v39, %v24965_v51  ;;  %v25008_v42 = vmul.f32 0.11111111, %v15851_v33  ;;  %v25010_v29 = vmul.f32 0.11111111, %v15852_v31 }
 0x712   : > { %v15541_v25 = vadd.f32 %v24965_v51, %v15477_v14  ;;  %v15416_v52 = vadd.f32 %v24990_v5, %v25000_v1  ;;  %v15417_v0 = vadd.f32 %v24992_v57, %v25002_v28  ;;  %v25856_v17 = vpack.c.bf16 %v24814_v19, %v24804_v16  ;;  %v25028_v14 = vld [vmem:[#allocation2 + $0xfa] sm:$0xff] }
 0x713   : > { %19584 = vmatmul.mubr.msk.bf16.gmra.mrb[28].mxu1 %vm516_vm3, %v25854_v60  ;;  %v15791_v34 = vadd.f32 %v24877_v21, %v15727_v43  ;;  %v15729_v48 = vadd.f32 %v15697_v56, %v15664_v58  ;;  %v15730_v20 = vadd.f32 %v15698_v11, %v15665_v44  ;;  %v15603_v49 = vadd.f32 %v24913_v55, %v15539_v46  ;;  %v25059_v44 = vld [vmem:[#allocation2 + $0x110] sm:$0xff] }
 0x714   : > { %19587 = vmatprep.mubr.msk.bf16.mxu1 %vm516_vm3, %v25855_v22  ;;  %v15853_v60 = vadd.f32 %v24867_v24, %v15789_v8  ;;  %v15854_v33 = vadd.f32 %v24869_v23, %v15790_v3  ;;  %v15792_v16 = vadd.f32 %v24909_v59, %v15728_v47  ;;  %v15666_v19 = vadd.f32 %v24942_v27, %v15602_v32  ;;  %v25047_v59 = vld [vmem:[#allocation2 + $0x108] sm:$0xff]  ;;  %v25063_v8 = vld [vmem:[#allocation2 + $0x111] sm:$0xff] }
 0x715   : > { %v15604_v21 = vadd.f32 %v24979_v30, %v15540_v7  ;;  %v15605_v56 = vadd.f32 %v24981_v39, %v15541_v25  ;;  %v15478_v11 = vadd.f32 %v25012_v62, %v15414_v37  ;;  %v15479_v31 = vadd.f32 %v25014_v54, %v15415_v53  ;;  %v25061_v46 = vld [vmem:[#allocation2 + $0x109] sm:$0xff]  ;;  %v25075_v7 = vld [vmem:[#allocation2 + $0x121] sm:$0xff] }
 0x716   : > { %v25857_v22 = vpack.c.bf16 %v24714_v41, %v24712_v4  ;;  %v15911_v24 = vpack.c.bf16 %v24975_v50, %v24973_v12  ;;  %v15912_v23 = vpack.c.bf16 %v25010_v29, %v25008_v42  ;;  %v15481_v43 = vadd.f32 %v25028_v14, %v15417_v0  ;;  %v25077_v25 = vld [vmem:[#allocation2 + $0x129] sm:$0xff]  ;;  %v25170_v42 = vld [vmem:[#allocation2 + $0x13a] sm:$0xff] }
 0x717   : > { %20356 = vmatmul.mubr.msk.bf16.gmra.mrb[172].mxu0 %vm618_vm8, %v25856_v17  ;;  %v25858_v58 = vpack.c.bf16 %v24720_v10, %v24716_v35  ;;  %v15855_v41 = vadd.f32 %v24920_v6, %v15791_v34  ;;  %v15793_v4 = vadd.f32 %v24911_v2, %v15729_v48  ;;  %v15794_v12 = vadd.f32 %v24913_v55, %v15730_v20  ;;  %v25079_v37 = vld [vmem:[#allocation2 + $0x10a] sm:$0xff]  ;;  %v25096_v20 = vld [vmem:[#allocation2 + $0x112] sm:$0xff]  ;;  %v25172_v29 = vld [vmem:[#allocation2 + $0x142] sm:$0xff] }
 0x718   : > { %20361 = vmatprep.mubr.msk.bf16.mxu0 %vm470_vm1, %v15909_v40  ;;  %v15480_v40 = vadd.f32 %v25026_v38, %v15416_v52  ;;  %v15667_v50 = vadd.f32 %v24944_v13, %v15603_v49  ;;  %v25065_v3 = vmul.f32 0.11111111, %v15853_v60  ;;  %v25067_v47 = vmul.f32 0.11111111, %v15854_v33  ;;  %v15705_v49 = vld [vmem:[#allocation2 + $0x120] sm:$0xff]  ;;  %v15706_v60 = vld [vmem:[#allocation2 + $0x128] sm:$0xff] }
 0x719   : > { %v15856_v10 = vadd.f32 %v24940_v9, %v15792_v16  ;;  %v15731_v35 = vadd.f32 %v24963_v63, %v15666_v19  ;;  %v15668_v2 = vadd.f32 %v25012_v62, %v15604_v21  ;;  %v15669_v55 = vadd.f32 %v25014_v54, %v15605_v56  ;;  %v25108_v19 = vld [vmem:[#allocation2 + $0x122] sm:$0xff]  ;;  %v25110_v21 = vld [vmem:[#allocation2 + $0x12a] sm:$0xff] }
 0x71a   : > { %v15542_v6 = vadd.f32 %v25000_v1, %v15478_v11  ;;  %v15543_v32 = vadd.f32 %v25002_v28, %v15479_v31  ;;  %v15544_v53 = vadd.f32 %v25047_v59, %v15480_v40  ;;  %v15545_v9 = vadd.f32 %v25059_v44, %v15481_v43  ;;  %v25859_v56 = vld [vmem:[#allocation54_spill] sm:$0xff]  ;;  %v25860_v11 = vld [vmem:[#allocation53_spill] sm:$0xff]  ;;  %v25863_v40 = vld [vmem:[#allocation55_spill] sm:$0xff] }
 0x71b   : > { %19588 = vmatmul.mubr.msk.bf16.gmra.mrb[32].mxu1 %vm516_vm3, %v25857_v22  ;;  %v15418_v63 = vadd.f32 %v25061_v46, %v25047_v59  ;;  %v15419_v52 = vadd.f32 %v25063_v8, %v25059_v44  ;;  %v25091_v0 = vmul.f32 0.11111111, %v15855_v41  ;;  %v15857_v17 = vadd.f32 %v24942_v27, %v15793_v4 }
 0x71c   : > { %19591 = vmatprep.mubr.msk.bf16.mxu1 %vm516_vm3, %v25858_v58  ;;  %v15858_v34 = vadd.f32 %v24944_v13, %v15794_v12  ;;  %v15732_v48 = vadd.f32 %v24965_v51, %v15667_v50  ;;  %v25099_v33 = vmul.f32 0.11111111, %v15856_v10  ;;  %v15795_v45 = vadd.f32 %v24979_v30, %v15731_v35  ;;  %v25131_v50 = vld [vmem:[#allocation2 + $0x138] sm:$0xff] }
 0x71d   : > { %v15420_v26 = vadd.f32 %v25075_v7, %v15705_v49  ;;  %v15733_v27 = vadd.f32 %v25000_v1, %v15668_v2  ;;  %v15734_v13 = vadd.f32 %v25002_v28, %v15669_v55  ;;  %v15606_v51 = vadd.f32 %v24990_v5, %v15542_v6  ;;  %v25136_v2 = vld [vmem:[#allocation2 + $0x140] sm:$0xff] }
 0x71e   : > { %v15607_v16 = vadd.f32 %v24992_v57, %v15543_v32  ;;  %v25861_v31 = vpack.c.bf16 %v25859_v56, %v25860_v11  ;;  %v15608_v30 = vadd.f32 %v25061_v46, %v15544_v53  ;;  %v15609_v22 = vadd.f32 %v25063_v8, %v15545_v9  ;;  %v25138_v55 = vld [vmem:[#allocation2 + $0x139] sm:$0xff]  ;;  %v25140_v6 = vld [vmem:[#allocation2 + $0x141] sm:$0xff] }
 0x71f   : > { %20362 = vmatmul.mubr.msk.bf16.vlgmr.msra.gmra.mrb[176].mxu0 %vm470_vm1, %v15910_v18  ;;  %v15421_v18 = vadd.f32 %v25077_v25, %v15706_v60  ;;  %v15482_v1 = vadd.f32 %v25079_v37, %v15418_v63  ;;  %v15483_v28 = vadd.f32 %v25096_v20, %v15419_v52  ;;  %v15913_v58 = vpack.c.bf16 %v25067_v47, %v25065_v3  ;;  %v25148_v63 = vld [vmem:[#allocation2 + $0x151] sm:$0xff] }
 0x720   : > { %20365 = vmatprep.mubr.msk.bf16.mxu0 %vm470_vm1, %v15911_v24  ;;  %v25862_v24 = vld [vmem:[#allocation56_spill] sm:$0xff]  ;;  %v25126_v41 = vmul.f32 0.11111111, %v15857_v17  ;;  %v25128_v4 = vmul.f32 0.11111111, %v15858_v34  ;;  %v15796_v12 = vadd.f32 %v24981_v39, %v15732_v48  ;;  %v15914_v10 = vpack.c.bf16 %v25099_v33, %v25091_v0 }
 0x721   : > { %v25864_v43 = vpack.c.bf16 %v25862_v24, %v25863_v40  ;;  %v15859_v35 = vadd.f32 %v25012_v62, %v15795_v45  ;;  %v15484_v3 = vadd.f32 %v25108_v19, %v15420_v26  ;;  %v15485_v47 = vadd.f32 %v25110_v21, %v15421_v18  ;;  %v25150_v62 = vld [vmem:[#allocation2 + $0x159] sm:$0xff]  ;;  %v25161_v45 = vld [vmem:[#allocation2 + $0x150] sm:$0xff] }
 0x722   : > { %v15797_v32 = vadd.f32 %v24990_v5, %v15733_v27  ;;  %v15798_v39 = vadd.f32 %v24992_v57, %v15734_v13  ;;  %v15670_v53 = vadd.f32 %v25026_v38, %v15606_v51  ;;  %v15671_v9 = vadd.f32 %v25028_v14, %v15607_v16  ;;  %v25163_v26 = vld [vmem:[#allocation2 + $0x158] sm:$0xff] }
 0x723   : > { %19592 = vmatmul.mubr.msk.bf16.gmra.mrb[36].mxu1 %vm516_vm3, %v25861_v31  ;;  %v15672_v52 = vadd.f32 %v25079_v37, %v15608_v30  ;;  %v15673_v17 = vadd.f32 %v25096_v20, %v15609_v22  ;;  %v15546_v34 = vadd.f32 %v15705_v49, %v15482_v1  ;;  %v15547_v48 = vadd.f32 %v15706_v60, %v15483_v28  ;;  %v25184_v30 = vld [vmem:[#allocation2 + $0x152] sm:$0xff]  ;;  %v25186_v22 = vld [vmem:[#allocation2 + $0x15a] sm:$0xff]  ;;  %v25865_v1 = vld [vmem:[#allocation58_spill] sm:$0xff] }
 0x724   : > { %19595 = vmatprep.mubr.msk.bf16.mxu1 %vm516_vm3, %v25864_v43  ;;  %v15915_v5 = vpack.c.bf16 %v25128_v4, %v25126_v41  ;;  %v15860_v57 = vadd.f32 %v25014_v54, %v15796_v12  ;;  %v15422_v18 = vadd.f32 %v25138_v55, %v25131_v50  ;;  %v15423_v27 = vadd.f32 %v25140_v6, %v25136_v2  ;;  %v25866_v28 = vld [vmem:[#allocation57_spill] sm:$0xff]  ;;  %v25200_v12 = vld [vmem:[#allocation2 + $0x168] sm:$0xff]  ;;  %v25233_v0 = vld [vmem:[#allocation2 + $0x172] sm:$0xff] }
 0x725   : > { %v15549_v54 = vadd.f32 %v25136_v2, %v15485_v47  ;;  %v15424_v13 = vadd.f32 %v25148_v63, %v25161_v45  ;;  %v15425_v51 = vadd.f32 %v25150_v62, %v25163_v26  ;;  %v15861_v16 = vadd.f32 %v25026_v38, %v15797_v32  ;;  %v25206_v47 = vld [vmem:[#allocation2 + $0x169] sm:$0xff]  ;;  %v25208_v32 = vld [vmem:[#allocation2 + $0x171] sm:$0xff] }
 0x726   : > { %v15862_v56 = vadd.f32 %v25028_v14, %v15798_v39  ;;  %v15735_v11 = vadd.f32 %v25047_v59, %v15670_v53  ;;  %v15736_v31 = vadd.f32 %v25059_v44, %v15671_v9  ;;  %v25867_v24 = vpack.c.bf16 %v25865_v1, %v25866_v28 }
 0x727   : > { %20366 = vmatmul.mubr.msk.bf16.gmra.mrb[180].mxu0 %vm470_vm1, %v15912_v23  ;;  %v15548_v23 = vadd.f32 %v25131_v50, %v15484_v3  ;;  %v15737_v40 = vadd.f32 %v15705_v49, %v15672_v52  ;;  %v15738_v43 = vadd.f32 %v15706_v60, %v15673_v17  ;;  %v15611_v38 = vadd.f32 %v25077_v25, %v15547_v48  ;;  %v25204_v3 = vld [vmem:[#allocation2 + $0x170] sm:$0xff] }
 0x728   : > { %20369 = vmatprep.mubr.msk.bf16.mxu0 %vm470_vm1, %v15913_v58  ;;  %v15610_v58 = vadd.f32 %v25075_v7, %v15546_v34  ;;  %v25868_v14 = vpack.c.bf16 %v24863_v36, %v24859_v15  ;;  %v15891_v59 = vmul.f32 0.11111111, %v15859_v35  ;;  %v15892_v44 = vmul.f32 0.11111111, %v15860_v57 }
 0x729   : > { %v15486_v41 = vadd.f32 %v25170_v42, %v15422_v18  ;;  %v15487_v4 = vadd.f32 %v25172_v29, %v15423_v27  ;;  %v15612_v49 = vadd.f32 %v25138_v55, %v15548_v23  ;;  %v15613_v60 = vadd.f32 %v25140_v6, %v15549_v54  ;;  %v25231_v27 = vld [vmem:[#allocation2 + $0x16a] sm:$0xff] }
 0x72a   : > { %v15488_v15 = vadd.f32 %v25184_v30, %v15424_v13  ;;  %v15489_v36 = vadd.f32 %v25186_v22, %v15425_v51  ;;  %v15893_v35 = vmul.f32 0.11111111, %v15861_v16  ;;  %v15894_v39 = vmul.f32 0.11111111, %v15862_v56 }
 0x72b   : > { %19596 = vmatmul.mubr.msk.bf16.gmra.mrb[40].mxu1 %vm516_vm3, %v25867_v24  ;;  %v15799_v53 = vadd.f32 %v25061_v46, %v15735_v11  ;;  %v15800_v9 = vadd.f32 %v25063_v8, %v15736_v31  ;;  %v15801_v52 = vadd.f32 %v25075_v7, %v15737_v40  ;;  %v15802_v17 = vadd.f32 %v25077_v25, %v15738_v43  ;;  %v15713_v43 = vld [vmem:[#allocation2 + $0x180] sm:$0xff] }
 0x72c   : > { %19599 = vmatprep.mubr.msk.bf16.mxu1 %vm516_vm3, %v25868_v14  ;;  %v15674_v34 = vadd.f32 %v25108_v19, %v15610_v58  ;;  %v15675_v48 = vadd.f32 %v25110_v21, %v15611_v38  ;;  %v15550_v57 = vadd.f32 %v25161_v45, %v15486_v41  ;;  %v15551_v18 = vadd.f32 %v25163_v26, %v15487_v4 }
 0x72d   : > { %v15426_v46 = vadd.f32 %v25206_v47, %v25200_v12  ;;  %v15427_v8 = vadd.f32 %v25208_v32, %v25204_v3  ;;  %v15676_v7 = vadd.f32 %v25170_v42, %v15612_v49  ;;  %v15677_v25 = vadd.f32 %v25172_v29, %v15613_v60 }
 0x72e   : > { %v15552_v33 = vadd.f32 %v25200_v12, %v15488_v15  ;;  %v15916_v23 = vpack.c.bf16 %v15892_v44, %v15891_v59  ;;  %v15917_v54 = vpack.c.bf16 %v15894_v39, %v15893_v35  ;;  %v15863_v13 = vadd.f32 %v25079_v37, %v15799_v53 }
 0x72f   : > { %20370 = vmatmul.mubr.msk.bf16.gmra.mrb[184].mxu0 %vm470_vm1, %v15914_v10  ;;  %v15553_v10 = vadd.f32 %v25204_v3, %v15489_v36  ;;  %v15864_v51 = vadd.f32 %v25096_v20, %v15800_v9  ;;  %v15865_v56 = vadd.f32 %v25108_v19, %v15801_v52  ;;  %v15866_v11 = vadd.f32 %v25110_v21, %v15802_v17  ;;  %v15777_v36 = vld [vmem:[#allocation2 + $0x181] sm:$0xff] }
 0x730   : > { %20373 = vmatprep.mubr.msk.bf16.mxu0 %vm470_vm1, %v15915_v5  ;;  %v25869_v5 = vld [vmem:[#allocation59_spill] sm:$0xff]  ;;  %v15739_v31 = vadd.f32 %v25131_v50, %v15674_v34  ;;  %v15740_v1 = vadd.f32 %v25136_v2, %v15675_v48  ;;  %v15614_v28 = vadd.f32 %v25148_v63, %v15550_v57  ;;  %v15615_v24 = vadd.f32 %v25150_v62, %v15551_v18  ;;  %v15714_v50 = vld [vmem:[#allocation2 + $0x188] sm:$0xff] }
 0x731   : > { %v25870_v16 = vpack.c.bf16 %v24897_v61, %v25869_v5  ;;  %v15490_v37 = vadd.f32 %v25231_v27, %v15426_v46  ;;  %v15491_v20 = vadd.f32 %v25233_v0, %v15427_v8  ;;  %v15741_v61 = vadd.f32 %v25161_v45, %v15676_v7  ;;  %v15841_v46 = vld [vmem:[#allocation2 + $0x182] sm:$0xff]  ;;  %v15842_v8 = vld [vmem:[#allocation2 + $0x18a] sm:$0xff] }
 0x732   : > { %v15742_v40 = vadd.f32 %v25163_v26, %v15677_v25  ;;  %v15616_v19 = vadd.f32 %v25206_v47, %v15552_v33  ;;  %v15617_v21 = vadd.f32 %v25208_v32, %v15553_v10  ;;  %v15895_v58 = vmul.f32 0.11111111, %v15863_v13 }
 0x733   : > { %19600 = vmatmul.mubr.msk.bf16.gmra.mrb[44].mxu1 %vm516_vm3, %v25870_v16  ;;  %v15896_v2 = vmul.f32 0.11111111, %v15864_v51  ;;  %v15897_v38 = vmul.f32 0.11111111, %v15865_v56  ;;  %v15898_v14 = vmul.f32 0.11111111, %v15866_v11  ;;  %v15803_v59 = vadd.f32 %v25138_v55, %v15739_v31 }
 0x734   : > { %v15804_v44 = vadd.f32 %v25140_v6, %v15740_v1  ;;  %v15678_v45 = vadd.f32 %v25184_v30, %v15614_v28  ;;  %v15679_v26 = vadd.f32 %v25186_v22, %v15615_v24  ;;  %v15554_v41 = vadd.f32 %v15713_v43, %v15490_v37  ;;  %v15778_v6 = vld [vmem:[#allocation2 + $0x189] sm:$0xff]  ;;  %v15779_v31 = vld [vmem:[#allocation2 + $0x199] sm:$0xff]  ;;  %v15780_v1 = vld [vmem:[#allocation2 + $0x1a1] sm:$0xff] }
 0x735   : > { %v15555_v4 = vadd.f32 %v15714_v50, %v15491_v20  ;;  %v15805_v49 = vadd.f32 %v25148_v63, %v15741_v61  ;;  %v15806_v60 = vadd.f32 %v25150_v62, %v15742_v40  ;;  %v15680_v15 = vadd.f32 %v25231_v27, %v15616_v19  ;;  %v15844_v19 = vld [vmem:[#allocation2 + $0x1a2] sm:$0xff] }
 0x736   : > { %v15681_v55 = vadd.f32 %v25233_v0, %v15617_v21  ;;  %v15918_v35 = vpack.c.bf16 %v15896_v2, %v15895_v58  ;;  %v15919_v39 = vpack.c.bf16 %v15898_v14, %v15897_v38  ;;  %v15867_v53 = vadd.f32 %v25170_v42, %v15803_v59  ;;  %v25285_v14 = vld [vmem:[%s25770_s10] ss:$0 sm:$0xff] }
 0x737   : > { %20374 = vmatmul.mubr.msk.bf16.gmra.mrb[188].mxu0 %vm470_vm1, %v15916_v23  ;;  %v15868_v9 = vadd.f32 %v25172_v29, %v15804_v44  ;;  %v15743_v52 = vadd.f32 %v25200_v12, %v15678_v45  ;;  %v15744_v17 = vadd.f32 %v25204_v3, %v15679_v26  ;;  %v15618_v34 = vadd.f32 %v15777_v36, %v15554_v41  ;;  %v15715_v23 = vld [vmem:[#allocation2 + $0x198] sm:$0xff] }
 0x738   : > { %20377 = vmatprep.mubr.msk.bf16.mxu0 %vm470_vm1, %v15917_v54  ;;  %v15619_v63 = vadd.f32 %v15778_v6, %v15555_v4  ;;  %v15869_v62 = vadd.f32 %v25184_v30, %v15805_v49  ;;  %v15870_v48 = vadd.f32 %v25186_v22, %v15806_v60  ;;  %v15745_v57 = vadd.f32 %v15713_v43, %v15680_v15  ;;  %v15716_v54 = vld [vmem:[#allocation2 + $0x1a0] sm:$0xff] }
 0x739   : > { %v15746_v18 = vadd.f32 %v15714_v50, %v15681_v55  ;;  %v15899_v7 = vmul.f32 0.11111111, %v15867_v53  ;;  %v15900_v25 = vmul.f32 0.11111111, %v15868_v9  ;;  %v15807_v42 = vadd.f32 %v25206_v47, %v15743_v52 }
 0x73a   : > { %v15808_v29 = vadd.f32 %v25208_v32, %v15744_v17  ;;  %v15682_v12 = vadd.f32 %v15841_v46, %v15618_v34  ;;  %v15683_v3 = vadd.f32 %v15842_v8, %v15619_v63  ;;  %v15901_v33 = vmul.f32 0.11111111, %v15869_v62 }
 0x73b   : > { %v15902_v30 = vmul.f32 0.11111111, %v15870_v48  ;;  %v15809_v10 = vadd.f32 %v15777_v36, %v15745_v57  ;;  %v15810_v22 = vadd.f32 %v15778_v6, %v15746_v18  ;;  %v15920_v13 = vpack.c.bf16 %v15900_v25, %v15899_v7 }
 0x73c   : > { %v15871_v51 = vadd.f32 %v25231_v27, %v15807_v42  ;;  %v15872_v5 = vadd.f32 %v25233_v0, %v15808_v29  ;;  %v15747_v16 = vadd.f32 %v15715_v23, %v15682_v12  ;;  %v15748_v56 = vadd.f32 %v15716_v54, %v15683_v3  ;;  %v15843_v27 = vld [vmem:[#allocation2 + $0x19a] sm:$0xff] }
 0x73d   : > { %v15921_v47 = vpack.c.bf16 %v15902_v30, %v15901_v33  ;;  %v15873_v11 = vadd.f32 %v15841_v46, %v15809_v10  ;;  %v15874_v32 = vadd.f32 %v15842_v8, %v15810_v22 }
 0x73e   : > { %v15903_v28 = vmul.f32 0.11111111, %v15871_v51  ;;  %v15904_v24 = vmul.f32 0.11111111, %v15872_v5  ;;  %v15811_v37 = vadd.f32 %v15779_v31, %v15747_v16  ;;  %v15812_v20 = vadd.f32 %v15780_v1, %v15748_v56  ;;  %v25871_v1 = vld [vmem:[#allocation21_spill] sm:$0xff] }
 0x73f   : > { %20378 = vmatmul.mubr.msk.bf16.gmra.mrb[192].mxu0 %vm470_vm1, %v15918_v35  ;;  %v15905_v61 = vmul.f32 0.11111111, %v15873_v11  ;;  %v15906_v40 = vmul.f32 0.11111111, %v15874_v32  ;;  %v25329_v32 = vld [vmem:[%s25766_s6] ss:$0 sm:$0xff] }
 0x740   : > { %20381 = vmatprep.mubr.msk.bf16.mxu0 %vm470_vm1, %v15919_v39  ;;  %v15922_v0 = vpack.c.bf16 %v15904_v24, %v15903_v28  ;;  %v15875_v21 = vadd.f32 %v15843_v27, %v15811_v37  ;;  %v15876_v43 = vadd.f32 %v15844_v19, %v15812_v20 }
 0x741   : > { %v15923_v50 = vpack.c.bf16 %v15906_v40, %v15905_v61  ;;  %v25872_v61 = vld [vmem:[#allocation22_spill] sm:$0xff] }
 0x742   : > { %v15907_v58 = vmul.f32 0.11111111, %v15875_v21  ;;  %v15908_v2 = vmul.f32 0.11111111, %v15876_v43 }
 0x744   : > { %v15924_v38 = vpack.c.bf16 %v15908_v2, %v15907_v58  ;;  %v25874_v58 = vld [vmem:[#allocation24_spill] sm:$0xff] }
 0x747   : > { %20382 = vmatmul.mubr.msk.bf16.gmra.mrb[196].mxu0 %vm470_vm1, %v15920_v13 }
 0x748   : > { %20385 = vmatprep.mubr.msk.bf16.mxu0 %vm470_vm1, %v15921_v47 }
 0x74f   : > { %20386 = vmatmul.mubr.msk.bf16.gmra.mrb[200].mxu0 %vm470_vm1, %v15922_v0  ;;  %v25873_v0 = vld [vmem:[#allocation23_spill] sm:$0xff] }
 0x750   : > { %20389 = vmatprep.mubr.msk.bf16.mxu0 %vm470_vm1, %v15923_v50 }
 0x757   : > { %20390 = vmatmul.mubr.msk.bf16.gmra.mrb[204].mxu0 %vm470_vm1, %v15924_v38 }
 0x7b2   : > { %v20329_v59 = vpop.f32.mrb[144].mxu0 }
 0x7b3   : > { %v15238_v44 = vadd.f32 %v20329_v59, %v25285_v14  ;;  %v15070_v45 = vpop.f32.mrb[145].mxu0 }
 0x7b4   : > { %v15236_v26 = vadd.f32 %v25285_v14, %v15070_v45  ;;  %v20330_v41 = vpop.f32.mrb[146].mxu0 }
 0x7b5   : > { %v15270_v4 = vmax.f32 %v15238_v44, 0.0  ;;  %v15239_v49 = vadd.f32 %v20330_v41, %v25285_v14  ;;  %v15073_v60 = vpop.f32.mrb[147].mxu0 }
 0x7b6   : > { %v15268_v15 = vmax.f32 %v15236_v26, 0.0  ;;  %v15237_v55 = vadd.f32 %v25285_v14, %v15073_v60 }
 0x7b7   : > { %16372 = vst.msk [vmem:[%s22671_s16 + $0x28] sm:$0xff] %vm618_vm8, %v15270_v4  ;;  %v15271_v36 = vmax.f32 %v15239_v49, 0.0 }
 0x7b8   : > { %16370 = vst.msk [vmem:[%s22671_s16 + $0x8] sm:$0xff] %vm618_vm8, %v15268_v15  ;;  %v15269_v6 = vmax.f32 %v15237_v55, 0.0 }
 0x7b9   : > { %16373 = vst.msk [vmem:[%s22671_s16 + $0x38] sm:$0xff] %vm618_vm8, %v15271_v36 }
 0x7ba   : > { %16371 = vst.msk [vmem:[%s22671_s16 + $0x18] sm:$0xff] %vm618_vm8, %v15269_v6  ;;  %v20333_v35 = vpop.f32.mrb[148].mxu0 }
 0x7bb   : > { %v15242_v39 = vadd.f32 %v20333_v35, %v25285_v14  ;;  %v15086_v53 = vpop.f32.mrb[149].mxu0 }
 0x7bc   : > { %v15240_v9 = vadd.f32 %v25285_v14, %v15086_v53  ;;  %v20334_v52 = vpop.f32.mrb[150].mxu0 }
 0x7bd   : > { %v15274_v17 = vmax.f32 %v15242_v39, 0.0  ;;  %v15243_v34 = vadd.f32 %v20334_v52, %v25285_v14  ;;  %v15089_v63 = vpop.f32.mrb[151].mxu0 }
 0x7be   : > { %v15272_v62 = vmax.f32 %v15240_v9, 0.0  ;;  %v15241_v48 = vadd.f32 %v25285_v14, %v15089_v63  ;;  %v25875_v9 = vld [vmem:[#allocation25_spill] sm:$0xff] }
 0x7bf   : > { %16376 = vst.msk [vmem:[%s22671_s16 + $0x68] sm:$0xff] %vm618_vm8, %v15274_v17  ;;  %v15275_v57 = vmax.f32 %v15243_v34, 0.0 }
 0x7c0   : > { %16374 = vst.msk [vmem:[%s22671_s16 + $0x48] sm:$0xff] %vm618_vm8, %v15272_v62  ;;  %v15273_v18 = vmax.f32 %v15241_v48, 0.0  ;;  %v25876_v48 = vld [vmem:[#allocation26_spill] sm:$0xff] }
 0x7c1   : > { %16377 = vst.msk [vmem:[%s22671_s16 + $0x78] sm:$0xff] %vm618_vm8, %v15275_v57 }
 0x7c2   : > { %16375 = vst.msk [vmem:[%s22671_s16 + $0x58] sm:$0xff] %vm618_vm8, %v15273_v18  ;;  %v20337_v46 = vpop.f32.mrb[152].mxu0 }
 0x7c3   : > { %v15246_v8 = vadd.f32 %v20337_v46, %v25285_v14  ;;  %v15102_v7 = vpop.f32.mrb[153].mxu0 }
 0x7c4   : > { %v15244_v25 = vadd.f32 %v25285_v14, %v15102_v7  ;;  %v20338_v42 = vpop.f32.mrb[154].mxu0  ;;  %v25877_v7 = vld [vmem:[#allocation27_spill] sm:$0xff] }
 0x7c5   : > { %v15278_v29 = vmax.f32 %v15246_v8, 0.0  ;;  %v15247_v12 = vadd.f32 %v20338_v42, %v25285_v14  ;;  %v15105_v3 = vpop.f32.mrb[155].mxu0 }
 0x7c6   : > { %v15276_v33 = vmax.f32 %v15244_v25, 0.0  ;;  %v15245_v30 = vadd.f32 %v25285_v14, %v15105_v3 }
 0x7c7   : > { %16380 = vst.msk [vmem:[%s22671_s16 + $0xa8] sm:$0xff] %vm618_vm8, %v15278_v29  ;;  %v15279_v10 = vmax.f32 %v15247_v12, 0.0  ;;  %v25878_v29 = vld [vmem:[#allocation28_spill] sm:$0xff] }
 0x7c8   : > { %16378 = vst.msk [vmem:[%s22671_s16 + $0x88] sm:$0xff] %vm618_vm8, %v15276_v33  ;;  %v15277_v22 = vmax.f32 %v15245_v30, 0.0 }
 0x7c9   : > { %16381 = vst.msk [vmem:[%s22671_s16 + $0xb8] sm:$0xff] %vm618_vm8, %v15279_v10 }
 0x7ca   : > { %16379 = vst.msk [vmem:[%s22671_s16 + $0x98] sm:$0xff] %vm618_vm8, %v15277_v22  ;;  %v20341_v23 = vpop.f32.mrb[156].mxu0 }
 0x7cb   : > { %v15250_v54 = vadd.f32 %v20341_v23, %v25285_v14  ;;  %v15118_v13 = vpop.f32.mrb[157].mxu0 }
 0x7cc   : > { %v15248_v51 = vadd.f32 %v25285_v14, %v15118_v13  ;;  %v20342_v5 = vpop.f32.mrb[158].mxu0 }
 0x7cd   : > { %v15282_v16 = vmax.f32 %v15250_v54, 0.0  ;;  %v15251_v56 = vadd.f32 %v20342_v5, %v25285_v14  ;;  %v15121_v11 = vpop.f32.mrb[159].mxu0 }
 0x7ce   : > { %v19573_v47 = vpop.f32.mrb[16].mxu1  ;;  %v15280_v31 = vmax.f32 %v15248_v51, 0.0  ;;  %v15249_v24 = vadd.f32 %v25285_v14, %v15121_v11 }
 0x7cf   : > { %v20395_v28 = vadd.f32 %v19573_v47, %v25871_v1  ;;  %v9083_v37 = vpop.f32.mrb[17].mxu1  ;;  %16384 = vst.msk [vmem:[%s22671_s16 + $0xe8] sm:$0xff] %vm618_vm8, %v15282_v16  ;;  %v15283_v20 = vmax.f32 %v15251_v56, 0.0  ;;  %v25879_v1 = vld [vmem:[#allocation29_spill] sm:$0xff] }
 0x7d0   : > { %v20396_v40 = vadd.f32 %v9083_v37, %v25872_v61  ;;  %v19574_v27 = vpop.f32.mrb[18].mxu1  ;;  %16382 = vst.msk [vmem:[%s22671_s16 + $0xc8] sm:$0xff] %vm618_vm8, %v15280_v31  ;;  %v15281_v19 = vmax.f32 %v15249_v24, 0.0 }
 0x7d1   : > { %v20397_v21 = vadd.f32 %v19574_v27, %v25873_v0  ;;  %v9086_v43 = vpop.f32.mrb[19].mxu1  ;;  %v9251_v50 = vadd.f32 %v20395_v28, %v25329_v32  ;;  %16385 = vst.msk [vmem:[%s22671_s16 + $0xf8] sm:$0xff] %vm618_vm8, %v15283_v20 }
 0x7d2   : > { %v20398_v2 = vadd.f32 %v9086_v43, %v25874_v58  ;;  %v9249_v38 = vadd.f32 %v20396_v40, %v25329_v32  ;;  %16383 = vst.msk [vmem:[%s22671_s16 + $0xd8] sm:$0xff] %vm618_vm8, %v15281_v19  ;;  %v20345_v44 = vpop.f32.mrb[160].mxu0  ;;  %v25880_v40 = vld [vmem:[#allocation30_spill] sm:$0xff] }
 0x7d3   : > { %v9252_v59 = vadd.f32 %v20397_v21, %v25329_v32  ;;  %v9283_v45 = vmax.f32 %v9251_v50, 0.0  ;;  %v15254_v41 = vadd.f32 %v20345_v44, %v25285_v14  ;;  %v15134_v4 = vpop.f32.mrb[161].mxu0  ;;  %v25881_v50 = vld [vmem:[#allocation31_spill] sm:$0xff] }
 0x7d4   : > { %v9250_v26 = vadd.f32 %v20398_v2, %v25329_v32  ;;  %v9281_v49 = vmax.f32 %v9249_v38, 0.0  ;;  %v15252_v60 = vadd.f32 %v25285_v14, %v15134_v4  ;;  %v20346_v15 = vpop.f32.mrb[162].mxu0  ;;  %v25882_v38 = vld [vmem:[#allocation32_spill] sm:$0xff] }
 0x7d5   : > { %16245 = vrot.lane.b32.xlu1 %v9283_v45, %s22048_s25  ;;  %v15286_v55 = vmax.f32 %v15254_v41, 0.0  ;;  %v15255_v36 = vadd.f32 %v20346_v15, %v25285_v14  ;;  %v15137_v35 = vpop.f32.mrb[163].mxu0  ;;  %v9284_v39 = vmax.f32 %v9252_v59, 0.0 }
 0x7d6   : > { %v19577_v6 = vpop.f32.mrb[20].mxu1  ;;  %16241 = vrot.lane.b32.xlu0 %v9281_v49, %s22048_s25  ;;  %v15284_v53 = vmax.f32 %v15252_v60, 0.0  ;;  %v15253_v17 = vadd.f32 %v25285_v14, %v15137_v35  ;;  %v9282_v63 = vmax.f32 %v9250_v26, 0.0 }
 0x7d7   : > { %v20399_v52 = vadd.f32 %v19577_v6, %v25875_v9  ;;  %v9099_v34 = vpop.f32.mrb[21].mxu1  ;;  %16388 = vst.msk [vmem:[%s22671_s16 + $0x128] sm:$0xff] %vm618_vm8, %v15286_v55  ;;  %v15287_v62 = vmax.f32 %v15255_v36, 0.0 }
 0x7d8   : > { %v20400_v57 = vadd.f32 %v9099_v34, %v25876_v48  ;;  %v19578_v18 = vpop.f32.mrb[22].mxu1  ;;  %16386 = vst.msk [vmem:[%s22671_s16 + $0x108] sm:$0xff] %vm618_vm8, %v15284_v53  ;;  %v15285_v8 = vmax.f32 %v15253_v17, 0.0 }
 0x7d9   : > { %v9255_v46 = vadd.f32 %v20399_v52, %v25329_v32  ;;  %v20401_v25 = vadd.f32 %v19578_v18, %v25877_v7  ;;  %v9102_v42 = vpop.f32.mrb[23].mxu1  ;;  %16247 = vrot.lane.b32.xlu1 %v9284_v39, %s22048_s25  ;;  %16389 = vst.msk [vmem:[%s22671_s16 + $0x138] sm:$0xff] %vm618_vm8, %v15287_v62  ;;  %v25883_v52 = vld [vmem:[#allocation33_spill] sm:$0xff] }
 0x7da   : > { %v20402_v12 = vadd.f32 %v9102_v42, %v25878_v29  ;;  %16243 = vrot.lane.b32.xlu0 %v9282_v63, %s22048_s25  ;;  %16387 = vst.msk [vmem:[%s22671_s16 + $0x118] sm:$0xff] %vm618_vm8, %v15285_v8  ;;  %v20349_v30 = vpop.f32.mrb[164].mxu0  ;;  %v9253_v10 = vadd.f32 %v20400_v57, %v25329_v32  ;;  %v25884_v57 = vld [vmem:[#allocation34_spill] sm:$0xff]  ;;  %v25885_v42 = vld [vmem:[#allocation35_spill] sm:$0xff] }
 0x7db   : > { %v9287_v3 = vmax.f32 %v9255_v46, 0.0  ;;  %v9256_v33 = vadd.f32 %v20401_v25, %v25329_v32  ;;  %v15258_v22 = vadd.f32 %v20349_v30, %v25285_v14  ;;  %v15150_v23 = vpop.f32.mrb[165].mxu0 }
 0x7dc   : > { %v9254_v13 = vadd.f32 %v20402_v12, %v25329_v32  ;;  %v15256_v51 = vadd.f32 %v25285_v14, %v15150_v23  ;;  %v20350_v5 = vpop.f32.mrb[166].mxu0  ;;  %v9285_v20 = vmax.f32 %v9253_v10, 0.0 }
 0x7dd   : > { %v9288_v54 = vmax.f32 %v9256_v33, 0.0  ;;  %v15290_v16 = vmax.f32 %v15258_v22, 0.0  ;;  %v15259_v56 = vadd.f32 %v20350_v5, %v25285_v14  ;;  %v15153_v11 = vpop.f32.mrb[167].mxu0 }
 0x7de   : > { %v19581_v47 = vpop.f32.mrb[24].mxu1  ;;  %16253 = vrot.lane.b32.xlu0 %v9287_v3, %s22048_s25  ;;  %v15288_v31 = vmax.f32 %v15256_v51, 0.0  ;;  %v15257_v24 = vadd.f32 %v25285_v14, %v15153_v11  ;;  %v9286_v0 = vmax.f32 %v9254_v13, 0.0  ;;  %v25886_v3 = vld [vmem:[#allocation36_spill] sm:$0xff] }
 0x7df   : > { %v20403_v28 = vadd.f32 %v19581_v47, %v25879_v1  ;;  %v9115_v37 = vpop.f32.mrb[25].mxu1  ;;  %16255 = vrot.lane.b32.xlu1 %v9288_v54, %s22048_s25  ;;  %16392 = vst.msk [vmem:[%s22671_s16 + $0x168] sm:$0xff] %vm618_vm8, %v15290_v16  ;;  %v15291_v61 = vmax.f32 %v15259_v56, 0.0 }
 0x7e0   : > { %v20404_v27 = vadd.f32 %v9115_v37, %v25880_v40  ;;  %v19582_v19 = vpop.f32.mrb[26].mxu1  ;;  %16390 = vst.msk [vmem:[%s22671_s16 + $0x148] sm:$0xff] %vm618_vm8, %v15288_v31  ;;  %v15289_v43 = vmax.f32 %v15257_v24, 0.0  ;;  %v25887_v24 = vld [vmem:[#allocation37_spill] sm:$0xff] }
 0x7e1   : > { %v9259_v21 = vadd.f32 %v20403_v28, %v25329_v32  ;;  %v20405_v58 = vadd.f32 %v19582_v19, %v25881_v50  ;;  %v9118_v2 = vpop.f32.mrb[27].mxu1  ;;  %16393 = vst.msk [vmem:[%s22671_s16 + $0x178] sm:$0xff] %vm618_vm8, %v15291_v61  ;;  %v25888_v19 = vld [vmem:[#allocation38_spill] sm:$0xff] }
 0x7e2   : > { %v20406_v59 = vadd.f32 %v9118_v2, %v25882_v38  ;;  %16249 = vrot.lane.b32.xlu0 %v9285_v20, %s22048_s25  ;;  %16391 = vst.msk [vmem:[%s22671_s16 + $0x158] sm:$0xff] %vm618_vm8, %v15289_v43  ;;  %v20353_v26 = vpop.f32.mrb[168].mxu0  ;;  %v9257_v41 = vadd.f32 %v20404_v27, %v25329_v32  ;;  %v25889_v2 = vld [vmem:[#allocation39_spill] sm:$0xff] }
 0x7e3   : > { %v9291_v44 = vmax.f32 %v9259_v21, 0.0  ;;  %v9260_v45 = vadd.f32 %v20405_v58, %v25329_v32  ;;  %16251 = vrot.lane.b32.xlu1 %v9286_v0, %s22048_s25  ;;  %v15262_v4 = vadd.f32 %v20353_v26, %v25285_v14  ;;  %v15166_v49 = vpop.f32.mrb[169].mxu0 }
 0x7e4   : > { %v9258_v15 = vadd.f32 %v20406_v59, %v25329_v32  ;;  %v15260_v55 = vadd.f32 %v25285_v14, %v15166_v49  ;;  %v20354_v36 = vpop.f32.mrb[170].mxu0  ;;  %v9289_v62 = vmax.f32 %v9257_v41, 0.0  ;;  %v25890_v59 = vld [vmem:[#allocation40_spill] sm:$0xff] }
 0x7e5   : > { %v9292_v60 = vmax.f32 %v9260_v45, 0.0  ;;  %v15294_v6 = vmax.f32 %v15262_v4, 0.0  ;;  %v15263_v35 = vadd.f32 %v20354_v36, %v25285_v14  ;;  %v15169_v53 = vpop.f32.mrb[171].mxu0  ;;  %v25445_v4 = vld [vmem:[%s25772_s12] ss:$0 sm:$0xff] }
 0x7e6   : > { %v19585_v39 = vpop.f32.mrb[28].mxu1  ;;  %16261 = vrot.lane.b32.xlu0 %v9291_v44, %s22048_s25  ;;  %v15292_v9 = vmax.f32 %v15260_v55, 0.0  ;;  %v15261_v34 = vadd.f32 %v25285_v14, %v15169_v53  ;;  %v9290_v8 = vmax.f32 %v9258_v15, 0.0  ;;  %v25891_v53 = vld [vmem:[#allocation41_spill] sm:$0xff] }
 0x7e7   : > { %v20407_v17 = vadd.f32 %v19585_v39, %v25883_v52  ;;  %v9131_v63 = vpop.f32.mrb[29].mxu1  ;;  %16263 = vrot.lane.b32.xlu1 %v9292_v60, %s22048_s25  ;;  %16396 = vst.msk [vmem:[%s22671_s16 + $0x1a8] sm:$0xff] %vm618_vm8, %v15294_v6  ;;  %v15295_v48 = vmax.f32 %v15263_v35, 0.0 }
 0x7e8   : > { %v20408_v18 = vadd.f32 %v9131_v63, %v25884_v57  ;;  %v19586_v46 = vpop.f32.mrb[30].mxu1  ;;  %16394 = vst.msk [vmem:[%s22671_s16 + $0x188] sm:$0xff] %vm618_vm8, %v15292_v9  ;;  %v15293_v25 = vmax.f32 %v15261_v34, 0.0  ;;  %v25892_v34 = vld [vmem:[#allocation42_spill] sm:$0xff] }
 0x7e9   : > { %v9263_v7 = vadd.f32 %v20407_v17, %v25329_v32  ;;  %v20409_v29 = vadd.f32 %v19586_v46, %v25885_v42  ;;  %v9134_v12 = vpop.f32.mrb[31].mxu1  ;;  %16397 = vst.msk [vmem:[%s22671_s16 + $0x1b8] sm:$0xff] %vm618_vm8, %v15295_v48 }
 0x7ea   : > { %v20410_v33 = vadd.f32 %v9134_v12, %v25886_v3  ;;  %16257 = vrot.lane.b32.xlu0 %v9289_v62, %s22048_s25  ;;  %16395 = vst.msk [vmem:[%s22671_s16 + $0x198] sm:$0xff] %vm618_vm8, %v15293_v25  ;;  %v20357_v22 = vpop.f32.mrb[172].mxu0  ;;  %v9261_v23 = vadd.f32 %v20408_v18, %v25329_v32  ;;  %v25893_v18 = vld [vmem:[#allocation43_spill] sm:$0xff]  ;;  %v25894_v25 = vld [vmem:[#allocation44_spill] sm:$0xff] }
 0x7eb   : > { %v9295_v30 = vmax.f32 %v9263_v7, 0.0  ;;  %v9264_v10 = vadd.f32 %v20409_v29, %v25329_v32  ;;  %16259 = vrot.lane.b32.xlu1 %v9290_v8, %s22048_s25  ;;  %v15266_v54 = vadd.f32 %v20357_v22, %v25285_v14  ;;  %v15182_v13 = vpop.f32.mrb[173].mxu0 }
 0x7ec   : > { %v9262_v5 = vadd.f32 %v20410_v33, %v25329_v32  ;;  %v15264_v16 = vadd.f32 %v25285_v14, %v15182_v13  ;;  %v20358_v56 = vpop.f32.mrb[174].mxu0  ;;  %v9293_v40 = vmax.f32 %v9261_v23, 0.0 }
 0x7ed   : > { %v9296_v51 = vmax.f32 %v9264_v10, 0.0  ;;  %v15298_v47 = vmax.f32 %v15266_v54, 0.0  ;;  %v15267_v11 = vadd.f32 %v20358_v56, %v25285_v14  ;;  %v15185_v1 = vpop.f32.mrb[175].mxu0  ;;  %v25895_v54 = vld [vmem:[#allocation45_spill] sm:$0xff]  ;;  %v25896_v56 = vld [vmem:[#allocation46_spill] sm:$0xff] }
 0x7ee   : > { %v19589_v31 = vpop.f32.mrb[32].mxu1  ;;  %16269 = vrot.lane.b32.xlu0 %v9295_v30, %s22048_s25  ;;  %v15296_v28 = vmax.f32 %v15264_v16, 0.0  ;;  %v15265_v20 = vadd.f32 %v25285_v14, %v15185_v1  ;;  %v9294_v43 = vmax.f32 %v9262_v5, 0.0 }
 0x7ef   : > { %v20411_v37 = vadd.f32 %v19589_v31, %v25887_v24  ;;  %v9147_v61 = vpop.f32.mrb[33].mxu1  ;;  %16271 = vrot.lane.b32.xlu1 %v9296_v51, %s22048_s25  ;;  %16400 = vst.msk [vmem:[%s22671_s16 + $0x1e8] sm:$0xff] %vm618_vm8, %v15298_v47  ;;  %v15299_v27 = vmax.f32 %v15267_v11, 0.0  ;;  %v25897_v24 = vld [vmem:[#allocation47_spill] sm:$0xff] }
 0x7f0   : > { %v20412_v0 = vadd.f32 %v9147_v61, %v25888_v19  ;;  %v19590_v21 = vpop.f32.mrb[34].mxu1  ;;  %16398 = vst.msk [vmem:[%s22671_s16 + $0x1c8] sm:$0xff] %vm618_vm8, %v15296_v28  ;;  %v15297_v58 = vmax.f32 %v15265_v20, 0.0 }
 0x7f1   : > { %v9267_v50 = vadd.f32 %v20411_v37, %v25329_v32  ;;  %v20413_v38 = vadd.f32 %v19590_v21, %v25889_v2  ;;  %v9150_v14 = vpop.f32.mrb[35].mxu1  ;;  %16401 = vst.msk [vmem:[%s22671_s16 + $0x1f8] sm:$0xff] %vm618_vm8, %v15299_v27 }
 0x7f2   : > { %v20414_v44 = vadd.f32 %v9150_v14, %v25890_v59  ;;  %16265 = vrot.lane.b32.xlu0 %v9293_v40, %s22048_s25  ;;  %16399 = vst.msk [vmem:[%s22671_s16 + $0x1d8] sm:$0xff] %vm618_vm8, %v15297_v58  ;;  %v20363_v41 = vpop.f32.mrb[176].mxu0  ;;  %v9265_v49 = vadd.f32 %v20412_v0, %v25329_v32  ;;  %v25898_v40 = vld [vmem:[#allocation48_spill] sm:$0xff] }
 0x7f3   : > { %v9299_v45 = vmax.f32 %v9267_v50, 0.0  ;;  %v9268_v26 = vadd.f32 %v20413_v38, %v25329_v32  ;;  %16267 = vrot.lane.b32.xlu1 %v9294_v43, %s22048_s25  ;;  %v16018_v60 = vpop.f32.mrb[177].mxu0  ;;  %v16027_v6 = vadd.f32 %v20363_v41, %v25445_v4 }
 0x7f4   : > { %v9266_v55 = vadd.f32 %v20414_v44, %v25329_v32  ;;  %v20364_v36 = vpop.f32.mrb[178].mxu0  ;;  %v9297_v17 = vmax.f32 %v9265_v49, 0.0  ;;  %v16019_v12 = vadd.f32 %v25445_v4, %v16018_v60 }
 0x7f5   : > { %v9300_v15 = vmax.f32 %v9268_v26, 0.0  ;;  %v16021_v39 = vpop.f32.mrb[179].mxu0  ;;  %v16030_v57 = vadd.f32 %v20364_v36, %v25445_v4  ;;  %v16147_v7 = vmax.f32 %v16027_v6, 0.0  ;;  %v25899_v26 = vld [vmem:[#allocation49_spill] sm:$0xff] }
 0x7f6   : > { %v19593_v35 = vpop.f32.mrb[36].mxu1  ;;  %16277 = vrot.lane.b32.xlu0 %v9299_v45, %s22048_s25  ;;  %v9298_v48 = vmax.f32 %v9266_v55, 0.0  ;;  %v16022_v30 = vadd.f32 %v25445_v4, %v16021_v39  ;;  %v16145_v16 = vmax.f32 %v16019_v12, 0.0 }
 0x7f7   : > { %v20415_v9 = vadd.f32 %v19593_v35, %v25891_v53  ;;  %v9163_v52 = vpop.f32.mrb[37].mxu1  ;;  %16279 = vrot.lane.b32.xlu1 %v9300_v15, %s22048_s25  ;;  %v16148_v33 = vmax.f32 %v16030_v57, 0.0  ;;  %v25900_v15 = vld [vmem:[#allocation50_spill] sm:$0xff]  ;;  %v25901_v53 = vld [vmem:[#allocation51_spill] sm:$0xff] }
 0x7f8   : > { %v20416_v63 = vadd.f32 %v9163_v52, %v25892_v34  ;;  %v19594_v62 = vpop.f32.mrb[38].mxu1  ;;  %v16146_v1 = vmax.f32 %v16022_v30, 0.0 }
 0x7f9   : > { %v20417_v46 = vadd.f32 %v19594_v62, %v25893_v18  ;;  %v9166_v8 = vpop.f32.mrb[39].mxu1  ;;  %v9271_v5 = vadd.f32 %v20415_v9, %v25329_v32 }
 0x7fa   : > { %v20418_v42 = vadd.f32 %v9166_v8, %v25894_v25  ;;  %16273 = vrot.lane.b32.xlu0 %v9297_v17, %s22048_s25  ;;  %v20367_v29 = vpop.f32.mrb[180].mxu0  ;;  %v9269_v43 = vadd.f32 %v20416_v63, %v25329_v32  ;;  %v25902_v63 = vld [vmem:[#allocation52_spill] sm:$0xff] }
 0x7fb   : > { %16275 = vrot.lane.b32.xlu1 %v9298_v48, %s22048_s25  ;;  %v16034_v3 = vpop.f32.mrb[181].mxu0  ;;  %v9272_v31 = vadd.f32 %v20417_v46, %v25329_v32  ;;  %v9303_v21 = vmax.f32 %v9271_v5, 0.0  ;;  %v16043_v59 = vadd.f32 %v20367_v29, %v25445_v4 }
 0x7fc   : > { %v20368_v10 = vpop.f32.mrb[182].mxu0  ;;  %v9270_v38 = vadd.f32 %v20418_v42, %v25329_v32  ;;  %v9301_v60 = vmax.f32 %v9269_v43, 0.0  ;;  %v16035_v18 = vadd.f32 %v25445_v4, %v16034_v3 }
 0x7fd   : > { %v16037_v23 = vpop.f32.mrb[183].mxu0  ;;  %v9304_v2 = vmax.f32 %v9272_v31, 0.0  ;;  %v16046_v39 = vadd.f32 %v20368_v10, %v25445_v4  ;;  %v16151_v17 = vmax.f32 %v16043_v59, 0.0 }
 0x7fe   : > { %v19597_v22 = vpop.f32.mrb[40].mxu1  ;;  %16438 = vrot.lane.b32.xlu0 %v16147_v7, %s22049_s23  ;;  %v9302_v6 = vmax.f32 %v9270_v38, 0.0  ;;  %v16038_v25 = vadd.f32 %v25445_v4, %v16037_v23  ;;  %v16149_v12 = vmax.f32 %v16035_v18, 0.0 }
 0x7ff   : > { %v20419_v13 = vadd.f32 %v19597_v22, %v25895_v54  ;;  %v9179_v51 = vpop.f32.mrb[41].mxu1  ;;  %16440 = vrot.lane.b32.xlu1 %v16148_v33, %s22049_s23  ;;  %v16152_v7 = vmax.f32 %v16046_v39, 0.0 }
 0x800   : > { %v20420_v47 = vadd.f32 %v9179_v51, %v25896_v56  ;;  %v19598_v11 = vpop.f32.mrb[42].mxu1  ;;  %v16150_v33 = vmax.f32 %v16038_v25, 0.0 }
 0x801   : > { %v9275_v28 = vadd.f32 %v20419_v13, %v25329_v32  ;;  %v20421_v37 = vadd.f32 %v19598_v11, %v25897_v24  ;;  %v9182_v20 = vpop.f32.mrb[43].mxu1 }
 0x802   : > { %v9273_v61 = vadd.f32 %v20420_v47, %v25329_v32  ;;  %v20422_v27 = vadd.f32 %v9182_v20, %v25898_v40  ;;  %16434 = vrot.lane.b32.xlu0 %v16145_v16, %s22049_s23  ;;  %v20371_v0 = vpop.f32.mrb[184].mxu0 }
 0x803   : > { %v9276_v19 = vadd.f32 %v20421_v37, %v25329_v32  ;;  %16436 = vrot.lane.b32.xlu1 %v16146_v1, %s22049_s23  ;;  %v16050_v58 = vpop.f32.mrb[185].mxu0  ;;  %v16059_v23 = vadd.f32 %v20371_v0, %v25445_v4 }
 0x804   : > { %v9274_v50 = vadd.f32 %v20422_v27, %v25329_v32  ;;  %v20372_v14 = vpop.f32.mrb[186].mxu0  ;;  %v9305_v13 = vmax.f32 %v9273_v61, 0.0  ;;  %v16051_v47 = vadd.f32 %v25445_v4, %v16050_v58 }
 0x805   : > { %v16053_v45 = vpop.f32.mrb[187].mxu0  ;;  %v9308_v10 = vmax.f32 %v9276_v19, 0.0  ;;  %v16062_v5 = vadd.f32 %v20372_v14, %v25445_v4  ;;  %v16155_v16 = vmax.f32 %v16059_v23, 0.0 }
 0x806   : > { %v19601_v44 = vpop.f32.mrb[44].mxu1  ;;  %16285 = vrot.lane.b32.xlu0 %v9303_v21, %s22048_s25  ;;  %v9306_v51 = vmax.f32 %v9274_v50, 0.0  ;;  %v16153_v27 = vmax.f32 %v16051_v47, 0.0 }
 0x807   : > { %v20423_v41 = vadd.f32 %v19601_v44, %v25899_v26  ;;  %v9195_v49 = vpop.f32.mrb[45].mxu1  ;;  %16287 = vrot.lane.b32.xlu1 %v9304_v2, %s22048_s25  ;;  %v16156_v1 = vmax.f32 %v16062_v5, 0.0 }
 0x808   : > { %v20424_v55 = vadd.f32 %v9195_v49, %v25900_v15  ;;  %v19602_v36 = vpop.f32.mrb[46].mxu1 }
 0x809   : > { %v25483_v35 = vadd.f32 %v20423_v41, %v25329_v32  ;;  %v20425_v9 = vadd.f32 %v19602_v36, %v25901_v53  ;;  %v9198_v52 = vpop.f32.mrb[47].mxu1 }
 0x80a   : > { %v25488_v34 = vadd.f32 %v20424_v55, %v25329_v32  ;;  %v20426_v62 = vadd.f32 %v9198_v52, %v25902_v63  ;;  %16281 = vrot.lane.b32.xlu0 %v9301_v60, %s22048_s25  ;;  %v20375_v57 = vpop.f32.mrb[188].mxu0 }
 0x80b   : > { %v9280_v48 = vadd.f32 %v20425_v9, %v25329_v32  ;;  %16283 = vrot.lane.b32.xlu1 %v9302_v6, %s22048_s25  ;;  %v25496_v8 = vpop.f32.mrb[189].mxu0  ;;  %v9311_v21 = vmax.f32 %v25483_v35, 0.0  ;;  %v16075_v26 = vadd.f32 %v20375_v57, %v25445_v4 }
 0x80c   : > { %v9278_v46 = vadd.f32 %v20426_v62, %v25329_v32  ;;  %v20376_v42 = vpop.f32.mrb[190].mxu0  ;;  %v9307_v32 = vmax.f32 %v9275_v28, 0.0  ;;  %v16054_v28 = vadd.f32 %v25445_v4, %v16053_v45  ;;  %v9309_v45 = vmax.f32 %v25488_v34, 0.0 }
 0x80d   : > { %v16069_v29 = vpop.f32.mrb[191].mxu0  ;;  %v9312_v58 = vmax.f32 %v9280_v48, 0.0  ;;  %v16078_v49 = vadd.f32 %v20376_v42, %v25445_v4  ;;  %v16159_v15 = vmax.f32 %v16075_v26, 0.0  ;;  %v16067_v55 = vadd.f32 %v25445_v4, %v25496_v8 }
 0x80e   : > { %16446 = vrot.lane.b32.xlu0 %v16151_v17, %s22049_s23  ;;  %v16154_v19 = vmax.f32 %v16054_v28, 0.0  ;;  %v9310_v41 = vmax.f32 %v9278_v46, 0.0  ;;  %v16070_v39 = vadd.f32 %v25445_v4, %v16069_v29 }
 0x80f   : > { %16448 = vrot.lane.b32.xlu1 %v16152_v7, %s22049_s23  ;;  %v16160_v35 = vmax.f32 %v16078_v49, 0.0  ;;  %v16157_v63 = vmax.f32 %v16067_v55, 0.0 }
 0x810   : > { %v16158_v48 = vmax.f32 %v16070_v39, 0.0 }
 0x812   : > { %16442 = vrot.lane.b32.xlu0 %v16149_v12, %s22049_s23  ;;  %v25503_v3 = vpop.f32.mrb[192].mxu0 }
 0x813   : > { %16444 = vrot.lane.b32.xlu1 %v16150_v33, %s22049_s23  ;;  %v25505_v30 = vpop.f32.mrb[193].mxu0  ;;  %v16091_v62 = vadd.f32 %v25503_v3, %v25445_v4 }
 0x814   : > { %v25507_v22 = vpop.f32.mrb[194].mxu0  ;;  %v16083_v46 = vadd.f32 %v25445_v4, %v25505_v30 }
 0x815   : > { %v25511_v54 = vpop.f32.mrb[195].mxu0  ;;  %v16094_v57 = vadd.f32 %v25507_v22, %v25445_v4  ;;  %v16163_v18 = vmax.f32 %v16091_v62, 0.0 }
 0x816   : > { %16293 = vrot.lane.b32.xlu0 %v9307_v32, %s22048_s25  ;;  %v16086_v7 = vadd.f32 %v25445_v4, %v25511_v54  ;;  %v16161_v25 = vmax.f32 %v16083_v46, 0.0 }
 0x817   : > { %16295 = vrot.lane.b32.xlu1 %v9308_v10, %s22048_s25  ;;  %v16164_v8 = vmax.f32 %v16094_v57, 0.0 }
 0x818   : > { %v16162_v42 = vmax.f32 %v16086_v7, 0.0 }
 0x81a   : > { %16289 = vrot.lane.b32.xlu0 %v9305_v13, %s22048_s25  ;;  %v20383_v56 = vpop.f32.mrb[196].mxu0 }
 0x81b   : > { %16291 = vrot.lane.b32.xlu1 %v9306_v51, %s22048_s25  ;;  %v25519_v11 = vadd.f32 %v20383_v56, %v25445_v4  ;;  %v16098_v31 = vpop.f32.mrb[197].mxu0 }
 0x81c   : > { %v25523_v24 = vadd.f32 %v25445_v4, %v16098_v31  ;;  %v20384_v37 = vpop.f32.mrb[198].mxu0 }
 0x81d   : > { %v16110_v20 = vadd.f32 %v20384_v37, %v25445_v4  ;;  %v16101_v61 = vpop.f32.mrb[199].mxu0  ;;  %v16167_v29 = vmax.f32 %v25519_v11, 0.0 }
 0x81e   : > { %16454 = vrot.lane.b32.xlu0 %v16155_v16, %s22049_s23  ;;  %v16102_v40 = vadd.f32 %v25445_v4, %v16101_v61 }
 0x81f   : > { %16456 = vrot.lane.b32.xlu1 %v16156_v1, %s22049_s23  ;;  %v16168_v12 = vmax.f32 %v16110_v20, 0.0 }
 0x820   : > { %v16166_v33 = vmax.f32 %v16102_v40, 0.0 }
 0x822   : > { %16450 = vrot.lane.b32.xlu0 %v16153_v27, %s22049_s23  ;;  %v20387_v0 = vpop.f32.mrb[200].mxu0 }
 0x823   : > { %16452 = vrot.lane.b32.xlu1 %v16154_v19, %s22049_s23  ;;  %v16123_v43 = vadd.f32 %v20387_v0, %v25445_v4  ;;  %v16114_v50 = vpop.f32.mrb[201].mxu0 }
 0x824   : > { %v16115_v2 = vadd.f32 %v25445_v4, %v16114_v50  ;;  %v20388_v38 = vpop.f32.mrb[202].mxu0 }
 0x825   : > { %v16126_v14 = vadd.f32 %v20388_v38, %v25445_v4  ;;  %v16117_v59 = vpop.f32.mrb[203].mxu0  ;;  %v16171_v3 = vmax.f32 %v16123_v43, 0.0 }
 0x826   : > { %16301 = vrot.lane.b32.xlu0 %v9311_v21, %s22048_s25  ;;  %v16118_v44 = vadd.f32 %v25445_v4, %v16117_v59  ;;  %v16169_v10 = vmax.f32 %v16115_v2, 0.0 }
 0x827   : > { %16303 = vrot.lane.b32.xlu1 %v9312_v58, %s22048_s25  ;;  %v16172_v32 = vmax.f32 %v16126_v14, 0.0 }
 0x828   : > { %v16170_v23 = vmax.f32 %v16118_v44, 0.0 }
 0x82a   : > { %16297 = vrot.lane.b32.xlu0 %v9309_v45, %s22048_s25  ;;  %v20391_v60 = vpop.f32.mrb[204].mxu0 }
 0x82b   : > { %16299 = vrot.lane.b32.xlu1 %v9310_v41, %s22048_s25  ;;  %v16139_v36 = vadd.f32 %v20391_v60, %v25445_v4  ;;  %v16130_v6 = vpop.f32.mrb[205].mxu0  ;;  %s21975_s25 = scalar_lea.vmem %s21974_s13, 16384 }
 0x82c   : > { %v16131_v53 = vadd.f32 %v25445_v4, %v16130_v6  ;;  %v20392_v9 = vpop.f32.mrb[206].mxu0  ;;  %p21977_p7 = scmp.lt.s32.totalorder %s21975_s25, %s21969_s24 }
 0x82d   : > { %v16142_v52 = vadd.f32 %v20392_v9, %v25445_v4  ;;  %v16133_v17 = vpop.f32.mrb[207].mxu0  ;;  %v16175_v16 = vmax.f32 %v16139_v36, 0.0 }
 0x82e   : > { %16462 = vrot.lane.b32.xlu0 %v16159_v15, %s22049_s23  ;;  %v16134_v34 = vadd.f32 %v25445_v4, %v16133_v17  ;;  %v16165_v4 = vmax.f32 %v25523_v24, 0.0  ;;  %v16173_v13 = vmax.f32 %v16131_v53, 0.0  ;;  %p21978_p8 = por %p21977_p7, %p21976_p4 }
 0x82f   : > { %16464 = vrot.lane.b32.xlu1 %v16160_v35, %s22049_s23  ;;  %v16176_v47 = vmax.f32 %v16142_v52, 0.0 }
 0x830   : > { %v16174_v5 = vmax.f32 %v16134_v34, 0.0  ;;  %p21979_p11 = pnand %p21978_p8, %p21972_p3 }
 0x832   : > { %16458 = vrot.lane.b32.xlu0 %v16157_v63, %s22049_s23 }
 0x833   : > { %16460 = vrot.lane.b32.xlu1 %v16158_v48, %s22049_s23 }
 0x836   : > { %16470 = vrot.lane.b32.xlu0 %v16163_v18, %s22049_s23 }
 0x837   : > { %16472 = vrot.lane.b32.xlu1 %v16164_v8, %s22049_s23 }
 0x83a   : > { %16466 = vrot.lane.b32.xlu0 %v16161_v25, %s22049_s23 }
 0x83b   : > { %16468 = vrot.lane.b32.xlu1 %v16162_v42, %s22049_s23 }
 0x83e   : > { %16478 = vrot.lane.b32.xlu0 %v16167_v29, %s22049_s23 }
 0x83f   : > { %16480 = vrot.lane.b32.xlu1 %v16168_v12, %s22049_s23 }
 0x842   : > { %16474 = vrot.lane.b32.xlu0 %v16165_v4, %s22049_s23 }
 0x843   : > { %16476 = vrot.lane.b32.xlu1 %v16166_v33, %s22049_s23 }
 0x846   : > { %16486 = vrot.lane.b32.xlu0 %v16171_v3, %s22049_s23 }
 0x847   : > { %v16246_v30 = vpop.permute.xlu1 %16245  ;;  %16488 = vrot.lane.b32.xlu1 %v16172_v32, %s22049_s23 }
 0x848   : > { %16340 = vst.msk [vmem:[%s22671_s16 + $0x20] sm:$0xff] %vm16337_vm13, %v16246_v30  ;;  %v16242_v22 = vpop.permute.xlu0 %16241 }
 0x849   : > { %16338 = vst.msk [vmem:[%s22671_s16] sm:$0xff] %vm16337_vm13, %v16242_v22 }
 0x84a   : > { %16482 = vrot.lane.b32.xlu0 %v16169_v10, %s22049_s23 }
 0x84b   : > { %v16248_v54 = vpop.permute.xlu1 %16247  ;;  %16484 = vrot.lane.b32.xlu1 %v16170_v23, %s22049_s23 }
 0x84c   : > { %16341 = vst.msk [vmem:[%s22671_s16 + $0x30] sm:$0xff] %vm16337_vm13, %v16248_v54  ;;  %v16244_v51 = vpop.permute.xlu0 %16243 }
 0x84d   : > { %16339 = vst.msk [vmem:[%s22671_s16 + $0x10] sm:$0xff] %vm16337_vm13, %v16244_v51 }
 0x84e   : > { %16490 = vrot.lane.b32.xlu0 %v16173_v13, %s22049_s23 }
 0x84f   : > { %16492 = vrot.lane.b32.xlu1 %v16174_v5, %s22049_s23 }
 0x850   : > { %v16254_v56 = vpop.permute.xlu0 %16253 }
 0x851   : > { %16344 = vst.msk [vmem:[%s22671_s16 + $0x60] sm:$0xff] %vm16337_vm13, %v16254_v56  ;;  %v16256_v11 = vpop.permute.xlu1 %16255 }
 0x852   : > { %16345 = vst.msk [vmem:[%s22671_s16 + $0x70] sm:$0xff] %vm16337_vm13, %v16256_v11  ;;  %16494 = vrot.lane.b32.xlu0 %v16175_v16, %s22049_s23 }
 0x853   : > { %16496 = vrot.lane.b32.xlu1 %v16176_v47, %s22049_s23 }
 0x854   : > { %v16250_v31 = vpop.permute.xlu0 %16249 }
 0x855   : > { %16342 = vst.msk [vmem:[%s22671_s16 + $0x40] sm:$0xff] %vm16337_vm13, %v16250_v31  ;;  %v16252_v1 = vpop.permute.xlu1 %16251 }
 0x856   : > { %16343 = vst.msk [vmem:[%s22671_s16 + $0x50] sm:$0xff] %vm16337_vm13, %v16252_v1 }
 0x858   : > { %v16262_v28 = vpop.permute.xlu0 %16261 }
 0x859   : > { %16348 = vst.msk [vmem:[%s22671_s16 + $0xa0] sm:$0xff] %vm16337_vm13, %v16262_v28  ;;  %v16264_v24 = vpop.permute.xlu1 %16263 }
 0x85a   : > { %16349 = vst.msk [vmem:[%s22671_s16 + $0xb0] sm:$0xff] %vm16337_vm13, %v16264_v24 }
 0x85c   : > { %v16258_v37 = vpop.permute.xlu0 %16257 }
 0x85d   : > { %16346 = vst.msk [vmem:[%s22671_s16 + $0x80] sm:$0xff] %vm16337_vm13, %v16258_v37  ;;  %v16260_v20 = vpop.permute.xlu1 %16259 }
 0x85e   : > { %16347 = vst.msk [vmem:[%s22671_s16 + $0x90] sm:$0xff] %vm16337_vm13, %v16260_v20 }
 0x860   : > { %v16270_v61 = vpop.permute.xlu0 %16269 }
 0x861   : > { %16352 = vst.msk [vmem:[%s22671_s16 + $0xe0] sm:$0xff] %vm16337_vm13, %v16270_v61  ;;  %v16272_v40 = vpop.permute.xlu1 %16271 }
 0x862   : > { %16353 = vst.msk [vmem:[%s22671_s16 + $0xf0] sm:$0xff] %vm16337_vm13, %v16272_v40 }
 0x864   : > { %v16266_v27 = vpop.permute.xlu0 %16265 }
 0x865   : > { %16350 = vst.msk [vmem:[%s22671_s16 + $0xc0] sm:$0xff] %vm16337_vm13, %v16266_v27  ;;  %v16268_v19 = vpop.permute.xlu1 %16267 }
 0x866   : > { %16351 = vst.msk [vmem:[%s22671_s16 + $0xd0] sm:$0xff] %vm16337_vm13, %v16268_v19 }
 0x868   : > { %v16278_v0 = vpop.permute.xlu0 %16277 }
 0x869   : > { %16356 = vst.msk [vmem:[%s22671_s16 + $0x120] sm:$0xff] %vm16337_vm13, %v16278_v0  ;;  %v16280_v21 = vpop.permute.xlu1 %16279 }
 0x86a   : > { %16357 = vst.msk [vmem:[%s22671_s16 + $0x130] sm:$0xff] %vm16337_vm13, %v16280_v21 }
 0x86c   : > { %v16274_v43 = vpop.permute.xlu0 %16273 }
 0x86d   : > { %16354 = vst.msk [vmem:[%s22671_s16 + $0x100] sm:$0xff] %vm16337_vm13, %v16274_v43  ;;  %v16276_v50 = vpop.permute.xlu1 %16275 }
 0x86e   : > { %16355 = vst.msk [vmem:[%s22671_s16 + $0x110] sm:$0xff] %vm16337_vm13, %v16276_v50 }
 0x870   : > { %v16439_v58 = vpop.permute.xlu0 %16438 }
 0x871   : > { %16533 = vst.msk [vmem:[%s22671_s16 + $0x28] sm:$0xff] %vm16530_vm14, %v16439_v58  ;;  %v16441_v2 = vpop.permute.xlu1 %16440 }
 0x872   : > { %16534 = vst.msk [vmem:[%s22671_s16 + $0x38] sm:$0xff] %vm16530_vm14, %v16441_v2 }
 0x874   : > { %v16435_v38 = vpop.permute.xlu0 %16434 }
 0x875   : > { %16531 = vst.msk [vmem:[%s22671_s16 + $0x8] sm:$0xff] %vm16530_vm14, %v16435_v38  ;;  %v16437_v14 = vpop.permute.xlu1 %16436 }
 0x876   : > { %16532 = vst.msk [vmem:[%s22671_s16 + $0x18] sm:$0xff] %vm16530_vm14, %v16437_v14 }
 0x878   : > { %v16286_v59 = vpop.permute.xlu0 %16285 }
 0x879   : > { %16360 = vst.msk [vmem:[%s22671_s16 + $0x160] sm:$0xff] %vm16337_vm13, %v16286_v59  ;;  %v16288_v44 = vpop.permute.xlu1 %16287 }
 0x87a   : > { %16361 = vst.msk [vmem:[%s22671_s16 + $0x170] sm:$0xff] %vm16337_vm13, %v16288_v44 }
 0x87c   : > { %v16282_v45 = vpop.permute.xlu0 %16281 }
 0x87d   : > { %16358 = vst.msk [vmem:[%s22671_s16 + $0x140] sm:$0xff] %vm16337_vm13, %v16282_v45  ;;  %v16284_v26 = vpop.permute.xlu1 %16283 }
 0x87e   : > { %16359 = vst.msk [vmem:[%s22671_s16 + $0x150] sm:$0xff] %vm16337_vm13, %v16284_v26 }
 0x880   : > { %v16447_v41 = vpop.permute.xlu0 %16446 }
 0x881   : > { %16537 = vst.msk [vmem:[%s22671_s16 + $0x68] sm:$0xff] %vm16530_vm14, %v16447_v41  ;;  %v16449_v49 = vpop.permute.xlu1 %16448 }
 0x882   : > { %16538 = vst.msk [vmem:[%s22671_s16 + $0x78] sm:$0xff] %vm16530_vm14, %v16449_v49 }
 0x884   : > { %v16443_v60 = vpop.permute.xlu0 %16442 }
 0x885   : > { %16535 = vst.msk [vmem:[%s22671_s16 + $0x48] sm:$0xff] %vm16530_vm14, %v16443_v60  ;;  %v16445_v15 = vpop.permute.xlu1 %16444 }
 0x886   : > { %16536 = vst.msk [vmem:[%s22671_s16 + $0x58] sm:$0xff] %vm16530_vm14, %v16445_v15 }
 0x888   : > { %v16294_v55 = vpop.permute.xlu0 %16293 }
 0x889   : > { %16364 = vst.msk [vmem:[%s22671_s16 + $0x1a0] sm:$0xff] %vm16337_vm13, %v16294_v55  ;;  %v16296_v36 = vpop.permute.xlu1 %16295 }
 0x88a   : > { %16365 = vst.msk [vmem:[%s22671_s16 + $0x1b0] sm:$0xff] %vm16337_vm13, %v16296_v36 }
 0x88c   : > { %v16290_v6 = vpop.permute.xlu0 %16289 }
 0x88d   : > { %16362 = vst.msk [vmem:[%s22671_s16 + $0x180] sm:$0xff] %vm16337_vm13, %v16290_v6  ;;  %v16292_v35 = vpop.permute.xlu1 %16291 }
 0x88e   : > { %16363 = vst.msk [vmem:[%s22671_s16 + $0x190] sm:$0xff] %vm16337_vm13, %v16292_v35 }
 0x890   : > { %v16455_v39 = vpop.permute.xlu0 %16454 }
 0x891   : > { %16541 = vst.msk [vmem:[%s22671_s16 + $0xa8] sm:$0xff] %vm16530_vm14, %v16455_v39  ;;  %v16457_v53 = vpop.permute.xlu1 %16456 }
 0x892   : > { %16542 = vst.msk [vmem:[%s22671_s16 + $0xb8] sm:$0xff] %vm16530_vm14, %v16457_v53 }
 0x894   : > { %v16451_v9 = vpop.permute.xlu0 %16450 }
 0x895   : > { %16539 = vst.msk [vmem:[%s22671_s16 + $0x88] sm:$0xff] %vm16530_vm14, %v16451_v9  ;;  %v16453_v52 = vpop.permute.xlu1 %16452 }
 0x896   : > { %16540 = vst.msk [vmem:[%s22671_s16 + $0x98] sm:$0xff] %vm16530_vm14, %v16453_v52 }
 0x898   : > { %v16302_v17 = vpop.permute.xlu0 %16301 }
 0x899   : > { %16368 = vst.msk [vmem:[%s22671_s16 + $0x1e0] sm:$0xff] %vm16337_vm13, %v16302_v17  ;;  %v16304_v34 = vpop.permute.xlu1 %16303 }
 0x89a   : > { %16369 = vst.msk [vmem:[%s22671_s16 + $0x1f0] sm:$0xff] %vm16337_vm13, %v16304_v34 }
 0x89c   : > { %v16298_v63 = vpop.permute.xlu0 %16297 }
 0x89d   : > { %16366 = vst.msk [vmem:[%s22671_s16 + $0x1c0] sm:$0xff] %vm16337_vm13, %v16298_v63  ;;  %v16300_v62 = vpop.permute.xlu1 %16299 }
 0x89e   : > { %16367 = vst.msk [vmem:[%s22671_s16 + $0x1d0] sm:$0xff] %vm16337_vm13, %v16300_v62 }
 0x8a0   : > { %v16463_v48 = vpop.permute.xlu0 %16462 }
 0x8a1   : > { %16545 = vst.msk [vmem:[%s22671_s16 + $0xe8] sm:$0xff] %vm16530_vm14, %v16463_v48  ;;  %v16465_v57 = vpop.permute.xlu1 %16464 }
 0x8a2   : > { %16546 = vst.msk [vmem:[%s22671_s16 + $0xf8] sm:$0xff] %vm16530_vm14, %v16465_v57 }
 0x8a4   : > { %v16459_v18 = vpop.permute.xlu0 %16458 }
 0x8a5   : > { %16543 = vst.msk [vmem:[%s22671_s16 + $0xc8] sm:$0xff] %vm16530_vm14, %v16459_v18  ;;  %v16461_v46 = vpop.permute.xlu1 %16460 }
 0x8a6   : > { %16544 = vst.msk [vmem:[%s22671_s16 + $0xd8] sm:$0xff] %vm16530_vm14, %v16461_v46 }
 0x8a8   : > { %v16471_v8 = vpop.permute.xlu0 %16470 }
 0x8a9   : > { %16549 = vst.msk [vmem:[%s22671_s16 + $0x128] sm:$0xff] %vm16530_vm14, %v16471_v8  ;;  %v16473_v7 = vpop.permute.xlu1 %16472 }
 0x8aa   : > { %16550 = vst.msk [vmem:[%s22671_s16 + $0x138] sm:$0xff] %vm16530_vm14, %v16473_v7 }
 0x8ac   : > { %v16467_v25 = vpop.permute.xlu0 %16466 }
 0x8ad   : > { %16547 = vst.msk [vmem:[%s22671_s16 + $0x108] sm:$0xff] %vm16530_vm14, %v16467_v25  ;;  %v16469_v42 = vpop.permute.xlu1 %16468 }
 0x8ae   : > { %16548 = vst.msk [vmem:[%s22671_s16 + $0x118] sm:$0xff] %vm16530_vm14, %v16469_v42 }
 0x8b0   : > { %v16479_v29 = vpop.permute.xlu0 %16478 }
 0x8b1   : > { %16553 = vst.msk [vmem:[%s22671_s16 + $0x168] sm:$0xff] %vm16530_vm14, %v16479_v29  ;;  %v16481_v12 = vpop.permute.xlu1 %16480 }
 0x8b2   : > { %16554 = vst.msk [vmem:[%s22671_s16 + $0x178] sm:$0xff] %vm16530_vm14, %v16481_v12 }
 0x8b4   : > { %v16475_v4 = vpop.permute.xlu0 %16474 }
 0x8b5   : > { %16551 = vst.msk [vmem:[%s22671_s16 + $0x148] sm:$0xff] %vm16530_vm14, %v16475_v4  ;;  %v16477_v33 = vpop.permute.xlu1 %16476 }
 0x8b6   : > { %16552 = vst.msk [vmem:[%s22671_s16 + $0x158] sm:$0xff] %vm16530_vm14, %v16477_v33 }
 0x8b8   : > { %v16487_v3 = vpop.permute.xlu0 %16486 }
 0x8b9   : > { %16557 = vst.msk [vmem:[%s22671_s16 + $0x1a8] sm:$0xff] %vm16530_vm14, %v16487_v3  ;;  %v16489_v32 = vpop.permute.xlu1 %16488 }
 0x8ba   : > { %16558 = vst.msk [vmem:[%s22671_s16 + $0x1b8] sm:$0xff] %vm16530_vm14, %v16489_v32 }
 0x8bc   : > { %v16483_v30 = vpop.permute.xlu0 %16482 }
 0x8bd   : > { %16555 = vst.msk [vmem:[%s22671_s16 + $0x188] sm:$0xff] %vm16530_vm14, %v16483_v30  ;;  %v16485_v10 = vpop.permute.xlu1 %16484 }
 0x8be   : > { %16556 = vst.msk [vmem:[%s22671_s16 + $0x198] sm:$0xff] %vm16530_vm14, %v16485_v10 }
 0x8c0   : > { %v16491_v22 = vpop.permute.xlu0 %16490 }
 0x8c1   : > { %16559 = vst.msk [vmem:[%s22671_s16 + $0x1c8] sm:$0xff] %vm16530_vm14, %v16491_v22  ;;  %v16493_v23 = vpop.permute.xlu1 %16492 }
 0x8c2   : > { %16560 = vst.msk [vmem:[%s22671_s16 + $0x1d8] sm:$0xff] %vm16530_vm14, %v16493_v23 }
 0x8c4   : > { %v16495_v54 = vpop.permute.xlu0 %16494 }
 0x8c5   : > { %16561 = vst.msk [vmem:[%s22671_s16 + $0x1e8] sm:$0xff] %vm16530_vm14, %v16495_v54  ;;  %v16497_v13 = vpop.permute.xlu1 %16496 }
 0x8c6   : > { %16562 = vst.msk [vmem:[%s22671_s16 + $0x1f8] sm:$0xff] %vm16530_vm14, %v16497_v13 }
 0x8c7   : > { %21982 = shalt.err (!%p21979_p11)
}
 0x8c8   : > { %s21983_s30 = scalar_lea.hbm %s25709_s21, 8192  ;;  %s21987_s20 = scalar_lea.hbm %s25903_s19, 16384 }
 0x8c9   : > { %p21984_p13 = scmp.ne.s32.totalorder %s25709_s21, %s21983_s30  ;;  %p21988_p6 = scmp.lt.u32.totalorder %s25709_s21, %s25903_s19 }
 0x8ca   : > { %p21989_p9 = scmp.lt.u32.totalorder %s21987_s20, %s21983_s30  ;;  %p21991_p10 = scmp.lt.u32.totalorder %s21983_s30, %s25709_s21 }
 0x8cb   : > { %p21985_p5 = pnand %p21984_p13, %p25904_p1 }
 0x8cc   : > { %p21990_p12 = por %p21989_p9, %p21988_p6 }
 0x8cd   : > { %p21986_p0 = pneg %p21985_p5 }
 0x8ce   : > { %p21992_p2 = por %p21991_p10, %p21990_p12 }
 0x8d0   : > { %p21993_p3 = pnand %p21992_p2, %p21986_p0 }
 0x8d2   : > { %21996 = shalt.err (!%p21993_p3)
}
 0x8d3   : > { %s22051_s14 = smov 256   ;;  %s22052_s17 = smov 16  }
 0x8d4   : > { %21686 = dma.vmem_to_hbm [thread:$0]  (%p25904_p1), %s25711_s15, 8192, %s25709_s21, %s25719_s29, %s22051_s14, %s22051_s14, %s22052_s17  }
 0x8d5 PF: > { %s25905_s24 = sld [smem:[#allocation17_spill]]  ;;  %s25906_s22 = sld [smem:[#allocation15_spill]] }
 0x8d6   : > { %s25907_s13 = sld [smem:[#allocation20_spill]] }
 0x8db   : > { %p21703_p4 = scmp.ge.s32.totalorder %s25905_s24, 2  ;;  %s16592_s25 = sand.u32 1, %s25906_s22  }
 0x8dc   : > { %p25908_p7 = scmp.ne.s32.totalorder %s25907_s13, 0  ;;  %s16593_s30 = scalar_lea.sflag [#allocation8], %s16592_s25 }
 0x8de   : > { %p21696_p8 = pnand %p21703_p4, %p25908_p7 }
 0x8e0   : > { %22022 = dma.done.wait (!%p21696_p8), %s16593_s30, 8192  }
 0x8e1   : > { %22024 = vsyncadd (!%p21696_p8), %s16593_s30, 4294959104  ;;  %s25909_s28 = sld [smem:[#allocation18_spill]]  ;;  %s25910_s16 = sld [smem:[#allocation16_spill]] }
 0x8e2   : > { %s25911_s27 = sld [smem:[#allocation19_spill]]  ;;  %s25912_s25 = smov %s22031_s26 }
 0x8e7   : > { %p25_p11 = scmp.ge.s32.totalorder %s25909_s28, 4   ;;  %s25913_s26 = smov %s25910_s16 }
 0x8e9   :  { %27 = sbr.rel (!%p25_p11) target bundleno = 7 (0x7), region = 170 }
 0x8f0   :  { %16598 = vsyncpa [#allocation7], 1 }
 0x8f1   :  { %16600 = vsyncpa [#allocation7 + $0x1], 1 }
 0x8f2   :  { %16601 = vsyncpa [#allocation10], 1 }
 0x8f3   :  { %16602 = vsyncpa [#allocation8], 1 }
 0x8f4   :  { %16604 = vsyncpa [#allocation8 + $0x1], 1 }

</bundles_post_ra>
